<compile_context>
chip_gen: v7x
topology: tpu7x:2x2x1
jax: 0.10.0
libtpu: 0.0.40
codegen_flags: <defaults>
</compile_context>

<pallas_src>
import numpy as np

import jax
import jax.numpy as jnp
from jax import lax
from jax.experimental import pallas as pl
from jax.experimental.pallas import tpu as pltpu


HIDDEN_SIZE_1 = 2 * 4 * 128 + 9 * 128 + 4 * 128 + 1 * 128  # = 2816
CONV_KSIZES = [(4, 1), (1, 4), (2, 2), (3, 3), (4, 4)]
IN_C, IN_H, IN_W = 12, 4, 4
IN_FEATURES = IN_C * IN_H * IN_W  # 192
K_PAD = 256                       # conv-matmul contraction dim padded 192 -> 2*128
CONV_OUT_CH = 128
FC3_OUT = 4
FC3_PAD = 128                     # lane-dense padded fc3 output width
MAX_TM = 256                      # max batch-tile rows per grid step


def _round_up(n, m):
    return ((n + m - 1) // m) * m


# -----------------------------------------------------------------------------
# Fused Pallas kernel: (convs-as-matmul) -> fc1 -> fc2 -> fc3
# -----------------------------------------------------------------------------
def _fused_forward_kernel(x_ref, wc_ref, bc_ref, w1_ref, b1_ref,
                          w2_ref, b2_ref, w3_ref, b3_ref, o_ref):
    """One batch tile of the whole network.

    All matmuls feed bf16 operands to the MXU and accumulate in f32; bias adds
    and ReLUs stay in f32 on the VPU.  Intermediates ((TM,2816), (TM,512),
    (TM,128)) never leave VMEM/vregs.
    """
    x = x_ref[...].astype(jnp.bfloat16)                        # (TM, 256)

    # conv_1..conv_5 + ReLU + flatten + concat == one lane-dense matmul.
    h = jnp.dot(x, wc_ref[...], preferred_element_type=jnp.float32)
    h = jnp.maximum(h + bc_ref[...], 0.0)                      # (TM, 2816)

    # dropout_1: identity (eval)
    h = jnp.dot(h.astype(jnp.bfloat16), w1_ref[...],
                preferred_element_type=jnp.float32)
    h = jnp.maximum(h + b1_ref[...], 0.0)                      # (TM, 512)

    # dropout_2: identity (eval)
    h = jnp.dot(h.astype(jnp.bfloat16), w2_ref[...],
                preferred_element_type=jnp.float32)
    h = jnp.maximum(h + b2_ref[...], 0.0)                      # (TM, 128)

    # dropout_3: identity (eval); fc3 output padded to 128 lanes.
    out = jnp.dot(h.astype(jnp.bfloat16), w3_ref[...],
                  preferred_element_type=jnp.float32)
    o_ref[...] = (out + b3_ref[...]).astype(o_ref.dtype)       # (TM, 128)


def conv_net_forward(packed, x, *, single_buffer_weights=True):
    """x: (N, 12, 4, 4) NCHW float32 -> (N, 4) float32."""
    N = x.shape[0]
    x_flat = x.reshape(N, IN_FEATURES)  # PyTorch (c, h, w) flatten order

    # Batch tile: multiple of 16 (bf16 sublane packing), at least 8 rows,
    # capped at MAX_TM; pad the batch up to a multiple of TM with zero rows.
    TM = min(MAX_TM, _round_up(max(N, 8), 16))
    N_pad = _round_up(N, TM)
    # Pad rows (batch) and columns (contraction 192 -> 256) with zeros; the
    # padded K columns multiply zero rows of w_conv, contributing nothing.
    x_p = (jnp.zeros((N_pad, K_PAD), jnp.float32)
           .at[:N, :IN_FEATURES].set(x_flat))

    weight_mode = pl.Buffered(1) if single_buffer_weights else None

    def const_spec(shape):
        # Full-extent block, constant block index across the grid -> stays
        # VMEM-resident; single-buffered since it is never re-fetched.
        return pl.BlockSpec(shape, lambda i: (0, 0), pipeline_mode=weight_mode)

    args = (
        x_p,
        packed["w_conv"], packed["b_conv"],
        packed["w_fc1"], packed["b_fc1"],
        packed["w_fc2"], packed["b_fc2"],
        packed["w_fc3"], packed["b_fc3"],
    )

    in_specs = [pl.BlockSpec((TM, K_PAD), lambda i: (i, 0))]
    in_specs += [const_spec(a.shape) for a in args[1:]]

    out_padded = pl.pallas_call(
        _fused_forward_kernel,
        out_shape=jax.ShapeDtypeStruct((N_pad, FC3_PAD), jnp.float32),
        grid=(N_pad // TM,),
        in_specs=in_specs,
        out_specs=pl.BlockSpec((TM, FC3_PAD), lambda i: (i, 0)),
        compiler_params=pltpu.CompilerParams(
            dimension_semantics=("parallel",),      # v7x: split tiles over 2 TCs
            vmem_limit_bytes=64 * 1024 * 1024),
    )(*args)
    return out_padded[:N, :FC3_OUT]


# -----------------------------------------------------------------------------
# Parameter construction (deterministic) + one-time packing for the kernel
# -----------------------------------------------------------------------------
def init_params(key):
    """PyTorch-layout parameters (f32)."""
    ks = jax.random.split(key, 16)
    params = {}
    idx = 0
    for i, (kh, kw) in enumerate(CONV_KSIZES, start=1):
        fan_in = IN_C * kh * kw
        scale = 1.0 / jnp.sqrt(fan_in)
        params[f"conv{i}_w"] = scale * jax.random.normal(
            ks[idx], (CONV_OUT_CH, IN_C, kh, kw), jnp.float32)
        params[f"conv{i}_b"] = scale * jax.random.normal(
            ks[idx + 1], (CONV_OUT_CH,), jnp.float32)
        idx += 2
    fc_dims = [(HIDDEN_SIZE_1, 512), (512, 128), (128, FC3_OUT)]
    for i, (fin, fout) in enumerate(fc_dims, start=1):
        scale = 1.0 / jnp.sqrt(fin)
        params[f"fc{i}_w"] = scale * jax.random.normal(
            ks[idx], (fin, fout), jnp.float32)
        params[f"fc{i}_b"] = scale * jax.random.normal(
            ks[idx + 1], (fout,), jnp.float32)
        idx += 2
    return params


def pack_params(params):
    """One-time fold: unrolled conv matrix (K padded to 256), broadcast conv
    bias, padded fc3, bf16 matmul weights, (1, N) f32 biases."""
    # Unroll each conv by pushing the 192 one-hot flattened inputs through a
    # VALID conv (linearity, no bias): row k of the unrolled matrix is the
    # flattened conv response to basis input k.  Column order per conv is
    # (c_out, oh, ow) == PyTorch .view(N,-1); convs are concatenated 1..5.
    eye = jnp.eye(IN_FEATURES, dtype=jnp.float32).reshape(
        IN_FEATURES, IN_C, IN_H, IN_W)
    w_cols, b_cols = [], []
    for i, (kh, kw) in enumerate(CONV_KSIZES, start=1):
        w = params[f"conv{i}_w"]                    # (128, 12, kh, kw)
        b = params[f"conv{i}_b"]                    # (128,)
        oh, ow = IN_H - kh + 1, IN_W - kw + 1
        y = lax.conv_general_dilated(
            eye, w, window_strides=(1, 1), padding="VALID",
            dimension_numbers=("NCHW", "OIHW", "NCHW"))  # (192, 128, oh, ow)
        w_cols.append(y.reshape(IN_FEATURES, CONV_OUT_CH * oh * ow))
        b_cols.append(jnp.repeat(b, oh * ow))       # (c_out, oh, ow) order
    w_conv = jnp.concatenate(w_cols, axis=1)        # (192, 2816)
    b_conv = jnp.concatenate(b_cols, axis=0)        # (2816,)
    assert w_conv.shape == (IN_FEATURES, HIDDEN_SIZE_1)

    # Pad contraction dim 192 -> 256 (2x128) for unmasked MXU feeds.
    w_conv_p = (jnp.zeros((K_PAD, HIDDEN_SIZE_1), jnp.float32)
                .at[:IN_FEATURES].set(w_conv))

    # Pad fc3 to 128 output columns for a lane-dense (unmasked) final store.
    w3 = params["fc3_w"]                            # (128, 4)
    b3 = params["fc3_b"]                            # (4,)
    w3p = jnp.zeros((w3.shape[0], FC3_PAD), jnp.float32).at[:, :FC3_OUT].set(w3)
    b3p = jnp.zeros((FC3_PAD,), jnp.float32).at[:FC3_OUT].set(b3)

    return {
        "w_conv": w_conv_p.astype(jnp.bfloat16),
        "b_conv": b_conv.reshape(1, -1).astype(jnp.float32),
        "w_fc1": params["fc1_w"].astype(jnp.bfloat16),
        "b_fc1": params["fc1_b"].reshape(1, -1).astype(jnp.float32),
        "w_fc2": params["fc2_w"].astype(jnp.bfloat16),
        "b_fc2": params["fc2_b"].reshape(1, -1).astype(jnp.float32),
        "w_fc3": w3p.astype(jnp.bfloat16),
        "b_fc3": b3p.reshape(1, -1).astype(jnp.float32),
    }


# -----------------------------------------------------------------------------
# Pure-JAX f32 reference (mirrors the PyTorch forward) for validation
# -----------------------------------------------------------------------------
def reference_forward(params, x):
    N = x.shape[0]
    feats = []
    for i, (kh, kw) in enumerate(CONV_KSIZES, start=1):
        w = params[f"conv{i}_w"]
        b = params[f"conv{i}_b"]
        y = lax.conv_general_dilated(
            x, w, window_strides=(1, 1), padding="VALID",
            dimension_numbers=("NCHW", "OIHW", "NCHW"))
        y = jax.nn.relu(y + b[None, :, None, None])
        feats.append(y.reshape(N, -1))
    h = jnp.concatenate(feats, axis=1)
    h = jax.nn.relu(h @ params["fc1_w"] + params["fc1_b"])
    h = jax.nn.relu(h @ params["fc2_w"] + params["fc2_b"])
    return h @ params["fc3_w"] + params["fc3_b"]


if __name__ == "__main__":
    key = jax.random.PRNGKey(0)
    pkey, xkey = jax.random.split(key)
    params = init_params(pkey)
    packed = pack_params(params)

    def make_fwd(single_buffer):
        @jax.jit
        def fwd(packed, x):
            return conv_net_forward(packed, x,
                                    single_buffer_weights=single_buffer)
        return fwd

    # HIDDEN_SIZE_1 implies a 4x4 spatial input with 12 channels.
    batch = 2
    x = jax.random.normal(xkey, (batch, IN_C, IN_H, IN_W), jnp.float32)

    fwd = make_fwd(True)
    try:
        out = jax.block_until_ready(fwd(packed, x))
    except Exception:
        # Fallback if this JAX build rejects single-buffered (Buffered(1))
        # constant-weight specs: use default double-buffering.
        fwd = make_fwd(False)
        out = jax.block_until_ready(fwd(packed, x))

    assert out.shape == (batch, FC3_OUT), out.shape
    assert out.dtype == jnp.float32

    # Validate the fused bf16 kernel against the f32 reference network.
    ref = reference_forward(params, x)
    np.testing.assert_allclose(np.asarray(out), np.asarray(ref),
                               rtol=5e-2, atol=5e-2)

    # Exercise the batch-tiled multi-step grid path (TM=256, grid=(2,)),
    # including weight residency across steps and the ragged-row padding.
    batch2 = 300
    x2 = jax.random.normal(jax.random.PRNGKey(1),
                           (batch2, IN_C, IN_H, IN_W), jnp.float32)
    out2 = jax.block_until_ready(fwd(packed, x2))
    assert out2.shape == (batch2, FC3_OUT), out2.shape
    ref2 = reference_forward(params, x2)
    np.testing.assert_allclose(np.asarray(out2), np.asarray(ref2),
                               rtol=1e-1, atol=1e-1)

    print("KERNEL_OK")
</pallas_src>

<mosaic_0001>
module attributes {stable_mosaic.version = 11 : i64} {
  func.func @_fused_forward_kernel(%arg0: i32, %arg1: memref<16x256xf32, #tpu.memory_space<vmem>>, %arg2: memref<256x2816xbf16, #tpu.memory_space<vmem>>, %arg3: memref<1x2816xf32, #tpu.memory_space<vmem>>, %arg4: memref<2816x512xbf16, #tpu.memory_space<vmem>>, %arg5: memref<1x512xf32, #tpu.memory_space<vmem>>, %arg6: memref<512x128xbf16, #tpu.memory_space<vmem>>, %arg7: memref<1x128xf32, #tpu.memory_space<vmem>>, %arg8: memref<128x128xbf16, #tpu.memory_space<vmem>>, %arg9: memref<1x128xf32, #tpu.memory_space<vmem>>, %arg10: memref<16x128xf32, #tpu.memory_space<vmem>>) attributes {dimension_semantics = [#tpu.dimension_semantics<parallel>], iteration_bounds = array<i64: 1>, scalar_prefetch = 0 : i64, scratch_operands = 0 : i64, tpu.core_type = #tpu.core_type<tc>, window_params = [{transform_indices = @transform_0, window_bounds = array<i64: 16, 256>}, {pipeline_mode = #tpu.pipeline_mode<synchronous>, transform_indices = @transform_1, window_bounds = array<i64: 256, 2816>}, {pipeline_mode = #tpu.pipeline_mode<synchronous>, transform_indices = @transform_2, window_bounds = array<i64: 1, 2816>}, {pipeline_mode = #tpu.pipeline_mode<synchronous>, transform_indices = @transform_3, window_bounds = array<i64: 2816, 512>}, {pipeline_mode = #tpu.pipeline_mode<synchronous>, transform_indices = @transform_4, window_bounds = array<i64: 1, 512>}, {pipeline_mode = #tpu.pipeline_mode<synchronous>, transform_indices = @transform_5, window_bounds = array<i64: 512, 128>}, {pipeline_mode = #tpu.pipeline_mode<synchronous>, transform_indices = @transform_6, window_bounds = array<i64: 1, 128>}, {pipeline_mode = #tpu.pipeline_mode<synchronous>, transform_indices = @transform_7, window_bounds = array<i64: 128, 128>}, {pipeline_mode = #tpu.pipeline_mode<synchronous>, transform_indices = @transform_8, window_bounds = array<i64: 1, 128>}, {transform_indices = @transform_9, window_bounds = array<i64: 16, 128>}]} {
    %c0 = arith.constant 0 : index
    %c0_0 = arith.constant 0 : index
    %0 = vector.load %arg1[%c0, %c0_0] : memref<16x256xf32, #tpu.memory_space<vmem>>, vector<16x256xf32>
    %1 = arith.truncf %0 : vector<16x256xf32> to vector<16x256xbf16>
    %c0_1 = arith.constant 0 : index
    %c0_2 = arith.constant 0 : index
    %2 = vector.load %arg2[%c0_1, %c0_2] : memref<256x2816xbf16, #tpu.memory_space<vmem>>, vector<256x2816xbf16>
    %cst = arith.constant dense<0.000000e+00> : vector<16x2816xf32>
    %3 = tpu.matmul %1, %2, %cst {dimension_numbers = #tpu.dot_dimension_numbers<[1], [0], [0], [1], [0, 0, 1, 1], [], []>} : vector<16x256xbf16>, vector<256x2816xbf16>, vector<16x2816xf32> -> vector<16x2816xf32>
    %c0_3 = arith.constant 0 : index
    %c0_4 = arith.constant 0 : index
    %4 = vector.load %arg3[%c0_3, %c0_4] : memref<1x2816xf32, #tpu.memory_space<vmem>>, vector<1x2816xf32>
    %5 = vector.broadcast %4 : vector<1x2816xf32> to vector<16x2816xf32>
    %6 = arith.addf %3, %5 : vector<16x2816xf32>
    %cst_5 = arith.constant 0.000000e+00 : f32
    %7 = vector.broadcast %cst_5 : f32 to vector<16x2816xf32>
    %8 = arith.maximumf %6, %7 : vector<16x2816xf32>
    %9 = arith.truncf %8 : vector<16x2816xf32> to vector<16x2816xbf16>
    %c0_6 = arith.constant 0 : index
    %c0_7 = arith.constant 0 : index
    %10 = vector.load %arg4[%c0_6, %c0_7] : memref<2816x512xbf16, #tpu.memory_space<vmem>>, vector<2816x512xbf16>
    %cst_8 = arith.constant dense<0.000000e+00> : vector<16x512xf32>
    %11 = tpu.matmul %9, %10, %cst_8 {dimension_numbers = #tpu.dot_dimension_numbers<[1], [0], [0], [1], [0, 0, 1, 1], [], []>} : vector<16x2816xbf16>, vector<2816x512xbf16>, vector<16x512xf32> -> vector<16x512xf32>
    %c0_9 = arith.constant 0 : index
    %c0_10 = arith.constant 0 : index
    %12 = vector.load %arg5[%c0_9, %c0_10] : memref<1x512xf32, #tpu.memory_space<vmem>>, vector<1x512xf32>
    %13 = vector.broadcast %12 : vector<1x512xf32> to vector<16x512xf32>
    %14 = arith.addf %11, %13 : vector<16x512xf32>
    %cst_11 = arith.constant 0.000000e+00 : f32
    %15 = vector.broadcast %cst_11 : f32 to vector<16x512xf32>
    %16 = arith.maximumf %14, %15 : vector<16x512xf32>
    %17 = arith.truncf %16 : vector<16x512xf32> to vector<16x512xbf16>
    %c0_12 = arith.constant 0 : index
    %c0_13 = arith.constant 0 : index
    %18 = vector.load %arg6[%c0_12, %c0_13] : memref<512x128xbf16, #tpu.memory_space<vmem>>, vector<512x128xbf16>
    %cst_14 = arith.constant dense<0.000000e+00> : vector<16x128xf32>
    %19 = tpu.matmul %17, %18, %cst_14 {dimension_numbers = #tpu.dot_dimension_numbers<[1], [0], [0], [1], [0, 0, 1, 1], [], []>} : vector<16x512xbf16>, vector<512x128xbf16>, vector<16x128xf32> -> vector<16x128xf32>
    %c0_15 = arith.constant 0 : index
    %c0_16 = arith.constant 0 : index
    %20 = vector.load %arg7[%c0_15, %c0_16] : memref<1x128xf32, #tpu.memory_space<vmem>>, vector<1x128xf32>
    %21 = vector.broadcast %20 : vector<1x128xf32> to vector<16x128xf32>
    %22 = arith.addf %19, %21 : vector<16x128xf32>
    %cst_17 = arith.constant 0.000000e+00 : f32
    %23 = vector.broadcast %cst_17 : f32 to vector<16x128xf32>
    %24 = arith.maximumf %22, %23 : vector<16x128xf32>
    %25 = arith.truncf %24 : vector<16x128xf32> to vector<16x128xbf16>
    %c0_18 = arith.constant 0 : index
    %c0_19 = arith.constant 0 : index
    %26 = vector.load %arg8[%c0_18, %c0_19] : memref<128x128xbf16, #tpu.memory_space<vmem>>, vector<128x128xbf16>
    %cst_20 = arith.constant dense<0.000000e+00> : vector<16x128xf32>
    %27 = tpu.matmul %25, %26, %cst_20 {dimension_numbers = #tpu.dot_dimension_numbers<[1], [0], [0], [1], [0, 0, 1, 1], [], []>} : vector<16x128xbf16>, vector<128x128xbf16>, vector<16x128xf32> -> vector<16x128xf32>
    %c0_21 = arith.constant 0 : index
    %c0_22 = arith.constant 0 : index
    %28 = vector.load %arg9[%c0_21, %c0_22] : memref<1x128xf32, #tpu.memory_space<vmem>>, vector<1x128xf32>
    %29 = vector.broadcast %28 : vector<1x128xf32> to vector<16x128xf32>
    %30 = arith.addf %27, %29 : vector<16x128xf32>
    %c0_23 = arith.constant 0 : index
    %c0_24 = arith.constant 0 : index
    %31 = vector.load %arg10[%c0_23, %c0_24] : memref<16x128xf32, #tpu.memory_space<vmem>>, vector<16x128xf32>
    tpu.vector_store %arg10[%c0_23, %c0_24], %30 {strides = array<i32>} : memref<16x128xf32, #tpu.memory_space<vmem>>, vector<16x128xf32>,
    return
  }
  func.func @transform_0(%arg0: i32) -> (i32, i32) {
    %c0_i32 = arith.constant 0 : i32
    %c0_i32_0 = arith.constant 0 : i32
    return %arg0, %c0_i32 : i32, i32
  }
  func.func @transform_1(%arg0: i32) -> (i32, i32) {
    %c0_i32 = arith.constant 0 : i32
    %c0_i32_0 = arith.constant 0 : i32
    %c0_i32_1 = arith.constant 0 : i32
    return %c0_i32, %c0_i32_0 : i32, i32
  }
  func.func @transform_2(%arg0: i32) -> (i32, i32) {
    %c0_i32 = arith.constant 0 : i32
    %c0_i32_0 = arith.constant 0 : i32
    %c0_i32_1 = arith.constant 0 : i32
    return %c0_i32, %c0_i32_0 : i32, i32
  }
  func.func @transform_3(%arg0: i32) -> (i32, i32) {
    %c0_i32 = arith.constant 0 : i32
    %c0_i32_0 = arith.constant 0 : i32
    %c0_i32_1 = arith.constant 0 : i32
    return %c0_i32, %c0_i32_0 : i32, i32
  }
  func.func @transform_4(%arg0: i32) -> (i32, i32) {
    %c0_i32 = arith.constant 0 : i32
    %c0_i32_0 = arith.constant 0 : i32
    %c0_i32_1 = arith.constant 0 : i32
    return %c0_i32, %c0_i32_0 : i32, i32
  }
  func.func @transform_5(%arg0: i32) -> (i32, i32) {
    %c0_i32 = arith.constant 0 : i32
    %c0_i32_0 = arith.constant 0 : i32
    %c0_i32_1 = arith.constant 0 : i32
    return %c0_i32, %c0_i32_0 : i32, i32
  }
  func.func @transform_6(%arg0: i32) -> (i32, i32) {
    %c0_i32 = arith.constant 0 : i32
    %c0_i32_0 = arith.constant 0 : i32
    %c0_i32_1 = arith.constant 0 : i32
    return %c0_i32, %c0_i32_0 : i32, i32
  }
  func.func @transform_7(%arg0: i32) -> (i32, i32) {
    %c0_i32 = arith.constant 0 : i32
    %c0_i32_0 = arith.constant 0 : i32
    %c0_i32_1 = arith.constant 0 : i32
    return %c0_i32, %c0_i32_0 : i32, i32
  }
  func.func @transform_8(%arg0: i32) -> (i32, i32) {
    %c0_i32 = arith.constant 0 : i32
    %c0_i32_0 = arith.constant 0 : i32
    %c0_i32_1 = arith.constant 0 : i32
    return %c0_i32, %c0_i32_0 : i32, i32
  }
  func.func @transform_9(%arg0: i32) -> (i32, i32) {
    %c0_i32 = arith.constant 0 : i32
    %c0_i32_0 = arith.constant 0 : i32
    return %arg0, %c0_i32 : i32, i32
  }
}

module attributes {stable_mosaic.version = 11 : i64} {
  func.func @_fused_forward_kernel(%arg0: i32, %arg1: memref<16x256xf32, #tpu.memory_space<vmem>>, %arg2: memref<256x2816xbf16, #tpu.memory_space<vmem>>, %arg3: memref<1x2816xf32, #tpu.memory_space<vmem>>, %arg4: memref<2816x512xbf16, #tpu.memory_space<vmem>>, %arg5: memref<1x512xf32, #tpu.memory_space<vmem>>, %arg6: memref<512x128xbf16, #tpu.memory_space<vmem>>, %arg7: memref<1x128xf32, #tpu.memory_space<vmem>>, %arg8: memref<128x128xbf16, #tpu.memory_space<vmem>>, %arg9: memref<1x128xf32, #tpu.memory_space<vmem>>, %arg10: memref<16x128xf32, #tpu.memory_space<vmem>>) attributes {dimension_semantics = [#tpu.dimension_semantics<parallel>], iteration_bounds = array<i64: 1>, scalar_prefetch = 0 : i64, scratch_operands = 0 : i64, tpu.core_type = #tpu.core_type<tc>, window_params = [{transform_indices = @transform_0, window_bounds = array<i64: 16, 256>}, {pipeline_mode = #tpu.pipeline_mode<synchronous>, transform_indices = @transform_1, window_bounds = array<i64: 256, 2816>}, {pipeline_mode = #tpu.pipeline_mode<synchronous>, transform_indices = @transform_2, window_bounds = array<i64: 1, 2816>}, {pipeline_mode = #tpu.pipeline_mode<synchronous>, transform_indices = @transform_3, window_bounds = array<i64: 2816, 512>}, {pipeline_mode = #tpu.pipeline_mode<synchronous>, transform_indices = @transform_4, window_bounds = array<i64: 1, 512>}, {pipeline_mode = #tpu.pipeline_mode<synchronous>, transform_indices = @transform_5, window_bounds = array<i64: 512, 128>}, {pipeline_mode = #tpu.pipeline_mode<synchronous>, transform_indices = @transform_6, window_bounds = array<i64: 1, 128>}, {pipeline_mode = #tpu.pipeline_mode<synchronous>, transform_indices = @transform_7, window_bounds = array<i64: 128, 128>}, {pipeline_mode = #tpu.pipeline_mode<synchronous>, transform_indices = @transform_8, window_bounds = array<i64: 1, 128>}, {transform_indices = @transform_9, window_bounds = array<i64: 16, 128>}]} {
    %c0 = arith.constant 0 : index
    %c0_0 = arith.constant 0 : index
    %0 = vector.load %arg1[%c0, %c0_0] : memref<16x256xf32, #tpu.memory_space<vmem>>, vector<16x256xf32>
    %1 = arith.truncf %0 : vector<16x256xf32> to vector<16x256xbf16>
    %c0_1 = arith.constant 0 : index
    %c0_2 = arith.constant 0 : index
    %2 = vector.load %arg2[%c0_1, %c0_2] : memref<256x2816xbf16, #tpu.memory_space<vmem>>, vector<256x2816xbf16>
    %cst = arith.constant dense<0.000000e+00> : vector<16x2816xf32>
    %3 = tpu.matmul %1, %2, %cst {dimension_numbers = #tpu.dot_dimension_numbers<[1], [0], [0], [1], [0, 0, 1, 1], [], []>} : vector<16x256xbf16>, vector<256x2816xbf16>, vector<16x2816xf32> -> vector<16x2816xf32>
    %c0_3 = arith.constant 0 : index
    %c0_4 = arith.constant 0 : index
    %4 = vector.load %arg3[%c0_3, %c0_4] : memref<1x2816xf32, #tpu.memory_space<vmem>>, vector<1x2816xf32>
    %5 = vector.broadcast %4 : vector<1x2816xf32> to vector<16x2816xf32>
    %6 = arith.addf %3, %5 : vector<16x2816xf32>
    %cst_5 = arith.constant 0.000000e+00 : f32
    %7 = vector.broadcast %cst_5 : f32 to vector<16x2816xf32>
    %8 = arith.maximumf %6, %7 : vector<16x2816xf32>
    %9 = arith.truncf %8 : vector<16x2816xf32> to vector<16x2816xbf16>
    %c0_6 = arith.constant 0 : index
    %c0_7 = arith.constant 0 : index
    %10 = vector.load %arg4[%c0_6, %c0_7] : memref<2816x512xbf16, #tpu.memory_space<vmem>>, vector<2816x512xbf16>
    %cst_8 = arith.constant dense<0.000000e+00> : vector<16x512xf32>
    %11 = tpu.matmul %9, %10, %cst_8 {dimension_numbers = #tpu.dot_dimension_numbers<[1], [0], [0], [1], [0, 0, 1, 1], [], []>} : vector<16x2816xbf16>, vector<2816x512xbf16>, vector<16x512xf32> -> vector<16x512xf32>
    %c0_9 = arith.constant 0 : index
    %c0_10 = arith.constant 0 : index
    %12 = vector.load %arg5[%c0_9, %c0_10] : memref<1x512xf32, #tpu.memory_space<vmem>>, vector<1x512xf32>
    %13 = vector.broadcast %12 : vector<1x512xf32> to vector<16x512xf32>
    %14 = arith.addf %11, %13 : vector<16x512xf32>
    %cst_11 = arith.constant 0.000000e+00 : f32
    %15 = vector.broadcast %cst_11 : f32 to vector<16x512xf32>
    %16 = arith.maximumf %14, %15 : vector<16x512xf32>
    %17 = arith.truncf %16 : vector<16x512xf32> to vector<16x512xbf16>
    %c0_12 = arith.constant 0 : index
    %c0_13 = arith.constant 0 : index
    %18 = vector.load %arg6[%c0_12, %c0_13] : memref<512x128xbf16, #tpu.memory_space<vmem>>, vector<512x128xbf16>
    %cst_14 = arith.constant dense<0.000000e+00> : vector<16x128xf32>
    %19 = tpu.matmul %17, %18, %cst_14 {dimension_numbers = #tpu.dot_dimension_numbers<[1], [0], [0], [1], [0, 0, 1, 1], [], []>} : vector<16x512xbf16>, vector<512x128xbf16>, vector<16x128xf32> -> vector<16x128xf32>
    %c0_15 = arith.constant 0 : index
    %c0_16 = arith.constant 0 : index
    %20 = vector.load %arg7[%c0_15, %c0_16] : memref<1x128xf32, #tpu.memory_space<vmem>>, vector<1x128xf32>
    %21 = vector.broadcast %20 : vector<1x128xf32> to vector<16x128xf32>
    %22 = arith.addf %19, %21 : vector<16x128xf32>
    %cst_17 = arith.constant 0.000000e+00 : f32
    %23 = vector.broadcast %cst_17 : f32 to vector<16x128xf32>
    %24 = arith.maximumf %22, %23 : vector<16x128xf32>
    %25 = arith.truncf %24 : vector<16x128xf32> to vector<16x128xbf16>
    %c0_18 = arith.constant 0 : index
    %c0_19 = arith.constant 0 : index
    %26 = vector.load %arg8[%c0_18, %c0_19] : memref<128x128xbf16, #tpu.memory_space<vmem>>, vector<128x128xbf16>
    %cst_20 = arith.constant dense<0.000000e+00> : vector<16x128xf32>
    %27 = tpu.matmul %25, %26, %cst_20 {dimension_numbers = #tpu.dot_dimension_numbers<[1], [0], [0], [1], [0, 0, 1, 1], [], []>} : vector<16x128xbf16>, vector<128x128xbf16>, vector<16x128xf32> -> vector<16x128xf32>
    %c0_21 = arith.constant 0 : index
    %c0_22 = arith.constant 0 : index
    %28 = vector.load %arg9[%c0_21, %c0_22] : memref<1x128xf32, #tpu.memory_space<vmem>>, vector<1x128xf32>
    %29 = vector.broadcast %28 : vector<1x128xf32> to vector<16x128xf32>
    %30 = arith.addf %27, %29 : vector<16x128xf32>
    %c0_23 = arith.constant 0 : index
    %c0_24 = arith.constant 0 : index
    %31 = vector.load %arg10[%c0_23, %c0_24] : memref<16x128xf32, #tpu.memory_space<vmem>>, vector<16x128xf32>
    tpu.vector_store %arg10[%c0_23, %c0_24], %30 {strides = array<i32>} : memref<16x128xf32, #tpu.memory_space<vmem>>, vector<16x128xf32>,
    return
  }
  func.func @transform_0(%arg0: i32) -> (i32, i32) {
    %c0_i32 = arith.constant 0 : i32
    %c0_i32_0 = arith.constant 0 : i32
    return %arg0, %c0_i32 : i32, i32
  }
  func.func @transform_1(%arg0: i32) -> (i32, i32) {
    %c0_i32 = arith.constant 0 : i32
    %c0_i32_0 = arith.constant 0 : i32
    %c0_i32_1 = arith.constant 0 : i32
    return %c0_i32, %c0_i32_0 : i32, i32
  }
  func.func @transform_2(%arg0: i32) -> (i32, i32) {
    %c0_i32 = arith.constant 0 : i32
    %c0_i32_0 = arith.constant 0 : i32
    %c0_i32_1 = arith.constant 0 : i32
    return %c0_i32, %c0_i32_0 : i32, i32
  }
  func.func @transform_3(%arg0: i32) -> (i32, i32) {
    %c0_i32 = arith.constant 0 : i32
    %c0_i32_0 = arith.constant 0 : i32
    %c0_i32_1 = arith.constant 0 : i32
    return %c0_i32, %c0_i32_0 : i32, i32
  }
  func.func @transform_4(%arg0: i32) -> (i32, i32) {
    %c0_i32 = arith.constant 0 : i32
    %c0_i32_0 = arith.constant 0 : i32
    %c0_i32_1 = arith.constant 0 : i32
    return %c0_i32, %c0_i32_0 : i32, i32
  }
  func.func @transform_5(%arg0: i32) -> (i32, i32) {
    %c0_i32 = arith.constant 0 : i32
    %c0_i32_0 = arith.constant 0 : i32
    %c0_i32_1 = arith.constant 0 : i32
    return %c0_i32, %c0_i32_0 : i32, i32
  }
  func.func @transform_6(%arg0: i32) -> (i32, i32) {
    %c0_i32 = arith.constant 0 : i32
    %c0_i32_0 = arith.constant 0 : i32
    %c0_i32_1 = arith.constant 0 : i32
    return %c0_i32, %c0_i32_0 : i32, i32
  }
  func.func @transform_7(%arg0: i32) -> (i32, i32) {
    %c0_i32 = arith.constant 0 : i32
    %c0_i32_0 = arith.constant 0 : i32
    %c0_i32_1 = arith.constant 0 : i32
    return %c0_i32, %c0_i32_0 : i32, i32
  }
  func.func @transform_8(%arg0: i32) -> (i32, i32) {
    %c0_i32 = arith.constant 0 : i32
    %c0_i32_0 = arith.constant 0 : i32
    %c0_i32_1 = arith.constant 0 : i32
    return %c0_i32, %c0_i32_0 : i32, i32
  }
  func.func @transform_9(%arg0: i32) -> (i32, i32) {
    %c0_i32 = arith.constant 0 : i32
    %c0_i32_0 = arith.constant 0 : i32
    return %arg0, %c0_i32 : i32, i32
  }
}

</mosaic_0001>

<bundles_post_ra>
// kernel: fwd.1
= control target key start
LH: loop header
LB: loop body
LE: loop exit
PB: predicated region body
PF: predicated region fallthrough
CT: control target
= control target key end

     0   :  { %14 = vsyncpa [#allocation3], 0  ;;  %s12133_s0 = inlined_call_operand.hbm [shape: f32[16,256], index: 0, kind: input, shape index: {}]   ;;  %s12134_s1 = inlined_call_operand.hbm [shape: bf16[256,2816], index: 1, kind: input, shape index: {}]   ;;  %s12135_s2 = inlined_call_operand.hbm [shape: f32[1,2816], index: 2, kind: input, shape index: {}]   ;;  %s12136_s3 = inlined_call_operand.hbm [shape: bf16[2816,512], index: 3, kind: input, shape index: {}]   ;;  %s12137_s4 = inlined_call_operand.hbm [shape: f32[1,512], index: 4, kind: input, shape index: {}]   ;;  %s12138_s5 = inlined_call_operand.hbm [shape: bf16[512,128], index: 5, kind: input, shape index: {}]   ;;  %s12139_s6 = inlined_call_operand.hbm [shape: f32[1,128], index: 6, kind: input, shape index: {}]   ;;  %s12140_s7 = inlined_call_operand.hbm [shape: bf16[128,128], index: 7, kind: input, shape index: {}]   ;;  %s12141_s8 = inlined_call_operand.hbm [shape: f32[1,128], index: 8, kind: input, shape index: {}]   ;;  %s12142_s9 = inlined_call_operand.hbm [shape: f32[16,128], index: 9, kind: output, shape index: {}]  }
   0x1   :  { %15 = vsyncpa [#allocation6], 0 }
   0x2   :  { %16 = vsyncpa [#allocation9], 0 }
   0x3   :  { %17 = vsyncpa [#allocation12], 0 }
   0x4   :  { %18 = vsyncpa [#allocation15], 0 }
   0x5   :  { %19 = vsyncpa [#allocation4], 0  ;;  %s11743_s30 = smov [#allocation5]   ;;  %s11511_s13 = scalar_lea.hbm %s12134_s1, 45056 }
   0x6   :  { %s37_s10 = sshll.u32 %s11743_s30, 4  ;;  %p11512_p0 = scmp.ne.s32.totalorder %s12134_s1, %s11511_s13  ;;  %s38_s10 = int_to_ptr.vmem [resolvable:$true] %s37_s10 }
   0x7   :  { %p11515_p1 = scmp.lt.u32.totalorder %s11511_s13, %s12134_s1 }
   0x9   :  { %p11517_p2 = pnand %p11515_p1, %p11512_p0 }
   0xb   :  { %11520 = shalt.err (!%p11517_p2)
}
   0xc   :  { %s11521_s18 = scalar_lea.vmem %s38_s10, 45056  ;;  %p11526_p4 = scmp.lt.s32.totalorder %s38_s10, %s38_s10 }
   0xd   :  { %p11522_p3 = scmp.ne.s32.totalorder %s38_s10, %s11521_s18  ;;  %p11527_p5 = scmp.lt.s32.totalorder %s11521_s18, %s11521_s18 }
   0xf   :  { %p11528_p6 = por %p11527_p5, %p11526_p4 }
  0x11   :  { %p11529_p7 = pnand %p11528_p6, %p11522_p3 }
  0x13   :  { %11532 = shalt.err (!%p11529_p7)
}
  0x14   :  { %s11744_s19 = smov 1408   ;;  %s11745_s20 = smov 88  }
  0x15   :  { %43 = dma.hbm_to_vmem [thread:$0]  %s12134_s1, 45056, %s38_s10, [#allocation6], %s11744_s19, %s11744_s19, %s11745_s20  }
  0x16   :  { %s11746_s23 = smov [#allocation8]   ;;  %s11747_s25 = smov [#allocation11]  }
  0x17   :  { %s59_s24 = sshll.u32 %s11746_s23, 4  ;;  %s81_s26 = sshll.u32 %s11747_s25, 4  ;;  %s60_s24 = int_to_ptr.vmem [resolvable:$true] %s59_s24  ;;  %s82_s26 = int_to_ptr.vmem [resolvable:$true] %s81_s26 }
  0x18   :  { %s11533_s29 = scalar_lea.hbm %s12136_s3, 90112 }
  0x19   :  { %p11534_p8 = scmp.ne.s32.totalorder %s12136_s3, %s11533_s29  ;;  %p11537_p9 = scmp.lt.u32.totalorder %s11533_s29, %s12136_s3 }
  0x1b   :  { %p11539_p10 = pnand %p11537_p9, %p11534_p8 }
  0x1d   :  { %11542 = shalt.err (!%p11539_p10)
}
  0x1e   :  { %s11543_s1 = scalar_lea.vmem %s60_s24, 90112  ;;  %p11548_p12 = scmp.lt.s32.totalorder %s60_s24, %s60_s24 }
  0x1f   :  { %p11544_p11 = scmp.ne.s32.totalorder %s60_s24, %s11543_s1  ;;  %p11549_p13 = scmp.lt.s32.totalorder %s11543_s1, %s11543_s1 }
  0x21   :  { %p11550_p0 = por %p11549_p13, %p11548_p12 }
  0x23   :  { %p11551_p1 = pnand %p11550_p0, %p11544_p11 }
  0x25   :  { %11554 = shalt.err (!%p11551_p1)
}
  0x26   :  { %s11748_s10 = smov 256   ;;  %s11749_s14 = smov 16  }
  0x27   :  { %65 = dma.hbm_to_vmem [thread:$0]  %s12136_s3, 90112, %s60_s24, [#allocation9], %s11748_s10, %s11748_s10, %s11749_s14  }
  0x28   :  { %s11555_s19 = scalar_lea.hbm %s12138_s5, 4096 }
  0x29   :  { %p11556_p2 = scmp.ne.s32.totalorder %s12138_s5, %s11555_s19  ;;  %p11559_p3 = scmp.lt.u32.totalorder %s11555_s19, %s12138_s5 }
  0x2b   :  { %p11561_p4 = pnand %p11559_p3, %p11556_p2 }
  0x2d   :  { %11564 = shalt.err (!%p11561_p4)
}
  0x2e   :  { %s11565_s25 = scalar_lea.vmem %s82_s26, 4096  ;;  %p11570_p6 = scmp.lt.s32.totalorder %s82_s26, %s82_s26 }
  0x2f   :  { %p11566_p5 = scmp.ne.s32.totalorder %s82_s26, %s11565_s25  ;;  %p11571_p7 = scmp.lt.s32.totalorder %s11565_s25, %s11565_s25 }
  0x31   :  { %p11572_p8 = por %p11571_p7, %p11570_p6 }
  0x33   :  { %p11573_p9 = pnand %p11572_p8, %p11566_p5 }
  0x35   :  { %11576 = shalt.err (!%p11573_p9)
}
  0x36   :  { %s11750_s3 = smov 64   ;;  %s11751_s24 = smov 4  }
  0x37   :  { %87 = dma.hbm_to_vmem [thread:$0]  %s12138_s5, 4096, %s82_s26, [#allocation12], %s11750_s3, %s11750_s3, %s11751_s24  }
  0x38   :  { %s11752_s29 = smov [#allocation14]   ;;  %s11753_s11 = smov [#allocation2]  }
  0x39   :  { %s103_s30 = sshll.u32 %s11752_s29, 4  ;;  %s25_s12 = sshll.u32 %s11753_s11, 4  ;;  %s104_s30 = int_to_ptr.vmem [resolvable:$true] %s103_s30  ;;  %s26_s12 = int_to_ptr.vmem [resolvable:$true] %s25_s12 }
  0x3a   :  { %s11577_s15 = scalar_lea.hbm %s12140_s7, 1024 }
  0x3b   :  { %p11578_p10 = scmp.ne.s32.totalorder %s12140_s7, %s11577_s15  ;;  %p11581_p11 = scmp.lt.u32.totalorder %s11577_s15, %s12140_s7 }
  0x3d   :  { %p11583_p12 = pnand %p11581_p11, %p11578_p10 }
  0x3f   :  { %11586 = shalt.err (!%p11583_p12)
}
  0x40   :  { %s11587_s5 = scalar_lea.vmem %s104_s30, 1024  ;;  %p11592_p0 = scmp.lt.s32.totalorder %s104_s30, %s104_s30 }
  0x41   :  { %p11588_p13 = scmp.ne.s32.totalorder %s104_s30, %s11587_s5  ;;  %p11593_p1 = scmp.lt.s32.totalorder %s11587_s5, %s11587_s5 }
  0x43   :  { %p11594_p2 = por %p11593_p1, %p11592_p0 }
  0x45   :  { %p11595_p3 = pnand %p11594_p2, %p11588_p13 }
  0x47   :  { %11598 = shalt.err (!%p11595_p3)
}
  0x48   :  { %109 = dma.hbm_to_vmem [thread:$0]  %s12140_s7, 1024, %s104_s30, [#allocation15], %s11750_s3, %s11750_s3, %s11751_s24  }
  0x49   :  { %s11599_s23 = scalar_lea.hbm %s12133_s0, 512 }
  0x4a   :  { %p11600_p4 = scmp.ne.s32.totalorder %s12133_s0, %s11599_s23  ;;  %p11603_p5 = scmp.lt.u32.totalorder %s11599_s23, %s12133_s0 }
  0x4c   :  { %p11605_p6 = pnand %p11603_p5, %p11600_p4 }
  0x4e   :  { %11608 = shalt.err (!%p11605_p6)
}
  0x4f   :  { %s11609_s11 = scalar_lea.vmem %s26_s12, 512  ;;  %p11614_p8 = scmp.lt.s32.totalorder %s26_s12, %s26_s12 }
  0x50   :  { %p11610_p7 = scmp.ne.s32.totalorder %s26_s12, %s11609_s11  ;;  %p11615_p9 = scmp.lt.s32.totalorder %s11609_s11, %s11609_s11 }
  0x52   :  { %p11616_p10 = por %p11615_p9, %p11614_p8 }
  0x54   :  { %p11617_p11 = pnand %p11616_p10, %p11610_p7 }
  0x56   :  { %11620 = shalt.err (!%p11617_p11)
}
  0x57   :  { %31 = dma.hbm_to_vmem [thread:$0]  %s12133_s0, 512, %s26_s12, [#allocation3], %s11748_s10, %s11748_s10, %s11749_s14  }
  0x58   :  { %s11754_s24 = smov [#allocation7]   ;;  %s11755_s13 = smov [#allocation10]  }
  0x59   :  { %s50_s30 = sshll.u32 %s11754_s24, 4  ;;  %s72_s1 = sshll.u32 %s11755_s13, 4  ;;  %s51_s30 = int_to_ptr.vmem [resolvable:$true] %s50_s30  ;;  %s73_s1 = int_to_ptr.vmem [resolvable:$true] %s72_s1 }
  0x5a   :  { %s11621_s17 = scalar_lea.hbm %s12135_s2, 352 }
  0x5b   :  { %p11622_p12 = scmp.ne.s32.totalorder %s12135_s2, %s11621_s17  ;;  %p11625_p13 = scmp.lt.u32.totalorder %s11621_s17, %s12135_s2 }
  0x5d   :  { %p11627_p0 = pnand %p11625_p13, %p11622_p12 }
  0x5f   :  { %11630 = shalt.err (!%p11627_p0)
}
  0x60   :  { %s11631_s0 = scalar_lea.vmem %s51_s30, 352  ;;  %p11636_p2 = scmp.lt.s32.totalorder %s51_s30, %s51_s30 }
  0x61   :  { %p11632_p1 = scmp.ne.s32.totalorder %s51_s30, %s11631_s0  ;;  %p11637_p3 = scmp.lt.s32.totalorder %s11631_s0, %s11631_s0 }
  0x63   :  { %p11638_p4 = por %p11637_p3, %p11636_p2 }
  0x65   :  { %p11639_p5 = pnand %p11638_p4, %p11632_p1 }
  0x67   :  { %11642 = shalt.err (!%p11639_p5)
}
  0x68   :  { %53 = dma.hbm_to_vmem [thread:$0]  %s12135_s2, 352, %s51_s30, [#allocation6]  }
  0x69   :  { %s11643_s21 = scalar_lea.hbm %s12137_s4, 64 }
  0x6a   :  { %p11644_p6 = scmp.ne.s32.totalorder %s12137_s4, %s11643_s21  ;;  %p11647_p7 = scmp.lt.u32.totalorder %s11643_s21, %s12137_s4 }
  0x6c   :  { %p11649_p8 = pnand %p11647_p7, %p11644_p6 }
  0x6e   :  { %11652 = shalt.err (!%p11649_p8)
}
  0x6f   :  { %s11653_s28 = scalar_lea.vmem %s73_s1, 64  ;;  %p11658_p10 = scmp.lt.s32.totalorder %s73_s1, %s73_s1 }
  0x70   :  { %p11654_p9 = scmp.ne.s32.totalorder %s73_s1, %s11653_s28  ;;  %p11659_p11 = scmp.lt.s32.totalorder %s11653_s28, %s11653_s28 }
  0x72   :  { %p11660_p12 = por %p11659_p11, %p11658_p10 }
  0x74   :  { %p11661_p13 = pnand %p11660_p12, %p11654_p9 }
  0x76   :  { %11664 = shalt.err (!%p11661_p13)
}
  0x77   :  { %75 = dma.hbm_to_vmem [thread:$0]  %s12137_s4, 64, %s73_s1, [#allocation9]  }
  0x78   :  { %s11756_s11 = smov [#allocation13]   ;;  %s11757_s3 = smov [#allocation16]  }
  0x79   :  { %s94_s7 = sshll.u32 %s11756_s11, 4  ;;  %s116_s24 = sshll.u32 %s11757_s3, 4  ;;  %s95_s7 = int_to_ptr.vmem [resolvable:$true] %s94_s7  ;;  %s117_s24 = int_to_ptr.vmem [resolvable:$true] %s116_s24 }
  0x7a   :  { %s11665_s15 = scalar_lea.hbm %s12139_s6, 16 }
  0x7b   :  { %p11666_p0 = scmp.ne.s32.totalorder %s12139_s6, %s11665_s15  ;;  %p11669_p1 = scmp.lt.u32.totalorder %s11665_s15, %s12139_s6 }
  0x7d   :  { %p11671_p2 = pnand %p11669_p1, %p11666_p0 }
  0x7f   :  { %11674 = shalt.err (!%p11671_p2)
}
  0x80   :  { %s11675_s4 = scalar_lea.vmem %s95_s7, 16  ;;  %s11679_s1 = scalar_lea.vmem %s95_s7, 32 }
  0x81   :  { %p11676_p3 = scmp.ne.s32.totalorder %s95_s7, %s11675_s4  ;;  %p11680_p4 = scmp.lt.s32.totalorder %s95_s7, %s95_s7 }
  0x82   :  { %p11681_p5 = scmp.lt.s32.totalorder %s11679_s1, %s11675_s4 }
  0x84   :  { %p11682_p6 = por %p11681_p5, %p11680_p4 }
  0x86   :  { %p11683_p7 = pnand %p11682_p6, %p11676_p3 }
  0x88   :  { %11686 = shalt.err (!%p11683_p7)
}
  0x89   :  { %97 = dma.hbm_to_vmem [thread:$0]  %s12139_s6, 16, %s95_s7, [#allocation12]  }
  0x8a   :  { %s11687_s14 = scalar_lea.hbm %s12141_s8, 16 }
  0x8b   :  { %p11688_p8 = scmp.ne.s32.totalorder %s12141_s8, %s11687_s14  ;;  %p11691_p9 = scmp.lt.u32.totalorder %s11687_s14, %s12141_s8 }
  0x8d   :  { %p11693_p10 = pnand %p11691_p9, %p11688_p8 }
  0x8f   :  { %11696 = shalt.err (!%p11693_p10)
}
  0x90   :  { %s11697_s23 = scalar_lea.vmem %s117_s24, 16  ;;  %s11701_s25 = scalar_lea.vmem %s117_s24, 32 }
  0x91   :  { %p11698_p11 = scmp.ne.s32.totalorder %s117_s24, %s11697_s23  ;;  %p11702_p12 = scmp.lt.s32.totalorder %s117_s24, %s117_s24 }
  0x92   :  { %p11703_p13 = scmp.lt.s32.totalorder %s11701_s25, %s11697_s23 }
  0x94   :  { %p11704_p0 = por %p11703_p13, %p11702_p12 }
  0x96   :  { %p11705_p1 = pnand %p11704_p0, %p11698_p11 }
  0x98   :  { %11708 = shalt.err (!%p11705_p1)
}
  0x99   :  { %119 = dma.hbm_to_vmem [thread:$0]  %s12141_s8, 16, %s117_s24, [#allocation15]  }
  0x9a   :  { %11731 = dma.done.wait [#allocation3], 512  }
  0x9b   :  { %11732 = vsyncadd [#allocation3], 4294966784 }
  0x9c   :  { %11733 = dma.done.wait [#allocation6], 45408  }
  0x9d   :  { %11734 = vsyncadd [#allocation6], 4294921888 }
  0x9e   :  { %11735 = dma.done.wait [#allocation9], 90176  }
  0x9f   :  { %11736 = vsyncadd [#allocation9], 4294877120 }
  0xa0   :  { %11737 = dma.done.wait [#allocation12], 4112  }
  0xa1   :  { %11738 = vsyncadd [#allocation12], 4294963184 }
  0xa2   :  { %11739 = dma.done.wait [#allocation15], 1040  }
  0xa3   :  { %11740 = vsyncadd [#allocation15], 4294966256  ;;  %v9887_v0 = vld [vmem:[#allocation5 + $0x4] ss:$88 sps:$4 sm:$0xff]   ;;  %v9891_v2 = vld [vmem:[#allocation5] ss:$88 sps:$4 sm:$0xff]  }
  0xa4   :  { %v9889_v1 = vld [vmem:[#allocation5 + $0xc] ss:$88 sps:$4 sm:$0xff]   ;;  %2382 = vmatprep.subr.bf16.mxu0 %v9887_v0  ;;  %v9892_v3 = vld [vmem:[#allocation5 + $0x8] ss:$88 sps:$4 sm:$0xff]   ;;  %v9895_v5 = vld [vmem:[#allocation5 + $0xbc] ss:$88 sps:$4 sm:$0xff]  }
  0xa5   :  { %2425 = vmatprep.subr.bf16.mxu1 %v9889_v1  ;;  %v9893_v4 = vld [vmem:[#allocation5 + $0xb4] ss:$88 sps:$4 sm:$0xff]   ;;  %2383 = vmatpush1.bf16.msra.mxu0 %v9891_v2  ;;  %v9897_v6 = vld [vmem:[#allocation5 + $0xb0] ss:$88 sps:$4 sm:$0xff]   ;;  %v9899_v8 = vld [vmem:[#allocation5 + $0x164] ss:$88 sps:$4 sm:$0xff]  }
  0xa6   :  { %2426 = vmatpush1.bf16.msra.mxu1 %v9892_v3  ;;  %2384 = vmatprep.subr.bf16.mxu0 %v9893_v4  ;;  %v9898_v7 = vld [vmem:[#allocation5 + $0xb8] ss:$88 sps:$4 sm:$0xff]   ;;  %v9901_v9 = vld [vmem:[#allocation5 + $0x16c] ss:$88 sps:$4 sm:$0xff]   ;;  %v9904_v11 = vld [vmem:[#allocation5 + $0x168] ss:$88 sps:$4 sm:$0xff]  }
  0xa7   :  { %2427 = vmatprep.subr.bf16.mxu1 %v9895_v5  ;;  %v9903_v10 = vld [vmem:[#allocation5 + $0x160] ss:$88 sps:$4 sm:$0xff]   ;;  %v9905_v12 = vld [vmem:[#allocation5 + $0x214] ss:$88 sps:$4 sm:$0xff]   ;;  %v9909_v14 = vld [vmem:[#allocation5 + $0x210] ss:$88 sps:$4 sm:$0xff]  }
  0xa8   :  { %v9907_v13 = vld [vmem:[#allocation5 + $0x21c] ss:$88 sps:$4 sm:$0xff]   ;;  %v9910_v15 = vld [vmem:[#allocation5 + $0x218] ss:$88 sps:$4 sm:$0xff]   ;;  %v9913_v17 = vld [vmem:[#allocation5 + $0x2cc] ss:$88 sps:$4 sm:$0xff]  }
  0xa9   :  { %2385 = vmatpush1.bf16.msra.mxu0 %v9897_v6  ;;  %v9911_v16 = vld [vmem:[#allocation5 + $0x2c4] ss:$88 sps:$4 sm:$0xff]   ;;  %v9915_v18 = vld [vmem:[#allocation5 + $0x2c0] ss:$88 sps:$4 sm:$0xff]   ;;  %v9917_v20 = vld [vmem:[#allocation5 + $0x374] ss:$88 sps:$4 sm:$0xff]  }
  0xaa   :  { %2428 = vmatpush1.bf16.msra.mxu1 %v9898_v7  ;;  %2386 = vmatprep.subr.bf16.mxu0 %v9899_v8  ;;  %v9916_v19 = vld [vmem:[#allocation5 + $0x2c8] ss:$88 sps:$4 sm:$0xff]   ;;  %v9919_v21 = vld [vmem:[#allocation5 + $0x37c] ss:$88 sps:$4 sm:$0xff]   ;;  %v9922_v23 = vld [vmem:[#allocation5 + $0x378] ss:$88 sps:$4 sm:$0xff]  }
  0xab   :  { %2429 = vmatprep.subr.bf16.mxu1 %v9901_v9  ;;  %v9921_v22 = vld [vmem:[#allocation5 + $0x370] ss:$88 sps:$4 sm:$0xff]   ;;  %v9923_v24 = vld [vmem:[#allocation5 + $0x424] ss:$88 sps:$4 sm:$0xff]   ;;  %v9927_v26 = vld [vmem:[#allocation5 + $0x420] ss:$88 sps:$4 sm:$0xff]  }
  0xac   :  { %v9925_v25 = vld [vmem:[#allocation5 + $0x42c] ss:$88 sps:$4 sm:$0xff]   ;;  %v9928_v27 = vld [vmem:[#allocation5 + $0x428] ss:$88 sps:$4 sm:$0xff]   ;;  %v9931_v29 = vld [vmem:[#allocation5 + $0x4dc] ss:$88 sps:$4 sm:$0xff]  }
  0xad   :  { %2387 = vmatpush1.bf16.msra.mxu0 %v9903_v10  ;;  %v9929_v28 = vld [vmem:[#allocation5 + $0x4d4] ss:$88 sps:$4 sm:$0xff]   ;;  %v9933_v30 = vld [vmem:[#allocation5 + $0x4d0] ss:$88 sps:$4 sm:$0xff]   ;;  %v9935_v32 = vld [vmem:[#allocation5 + $0x584] ss:$88 sps:$4 sm:$0xff]  }
  0xae   :  { %2430 = vmatpush1.bf16.msra.mxu1 %v9904_v11  ;;  %2388 = vmatprep.subr.bf16.mxu0 %v9905_v12  ;;  %v9934_v31 = vld [vmem:[#allocation5 + $0x4d8] ss:$88 sps:$4 sm:$0xff]   ;;  %v9937_v33 = vld [vmem:[#allocation5 + $0x58c] ss:$88 sps:$4 sm:$0xff]   ;;  %v9940_v35 = vld [vmem:[#allocation5 + $0x588] ss:$88 sps:$4 sm:$0xff]  }
  0xaf   :  { %2431 = vmatprep.subr.bf16.mxu1 %v9907_v13  ;;  %v9939_v34 = vld [vmem:[#allocation5 + $0x580] ss:$88 sps:$4 sm:$0xff]   ;;  %v9941_v36 = vld [vmem:[#allocation5 + $0x634] ss:$88 sps:$4 sm:$0xff]   ;;  %v9945_v38 = vld [vmem:[#allocation5 + $0x630] ss:$88 sps:$4 sm:$0xff]  }
  0xb0   :  { %v9943_v37 = vld [vmem:[#allocation5 + $0x63c] ss:$88 sps:$4 sm:$0xff]   ;;  %v9946_v39 = vld [vmem:[#allocation5 + $0x638] ss:$88 sps:$4 sm:$0xff]   ;;  %v9949_v41 = vld [vmem:[#allocation5 + $0x6ec] ss:$88 sps:$4 sm:$0xff]  }
  0xb1   :  { %2389 = vmatpush1.bf16.msra.mxu0 %v9909_v14  ;;  %v9947_v40 = vld [vmem:[#allocation5 + $0x6e4] ss:$88 sps:$4 sm:$0xff]   ;;  %v9951_v42 = vld [vmem:[#allocation5 + $0x6e0] ss:$88 sps:$4 sm:$0xff]   ;;  %v9953_v44 = vld [vmem:[#allocation5 + $0x794] ss:$88 sps:$4 sm:$0xff]  }
  0xb2   :  { %2432 = vmatpush1.bf16.msra.mxu1 %v9910_v15  ;;  %2390 = vmatprep.subr.bf16.mxu0 %v9911_v16  ;;  %v9952_v43 = vld [vmem:[#allocation5 + $0x6e8] ss:$88 sps:$4 sm:$0xff]   ;;  %v9955_v45 = vld [vmem:[#allocation5 + $0x79c] ss:$88 sps:$4 sm:$0xff]   ;;  %v9958_v48 = vld [vmem:[#allocation5 + $0x798] ss:$88 sps:$4 sm:$0xff]  }
  0xb3   :  { %2433 = vmatprep.subr.bf16.mxu1 %v9913_v17  ;;  %v149_v46 = vld [vmem:[#allocation2 + $0x8] sm:$0xff]  ;;  %v151_v49 = vld [vmem:[#allocation2 + $0x18] sm:$0xff]  ;;  %v148_v3 = vld [vmem:[#allocation2] sm:$0xff]  ;;  %vm11759_vm0 = vmmov 0   ;;  %s11760_s8 = smov [#allocation17]  }
  0xb4   :  { %v9957_v47 = vld [vmem:[#allocation5 + $0x790] ss:$88 sps:$4 sm:$0xff]   ;;  %v9959_v50 = vld [vmem:[#allocation5 + $0x844] ss:$88 sps:$4 sm:$0xff]   ;;  %v11927_v51 = vpack.c.bf16 %v151_v49, %v149_v46  ;;  %v9963_v53 = vld [vmem:[#allocation5 + $0x840] ss:$88 sps:$4 sm:$0xff]  }
  0xb5   :  { %2391 = vmatpush1.bf16.msra.mxu0 %v9915_v18  ;;  %v9961_v52 = vld [vmem:[#allocation5 + $0x84c] ss:$88 sps:$4 sm:$0xff]   ;;  %v9964_v54 = vld [vmem:[#allocation5 + $0x848] ss:$88 sps:$4 sm:$0xff]   ;;  %v9967_v56 = vld [vmem:[#allocation5 + $0x8fc] ss:$88 sps:$4 sm:$0xff]  }
  0xb6   :  { %2434 = vmatpush1.bf16.msra.mxu1 %v9916_v19  ;;  %2392 = vmatprep.subr.bf16.mxu0 %v9917_v20  ;;  %v9965_v55 = vld [vmem:[#allocation5 + $0x8f4] ss:$88 sps:$4 sm:$0xff]   ;;  %v9969_v57 = vld [vmem:[#allocation5 + $0x8f0] ss:$88 sps:$4 sm:$0xff]   ;;  %v9971_v59 = vld [vmem:[#allocation5 + $0x9a4] ss:$88 sps:$4 sm:$0xff]  }
  0xb7   :  { %2435 = vmatprep.subr.bf16.mxu1 %v9919_v21  ;;  %2414 = vmatprep.mubr.bf16.mxu0 %v11927_v51  ;;  %v9970_v58 = vld [vmem:[#allocation5 + $0x8f8] ss:$88 sps:$4 sm:$0xff]   ;;  %v9973_v60 = vld [vmem:[#allocation5 + $0x9ac] ss:$88 sps:$4 sm:$0xff]   ;;  %v9976_v62 = vld [vmem:[#allocation5 + $0x9a8] ss:$88 sps:$4 sm:$0xff]  }
  0xb8   :  { %2457 = vmatprep.mubr.bf16.mxu1 %v11927_v51  ;;  %v9975_v61 = vld [vmem:[#allocation5 + $0x9a0] ss:$88 sps:$4 sm:$0xff]   ;;  %v9977_v63 = vld [vmem:[#allocation5 + $0xa54] ss:$88 sps:$4 sm:$0xff]   ;;  %v9981_v1 = vld [vmem:[#allocation5 + $0xa50] ss:$88 sps:$4 sm:$0xff]  }
  0xb9   :  { %2393 = vmatpush1.bf16.msra.mxu0 %v9921_v22  ;;  %v9979_v0 = vld [vmem:[#allocation5 + $0xa5c] ss:$88 sps:$4 sm:$0xff]   ;;  %v9982_v2 = vld [vmem:[#allocation5 + $0xa58] ss:$88 sps:$4 sm:$0xff]   ;;  %v9994_v11 = vld [vmem:[#allocation5 + $0xcc] ss:$88 sps:$4 sm:$0xff]  }
  0xba   :  { %2436 = vmatpush1.bf16.msra.mxu1 %v9922_v23  ;;  %2394 = vmatprep.subr.bf16.mxu0 %v9923_v24  ;;  %v150_v4 = vld [vmem:[#allocation2 + $0x10] sm:$0xff]  ;;  %v9991_v10 = vld [vmem:[#allocation5 + $0xc4] ss:$88 sps:$4 sm:$0xff]   ;;  %v9989_v12 = vld [vmem:[#allocation5 + $0xc0] ss:$88 sps:$4 sm:$0xff]   ;;  %s8592_s28 = sshll.u32 %s11760_s8, 4  ;;  %s8593_s28 = int_to_ptr.vmem [resolvable:$true] %s8592_s28 }
  0xbb   :  { %2437 = vmatprep.subr.bf16.mxu1 %v9925_v25  ;;  %v9985_v5 = vld [vmem:[#allocation5 + $0x14] ss:$88 sps:$4 sm:$0xff]   ;;  %v11931_v7 = vpack.c.bf16 %v150_v4, %v148_v3  ;;  %v9983_v8 = vld [vmem:[#allocation5 + $0x10] ss:$88 sps:$4 sm:$0xff]   ;;  %v10003_v18 = vld [vmem:[#allocation5 + $0x224] ss:$88 sps:$4 sm:$0xff]   ;;  %p11714_p3 = scmp.lt.s32.totalorder %s8593_s28, %s8593_s28 }
  0xbc   :  { %v9988_v6 = vld [vmem:[#allocation5 + $0x1c] ss:$88 sps:$4 sm:$0xff]   ;;  %v9986_v9 = vld [vmem:[#allocation5 + $0x18] ss:$88 sps:$4 sm:$0xff]   ;;  %v9992_v13 = vld [vmem:[#allocation5 + $0xc8] ss:$88 sps:$4 sm:$0xff]  }
  0xbd   :  { %2395 = vmatpush1.bf16.msra.mxu0 %v9927_v26  ;;  %v9997_v14 = vld [vmem:[#allocation5 + $0x174] ss:$88 sps:$4 sm:$0xff]   ;;  %v9995_v16 = vld [vmem:[#allocation5 + $0x170] ss:$88 sps:$4 sm:$0xff]   ;;  %v10001_v20 = vld [vmem:[#allocation5 + $0x220] ss:$88 sps:$4 sm:$0xff]  }
  0xbe   :  { %2438 = vmatpush1.bf16.msra.mxu1 %v9928_v27  ;;  %2396 = vmatprep.subr.bf16.mxu0 %v9929_v28  ;;  %v10000_v15 = vld [vmem:[#allocation5 + $0x17c] ss:$88 sps:$4 sm:$0xff]   ;;  %v9998_v17 = vld [vmem:[#allocation5 + $0x178] ss:$88 sps:$4 sm:$0xff]   ;;  %v10006_v19 = vld [vmem:[#allocation5 + $0x22c] ss:$88 sps:$4 sm:$0xff]  }
  0xbf   :  { %2439 = vmatprep.subr.bf16.mxu1 %v9931_v29  ;;  %v10004_v21 = vld [vmem:[#allocation5 + $0x228] ss:$88 sps:$4 sm:$0xff]   ;;  %v10009_v22 = vld [vmem:[#allocation5 + $0x2d4] ss:$88 sps:$4 sm:$0xff]   ;;  %v10010_v25 = vld [vmem:[#allocation5 + $0x2d8] ss:$88 sps:$4 sm:$0xff]  }
  0xc0   :  { %v10012_v23 = vld [vmem:[#allocation5 + $0x2dc] ss:$88 sps:$4 sm:$0xff]   ;;  %v10007_v24 = vld [vmem:[#allocation5 + $0x2d0] ss:$88 sps:$4 sm:$0xff]   ;;  %v10018_v27 = vld [vmem:[#allocation5 + $0x38c] ss:$88 sps:$4 sm:$0xff]  }
  0xc1   :  { %2397 = vmatpush1.bf16.msra.mxu0 %v9933_v30  ;;  %v10015_v26 = vld [vmem:[#allocation5 + $0x384] ss:$88 sps:$4 sm:$0xff]   ;;  %v10013_v28 = vld [vmem:[#allocation5 + $0x380] ss:$88 sps:$4 sm:$0xff]   ;;  %v10021_v30 = vld [vmem:[#allocation5 + $0x434] ss:$88 sps:$4 sm:$0xff]  }
  0xc2   :  { %2440 = vmatpush1.bf16.msra.mxu1 %v9934_v31  ;;  %2398 = vmatprep.subr.bf16.mxu0 %v9935_v32  ;;  %v10016_v29 = vld [vmem:[#allocation5 + $0x388] ss:$88 sps:$4 sm:$0xff]   ;;  %v10024_v31 = vld [vmem:[#allocation5 + $0x43c] ss:$88 sps:$4 sm:$0xff]   ;;  %v10046_v49 = vld [vmem:[#allocation5 + $0x6f8] ss:$88 sps:$4 sm:$0xff]  }
  0xc3   :  { %2441 = vmatprep.subr.bf16.mxu1 %v9937_v33  ;;  %v10019_v32 = vld [vmem:[#allocation5 + $0x430] ss:$88 sps:$4 sm:$0xff]   ;;  %v10045_v46 = vld [vmem:[#allocation5 + $0x6f4] ss:$88 sps:$4 sm:$0xff]   ;;  %v10075_v3 = vld [vmem:[#allocation5 + $0xa64] ss:$88 sps:$4 sm:$0xff]  }
  0xc4   :  { %v10022_v33 = vld [vmem:[#allocation5 + $0x438] ss:$88 sps:$4 sm:$0xff]   ;;  %v10078_v4 = vld [vmem:[#allocation5 + $0xa6c] ss:$88 sps:$4 sm:$0xff]   ;;  %s11709_s2 = scalar_lea.vmem %s8593_s28, 256 }
  0xc5   :  { %2399 = vmatpush1.bf16.msra.mxu0 %v9939_v34  ;;  %v10027_v34 = vld [vmem:[#allocation5 + $0x4e4] ss:$88 sps:$4 sm:$0xff]   ;;  %p11710_p2 = scmp.ne.s32.totalorder %s8593_s28, %s11709_s2  ;;  %p11715_p4 = scmp.lt.s32.totalorder %s11709_s2, %s11709_s2 }
  0xc6   :  { %2442 = vmatpush1.bf16.msra.mxu1 %v9940_v35  ;;  %2400 = vmatprep.subr.bf16.mxu0 %v9941_v36  ;;  %v10030_v35 = vld [vmem:[#allocation5 + $0x4ec] ss:$88 sps:$4 sm:$0xff]   ;;  %v10025_v36 = vld [vmem:[#allocation5 + $0x4e0] ss:$88 sps:$4 sm:$0xff]  }
  0xc7   :  { %2443 = vmatprep.subr.bf16.mxu1 %v9943_v37  ;;  %v10028_v37 = vld [vmem:[#allocation5 + $0x4e8] ss:$88 sps:$4 sm:$0xff]   ;;  %p11716_p5 = por %p11715_p4, %p11714_p3 }
  0xc9   :  { %2401 = vmatpush1.bf16.msra.mxu0 %v9945_v38  ;;  %v10033_v38 = vld [vmem:[#allocation5 + $0x594] ss:$88 sps:$4 sm:$0xff]   ;;  %p11717_p6 = pnand %p11716_p5, %p11710_p2 }
  0xca   :  { %2444 = vmatpush1.bf16.msra.mxu1 %v9946_v39  ;;  %2402 = vmatprep.subr.bf16.mxu0 %v9947_v40  ;;  %v10036_v39 = vld [vmem:[#allocation5 + $0x59c] ss:$88 sps:$4 sm:$0xff]   ;;  %v10031_v40 = vld [vmem:[#allocation5 + $0x590] ss:$88 sps:$4 sm:$0xff]  }
  0xcb   :  { %2445 = vmatprep.subr.bf16.mxu1 %v9949_v41  ;;  %v10034_v41 = vld [vmem:[#allocation5 + $0x598] ss:$88 sps:$4 sm:$0xff]  }
  0xcd   :  { %2403 = vmatpush1.bf16.msra.mxu0 %v9951_v42  ;;  %v10039_v42 = vld [vmem:[#allocation5 + $0x644] ss:$88 sps:$4 sm:$0xff]  }
  0xce   :  { %2446 = vmatpush1.bf16.msra.mxu1 %v9952_v43  ;;  %2404 = vmatprep.subr.bf16.mxu0 %v9953_v44  ;;  %v10042_v43 = vld [vmem:[#allocation5 + $0x64c] ss:$88 sps:$4 sm:$0xff]   ;;  %v10037_v44 = vld [vmem:[#allocation5 + $0x640] ss:$88 sps:$4 sm:$0xff]  }
  0xcf   :  { %2447 = vmatprep.subr.bf16.mxu1 %v9955_v45  ;;  %v10040_v45 = vld [vmem:[#allocation5 + $0x648] ss:$88 sps:$4 sm:$0xff]  }
  0xd1   :  { %2405 = vmatpush1.bf16.msra.mxu0 %v9957_v47  ;;  %v10048_v47 = vld [vmem:[#allocation5 + $0x6fc] ss:$88 sps:$4 sm:$0xff]  }
  0xd2   :  { %2448 = vmatpush1.bf16.msra.mxu1 %v9958_v48  ;;  %2406 = vmatprep.subr.bf16.mxu0 %v9959_v50  ;;  %v10043_v48 = vld [vmem:[#allocation5 + $0x6f0] ss:$88 sps:$4 sm:$0xff]   ;;  %v10051_v50 = vld [vmem:[#allocation5 + $0x7a4] ss:$88 sps:$4 sm:$0xff]  }
  0xd3   :  { %2449 = vmatprep.subr.bf16.mxu1 %v9961_v52  ;;  %v10054_v52 = vld [vmem:[#allocation5 + $0x7ac] ss:$88 sps:$4 sm:$0xff]  }
  0xd5   :  { %2407 = vmatpush1.bf16.msra.mxu0 %v9963_v53  ;;  %v10049_v53 = vld [vmem:[#allocation5 + $0x7a0] ss:$88 sps:$4 sm:$0xff]  }
  0xd6   :  { %2450 = vmatpush1.bf16.msra.mxu1 %v9964_v54  ;;  %2408 = vmatprep.subr.bf16.mxu0 %v9965_v55  ;;  %v10052_v54 = vld [vmem:[#allocation5 + $0x7a8] ss:$88 sps:$4 sm:$0xff]   ;;  %v10057_v55 = vld [vmem:[#allocation5 + $0x854] ss:$88 sps:$4 sm:$0xff]  }
  0xd7   :  { %2451 = vmatprep.subr.bf16.mxu1 %v9967_v56  ;;  %v10060_v56 = vld [vmem:[#allocation5 + $0x85c] ss:$88 sps:$4 sm:$0xff]  }
  0xd9   :  { %2409 = vmatpush1.bf16.msra.mxu0 %v9969_v57  ;;  %v10055_v57 = vld [vmem:[#allocation5 + $0x850] ss:$88 sps:$4 sm:$0xff]  }
  0xda   :  { %2452 = vmatpush1.bf16.msra.mxu1 %v9970_v58  ;;  %2410 = vmatprep.subr.bf16.mxu0 %v9971_v59  ;;  %v10058_v58 = vld [vmem:[#allocation5 + $0x858] ss:$88 sps:$4 sm:$0xff]   ;;  %v10063_v59 = vld [vmem:[#allocation5 + $0x904] ss:$88 sps:$4 sm:$0xff]  }
  0xdb   :  { %2453 = vmatprep.subr.bf16.mxu1 %v9973_v60  ;;  %v10066_v60 = vld [vmem:[#allocation5 + $0x90c] ss:$88 sps:$4 sm:$0xff]  }
  0xdd   :  { %2411 = vmatpush1.bf16.msra.mxu0 %v9975_v61  ;;  %v10061_v61 = vld [vmem:[#allocation5 + $0x900] ss:$88 sps:$4 sm:$0xff]  }
  0xde   :  { %2454 = vmatpush1.bf16.msra.mxu1 %v9976_v62  ;;  %2412 = vmatprep.subr.bf16.mxu0 %v9977_v63  ;;  %v10064_v62 = vld [vmem:[#allocation5 + $0x908] ss:$88 sps:$4 sm:$0xff]   ;;  %v10069_v63 = vld [vmem:[#allocation5 + $0x9b4] ss:$88 sps:$4 sm:$0xff]  }
  0xdf   :  { %2455 = vmatprep.subr.bf16.mxu1 %v9979_v0  ;;  %v10072_v0 = vld [vmem:[#allocation5 + $0x9bc] ss:$88 sps:$4 sm:$0xff]  }
  0xe1   :  { %2413 = vmatpush1.bf16.msra.mxu0 %v9981_v1  ;;  %v10067_v1 = vld [vmem:[#allocation5 + $0x9b0] ss:$88 sps:$4 sm:$0xff]  }
  0xe2   :  { %2456 = vmatpush1.bf16.msra.mxu1 %v9982_v2  ;;  %2468 = vmatprep.subr.bf16.mxu0 %v9985_v5  ;;  %v10070_v2 = vld [vmem:[#allocation5 + $0x9b8] ss:$88 sps:$4 sm:$0xff]  }
  0xe3   :  { %2511 = vmatprep.subr.bf16.mxu1 %v9988_v6  ;;  %v10073_v5 = vld [vmem:[#allocation5 + $0xa60] ss:$88 sps:$4 sm:$0xff]  }
  0xe4   :  { %2415 = vmatmul.mubr.bf16.vlgmr.msra.gmra.mrb[0].mxu0 %v11931_v7  ;;  %v10076_v6 = vld [vmem:[#allocation5 + $0xa68] ss:$88 sps:$4 sm:$0xff]  }
  0xe5   :  { %2458 = vmatmul.mubr.bf16.vlgmr.msra.gmra.mrb[0].mxu1 %v11931_v7  ;;  %2469 = vmatpush1.bf16.msra.mxu0 %v9983_v8  ;;  %v10081_v8 = vld [vmem:[#allocation5 + $0x24] ss:$88 sps:$4 sm:$0xff]  }
  0xe6   :  { %2512 = vmatpush1.bf16.msra.mxu1 %v9986_v9  ;;  %2470 = vmatprep.subr.bf16.mxu0 %v9991_v10  ;;  %v10084_v9 = vld [vmem:[#allocation5 + $0x2c] ss:$88 sps:$4 sm:$0xff]   ;;  %v10079_v10 = vld [vmem:[#allocation5 + $0x20] ss:$88 sps:$4 sm:$0xff]  }
  0xe7   :  { %2513 = vmatprep.subr.bf16.mxu1 %v9994_v11  ;;  %2500 = vmatprep.mubr.bf16.mxu0 %v11927_v51  ;;  %v10082_v11 = vld [vmem:[#allocation5 + $0x28] ss:$88 sps:$4 sm:$0xff]  }
  0xe8   :  { %2543 = vmatprep.mubr.bf16.mxu1 %v11927_v51 }
  0xe9   :  { %2471 = vmatpush1.bf16.msra.mxu0 %v9989_v12  ;;  %v10087_v12 = vld [vmem:[#allocation5 + $0xd4] ss:$88 sps:$4 sm:$0xff]  }
  0xea   :  { %2514 = vmatpush1.bf16.msra.mxu1 %v9992_v13  ;;  %2472 = vmatprep.subr.bf16.mxu0 %v9997_v14  ;;  %v10090_v13 = vld [vmem:[#allocation5 + $0xdc] ss:$88 sps:$4 sm:$0xff]   ;;  %v10085_v14 = vld [vmem:[#allocation5 + $0xd0] ss:$88 sps:$4 sm:$0xff]  }
  0xeb   :  { %2515 = vmatprep.subr.bf16.mxu1 %v10000_v15  ;;  %v10088_v15 = vld [vmem:[#allocation5 + $0xd8] ss:$88 sps:$4 sm:$0xff]  }
  0xed   :  { %2473 = vmatpush1.bf16.msra.mxu0 %v9995_v16  ;;  %v10093_v16 = vld [vmem:[#allocation5 + $0x184] ss:$88 sps:$4 sm:$0xff]  }
  0xee   :  { %2516 = vmatpush1.bf16.msra.mxu1 %v9998_v17  ;;  %2474 = vmatprep.subr.bf16.mxu0 %v10003_v18  ;;  %v10096_v17 = vld [vmem:[#allocation5 + $0x18c] ss:$88 sps:$4 sm:$0xff]   ;;  %v10091_v18 = vld [vmem:[#allocation5 + $0x180] ss:$88 sps:$4 sm:$0xff]  }
  0xef   :  { %2517 = vmatprep.subr.bf16.mxu1 %v10006_v19  ;;  %v10094_v19 = vld [vmem:[#allocation5 + $0x188] ss:$88 sps:$4 sm:$0xff]  }
  0xf1   :  { %2475 = vmatpush1.bf16.msra.mxu0 %v10001_v20  ;;  %v10099_v20 = vld [vmem:[#allocation5 + $0x234] ss:$88 sps:$4 sm:$0xff]  }
  0xf2   :  { %2518 = vmatpush1.bf16.msra.mxu1 %v10004_v21  ;;  %2476 = vmatprep.subr.bf16.mxu0 %v10009_v22  ;;  %v10102_v21 = vld [vmem:[#allocation5 + $0x23c] ss:$88 sps:$4 sm:$0xff]   ;;  %v10097_v22 = vld [vmem:[#allocation5 + $0x230] ss:$88 sps:$4 sm:$0xff]  }
  0xf3   :  { %2519 = vmatprep.subr.bf16.mxu1 %v10012_v23  ;;  %v10100_v23 = vld [vmem:[#allocation5 + $0x238] ss:$88 sps:$4 sm:$0xff]  }
  0xf5   :  { %2477 = vmatpush1.bf16.msra.mxu0 %v10007_v24  ;;  %v10105_v24 = vld [vmem:[#allocation5 + $0x2e4] ss:$88 sps:$4 sm:$0xff]  }
  0xf6   :  { %2520 = vmatpush1.bf16.msra.mxu1 %v10010_v25  ;;  %2478 = vmatprep.subr.bf16.mxu0 %v10015_v26  ;;  %v10108_v25 = vld [vmem:[#allocation5 + $0x2ec] ss:$88 sps:$4 sm:$0xff]   ;;  %v10103_v26 = vld [vmem:[#allocation5 + $0x2e0] ss:$88 sps:$4 sm:$0xff]  }
  0xf7   :  { %2521 = vmatprep.subr.bf16.mxu1 %v10018_v27  ;;  %v10106_v27 = vld [vmem:[#allocation5 + $0x2e8] ss:$88 sps:$4 sm:$0xff]  }
  0xf9   :  { %2479 = vmatpush1.bf16.msra.mxu0 %v10013_v28  ;;  %v10111_v28 = vld [vmem:[#allocation5 + $0x394] ss:$88 sps:$4 sm:$0xff]  }
  0xfa   :  { %2522 = vmatpush1.bf16.msra.mxu1 %v10016_v29  ;;  %2480 = vmatprep.subr.bf16.mxu0 %v10021_v30  ;;  %v10114_v29 = vld [vmem:[#allocation5 + $0x39c] ss:$88 sps:$4 sm:$0xff]   ;;  %v10109_v30 = vld [vmem:[#allocation5 + $0x390] ss:$88 sps:$4 sm:$0xff]  }
  0xfb   :  { %2523 = vmatprep.subr.bf16.mxu1 %v10024_v31  ;;  %v10112_v31 = vld [vmem:[#allocation5 + $0x398] ss:$88 sps:$4 sm:$0xff]  }
  0xfd   :  { %2481 = vmatpush1.bf16.msra.mxu0 %v10019_v32  ;;  %v10117_v32 = vld [vmem:[#allocation5 + $0x444] ss:$88 sps:$4 sm:$0xff]  }
  0xfe   :  { %2524 = vmatpush1.bf16.msra.mxu1 %v10022_v33  ;;  %2482 = vmatprep.subr.bf16.mxu0 %v10027_v34  ;;  %v10120_v33 = vld [vmem:[#allocation5 + $0x44c] ss:$88 sps:$4 sm:$0xff]   ;;  %v10115_v34 = vld [vmem:[#allocation5 + $0x440] ss:$88 sps:$4 sm:$0xff]  }
  0xff   :  { %2525 = vmatprep.subr.bf16.mxu1 %v10030_v35  ;;  %v10118_v35 = vld [vmem:[#allocation5 + $0x448] ss:$88 sps:$4 sm:$0xff]  }
 0x101   :  { %2483 = vmatpush1.bf16.msra.mxu0 %v10025_v36  ;;  %v10123_v36 = vld [vmem:[#allocation5 + $0x4f4] ss:$88 sps:$4 sm:$0xff]  }
 0x102   :  { %2526 = vmatpush1.bf16.msra.mxu1 %v10028_v37  ;;  %2484 = vmatprep.subr.bf16.mxu0 %v10033_v38  ;;  %v10126_v37 = vld [vmem:[#allocation5 + $0x4fc] ss:$88 sps:$4 sm:$0xff]   ;;  %v10121_v38 = vld [vmem:[#allocation5 + $0x4f0] ss:$88 sps:$4 sm:$0xff]  }
 0x103   :  { %2527 = vmatprep.subr.bf16.mxu1 %v10036_v39  ;;  %v10124_v39 = vld [vmem:[#allocation5 + $0x4f8] ss:$88 sps:$4 sm:$0xff]  }
 0x105   :  { %2485 = vmatpush1.bf16.msra.mxu0 %v10031_v40  ;;  %v10129_v40 = vld [vmem:[#allocation5 + $0x5a4] ss:$88 sps:$4 sm:$0xff]  }
 0x106   :  { %2528 = vmatpush1.bf16.msra.mxu1 %v10034_v41  ;;  %2486 = vmatprep.subr.bf16.mxu0 %v10039_v42  ;;  %v10132_v41 = vld [vmem:[#allocation5 + $0x5ac] ss:$88 sps:$4 sm:$0xff]   ;;  %v10127_v42 = vld [vmem:[#allocation5 + $0x5a0] ss:$88 sps:$4 sm:$0xff]  }
 0x107   :  { %2529 = vmatprep.subr.bf16.mxu1 %v10042_v43  ;;  %v10130_v43 = vld [vmem:[#allocation5 + $0x5a8] ss:$88 sps:$4 sm:$0xff]  }
 0x109   :  { %2487 = vmatpush1.bf16.msra.mxu0 %v10037_v44  ;;  %v10135_v44 = vld [vmem:[#allocation5 + $0x654] ss:$88 sps:$4 sm:$0xff]  }
 0x10a   :  { %2530 = vmatpush1.bf16.msra.mxu1 %v10040_v45  ;;  %2488 = vmatprep.subr.bf16.mxu0 %v10045_v46  ;;  %v10138_v45 = vld [vmem:[#allocation5 + $0x65c] ss:$88 sps:$4 sm:$0xff]   ;;  %v10133_v46 = vld [vmem:[#allocation5 + $0x650] ss:$88 sps:$4 sm:$0xff]  }
 0x10b   :  { %2531 = vmatprep.subr.bf16.mxu1 %v10048_v47  ;;  %v10136_v47 = vld [vmem:[#allocation5 + $0x658] ss:$88 sps:$4 sm:$0xff]  }
 0x10d   :  { %2489 = vmatpush1.bf16.msra.mxu0 %v10043_v48  ;;  %v10141_v48 = vld [vmem:[#allocation5 + $0x704] ss:$88 sps:$4 sm:$0xff]  }
 0x10e   :  { %2532 = vmatpush1.bf16.msra.mxu1 %v10046_v49  ;;  %2490 = vmatprep.subr.bf16.mxu0 %v10051_v50  ;;  %v10144_v49 = vld [vmem:[#allocation5 + $0x70c] ss:$88 sps:$4 sm:$0xff]   ;;  %v10139_v50 = vld [vmem:[#allocation5 + $0x700] ss:$88 sps:$4 sm:$0xff]  }
 0x10f   :  { %2533 = vmatprep.subr.bf16.mxu1 %v10054_v52  ;;  %v10142_v52 = vld [vmem:[#allocation5 + $0x708] ss:$88 sps:$4 sm:$0xff]  }
 0x111   :  { %2491 = vmatpush1.bf16.msra.mxu0 %v10049_v53  ;;  %v10147_v53 = vld [vmem:[#allocation5 + $0x7b4] ss:$88 sps:$4 sm:$0xff]  }
 0x112   :  { %2534 = vmatpush1.bf16.msra.mxu1 %v10052_v54  ;;  %2492 = vmatprep.subr.bf16.mxu0 %v10057_v55  ;;  %v10150_v54 = vld [vmem:[#allocation5 + $0x7bc] ss:$88 sps:$4 sm:$0xff]   ;;  %v10145_v55 = vld [vmem:[#allocation5 + $0x7b0] ss:$88 sps:$4 sm:$0xff]  }
 0x113   :  { %2535 = vmatprep.subr.bf16.mxu1 %v10060_v56  ;;  %v10148_v56 = vld [vmem:[#allocation5 + $0x7b8] ss:$88 sps:$4 sm:$0xff]  }
 0x115   :  { %2493 = vmatpush1.bf16.msra.mxu0 %v10055_v57  ;;  %v10153_v57 = vld [vmem:[#allocation5 + $0x864] ss:$88 sps:$4 sm:$0xff]  }
 0x116   :  { %2536 = vmatpush1.bf16.msra.mxu1 %v10058_v58  ;;  %2494 = vmatprep.subr.bf16.mxu0 %v10063_v59  ;;  %v10156_v58 = vld [vmem:[#allocation5 + $0x86c] ss:$88 sps:$4 sm:$0xff]   ;;  %v10151_v59 = vld [vmem:[#allocation5 + $0x860] ss:$88 sps:$4 sm:$0xff]  }
 0x117   :  { %2537 = vmatprep.subr.bf16.mxu1 %v10066_v60  ;;  %v10154_v60 = vld [vmem:[#allocation5 + $0x868] ss:$88 sps:$4 sm:$0xff]  }
 0x119   :  { %2495 = vmatpush1.bf16.msra.mxu0 %v10061_v61  ;;  %v10159_v61 = vld [vmem:[#allocation5 + $0x914] ss:$88 sps:$4 sm:$0xff]  }
 0x11a   :  { %2538 = vmatpush1.bf16.msra.mxu1 %v10064_v62  ;;  %2496 = vmatprep.subr.bf16.mxu0 %v10069_v63  ;;  %v10162_v62 = vld [vmem:[#allocation5 + $0x91c] ss:$88 sps:$4 sm:$0xff]   ;;  %v10157_v63 = vld [vmem:[#allocation5 + $0x910] ss:$88 sps:$4 sm:$0xff]  }
 0x11b   :  { %2539 = vmatprep.subr.bf16.mxu1 %v10072_v0  ;;  %v10160_v0 = vld [vmem:[#allocation5 + $0x918] ss:$88 sps:$4 sm:$0xff]  }
 0x11d   :  { %2497 = vmatpush1.bf16.msra.mxu0 %v10067_v1  ;;  %v10165_v1 = vld [vmem:[#allocation5 + $0x9c4] ss:$88 sps:$4 sm:$0xff]  }
 0x11e   :  { %2540 = vmatpush1.bf16.msra.mxu1 %v10070_v2  ;;  %2498 = vmatprep.subr.bf16.mxu0 %v10075_v3  ;;  %v10168_v2 = vld [vmem:[#allocation5 + $0x9cc] ss:$88 sps:$4 sm:$0xff]   ;;  %v10163_v3 = vld [vmem:[#allocation5 + $0x9c0] ss:$88 sps:$4 sm:$0xff]  }
 0x11f   :  { %2541 = vmatprep.subr.bf16.mxu1 %v10078_v4  ;;  %v10166_v4 = vld [vmem:[#allocation5 + $0x9c8] ss:$88 sps:$4 sm:$0xff]  }
 0x121   :  { %2499 = vmatpush1.bf16.msra.mxu0 %v10073_v5  ;;  %v10171_v5 = vld [vmem:[#allocation5 + $0xa74] ss:$88 sps:$4 sm:$0xff]  }
 0x122   :  { %2542 = vmatpush1.bf16.msra.mxu1 %v10076_v6  ;;  %2554 = vmatprep.subr.bf16.mxu0 %v10081_v8  ;;  %v10174_v6 = vld [vmem:[#allocation5 + $0xa7c] ss:$88 sps:$4 sm:$0xff]   ;;  %v10169_v8 = vld [vmem:[#allocation5 + $0xa70] ss:$88 sps:$4 sm:$0xff]  }
 0x123   :  { %2597 = vmatprep.subr.bf16.mxu1 %v10084_v9  ;;  %v10172_v9 = vld [vmem:[#allocation5 + $0xa78] ss:$88 sps:$4 sm:$0xff]  }
 0x124   :  { %2501 = vmatmul.mubr.bf16.vlgmr.msra.gmra.mrb[4].mxu0 %v11931_v7 }
 0x125   :  { %2544 = vmatmul.mubr.bf16.vlgmr.msra.gmra.mrb[4].mxu1 %v11931_v7  ;;  %2555 = vmatpush1.bf16.msra.mxu0 %v10079_v10  ;;  %v10177_v10 = vld [vmem:[#allocation5 + $0x34] ss:$88 sps:$4 sm:$0xff]  }
 0x126   :  { %2598 = vmatpush1.bf16.msra.mxu1 %v10082_v11  ;;  %2556 = vmatprep.subr.bf16.mxu0 %v10087_v12  ;;  %v10180_v11 = vld [vmem:[#allocation5 + $0x3c] ss:$88 sps:$4 sm:$0xff]   ;;  %v10175_v12 = vld [vmem:[#allocation5 + $0x30] ss:$88 sps:$4 sm:$0xff]  }
 0x127   :  { %2599 = vmatprep.subr.bf16.mxu1 %v10090_v13  ;;  %2586 = vmatprep.mubr.bf16.mxu0 %v11927_v51  ;;  %v10178_v13 = vld [vmem:[#allocation5 + $0x38] ss:$88 sps:$4 sm:$0xff]  }
 0x128   :  { %2629 = vmatprep.mubr.bf16.mxu1 %v11927_v51 }
 0x129   :  { %2557 = vmatpush1.bf16.msra.mxu0 %v10085_v14  ;;  %v10183_v14 = vld [vmem:[#allocation5 + $0xe4] ss:$88 sps:$4 sm:$0xff]  }
 0x12a   :  { %2600 = vmatpush1.bf16.msra.mxu1 %v10088_v15  ;;  %2558 = vmatprep.subr.bf16.mxu0 %v10093_v16  ;;  %v10186_v15 = vld [vmem:[#allocation5 + $0xec] ss:$88 sps:$4 sm:$0xff]   ;;  %v10181_v16 = vld [vmem:[#allocation5 + $0xe0] ss:$88 sps:$4 sm:$0xff]  }
 0x12b   :  { %2601 = vmatprep.subr.bf16.mxu1 %v10096_v17  ;;  %v10184_v17 = vld [vmem:[#allocation5 + $0xe8] ss:$88 sps:$4 sm:$0xff]  }
 0x12d   :  { %2559 = vmatpush1.bf16.msra.mxu0 %v10091_v18  ;;  %v10189_v18 = vld [vmem:[#allocation5 + $0x194] ss:$88 sps:$4 sm:$0xff]  }
 0x12e   :  { %2602 = vmatpush1.bf16.msra.mxu1 %v10094_v19  ;;  %2560 = vmatprep.subr.bf16.mxu0 %v10099_v20  ;;  %v10192_v19 = vld [vmem:[#allocation5 + $0x19c] ss:$88 sps:$4 sm:$0xff]   ;;  %v10187_v20 = vld [vmem:[#allocation5 + $0x190] ss:$88 sps:$4 sm:$0xff]  }
 0x12f   :  { %2603 = vmatprep.subr.bf16.mxu1 %v10102_v21  ;;  %v10190_v21 = vld [vmem:[#allocation5 + $0x198] ss:$88 sps:$4 sm:$0xff]  }
 0x131   :  { %2561 = vmatpush1.bf16.msra.mxu0 %v10097_v22  ;;  %v10195_v22 = vld [vmem:[#allocation5 + $0x244] ss:$88 sps:$4 sm:$0xff]  }
 0x132   :  { %2604 = vmatpush1.bf16.msra.mxu1 %v10100_v23  ;;  %2562 = vmatprep.subr.bf16.mxu0 %v10105_v24  ;;  %v10198_v23 = vld [vmem:[#allocation5 + $0x24c] ss:$88 sps:$4 sm:$0xff]   ;;  %v10193_v24 = vld [vmem:[#allocation5 + $0x240] ss:$88 sps:$4 sm:$0xff]  }
 0x133   :  { %2605 = vmatprep.subr.bf16.mxu1 %v10108_v25  ;;  %v10196_v25 = vld [vmem:[#allocation5 + $0x248] ss:$88 sps:$4 sm:$0xff]  }
 0x135   :  { %2563 = vmatpush1.bf16.msra.mxu0 %v10103_v26  ;;  %v10201_v26 = vld [vmem:[#allocation5 + $0x2f4] ss:$88 sps:$4 sm:$0xff]  }
 0x136   :  { %2606 = vmatpush1.bf16.msra.mxu1 %v10106_v27  ;;  %2564 = vmatprep.subr.bf16.mxu0 %v10111_v28  ;;  %v10204_v27 = vld [vmem:[#allocation5 + $0x2fc] ss:$88 sps:$4 sm:$0xff]   ;;  %v10199_v28 = vld [vmem:[#allocation5 + $0x2f0] ss:$88 sps:$4 sm:$0xff]  }
 0x137   :  { %2607 = vmatprep.subr.bf16.mxu1 %v10114_v29  ;;  %v10202_v29 = vld [vmem:[#allocation5 + $0x2f8] ss:$88 sps:$4 sm:$0xff]  }
 0x139   :  { %2565 = vmatpush1.bf16.msra.mxu0 %v10109_v30  ;;  %v10207_v30 = vld [vmem:[#allocation5 + $0x3a4] ss:$88 sps:$4 sm:$0xff]  }
 0x13a   :  { %2608 = vmatpush1.bf16.msra.mxu1 %v10112_v31  ;;  %2566 = vmatprep.subr.bf16.mxu0 %v10117_v32  ;;  %v10210_v31 = vld [vmem:[#allocation5 + $0x3ac] ss:$88 sps:$4 sm:$0xff]   ;;  %v10205_v32 = vld [vmem:[#allocation5 + $0x3a0] ss:$88 sps:$4 sm:$0xff]  }
 0x13b   :  { %2609 = vmatprep.subr.bf16.mxu1 %v10120_v33  ;;  %v10208_v33 = vld [vmem:[#allocation5 + $0x3a8] ss:$88 sps:$4 sm:$0xff]  }
 0x13d   :  { %2567 = vmatpush1.bf16.msra.mxu0 %v10115_v34  ;;  %v10213_v34 = vld [vmem:[#allocation5 + $0x454] ss:$88 sps:$4 sm:$0xff]  }
 0x13e   :  { %2610 = vmatpush1.bf16.msra.mxu1 %v10118_v35  ;;  %2568 = vmatprep.subr.bf16.mxu0 %v10123_v36  ;;  %v10216_v35 = vld [vmem:[#allocation5 + $0x45c] ss:$88 sps:$4 sm:$0xff]   ;;  %v10211_v36 = vld [vmem:[#allocation5 + $0x450] ss:$88 sps:$4 sm:$0xff]  }
 0x13f   :  { %2611 = vmatprep.subr.bf16.mxu1 %v10126_v37  ;;  %v10214_v37 = vld [vmem:[#allocation5 + $0x458] ss:$88 sps:$4 sm:$0xff]  }
 0x141   :  { %2569 = vmatpush1.bf16.msra.mxu0 %v10121_v38  ;;  %v10219_v38 = vld [vmem:[#allocation5 + $0x504] ss:$88 sps:$4 sm:$0xff]  }
 0x142   :  { %2612 = vmatpush1.bf16.msra.mxu1 %v10124_v39  ;;  %2570 = vmatprep.subr.bf16.mxu0 %v10129_v40  ;;  %v10222_v39 = vld [vmem:[#allocation5 + $0x50c] ss:$88 sps:$4 sm:$0xff]   ;;  %v10217_v40 = vld [vmem:[#allocation5 + $0x500] ss:$88 sps:$4 sm:$0xff]  }
 0x143   :  { %2613 = vmatprep.subr.bf16.mxu1 %v10132_v41  ;;  %v10220_v41 = vld [vmem:[#allocation5 + $0x508] ss:$88 sps:$4 sm:$0xff]  }
 0x145   :  { %2571 = vmatpush1.bf16.msra.mxu0 %v10127_v42  ;;  %v10225_v42 = vld [vmem:[#allocation5 + $0x5b4] ss:$88 sps:$4 sm:$0xff]  }
 0x146   :  { %2614 = vmatpush1.bf16.msra.mxu1 %v10130_v43  ;;  %2572 = vmatprep.subr.bf16.mxu0 %v10135_v44  ;;  %v10228_v43 = vld [vmem:[#allocation5 + $0x5bc] ss:$88 sps:$4 sm:$0xff]   ;;  %v10223_v44 = vld [vmem:[#allocation5 + $0x5b0] ss:$88 sps:$4 sm:$0xff]  }
 0x147   :  { %2615 = vmatprep.subr.bf16.mxu1 %v10138_v45  ;;  %v10226_v45 = vld [vmem:[#allocation5 + $0x5b8] ss:$88 sps:$4 sm:$0xff]  }
 0x149   :  { %2573 = vmatpush1.bf16.msra.mxu0 %v10133_v46  ;;  %v10231_v46 = vld [vmem:[#allocation5 + $0x664] ss:$88 sps:$4 sm:$0xff]  }
 0x14a   :  { %2616 = vmatpush1.bf16.msra.mxu1 %v10136_v47  ;;  %2574 = vmatprep.subr.bf16.mxu0 %v10141_v48  ;;  %v10234_v47 = vld [vmem:[#allocation5 + $0x66c] ss:$88 sps:$4 sm:$0xff]   ;;  %v10229_v48 = vld [vmem:[#allocation5 + $0x660] ss:$88 sps:$4 sm:$0xff]  }
 0x14b   :  { %2617 = vmatprep.subr.bf16.mxu1 %v10144_v49  ;;  %v10232_v49 = vld [vmem:[#allocation5 + $0x668] ss:$88 sps:$4 sm:$0xff]  }
 0x14d   :  { %2575 = vmatpush1.bf16.msra.mxu0 %v10139_v50  ;;  %v10237_v50 = vld [vmem:[#allocation5 + $0x714] ss:$88 sps:$4 sm:$0xff]  }
 0x14e   :  { %2618 = vmatpush1.bf16.msra.mxu1 %v10142_v52  ;;  %2576 = vmatprep.subr.bf16.mxu0 %v10147_v53  ;;  %v10240_v52 = vld [vmem:[#allocation5 + $0x71c] ss:$88 sps:$4 sm:$0xff]   ;;  %v10235_v53 = vld [vmem:[#allocation5 + $0x710] ss:$88 sps:$4 sm:$0xff]  }
 0x14f   :  { %2619 = vmatprep.subr.bf16.mxu1 %v10150_v54  ;;  %v10238_v54 = vld [vmem:[#allocation5 + $0x718] ss:$88 sps:$4 sm:$0xff]  }
 0x151   :  { %2577 = vmatpush1.bf16.msra.mxu0 %v10145_v55  ;;  %v10243_v55 = vld [vmem:[#allocation5 + $0x7c4] ss:$88 sps:$4 sm:$0xff]  }
 0x152   :  { %2620 = vmatpush1.bf16.msra.mxu1 %v10148_v56  ;;  %2578 = vmatprep.subr.bf16.mxu0 %v10153_v57  ;;  %v10246_v56 = vld [vmem:[#allocation5 + $0x7cc] ss:$88 sps:$4 sm:$0xff]   ;;  %v10241_v57 = vld [vmem:[#allocation5 + $0x7c0] ss:$88 sps:$4 sm:$0xff]  }
 0x153   :  { %2621 = vmatprep.subr.bf16.mxu1 %v10156_v58  ;;  %v10244_v58 = vld [vmem:[#allocation5 + $0x7c8] ss:$88 sps:$4 sm:$0xff]  }
 0x155   :  { %2579 = vmatpush1.bf16.msra.mxu0 %v10151_v59  ;;  %v10249_v59 = vld [vmem:[#allocation5 + $0x874] ss:$88 sps:$4 sm:$0xff]  }
 0x156   :  { %2622 = vmatpush1.bf16.msra.mxu1 %v10154_v60  ;;  %2580 = vmatprep.subr.bf16.mxu0 %v10159_v61  ;;  %v10252_v60 = vld [vmem:[#allocation5 + $0x87c] ss:$88 sps:$4 sm:$0xff]   ;;  %v10247_v61 = vld [vmem:[#allocation5 + $0x870] ss:$88 sps:$4 sm:$0xff]  }
 0x157   :  { %2623 = vmatprep.subr.bf16.mxu1 %v10162_v62  ;;  %v10250_v62 = vld [vmem:[#allocation5 + $0x878] ss:$88 sps:$4 sm:$0xff]  }
 0x159   :  { %2581 = vmatpush1.bf16.msra.mxu0 %v10157_v63  ;;  %v10255_v63 = vld [vmem:[#allocation5 + $0x924] ss:$88 sps:$4 sm:$0xff]  }
 0x15a   :  { %2624 = vmatpush1.bf16.msra.mxu1 %v10160_v0  ;;  %2582 = vmatprep.subr.bf16.mxu0 %v10165_v1  ;;  %v10258_v0 = vld [vmem:[#allocation5 + $0x92c] ss:$88 sps:$4 sm:$0xff]   ;;  %v10253_v1 = vld [vmem:[#allocation5 + $0x920] ss:$88 sps:$4 sm:$0xff]  }
 0x15b   :  { %2625 = vmatprep.subr.bf16.mxu1 %v10168_v2  ;;  %v10256_v2 = vld [vmem:[#allocation5 + $0x928] ss:$88 sps:$4 sm:$0xff]  }
 0x15d   :  { %2583 = vmatpush1.bf16.msra.mxu0 %v10163_v3  ;;  %v10261_v3 = vld [vmem:[#allocation5 + $0x9d4] ss:$88 sps:$4 sm:$0xff]  }
 0x15e   :  { %2626 = vmatpush1.bf16.msra.mxu1 %v10166_v4  ;;  %2584 = vmatprep.subr.bf16.mxu0 %v10171_v5  ;;  %v10264_v4 = vld [vmem:[#allocation5 + $0x9dc] ss:$88 sps:$4 sm:$0xff]   ;;  %v10259_v5 = vld [vmem:[#allocation5 + $0x9d0] ss:$88 sps:$4 sm:$0xff]  }
 0x15f   :  { %2627 = vmatprep.subr.bf16.mxu1 %v10174_v6  ;;  %v10262_v6 = vld [vmem:[#allocation5 + $0x9d8] ss:$88 sps:$4 sm:$0xff]  }
 0x161   :  { %2585 = vmatpush1.bf16.msra.mxu0 %v10169_v8  ;;  %v10267_v8 = vld [vmem:[#allocation5 + $0xa84] ss:$88 sps:$4 sm:$0xff]  }
 0x162   :  { %2628 = vmatpush1.bf16.msra.mxu1 %v10172_v9  ;;  %2640 = vmatprep.subr.bf16.mxu0 %v10177_v10  ;;  %v10270_v9 = vld [vmem:[#allocation5 + $0xa8c] ss:$88 sps:$4 sm:$0xff]   ;;  %v10265_v10 = vld [vmem:[#allocation5 + $0xa80] ss:$88 sps:$4 sm:$0xff]  }
 0x163   :  { %2683 = vmatprep.subr.bf16.mxu1 %v10180_v11  ;;  %v10268_v11 = vld [vmem:[#allocation5 + $0xa88] ss:$88 sps:$4 sm:$0xff]  }
 0x164   :  { %2587 = vmatmul.mubr.bf16.vlgmr.msra.gmra.mrb[8].mxu0 %v11931_v7 }
 0x165   :  { %2630 = vmatmul.mubr.bf16.vlgmr.msra.gmra.mrb[8].mxu1 %v11931_v7  ;;  %2641 = vmatpush1.bf16.msra.mxu0 %v10175_v12  ;;  %v10273_v12 = vld [vmem:[#allocation5 + $0x44] ss:$88 sps:$4 sm:$0xff]  }
 0x166   :  { %2684 = vmatpush1.bf16.msra.mxu1 %v10178_v13  ;;  %2642 = vmatprep.subr.bf16.mxu0 %v10183_v14  ;;  %v10276_v13 = vld [vmem:[#allocation5 + $0x4c] ss:$88 sps:$4 sm:$0xff]   ;;  %v10271_v14 = vld [vmem:[#allocation5 + $0x40] ss:$88 sps:$4 sm:$0xff]  }
 0x167   :  { %2685 = vmatprep.subr.bf16.mxu1 %v10186_v15  ;;  %2672 = vmatprep.mubr.bf16.mxu0 %v11927_v51  ;;  %v10274_v15 = vld [vmem:[#allocation5 + $0x48] ss:$88 sps:$4 sm:$0xff]  }
 0x168   :  { %2715 = vmatprep.mubr.bf16.mxu1 %v11927_v51 }
 0x169   :  { %2643 = vmatpush1.bf16.msra.mxu0 %v10181_v16  ;;  %v10279_v16 = vld [vmem:[#allocation5 + $0xf4] ss:$88 sps:$4 sm:$0xff]  }
 0x16a   :  { %2686 = vmatpush1.bf16.msra.mxu1 %v10184_v17  ;;  %2644 = vmatprep.subr.bf16.mxu0 %v10189_v18  ;;  %v10282_v17 = vld [vmem:[#allocation5 + $0xfc] ss:$88 sps:$4 sm:$0xff]   ;;  %v10277_v18 = vld [vmem:[#allocation5 + $0xf0] ss:$88 sps:$4 sm:$0xff]  }
 0x16b   :  { %2687 = vmatprep.subr.bf16.mxu1 %v10192_v19  ;;  %v10280_v19 = vld [vmem:[#allocation5 + $0xf8] ss:$88 sps:$4 sm:$0xff]  }
 0x16d   :  { %2645 = vmatpush1.bf16.msra.mxu0 %v10187_v20  ;;  %v10285_v20 = vld [vmem:[#allocation5 + $0x1a4] ss:$88 sps:$4 sm:$0xff]  }
 0x16e   :  { %2688 = vmatpush1.bf16.msra.mxu1 %v10190_v21  ;;  %2646 = vmatprep.subr.bf16.mxu0 %v10195_v22  ;;  %v10288_v21 = vld [vmem:[#allocation5 + $0x1ac] ss:$88 sps:$4 sm:$0xff]   ;;  %v10283_v22 = vld [vmem:[#allocation5 + $0x1a0] ss:$88 sps:$4 sm:$0xff]  }
 0x16f   :  { %2689 = vmatprep.subr.bf16.mxu1 %v10198_v23  ;;  %v10286_v23 = vld [vmem:[#allocation5 + $0x1a8] ss:$88 sps:$4 sm:$0xff]  }
 0x171   :  { %2647 = vmatpush1.bf16.msra.mxu0 %v10193_v24  ;;  %v512_v24 = vlaneseq }
 0x172   :  { %2690 = vmatpush1.bf16.msra.mxu1 %v10196_v25  ;;  %2648 = vmatprep.subr.bf16.mxu0 %v10201_v26  ;;  %v10291_v25 = vld [vmem:[#allocation5 + $0x254] ss:$88 sps:$4 sm:$0xff]  }
 0x173   :  { %2691 = vmatprep.subr.bf16.mxu1 %v10204_v27  ;;  %v10294_v26 = vld [vmem:[#allocation5 + $0x25c] ss:$88 sps:$4 sm:$0xff]   ;;  %v10289_v27 = vld [vmem:[#allocation5 + $0x250] ss:$88 sps:$4 sm:$0xff]  }
 0x175   :  { %2649 = vmatpush1.bf16.msra.mxu0 %v10199_v28  ;;  %v10292_v28 = vld [vmem:[#allocation5 + $0x258] ss:$88 sps:$4 sm:$0xff]  }
 0x176   :  { %2692 = vmatpush1.bf16.msra.mxu1 %v10202_v29  ;;  %2650 = vmatprep.subr.bf16.mxu0 %v10207_v30  ;;  %v11949_v29 = vshrl.u32 %v512_v24, 7  ;;  %v10297_v30 = vld [vmem:[#allocation5 + $0x304] ss:$88 sps:$4 sm:$0xff]   ;;  %v10322_v24 = vld [vmem:[#allocation5 + $0x5c8] ss:$88 sps:$4 sm:$0xff]  }
 0x177   :  { %2693 = vmatprep.subr.bf16.mxu1 %v10210_v31  ;;  %v10300_v31 = vld [vmem:[#allocation5 + $0x30c] ss:$88 sps:$4 sm:$0xff]  }
 0x179   :  { %2651 = vmatpush1.bf16.msra.mxu0 %v10205_v32  ;;  %v10295_v32 = vld [vmem:[#allocation5 + $0x300] ss:$88 sps:$4 sm:$0xff]  }
 0x17a   :  { %2694 = vmatpush1.bf16.msra.mxu1 %v10208_v33  ;;  %2652 = vmatprep.subr.bf16.mxu0 %v10213_v34  ;;  %v10298_v33 = vld [vmem:[#allocation5 + $0x308] ss:$88 sps:$4 sm:$0xff]  }
 0x17b   :  { %2695 = vmatprep.subr.bf16.mxu1 %v10216_v35  ;;  %v11951_v34 = vld [vmem:[#allocation7] sm:$0xff]  ;;  %v11954_v35 = vsub.s32 0, %v11949_v29 }
 0x17d   :  { %2653 = vmatpush1.bf16.msra.mxu0 %v10211_v36  ;;  %v11957_v36 = vsub.s32 2, %v11949_v29 }
 0x17e   :  { %2696 = vmatpush1.bf16.msra.mxu1 %v10214_v37  ;;  %2654 = vmatprep.subr.bf16.mxu0 %v10219_v38  ;;  %v11960_v37 = vsub.s32 1, %v11949_v29  ;;  %v11963_v38 = vsub.s32 3, %v11949_v29 }
 0x17f   :  { %2697 = vmatprep.subr.bf16.mxu1 %v10222_v39  ;;  %v10303_v39 = vld [vmem:[#allocation5 + $0x3b4] ss:$88 sps:$4 sm:$0xff]  }
 0x181   :  { %2655 = vmatpush1.bf16.msra.mxu0 %v10217_v40  ;;  %v10306_v40 = vld [vmem:[#allocation5 + $0x3bc] ss:$88 sps:$4 sm:$0xff]  }
 0x182   :  { %2698 = vmatpush1.bf16.msra.mxu1 %v10220_v41  ;;  %2656 = vmatprep.subr.bf16.mxu0 %v10225_v42  ;;  %v10301_v41 = vld [vmem:[#allocation5 + $0x3b0] ss:$88 sps:$4 sm:$0xff]  }
 0x183   :  { %2699 = vmatprep.subr.bf16.mxu1 %v10228_v43  ;;  %v10304_v42 = vld [vmem:[#allocation5 + $0x3b8] ss:$88 sps:$4 sm:$0xff]   ;;  %v515_v43 = vrot.slane %v11951_v34, %v11954_v35 }
 0x185   :  { %2657 = vmatpush1.bf16.msra.mxu0 %v10223_v44  ;;  %v10309_v44 = vld [vmem:[#allocation5 + $0x464] ss:$88 sps:$4 sm:$0xff]  }
 0x186   :  { %2700 = vmatpush1.bf16.msra.mxu1 %v10226_v45  ;;  %2658 = vmatprep.subr.bf16.mxu0 %v10231_v46  ;;  %v523_v45 = vrot.slane %v11951_v34, %v11957_v36  ;;  %v519_v46 = vrot.slane %v11951_v34, %v11960_v37 }
 0x187   :  { %2701 = vmatprep.subr.bf16.mxu1 %v10234_v47  ;;  %v527_v47 = vrot.slane %v11951_v34, %v11963_v38 }
 0x189   :  { %2659 = vmatpush1.bf16.msra.mxu0 %v10229_v48  ;;  %v10312_v48 = vld [vmem:[#allocation5 + $0x46c] ss:$88 sps:$4 sm:$0xff]  }
 0x18a   :  { %2702 = vmatpush1.bf16.msra.mxu1 %v10232_v49  ;;  %2660 = vmatprep.subr.bf16.mxu0 %v10237_v50  ;;  %v10307_v50 = vld [vmem:[#allocation5 + $0x460] ss:$88 sps:$4 sm:$0xff]  }
 0x18b   :  { %2703 = vmatprep.subr.bf16.mxu1 %v10240_v52  ;;  %v10310_v52 = vld [vmem:[#allocation5 + $0x468] ss:$88 sps:$4 sm:$0xff]  }
 0x18d   :  { %2661 = vmatpush1.bf16.msra.mxu0 %v10235_v53 }
 0x18e   :  { %2704 = vmatpush1.bf16.msra.mxu1 %v10238_v54  ;;  %2662 = vmatprep.subr.bf16.mxu0 %v10243_v55 }
 0x18f   :  { %2705 = vmatprep.subr.bf16.mxu1 %v10246_v56  ;;  %v10315_v56 = vld [vmem:[#allocation5 + $0x514] ss:$88 sps:$4 sm:$0xff]  }
 0x191   :  { %2663 = vmatpush1.bf16.msra.mxu0 %v10241_v57  ;;  %v10318_v57 = vld [vmem:[#allocation5 + $0x51c] ss:$88 sps:$4 sm:$0xff]  }
 0x192   :  { %2706 = vmatpush1.bf16.msra.mxu1 %v10244_v58  ;;  %2664 = vmatprep.subr.bf16.mxu0 %v10249_v59 }
 0x193   :  { %2707 = vmatprep.subr.bf16.mxu1 %v10252_v60 }
 0x195   :  { %2665 = vmatpush1.bf16.msra.mxu0 %v10247_v61 }
 0x196   :  { %2708 = vmatpush1.bf16.msra.mxu1 %v10250_v62  ;;  %2666 = vmatprep.subr.bf16.mxu0 %v10255_v63 }
 0x197   :  { %2709 = vmatprep.subr.bf16.mxu1 %v10258_v0 }
 0x199   :  { %2667 = vmatpush1.bf16.msra.mxu0 %v10253_v1 }
 0x19a   :  { %2710 = vmatpush1.bf16.msra.mxu1 %v10256_v2  ;;  %2668 = vmatprep.subr.bf16.mxu0 %v10261_v3 }
 0x19b   :  { %2711 = vmatprep.subr.bf16.mxu1 %v10264_v4 }
 0x19d   :  { %2669 = vmatpush1.bf16.msra.mxu0 %v10259_v5 }
 0x19e   :  { %2712 = vmatpush1.bf16.msra.mxu1 %v10262_v6  ;;  %2670 = vmatprep.subr.bf16.mxu0 %v10267_v8  ;;  %v10313_v8 = vld [vmem:[#allocation5 + $0x510] ss:$88 sps:$4 sm:$0xff]  }
 0x19f   :  { %2713 = vmatprep.subr.bf16.mxu1 %v10270_v9  ;;  %v10316_v9 = vld [vmem:[#allocation5 + $0x518] ss:$88 sps:$4 sm:$0xff]  }
 0x1a1   :  { %2671 = vmatpush1.bf16.msra.mxu0 %v10265_v10 }
 0x1a2   :  { %2714 = vmatpush1.bf16.msra.mxu1 %v10268_v11  ;;  %2726 = vmatprep.subr.bf16.mxu0 %v10273_v12 }
 0x1a3   :  { %2769 = vmatprep.subr.bf16.mxu1 %v10276_v13  ;;  %v10321_v13 = vld [vmem:[#allocation5 + $0x5c4] ss:$88 sps:$4 sm:$0xff]  }
 0x1a4   :  { %2673 = vmatmul.mubr.bf16.vlgmr.msra.gmra.mrb[12].mxu0 %v11931_v7 }
 0x1a5   :  { %2716 = vmatmul.mubr.bf16.vlgmr.msra.gmra.mrb[12].mxu1 %v11931_v7  ;;  %2727 = vmatpush1.bf16.msra.mxu0 %v10271_v14  ;;  %v10324_v14 = vld [vmem:[#allocation5 + $0x5cc] ss:$88 sps:$4 sm:$0xff]  }
 0x1a6   :  { %2770 = vmatpush1.bf16.msra.mxu1 %v10274_v15  ;;  %2728 = vmatprep.subr.bf16.mxu0 %v10279_v16 }
 0x1a7   :  { %2771 = vmatprep.subr.bf16.mxu1 %v10282_v17  ;;  %2758 = vmatprep.mubr.bf16.mxu0 %v11927_v51 }
 0x1a8   :  { %2801 = vmatprep.mubr.bf16.mxu1 %v11927_v51 }
 0x1a9   :  { %2729 = vmatpush1.bf16.msra.mxu0 %v10277_v18 }
 0x1aa   :  { %2772 = vmatpush1.bf16.msra.mxu1 %v10280_v19  ;;  %2730 = vmatprep.subr.bf16.mxu0 %v10285_v20 }
 0x1ab   :  { %2773 = vmatprep.subr.bf16.mxu1 %v10288_v21 }
 0x1ad   :  { %2731 = vmatpush1.bf16.msra.mxu0 %v10283_v22  ;;  %v10319_v22 = vld [vmem:[#allocation5 + $0x5c0] ss:$88 sps:$4 sm:$0xff]  }
 0x1ae   :  { %2774 = vmatpush1.bf16.msra.mxu1 %v10286_v23  ;;  %2732 = vmatprep.subr.bf16.mxu0 %v10291_v25  ;;  %v10327_v25 = vld [vmem:[#allocation5 + $0x674] ss:$88 sps:$4 sm:$0xff]  }
 0x1af   :  { %2775 = vmatprep.subr.bf16.mxu1 %v10294_v26  ;;  %v10330_v26 = vld [vmem:[#allocation5 + $0x67c] ss:$88 sps:$4 sm:$0xff]  }
 0x1b1   :  { %2733 = vmatpush1.bf16.msra.mxu0 %v10289_v27  ;;  %v10325_v27 = vld [vmem:[#allocation5 + $0x670] ss:$88 sps:$4 sm:$0xff]  }
 0x1b2   :  { %2776 = vmatpush1.bf16.msra.mxu1 %v10292_v28  ;;  %2734 = vmatprep.subr.bf16.mxu0 %v10297_v30  ;;  %v10328_v28 = vld [vmem:[#allocation5 + $0x678] ss:$88 sps:$4 sm:$0xff]   ;;  %v10333_v30 = vld [vmem:[#allocation5 + $0x724] ss:$88 sps:$4 sm:$0xff]  }
 0x1b3   :  { %2777 = vmatprep.subr.bf16.mxu1 %v10300_v31  ;;  %v10336_v31 = vld [vmem:[#allocation5 + $0x72c] ss:$88 sps:$4 sm:$0xff]  }
 0x1b5   :  { %2735 = vmatpush1.bf16.msra.mxu0 %v10295_v32  ;;  %v10331_v32 = vld [vmem:[#allocation5 + $0x720] ss:$88 sps:$4 sm:$0xff]  }
 0x1b6   :  { %2778 = vmatpush1.bf16.msra.mxu1 %v10298_v33  ;;  %2736 = vmatprep.subr.bf16.mxu0 %v10303_v39  ;;  %v10334_v33 = vld [vmem:[#allocation5 + $0x728] ss:$88 sps:$4 sm:$0xff]   ;;  %v10339_v39 = vld [vmem:[#allocation5 + $0x7d4] ss:$88 sps:$4 sm:$0xff]  }
 0x1b7   :  { %2779 = vmatprep.subr.bf16.mxu1 %v10306_v40  ;;  %v2416_v49 = vpop.f32.mrb[0].mxu0  ;;  %v10342_v40 = vld [vmem:[#allocation5 + $0x7dc] ss:$88 sps:$4 sm:$0xff]  }
 0x1b8   :  { %v2459_v53 = vpop.f32.mrb[0].mxu1  ;;  %v2417_v54 = vadd.f32 %v2416_v49, %v515_v43  ;;  %v2418_v55 = vpop.f32.mrb[1].mxu0  ;;  %v10349_v49 = vld [vmem:[#allocation5 + $0x930] ss:$88 sps:$4 sm:$0xff]  }
 0x1b9   :  { %v2460_v58 = vadd.f32 %v2459_v53, %v523_v45  ;;  %v2461_v59 = vpop.f32.mrb[1].mxu1  ;;  %v2419_v60 = vadd.f32 %v2418_v55, %v519_v46  ;;  %v2420_v61 = vpop.f32.mrb[2].mxu0  ;;  %2737 = vmatpush1.bf16.msra.mxu0 %v10301_v41  ;;  %v10337_v41 = vld [vmem:[#allocation5 + $0x7d0] ss:$88 sps:$4 sm:$0xff]   ;;  %v10360_v53 = vld [vmem:[#allocation5 + $0x9ec] ss:$88 sps:$4 sm:$0xff]  }
 0x1ba   :  { %2780 = vmatpush1.bf16.msra.mxu1 %v10304_v42  ;;  %v2462_v62 = vadd.f32 %v2461_v59, %v527_v47  ;;  %v2463_v63 = vpop.f32.mrb[2].mxu1  ;;  %v2855_v0 = vmax.f32 %v2417_v54, 0.0  ;;  %v2421_v1 = vadd.f32 %v2420_v61, %v515_v43  ;;  %v2422_v2 = vpop.f32.mrb[3].mxu0  ;;  %2738 = vmatprep.subr.bf16.mxu0 %v10309_v44  ;;  %v10340_v42 = vld [vmem:[#allocation5 + $0x7d8] ss:$88 sps:$4 sm:$0xff]  }
 0x1bb   :  { %2781 = vmatprep.subr.bf16.mxu1 %v10312_v48  ;;  %v2857_v3 = vmax.f32 %v2460_v58, 0.0  ;;  %v2464_v4 = vadd.f32 %v2463_v63, %v523_v45  ;;  %v2465_v5 = vpop.f32.mrb[3].mxu1  ;;  %v2423_v6 = vadd.f32 %v2422_v2, %v519_v46  ;;  %v2856_v16 = vmax.f32 %v2419_v60, 0.0  ;;  %v10345_v43 = vld [vmem:[#allocation5 + $0x884] ss:$88 sps:$4 sm:$0xff]  }
 0x1bc   :  { %v2858_v10 = vmax.f32 %v2462_v62, 0.0  ;;  %v2466_v11 = vadd.f32 %v2465_v5, %v527_v47  ;;  %v2877_v12 = vmax.f32 %v2421_v1, 0.0  ;;  %v10348_v44 = vld [vmem:[#allocation5 + $0x88c] ss:$88 sps:$4 sm:$0xff]   ;;  %v10343_v45 = vld [vmem:[#allocation5 + $0x880] ss:$88 sps:$4 sm:$0xff]  }
 0x1bd   :  { %v2879_v15 = vmax.f32 %v2464_v4, 0.0  ;;  %v2878_v17 = vmax.f32 %v2423_v6, 0.0  ;;  %2739 = vmatpush1.bf16.msra.mxu0 %v10307_v50  ;;  %v10346_v46 = vld [vmem:[#allocation5 + $0x888] ss:$88 sps:$4 sm:$0xff]   ;;  %v10351_v47 = vld [vmem:[#allocation5 + $0x934] ss:$88 sps:$4 sm:$0xff]  }
 0x1be   :  { %2782 = vmatpush1.bf16.msra.mxu1 %v10310_v52  ;;  %v2880_v18 = vmax.f32 %v2466_v11, 0.0  ;;  %v11973_v19 = vpack.c.bf16 %v2877_v12, %v2855_v0  ;;  %2740 = vmatprep.subr.bf16.mxu0 %v10315_v56  ;;  %v10354_v48 = vld [vmem:[#allocation5 + $0x93c] ss:$88 sps:$4 sm:$0xff]   ;;  %v10352_v50 = vld [vmem:[#allocation5 + $0x938] ss:$88 sps:$4 sm:$0xff]  }
 0x1bf   :  { %2783 = vmatprep.subr.bf16.mxu1 %v10318_v57  ;;  %v11975_v20 = vpack.c.bf16 %v2879_v15, %v2857_v3  ;;  %v11977_v21 = vpack.c.bf16 %v2878_v17, %v2856_v16  ;;  %v10357_v52 = vld [vmem:[#allocation5 + $0x9e4] ss:$88 sps:$4 sm:$0xff]   ;;  %v10355_v54 = vld [vmem:[#allocation5 + $0x9e0] ss:$88 sps:$4 sm:$0xff]   ;;  %v10363_v56 = vld [vmem:[#allocation5 + $0xa94] ss:$88 sps:$4 sm:$0xff]  }
 0x1c0   :  { %v11979_v23 = vpack.c.bf16 %v2880_v18, %v2858_v10  ;;  %v10358_v55 = vld [vmem:[#allocation5 + $0x9e8] ss:$88 sps:$4 sm:$0xff]   ;;  %v10366_v57 = vld [vmem:[#allocation5 + $0xa9c] ss:$88 sps:$4 sm:$0xff]   ;;  %v10364_v59 = vld [vmem:[#allocation5 + $0xa98] ss:$88 sps:$4 sm:$0xff]  }
 0x1c1   :  { %2741 = vmatpush1.bf16.msra.mxu0 %v10313_v8  ;;  %v10361_v58 = vld [vmem:[#allocation5 + $0xa90] ss:$88 sps:$4 sm:$0xff]   ;;  %v10369_v60 = vld [vmem:[#allocation5 + $0x54] ss:$88 sps:$4 sm:$0xff]   ;;  %v10375_v0 = vld [vmem:[#allocation5 + $0x104] ss:$88 sps:$4 sm:$0xff]  }
 0x1c2   :  { %2784 = vmatpush1.bf16.msra.mxu1 %v10316_v9  ;;  %2742 = vmatprep.subr.bf16.mxu0 %v10321_v13  ;;  %v10372_v61 = vld [vmem:[#allocation8 + $0x4] ss:$16 sps:$4 sm:$0xff]   ;;  %v10370_v63 = vld [vmem:[#allocation8] ss:$16 sps:$4 sm:$0xff]   ;;  %v11986_v17 = vsub.s32 4, %v11949_v29  ;;  %v11990_v18 = vsub.s32 5, %v11949_v29 }
 0x1c3   :  { %2785 = vmatprep.subr.bf16.mxu1 %v10324_v14  ;;  %v10367_v62 = vld [vmem:[#allocation5 + $0x50] ss:$88 sps:$4 sm:$0xff]   ;;  %v10373_v1 = vld [vmem:[#allocation5 + $0x100] ss:$88 sps:$4 sm:$0xff]   ;;  %v10381_v4 = vld [vmem:[#allocation5 + $0x1b4] ss:$88 sps:$4 sm:$0xff]  }
 0x1c4   :  { %v10376_v2 = vld [vmem:[#allocation8 + $0x20] ss:$16 sps:$4 sm:$0xff]   ;;  %v10378_v3 = vld [vmem:[#allocation8 + $0x24] ss:$16 sps:$4 sm:$0xff]  }
 0x1c5   :  { %2743 = vmatpush1.bf16.msra.mxu0 %v10319_v22  ;;  %v10384_v5 = vld [vmem:[#allocation8 + $0x44] ss:$16 sps:$4 sm:$0xff]   ;;  %v10382_v8 = vld [vmem:[#allocation8 + $0x40] ss:$16 sps:$4 sm:$0xff]   ;;  %v542_v22 = vsub.s32 7, %v11949_v29 }
 0x1c6   :  { %2786 = vmatpush1.bf16.msra.mxu1 %v10322_v24  ;;  %2744 = vmatprep.subr.bf16.mxu0 %v10327_v25  ;;  %v10379_v6 = vld [vmem:[#allocation5 + $0x1b0] ss:$88 sps:$4 sm:$0xff]   ;;  %v10387_v9 = vld [vmem:[#allocation5 + $0x264] ss:$88 sps:$4 sm:$0xff]   ;;  %v10385_v11 = vld [vmem:[#allocation5 + $0x260] ss:$88 sps:$4 sm:$0xff]  }
 0x1c7   :  { %2787 = vmatprep.subr.bf16.mxu1 %v10330_v26  ;;  %v10390_v10 = vld [vmem:[#allocation8 + $0x64] ss:$16 sps:$4 sm:$0xff]   ;;  %v10388_v12 = vld [vmem:[#allocation8 + $0x60] ss:$16 sps:$4 sm:$0xff]  }
 0x1c8   :  { %v10393_v13 = vld [vmem:[#allocation5 + $0x314] ss:$88 sps:$4 sm:$0xff]   ;;  %v10391_v15 = vld [vmem:[#allocation5 + $0x310] ss:$88 sps:$4 sm:$0xff]   ;;  %v10399_v24 = vld [vmem:[#allocation5 + $0x3c4] ss:$88 sps:$4 sm:$0xff]  }
 0x1c9   :  { %2745 = vmatpush1.bf16.msra.mxu0 %v10325_v27  ;;  %v10396_v14 = vld [vmem:[#allocation8 + $0x84] ss:$16 sps:$4 sm:$0xff]   ;;  %v10394_v16 = vld [vmem:[#allocation8 + $0x80] ss:$16 sps:$4 sm:$0xff]  }
 0x1ca   :  { %2788 = vmatpush1.bf16.msra.mxu1 %v10328_v28  ;;  %2746 = vmatprep.subr.bf16.mxu0 %v10333_v30  ;;  %v10402_v25 = vld [vmem:[#allocation8 + $0xa4] ss:$16 sps:$4 sm:$0xff]   ;;  %v10400_v27 = vld [vmem:[#allocation8 + $0xa0] ss:$16 sps:$4 sm:$0xff]   ;;  %v531_v28 = vrot.slane %v11951_v34, %v11986_v17 }
 0x1cb   :  { %2789 = vmatprep.subr.bf16.mxu1 %v10336_v31  ;;  %v10397_v26 = vld [vmem:[#allocation5 + $0x3c0] ss:$88 sps:$4 sm:$0xff]   ;;  %v10405_v30 = vld [vmem:[#allocation5 + $0x474] ss:$88 sps:$4 sm:$0xff]  }
 0x1cc   :  { %v10408_v31 = vld [vmem:[#allocation8 + $0xc4] ss:$16 sps:$4 sm:$0xff]  }
 0x1cd   :  { %2747 = vmatpush1.bf16.msra.mxu0 %v10331_v32 }
 0x1ce   :  { %2790 = vmatpush1.bf16.msra.mxu1 %v10334_v33  ;;  %2748 = vmatprep.subr.bf16.mxu0 %v10339_v39  ;;  %v535_v33 = vrot.slane %v11951_v34, %v11990_v18  ;;  %v543_v39 = vrot.slane %v11951_v34, %v542_v22 }
 0x1cf   :  { %2791 = vmatprep.subr.bf16.mxu1 %v10342_v40 }
 0x1d1   :  { %2749 = vmatpush1.bf16.msra.mxu0 %v10337_v41 }
 0x1d2   :  { %2792 = vmatpush1.bf16.msra.mxu1 %v10340_v42  ;;  %2750 = vmatprep.subr.bf16.mxu0 %v10345_v43 }
 0x1d3   :  { %2793 = vmatprep.subr.bf16.mxu1 %v10348_v44  ;;  %v10403_v44 = vld [vmem:[#allocation5 + $0x470] ss:$88 sps:$4 sm:$0xff]  }
 0x1d5   :  { %2751 = vmatpush1.bf16.msra.mxu0 %v10343_v45  ;;  %v10406_v45 = vld [vmem:[#allocation8 + $0xc0] ss:$16 sps:$4 sm:$0xff]  }
 0x1d6   :  { %2794 = vmatpush1.bf16.msra.mxu1 %v10346_v46  ;;  %2752 = vmatprep.subr.bf16.mxu0 %v10351_v47 }
 0x1d7   :  { %2795 = vmatprep.subr.bf16.mxu1 %v10354_v48 }
 0x1d9   :  { %2753 = vmatpush1.bf16.msra.mxu0 %v10349_v49 }
 0x1da   :  { %2796 = vmatpush1.bf16.msra.mxu1 %v10352_v50  ;;  %2754 = vmatprep.subr.bf16.mxu0 %v10357_v52  ;;  %v10411_v50 = vld [vmem:[#allocation5 + $0x524] ss:$88 sps:$4 sm:$0xff]  }
 0x1db   :  { %2797 = vmatprep.subr.bf16.mxu1 %v10360_v53  ;;  %v10414_v52 = vld [vmem:[#allocation8 + $0xe4] ss:$16 sps:$4 sm:$0xff]  }
 0x1dd   :  { %2755 = vmatpush1.bf16.msra.mxu0 %v10355_v54 }
 0x1de   :  { %2798 = vmatpush1.bf16.msra.mxu1 %v10358_v55  ;;  %2756 = vmatprep.subr.bf16.mxu0 %v10363_v56 }
 0x1df   :  { %2799 = vmatprep.subr.bf16.mxu1 %v10366_v57 }
 0x1e1   :  { %2757 = vmatpush1.bf16.msra.mxu0 %v10361_v58 }
 0x1e2   :  { %2800 = vmatpush1.bf16.msra.mxu1 %v10364_v59  ;;  %2812 = vmatprep.subr.bf16.mxu0 %v10369_v60 }
 0x1e3   :  { %7167 = vmatprep.subr.bf16.mxu1 %v10372_v61  ;;  %v10409_v61 = vld [vmem:[#allocation5 + $0x520] ss:$88 sps:$4 sm:$0xff]  }
 0x1e4   :  { %2759 = vmatmul.mubr.bf16.vlgmr.msra.gmra.mrb[16].mxu0 %v11931_v7 }
 0x1e5   :  { %2802 = vmatmul.mubr.bf16.vlgmr.msra.gmra.mrb[16].mxu1 %v11931_v7  ;;  %2813 = vmatpush1.bf16.msra.mxu0 %v10367_v62 }
 0x1e6   :  { %7168 = vmatpush1.bf16.msra.mxu1 %v10370_v63  ;;  %7199 = vmatprep.mubr.bf16.mxu1 %v11977_v21 }
 0x1e7   :  { %2814 = vmatprep.subr.bf16.mxu0 %v10375_v0  ;;  %7169 = vmatprep.subr.bf16.mxu1 %v10378_v3 }
 0x1e8   :  { %2844 = vmatprep.mubr.bf16.mxu0 %v11927_v51  ;;  %v538_v51 = vsub.s32 6, %v11949_v29 }
 0x1e9   :  { %2815 = vmatpush1.bf16.msra.mxu0 %v10373_v1  ;;  %v10412_v1 = vld [vmem:[#allocation8 + $0xe0] ss:$16 sps:$4 sm:$0xff]  }
 0x1ea   :  { %7170 = vmatpush1.bf16.msra.mxu1 %v10376_v2  ;;  %2816 = vmatprep.subr.bf16.mxu0 %v10381_v4  ;;  %v539_v32 = vrot.slane %v11951_v34, %v538_v51  ;;  %v10417_v2 = vld [vmem:[#allocation5 + $0x5d4] ss:$88 sps:$4 sm:$0xff]  }
 0x1eb   :  { %7171 = vmatprep.subr.bf16.mxu1 %v10384_v5 }
 0x1ed   :  { %2817 = vmatpush1.bf16.msra.mxu0 %v10379_v6  ;;  %v10420_v6 = vld [vmem:[#allocation8 + $0x104] ss:$16 sps:$4 sm:$0xff]  }
 0x1ee   :  { %7172 = vmatpush1.bf16.msra.mxu1 %v10382_v8  ;;  %2818 = vmatprep.subr.bf16.mxu0 %v10387_v9 }
 0x1ef   :  { %7173 = vmatprep.subr.bf16.mxu1 %v10390_v10 }
 0x1f1   :  { %2819 = vmatpush1.bf16.msra.mxu0 %v10385_v11 }
 0x1f2   :  { %7174 = vmatpush1.bf16.msra.mxu1 %v10388_v12  ;;  %2820 = vmatprep.subr.bf16.mxu0 %v10393_v13  ;;  %v10415_v12 = vld [vmem:[#allocation5 + $0x5d0] ss:$88 sps:$4 sm:$0xff]  }
 0x1f3   :  { %7175 = vmatprep.subr.bf16.mxu1 %v10396_v14  ;;  %v10418_v14 = vld [vmem:[#allocation8 + $0x100] ss:$16 sps:$4 sm:$0xff]  }
 0x1f5   :  { %2821 = vmatpush1.bf16.msra.mxu0 %v10391_v15  ;;  %v10423_v15 = vld [vmem:[#allocation5 + $0x684] ss:$88 sps:$4 sm:$0xff]  }
 0x1f6   :  { %7176 = vmatpush1.bf16.msra.mxu1 %v10394_v16  ;;  %2822 = vmatprep.subr.bf16.mxu0 %v10399_v24  ;;  %v10426_v16 = vld [vmem:[#allocation8 + $0x124] ss:$16 sps:$4 sm:$0xff]  }
 0x1f7   :  { %7177 = vmatprep.subr.bf16.mxu1 %v10402_v25  ;;  %v2502_v40 = vpop.f32.mrb[4].mxu0  ;;  %v10421_v24 = vld [vmem:[#allocation5 + $0x680] ss:$88 sps:$4 sm:$0xff]  }
 0x1f8   :  { %v2545_v41 = vpop.f32.mrb[4].mxu1  ;;  %v2503_v42 = vadd.f32 %v2502_v40, %v531_v28  ;;  %v2504_v43 = vpop.f32.mrb[5].mxu0  ;;  %v10424_v25 = vld [vmem:[#allocation8 + $0x120] ss:$16 sps:$4 sm:$0xff]  }
 0x1f9   :  { %v2546_v46 = vadd.f32 %v2545_v41, %v539_v32  ;;  %v2547_v47 = vpop.f32.mrb[5].mxu1  ;;  %v2505_v48 = vadd.f32 %v2504_v43, %v535_v33  ;;  %v2506_v49 = vpop.f32.mrb[6].mxu0  ;;  %2823 = vmatpush1.bf16.msra.mxu0 %v10397_v26  ;;  %v10429_v26 = vld [vmem:[#allocation5 + $0x734] ss:$88 sps:$4 sm:$0xff]  }
 0x1fa   :  { %7178 = vmatpush1.bf16.msra.mxu1 %v10400_v27  ;;  %v2548_v53 = vadd.f32 %v2547_v47, %v543_v39  ;;  %v2549_v54 = vpop.f32.mrb[6].mxu1  ;;  %v2859_v55 = vmax.f32 %v2503_v42, 0.0  ;;  %v2507_v34 = vadd.f32 %v2506_v49, %v531_v28  ;;  %v2508_v56 = vpop.f32.mrb[7].mxu0  ;;  %2824 = vmatprep.subr.bf16.mxu0 %v10405_v30  ;;  %v10432_v27 = vld [vmem:[#allocation8 + $0x144] ss:$16 sps:$4 sm:$0xff]  }
 0x1fb   :  { %7179 = vmatprep.subr.bf16.mxu1 %v10408_v31  ;;  %v2861_v57 = vmax.f32 %v2546_v46, 0.0  ;;  %v2550_v58 = vadd.f32 %v2549_v54, %v539_v32  ;;  %v2551_v59 = vpop.f32.mrb[7].mxu1  ;;  %v2509_v60 = vadd.f32 %v2508_v56, %v535_v33  ;;  %v2860_v4 = vmax.f32 %v2505_v48, 0.0  ;;  %v10427_v28 = vld [vmem:[#allocation5 + $0x730] ss:$88 sps:$4 sm:$0xff]  }
 0x1fc   :  { %v2862_v62 = vmax.f32 %v2548_v53, 0.0  ;;  %v2552_v63 = vadd.f32 %v2551_v59, %v543_v39  ;;  %v2881_v0 = vmax.f32 %v2507_v34, 0.0  ;;  %v10430_v30 = vld [vmem:[#allocation8 + $0x140] ss:$16 sps:$4 sm:$0xff]   ;;  %v10438_v32 = vld [vmem:[#allocation8 + $0x164] ss:$16 sps:$4 sm:$0xff]  }
 0x1fd   :  { %v2883_v3 = vmax.f32 %v2550_v58, 0.0  ;;  %v2882_v5 = vmax.f32 %v2509_v60, 0.0  ;;  %2825 = vmatpush1.bf16.msra.mxu0 %v10403_v44  ;;  %v10435_v31 = vld [vmem:[#allocation5 + $0x7e4] ss:$88 sps:$4 sm:$0xff]   ;;  %v10433_v33 = vld [vmem:[#allocation5 + $0x7e0] ss:$88 sps:$4 sm:$0xff]  }
 0x1fe   :  { %7180 = vmatpush1.bf16.msra.mxu1 %v10406_v45  ;;  %v2884_v8 = vmax.f32 %v2552_v63, 0.0  ;;  %v12003_v9 = vpack.c.bf16 %v2881_v0, %v2859_v55  ;;  %2826 = vmatprep.subr.bf16.mxu0 %v10411_v50  ;;  %v10436_v39 = vld [vmem:[#allocation8 + $0x160] ss:$16 sps:$4 sm:$0xff]   ;;  %v10444_v41 = vld [vmem:[#allocation8 + $0x184] ss:$16 sps:$4 sm:$0xff]  }
 0x1ff   :  { %7181 = vmatprep.subr.bf16.mxu1 %v10414_v52  ;;  %v12005_v10 = vpack.c.bf16 %v2883_v3, %v2861_v57  ;;  %v12007_v11 = vpack.c.bf16 %v2882_v5, %v2860_v4  ;;  %v10441_v40 = vld [vmem:[#allocation5 + $0x894] ss:$88 sps:$4 sm:$0xff]   ;;  %v10439_v42 = vld [vmem:[#allocation5 + $0x890] ss:$88 sps:$4 sm:$0xff]   ;;  %v10447_v44 = vld [vmem:[#allocation5 + $0x944] ss:$88 sps:$4 sm:$0xff]  }
 0x200   :  { %v12009_v13 = vpack.c.bf16 %v2884_v8, %v2862_v62  ;;  %v10442_v43 = vld [vmem:[#allocation8 + $0x180] ss:$16 sps:$4 sm:$0xff]   ;;  %v10450_v45 = vld [vmem:[#allocation8 + $0x1a4] ss:$16 sps:$4 sm:$0xff]   ;;  %v10468_v57 = vld [vmem:[#allocation8 + $0xc] ss:$16 sps:$4 sm:$0xff]  }
 0x201   :  { %2827 = vmatpush1.bf16.msra.mxu0 %v10409_v61  ;;  %v10445_v46 = vld [vmem:[#allocation5 + $0x940] ss:$88 sps:$4 sm:$0xff]   ;;  %v10453_v48 = vld [vmem:[#allocation5 + $0x9f4] ss:$88 sps:$4 sm:$0xff]   ;;  %v10451_v50 = vld [vmem:[#allocation5 + $0x9f0] ss:$88 sps:$4 sm:$0xff]  }
 0x202   :  { %7182 = vmatpush1.bf16.msra.mxu1 %v10412_v1  ;;  %2828 = vmatprep.subr.bf16.mxu0 %v10417_v2  ;;  %v10448_v47 = vld [vmem:[#allocation8 + $0x1a0] ss:$16 sps:$4 sm:$0xff]   ;;  %v10456_v49 = vld [vmem:[#allocation8 + $0x1c4] ss:$16 sps:$4 sm:$0xff]   ;;  %v10466_v59 = vld [vmem:[#allocation8 + $0x8] ss:$16 sps:$4 sm:$0xff]  }
 0x203   :  { %7183 = vmatprep.subr.bf16.mxu1 %v10420_v6  ;;  %v10454_v52 = vld [vmem:[#allocation8 + $0x1c0] ss:$16 sps:$4 sm:$0xff]   ;;  %v10462_v54 = vld [vmem:[#allocation8 + $0x1e4] ss:$16 sps:$4 sm:$0xff]   ;;  %v10474_v61 = vld [vmem:[#allocation8 + $0x2c] ss:$16 sps:$4 sm:$0xff]  }
 0x204   :  { %v10459_v53 = vld [vmem:[#allocation5 + $0xaa4] ss:$88 sps:$4 sm:$0xff]   ;;  %v10457_v55 = vld [vmem:[#allocation5 + $0xaa0] ss:$88 sps:$4 sm:$0xff]  }
 0x205   :  { %2829 = vmatpush1.bf16.msra.mxu0 %v10415_v12  ;;  %v10460_v34 = vld [vmem:[#allocation8 + $0x1e0] ss:$16 sps:$4 sm:$0xff]   ;;  %v10465_v56 = vld [vmem:[#allocation8 + $0x204] ss:$16 sps:$4 sm:$0xff]   ;;  %v10472_v63 = vld [vmem:[#allocation8 + $0x28] ss:$16 sps:$4 sm:$0xff]  }
 0x206   :  { %7184 = vmatpush1.bf16.msra.mxu1 %v10418_v14  ;;  %2830 = vmatprep.subr.bf16.mxu0 %v10423_v15  ;;  %v10463_v58 = vld [vmem:[#allocation8 + $0x200] ss:$16 sps:$4 sm:$0xff]   ;;  %v10471_v60 = vld [vmem:[#allocation8 + $0x224] ss:$16 sps:$4 sm:$0xff]   ;;  %v10480_v1 = vld [vmem:[#allocation8 + $0x4c] ss:$16 sps:$4 sm:$0xff]  }
 0x207   :  { %7185 = vmatprep.subr.bf16.mxu1 %v10426_v16  ;;  %v10469_v62 = vld [vmem:[#allocation8 + $0x220] ss:$16 sps:$4 sm:$0xff]   ;;  %v10477_v0 = vld [vmem:[#allocation8 + $0x244] ss:$16 sps:$4 sm:$0xff]   ;;  %v10478_v3 = vld [vmem:[#allocation8 + $0x48] ss:$16 sps:$4 sm:$0xff]  }
 0x208   :  { %v10475_v2 = vld [vmem:[#allocation8 + $0x240] ss:$16 sps:$4 sm:$0xff]   ;;  %v10486_v5 = vld [vmem:[#allocation8 + $0x6c] ss:$16 sps:$4 sm:$0xff]   ;;  %v10484_v6 = vld [vmem:[#allocation8 + $0x68] ss:$16 sps:$4 sm:$0xff]  }
 0x209   :  { %2831 = vmatpush1.bf16.msra.mxu0 %v10421_v24  ;;  %v10481_v4 = vld [vmem:[#allocation8 + $0x260] ss:$16 sps:$4 sm:$0xff]   ;;  %v10489_v8 = vld [vmem:[#allocation8 + $0x284] ss:$16 sps:$4 sm:$0xff]   ;;  %v10492_v12 = vld [vmem:[#allocation8 + $0x8c] ss:$16 sps:$4 sm:$0xff]  }
 0x20a   :  { %7186 = vmatpush1.bf16.msra.mxu1 %v10424_v25  ;;  %2832 = vmatprep.subr.bf16.mxu0 %v10429_v26  ;;  %v12015_v14 = vld [vmem:[#allocation7 + $0x8] sm:$0xff]  ;;  %v10498_v24 = vld [vmem:[#allocation8 + $0xac] ss:$16 sps:$4 sm:$0xff]  }
 0x20b   :  { %7187 = vmatprep.subr.bf16.mxu1 %v10432_v27  ;;  %v10490_v15 = vld [vmem:[#allocation8 + $0x88] ss:$16 sps:$4 sm:$0xff]   ;;  %v10495_v16 = vld [vmem:[#allocation8 + $0x2a4] ss:$16 sps:$4 sm:$0xff]   ;;  %v10493_v25 = vld [vmem:[#allocation8 + $0x2a0] ss:$16 sps:$4 sm:$0xff]   ;;  %v547_v26 = vrot.slane %v12015_v14, %v11954_v35 }
 0x20c   :  { %v10496_v27 = vld [vmem:[#allocation8 + $0xa8] ss:$16 sps:$4 sm:$0xff]  }
 0x20d   :  { %2833 = vmatpush1.bf16.msra.mxu0 %v10427_v28  ;;  %v10501_v28 = vld [vmem:[#allocation8 + $0x2c4] ss:$16 sps:$4 sm:$0xff]  }
 0x20e   :  { %7188 = vmatpush1.bf16.msra.mxu1 %v10430_v30  ;;  %2834 = vmatprep.subr.bf16.mxu0 %v10435_v31  ;;  %v555_v30 = vrot.slane %v12015_v14, %v11957_v36  ;;  %v551_v31 = vrot.slane %v12015_v14, %v11960_v37 }
 0x20f   :  { %7189 = vmatprep.subr.bf16.mxu1 %v10438_v32  ;;  %v559_v32 = vrot.slane %v12015_v14, %v11963_v38 }
 0x211   :  { %2835 = vmatpush1.bf16.msra.mxu0 %v10433_v33  ;;  %v10504_v33 = vld [vmem:[#allocation8 + $0xcc] ss:$16 sps:$4 sm:$0xff]  }
 0x212   :  { %7190 = vmatpush1.bf16.msra.mxu1 %v10436_v39  ;;  %2836 = vmatprep.subr.bf16.mxu0 %v10441_v40 }
 0x213   :  { %7191 = vmatprep.subr.bf16.mxu1 %v10444_v41 }
 0x215   :  { %2837 = vmatpush1.bf16.msra.mxu0 %v10439_v42 }
 0x216   :  { %7192 = vmatpush1.bf16.msra.mxu1 %v10442_v43  ;;  %2838 = vmatprep.subr.bf16.mxu0 %v10447_v44  ;;  %v10499_v43 = vld [vmem:[#allocation8 + $0x2c0] ss:$16 sps:$4 sm:$0xff]   ;;  %v10502_v44 = vld [vmem:[#allocation8 + $0xc8] ss:$16 sps:$4 sm:$0xff]  }
 0x217   :  { %7193 = vmatprep.subr.bf16.mxu1 %v10450_v45 }
 0x219   :  { %2839 = vmatpush1.bf16.msra.mxu0 %v10445_v46 }
 0x21a   :  { %7194 = vmatpush1.bf16.msra.mxu1 %v10448_v47  ;;  %2840 = vmatprep.subr.bf16.mxu0 %v10453_v48 }
 0x21b   :  { %7195 = vmatprep.subr.bf16.mxu1 %v10456_v49  ;;  %v10507_v49 = vld [vmem:[#allocation8 + $0x2e4] ss:$16 sps:$4 sm:$0xff]  }
 0x21d   :  { %2841 = vmatpush1.bf16.msra.mxu0 %v10451_v50  ;;  %v10510_v50 = vld [vmem:[#allocation8 + $0xec] ss:$16 sps:$4 sm:$0xff]  }
 0x21e   :  { %7196 = vmatpush1.bf16.msra.mxu1 %v10454_v52  ;;  %2842 = vmatprep.subr.bf16.mxu0 %v10459_v53 }
 0x21f   :  { %7197 = vmatprep.subr.bf16.mxu1 %v10462_v54 }
 0x221   :  { %2843 = vmatpush1.bf16.msra.mxu0 %v10457_v55 }
 0x222   :  { %7198 = vmatpush1.bf16.msra.mxu1 %v10460_v34  ;;  %7640 = vmatprep.subr.bf16.mxu0 %v10468_v57 }
 0x223   :  { %7210 = vmatprep.subr.bf16.mxu1 %v10465_v56 }
 0x224   :  { %2845 = vmatmul.mubr.bf16.vlgmr.msra.gmra.mrb[20].mxu0 %v11931_v7  ;;  %v10483_v7 = vld [vmem:[#allocation8 + $0x264] ss:$16 sps:$4 sm:$0xff]  }
 0x225   :  { %7200 = vmatmul.mubr.bf16.vlgmr.msra.gmra.mrb[20].mxu1 %v11973_v19  ;;  %7641 = vmatpush1.bf16.msra.mxu0 %v10466_v59 }
 0x226   :  { %7211 = vmatpush1.bf16.msra.mxu1 %v10463_v58  ;;  %7242 = vmatprep.mubr.bf16.mxu1 %v11979_v23 }
 0x227   :  { %7672 = vmatprep.mubr.bf16.mxu0 %v11977_v21  ;;  %7212 = vmatprep.subr.bf16.mxu1 %v10471_v60  ;;  %v10487_v21 = vld [vmem:[#allocation8 + $0x280] ss:$16 sps:$4 sm:$0xff]  }
 0x228   :  { %7642 = vmatprep.subr.bf16.mxu0 %v10474_v61 }
 0x229   :  { %7643 = vmatpush1.bf16.msra.mxu0 %v10472_v63  ;;  %v10505_v63 = vld [vmem:[#allocation8 + $0x2e0] ss:$16 sps:$4 sm:$0xff]  }
 0x22a   :  { %7213 = vmatpush1.bf16.msra.mxu1 %v10469_v62  ;;  %7644 = vmatprep.subr.bf16.mxu0 %v10480_v1 }
 0x22b   :  { %7214 = vmatprep.subr.bf16.mxu1 %v10477_v0  ;;  %v10508_v0 = vld [vmem:[#allocation8 + $0xe8] ss:$16 sps:$4 sm:$0xff]  }
 0x22d   :  { %7645 = vmatpush1.bf16.msra.mxu0 %v10478_v3 }
 0x22e   :  { %7215 = vmatpush1.bf16.msra.mxu1 %v10475_v2  ;;  %7646 = vmatprep.subr.bf16.mxu0 %v10486_v5 }
 0x22f   :  { %7216 = vmatprep.subr.bf16.mxu1 %v10483_v7  ;;  %v10513_v7 = vld [vmem:[#allocation8 + $0x304] ss:$16 sps:$4 sm:$0xff]  }
 0x231   :  { %7647 = vmatpush1.bf16.msra.mxu0 %v10484_v6 }
 0x232   :  { %7217 = vmatpush1.bf16.msra.mxu1 %v10481_v4  ;;  %7648 = vmatprep.subr.bf16.mxu0 %v10492_v12  ;;  %v10516_v12 = vld [vmem:[#allocation8 + $0x10c] ss:$16 sps:$4 sm:$0xff]  }
 0x233   :  { %7218 = vmatprep.subr.bf16.mxu1 %v10489_v8 }
 0x235   :  { %7649 = vmatpush1.bf16.msra.mxu0 %v10490_v15  ;;  %v10511_v15 = vld [vmem:[#allocation8 + $0x300] ss:$16 sps:$4 sm:$0xff]  }
 0x236   :  { %7219 = vmatpush1.bf16.msra.mxu1 %v10487_v21  ;;  %7650 = vmatprep.subr.bf16.mxu0 %v10498_v24  ;;  %v10519_v24 = vld [vmem:[#allocation8 + $0x324] ss:$16 sps:$4 sm:$0xff]  }
 0x237   :  { %7220 = vmatprep.subr.bf16.mxu1 %v10495_v16  ;;  %v2588_v39 = vpop.f32.mrb[8].mxu0  ;;  %v10514_v16 = vld [vmem:[#allocation8 + $0x108] ss:$16 sps:$4 sm:$0xff]  }
 0x238   :  { %v2631_v40 = vpop.f32.mrb[8].mxu1  ;;  %v2589_v41 = vadd.f32 %v2588_v39, %v547_v26  ;;  %v2590_v42 = vpop.f32.mrb[9].mxu0  ;;  %v10529_v39 = vld [vmem:[#allocation8 + $0x360] ss:$16 sps:$4 sm:$0xff]  }
 0x239   :  { %v2632_v45 = vadd.f32 %v2631_v40, %v555_v30  ;;  %v2633_v46 = vpop.f32.mrb[9].mxu1  ;;  %v2591_v47 = vadd.f32 %v2590_v42, %v551_v31  ;;  %v2592_v48 = vpop.f32.mrb[10].mxu0  ;;  %7651 = vmatpush1.bf16.msra.mxu0 %v10496_v27  ;;  %v10520_v27 = vld [vmem:[#allocation8 + $0x128] ss:$16 sps:$4 sm:$0xff]   ;;  %v10534_v40 = vld [vmem:[#allocation8 + $0x16c] ss:$16 sps:$4 sm:$0xff]  }
 0x23a   :  { %7221 = vmatpush1.bf16.msra.mxu1 %v10493_v25  ;;  %v2634_v52 = vadd.f32 %v2633_v46, %v559_v32  ;;  %v2635_v53 = vpop.f32.mrb[10].mxu1  ;;  %v2863_v54 = vmax.f32 %v2589_v41, 0.0  ;;  %v2593_v55 = vadd.f32 %v2592_v48, %v547_v26  ;;  %v2594_v34 = vpop.f32.mrb[11].mxu0  ;;  %7652 = vmatprep.subr.bf16.mxu0 %v10504_v33  ;;  %v10517_v25 = vld [vmem:[#allocation8 + $0x320] ss:$16 sps:$4 sm:$0xff]  }
 0x23b   :  { %7222 = vmatprep.subr.bf16.mxu1 %v10501_v28  ;;  %v2865_v56 = vmax.f32 %v2632_v45, 0.0  ;;  %v2636_v57 = vadd.f32 %v2635_v53, %v555_v30  ;;  %v2637_v58 = vpop.f32.mrb[11].mxu1  ;;  %v2595_v59 = vadd.f32 %v2594_v34, %v551_v31  ;;  %v2864_v2 = vmax.f32 %v2591_v47, 0.0  ;;  %v10522_v26 = vld [vmem:[#allocation8 + $0x12c] ss:$16 sps:$4 sm:$0xff]  }
 0x23c   :  { %v2866_v60 = vmax.f32 %v2634_v52, 0.0  ;;  %v2638_v61 = vadd.f32 %v2637_v58, %v559_v32  ;;  %v2885_v62 = vmax.f32 %v2593_v55, 0.0  ;;  %v10525_v28 = vld [vmem:[#allocation8 + $0x344] ss:$16 sps:$4 sm:$0xff]   ;;  %v10523_v30 = vld [vmem:[#allocation8 + $0x340] ss:$16 sps:$4 sm:$0xff]  }
 0x23d   :  { %v2887_v1 = vmax.f32 %v2636_v57, 0.0  ;;  %v2886_v3 = vmax.f32 %v2595_v59, 0.0  ;;  %7653 = vmatpush1.bf16.msra.mxu0 %v10502_v44  ;;  %v10528_v31 = vld [vmem:[#allocation8 + $0x14c] ss:$16 sps:$4 sm:$0xff]   ;;  %v10526_v32 = vld [vmem:[#allocation8 + $0x148] ss:$16 sps:$4 sm:$0xff]  }
 0x23e   :  { %7223 = vmatpush1.bf16.msra.mxu1 %v10499_v43  ;;  %v2888_v4 = vmax.f32 %v2638_v61, 0.0  ;;  %v12025_v5 = vpack.c.bf16 %v2885_v62, %v2863_v54  ;;  %7654 = vmatprep.subr.bf16.mxu0 %v10510_v50  ;;  %v10531_v33 = vld [vmem:[#allocation8 + $0x364] ss:$16 sps:$4 sm:$0xff]   ;;  %v10532_v41 = vld [vmem:[#allocation8 + $0x168] ss:$16 sps:$4 sm:$0xff]  }
 0x23f   :  { %7224 = vmatprep.subr.bf16.mxu1 %v10507_v49  ;;  %v12027_v6 = vpack.c.bf16 %v2887_v1, %v2865_v56  ;;  %v12029_v8 = vpack.c.bf16 %v2886_v3, %v2864_v2  ;;  %v10537_v42 = vld [vmem:[#allocation8 + $0x384] ss:$16 sps:$4 sm:$0xff]   ;;  %v10535_v43 = vld [vmem:[#allocation8 + $0x380] ss:$16 sps:$4 sm:$0xff]   ;;  %v10540_v44 = vld [vmem:[#allocation8 + $0x18c] ss:$16 sps:$4 sm:$0xff]  }
 0x240   :  { %v12031_v21 = vpack.c.bf16 %v2888_v4, %v2866_v60  ;;  %v10538_v45 = vld [vmem:[#allocation8 + $0x188] ss:$16 sps:$4 sm:$0xff]   ;;  %v10543_v46 = vld [vmem:[#allocation8 + $0x3a4] ss:$16 sps:$4 sm:$0xff]   ;;  %v10541_v47 = vld [vmem:[#allocation8 + $0x3a0] ss:$16 sps:$4 sm:$0xff]  }
 0x241   :  { %7655 = vmatpush1.bf16.msra.mxu0 %v10508_v0  ;;  %v10546_v48 = vld [vmem:[#allocation8 + $0x1ac] ss:$16 sps:$4 sm:$0xff]   ;;  %v10544_v49 = vld [vmem:[#allocation8 + $0x1a8] ss:$16 sps:$4 sm:$0xff]   ;;  %v10549_v50 = vld [vmem:[#allocation8 + $0x3c4] ss:$16 sps:$4 sm:$0xff]  }
 0x242   :  { %7225 = vmatpush1.bf16.msra.mxu1 %v10505_v63  ;;  %7656 = vmatprep.subr.bf16.mxu0 %v10516_v12  ;;  %v10547_v52 = vld [vmem:[#allocation8 + $0x3c0] ss:$16 sps:$4 sm:$0xff]   ;;  %v10552_v53 = vld [vmem:[#allocation8 + $0x1cc] ss:$16 sps:$4 sm:$0xff]   ;;  %v10550_v54 = vld [vmem:[#allocation8 + $0x1c8] ss:$16 sps:$4 sm:$0xff]  }
 0x243   :  { %7226 = vmatprep.subr.bf16.mxu1 %v10513_v7  ;;  %v10555_v55 = vld [vmem:[#allocation8 + $0x3e4] ss:$16 sps:$4 sm:$0xff]   ;;  %v10553_v34 = vld [vmem:[#allocation8 + $0x3e0] ss:$16 sps:$4 sm:$0xff]   ;;  %v10558_v56 = vld [vmem:[#allocation8 + $0x1ec] ss:$16 sps:$4 sm:$0xff]  }
 0x244   :  { %v10556_v57 = vld [vmem:[#allocation8 + $0x1e8] ss:$16 sps:$4 sm:$0xff]   ;;  %v10561_v58 = vld [vmem:[#allocation8 + $0x404] ss:$16 sps:$4 sm:$0xff]   ;;  %v10564_v59 = vld [vmem:[#allocation8 + $0x20c] ss:$16 sps:$4 sm:$0xff]  }
 0x245   :  { %7657 = vmatpush1.bf16.msra.mxu0 %v10514_v16  ;;  %v10559_v60 = vld [vmem:[#allocation8 + $0x400] ss:$16 sps:$4 sm:$0xff]   ;;  %v10562_v61 = vld [vmem:[#allocation8 + $0x208] ss:$16 sps:$4 sm:$0xff]   ;;  %v10567_v62 = vld [vmem:[#allocation8 + $0x424] ss:$16 sps:$4 sm:$0xff]  }
 0x246   :  { %7227 = vmatpush1.bf16.msra.mxu1 %v10511_v15  ;;  %7658 = vmatprep.subr.bf16.mxu0 %v10522_v26  ;;  %v10565_v63 = vld [vmem:[#allocation8 + $0x420] ss:$16 sps:$4 sm:$0xff]   ;;  %v10568_v0 = vld [vmem:[#allocation8 + $0x228] ss:$16 sps:$4 sm:$0xff]   ;;  %v10570_v1 = vld [vmem:[#allocation8 + $0x22c] ss:$16 sps:$4 sm:$0xff]  }
 0x247   :  { %7228 = vmatprep.subr.bf16.mxu1 %v10519_v24  ;;  %v10573_v2 = vld [vmem:[#allocation8 + $0x444] ss:$16 sps:$4 sm:$0xff]   ;;  %v10576_v3 = vld [vmem:[#allocation8 + $0x24c] ss:$16 sps:$4 sm:$0xff]   ;;  %v10571_v7 = vld [vmem:[#allocation8 + $0x440] ss:$16 sps:$4 sm:$0xff]  }
 0x248   :  { %v10574_v4 = vld [vmem:[#allocation8 + $0x248] ss:$16 sps:$4 sm:$0xff]   ;;  %v10579_v12 = vld [vmem:[#allocation8 + $0x464] ss:$16 sps:$4 sm:$0xff]   ;;  %v10577_v15 = vld [vmem:[#allocation8 + $0x460] ss:$16 sps:$4 sm:$0xff]  }
 0x249   :  { %7659 = vmatpush1.bf16.msra.mxu0 %v10520_v27  ;;  %v10582_v16 = vld [vmem:[#allocation8 + $0x26c] ss:$16 sps:$4 sm:$0xff]   ;;  %v10585_v24 = vld [vmem:[#allocation8 + $0x484] ss:$16 sps:$4 sm:$0xff]   ;;  %v10586_v26 = vld [vmem:[#allocation8 + $0x288] ss:$16 sps:$4 sm:$0xff]  }
 0x24a   :  { %7229 = vmatpush1.bf16.msra.mxu1 %v10517_v25  ;;  %7660 = vmatprep.subr.bf16.mxu0 %v10528_v31  ;;  %v10583_v25 = vld [vmem:[#allocation8 + $0x480] ss:$16 sps:$4 sm:$0xff]   ;;  %v10591_v27 = vld [vmem:[#allocation8 + $0x4a4] ss:$16 sps:$4 sm:$0xff]   ;;  %v563_v31 = vrot.slane %v12015_v14, %v11986_v17 }
 0x24b   :  { %7230 = vmatprep.subr.bf16.mxu1 %v10525_v28  ;;  %v10594_v28 = vld [vmem:[#allocation8 + $0x2ac] ss:$16 sps:$4 sm:$0xff]  }
 0x24d   :  { %7661 = vmatpush1.bf16.msra.mxu0 %v10526_v32  ;;  %v10592_v32 = vld [vmem:[#allocation8 + $0x2a8] ss:$16 sps:$4 sm:$0xff]  }
 0x24e   :  { %7231 = vmatpush1.bf16.msra.mxu1 %v10523_v30  ;;  %7662 = vmatprep.subr.bf16.mxu0 %v10534_v40  ;;  %v10589_v30 = vld [vmem:[#allocation8 + $0x4a0] ss:$16 sps:$4 sm:$0xff]   ;;  %v567_v40 = vrot.slane %v12015_v14, %v11990_v18 }
 0x24f   :  { %7232 = vmatprep.subr.bf16.mxu1 %v10531_v33  ;;  %v10597_v33 = vld [vmem:[#allocation8 + $0x4c4] ss:$16 sps:$4 sm:$0xff]  }
 0x251   :  { %7663 = vmatpush1.bf16.msra.mxu0 %v10532_v41  ;;  %v10600_v41 = vld [vmem:[#allocation8 + $0x2cc] ss:$16 sps:$4 sm:$0xff]  }
 0x252   :  { %7233 = vmatpush1.bf16.msra.mxu1 %v10529_v39  ;;  %7664 = vmatprep.subr.bf16.mxu0 %v10540_v44  ;;  %v571_v39 = vrot.slane %v12015_v14, %v538_v51 }
 0x253   :  { %7234 = vmatprep.subr.bf16.mxu1 %v10537_v42  ;;  %v575_v42 = vrot.slane %v12015_v14, %v542_v22 }
 0x255   :  { %7665 = vmatpush1.bf16.msra.mxu0 %v10538_v45 }
 0x256   :  { %7235 = vmatpush1.bf16.msra.mxu1 %v10535_v43  ;;  %7666 = vmatprep.subr.bf16.mxu0 %v10546_v48  ;;  %v10598_v48 = vld [vmem:[#allocation8 + $0x2c8] ss:$16 sps:$4 sm:$0xff]  }
 0x257   :  { %7236 = vmatprep.subr.bf16.mxu1 %v10543_v46 }
 0x259   :  { %7667 = vmatpush1.bf16.msra.mxu0 %v10544_v49 }
 0x25a   :  { %7237 = vmatpush1.bf16.msra.mxu1 %v10541_v47  ;;  %7668 = vmatprep.subr.bf16.mxu0 %v10552_v53  ;;  %v10595_v47 = vld [vmem:[#allocation8 + $0x4c0] ss:$16 sps:$4 sm:$0xff]   ;;  %v10603_v53 = vld [vmem:[#allocation8 + $0x4e4] ss:$16 sps:$4 sm:$0xff]  }
 0x25b   :  { %7238 = vmatprep.subr.bf16.mxu1 %v10549_v50 }
 0x25d   :  { %7669 = vmatpush1.bf16.msra.mxu0 %v10550_v54  ;;  %v10606_v54 = vld [vmem:[#allocation8 + $0x2ec] ss:$16 sps:$4 sm:$0xff]  }
 0x25e   :  { %7239 = vmatpush1.bf16.msra.mxu1 %v10547_v52  ;;  %7670 = vmatprep.subr.bf16.mxu0 %v10558_v56 }
 0x25f   :  { %7240 = vmatprep.subr.bf16.mxu1 %v10555_v55 }
 0x261   :  { %7671 = vmatpush1.bf16.msra.mxu0 %v10556_v57 }
 0x262   :  { %7241 = vmatpush1.bf16.msra.mxu1 %v10553_v34  ;;  %7683 = vmatprep.subr.bf16.mxu0 %v10564_v59 }
 0x263   :  { %7253 = vmatprep.subr.bf16.mxu1 %v10561_v58 }
 0x264   :  { %7673 = vmatmul.mubr.bf16.vlgmr.msra.gmra.mrb[24].mxu0 %v11973_v19  ;;  %v10580_v19 = vld [vmem:[#allocation8 + $0x268] ss:$16 sps:$4 sm:$0xff]  }
 0x265   :  { %7243 = vmatmul.mubr.bf16.vlgmr.msra.gmra.mrb[20].mxu1 %v11975_v20  ;;  %7684 = vmatpush1.bf16.msra.mxu0 %v10562_v61 }
 0x266   :  { %7254 = vmatpush1.bf16.msra.mxu1 %v10559_v60  ;;  %7285 = vmatprep.mubr.bf16.mxu1 %v12007_v11 }
 0x267   :  { %7715 = vmatprep.mubr.bf16.mxu0 %v11979_v23  ;;  %7255 = vmatprep.subr.bf16.mxu1 %v10567_v62  ;;  %v10588_v23 = vld [vmem:[#allocation8 + $0x28c] ss:$16 sps:$4 sm:$0xff]  }
 0x268   :  { %7685 = vmatprep.subr.bf16.mxu0 %v10570_v1 }
 0x269   :  { %7686 = vmatpush1.bf16.msra.mxu0 %v10568_v0  ;;  %v10604_v0 = vld [vmem:[#allocation8 + $0x2e8] ss:$16 sps:$4 sm:$0xff]  }
 0x26a   :  { %7256 = vmatpush1.bf16.msra.mxu1 %v10565_v63  ;;  %7687 = vmatprep.subr.bf16.mxu0 %v10576_v3  ;;  %v10601_v63 = vld [vmem:[#allocation8 + $0x4e0] ss:$16 sps:$4 sm:$0xff]  }
 0x26b   :  { %7257 = vmatprep.subr.bf16.mxu1 %v10573_v2 }
 0x26d   :  { %7688 = vmatpush1.bf16.msra.mxu0 %v10574_v4 }
 0x26e   :  { %7258 = vmatpush1.bf16.msra.mxu1 %v10571_v7  ;;  %7689 = vmatprep.subr.bf16.mxu0 %v10582_v16  ;;  %v10609_v7 = vld [vmem:[#allocation8 + $0x504] ss:$16 sps:$4 sm:$0xff]  }
 0x26f   :  { %7259 = vmatprep.subr.bf16.mxu1 %v10579_v12 }
 0x271   :  { %7690 = vmatpush1.bf16.msra.mxu0 %v10580_v19  ;;  %v10612_v19 = vld [vmem:[#allocation8 + $0x30c] ss:$16 sps:$4 sm:$0xff]  }
 0x272   :  { %7260 = vmatpush1.bf16.msra.mxu1 %v10577_v15  ;;  %7691 = vmatprep.subr.bf16.mxu0 %v10588_v23  ;;  %v10610_v23 = vld [vmem:[#allocation8 + $0x308] ss:$16 sps:$4 sm:$0xff]  }
 0x273   :  { %7261 = vmatprep.subr.bf16.mxu1 %v10585_v24 }
 0x275   :  { %7692 = vmatpush1.bf16.msra.mxu0 %v10586_v26  ;;  %v10615_v26 = vld [vmem:[#allocation8 + $0x524] ss:$16 sps:$4 sm:$0xff]  }
 0x276   :  { %7262 = vmatpush1.bf16.msra.mxu1 %v10583_v25  ;;  %7693 = vmatprep.subr.bf16.mxu0 %v10594_v28  ;;  %v10607_v25 = vld [vmem:[#allocation8 + $0x500] ss:$16 sps:$4 sm:$0xff]   ;;  %v10618_v28 = vld [vmem:[#allocation8 + $0x32c] ss:$16 sps:$4 sm:$0xff]  }
 0x277   :  { %7263 = vmatprep.subr.bf16.mxu1 %v10591_v27  ;;  %v2674_v43 = vpop.f32.mrb[12].mxu0  ;;  %v10613_v27 = vld [vmem:[#allocation8 + $0x520] ss:$16 sps:$4 sm:$0xff]  }
 0x278   :  { %v2717_v44 = vpop.f32.mrb[12].mxu1  ;;  %v2675_v45 = vadd.f32 %v2674_v43, %v563_v31  ;;  %v2676_v46 = vpop.f32.mrb[13].mxu0  ;;  %v10628_v43 = vld [vmem:[#allocation8 + $0x368] ss:$16 sps:$4 sm:$0xff]  }
 0x279   :  { %v2718_v49 = vadd.f32 %v2717_v44, %v571_v39  ;;  %v2719_v51 = vpop.f32.mrb[13].mxu1  ;;  %v2677_v50 = vadd.f32 %v2676_v46, %v567_v40  ;;  %v2678_v52 = vpop.f32.mrb[14].mxu0  ;;  %7694 = vmatpush1.bf16.msra.mxu0 %v10592_v32  ;;  %v10619_v32 = vld [vmem:[#allocation8 + $0x540] ss:$16 sps:$4 sm:$0xff]   ;;  %v10633_v44 = vld [vmem:[#allocation8 + $0x584] ss:$16 sps:$4 sm:$0xff]  }
 0x27a   :  { %7264 = vmatpush1.bf16.msra.mxu1 %v10589_v30  ;;  %v2720_v55 = vadd.f32 %v2719_v51, %v575_v42  ;;  %v2721_v29 = vpop.f32.mrb[14].mxu1  ;;  %v2867_v34 = vmax.f32 %v2675_v45, 0.0  ;;  %v2679_v22 = vadd.f32 %v2678_v52, %v563_v31  ;;  %v2680_v14 = vpop.f32.mrb[15].mxu0  ;;  %7695 = vmatprep.subr.bf16.mxu0 %v10600_v41  ;;  %v10616_v30 = vld [vmem:[#allocation8 + $0x328] ss:$16 sps:$4 sm:$0xff]  }
 0x27b   :  { %7265 = vmatprep.subr.bf16.mxu1 %v10597_v33  ;;  %v2869_v56 = vmax.f32 %v2718_v49, 0.0  ;;  %v2722_v57 = vadd.f32 %v2721_v29, %v571_v39  ;;  %v2723_v58 = vpop.f32.mrb[15].mxu1  ;;  %v2681_v59 = vadd.f32 %v2680_v14, %v567_v40  ;;  %v2868_v2 = vmax.f32 %v2677_v50, 0.0  ;;  %v10621_v31 = vld [vmem:[#allocation8 + $0x544] ss:$16 sps:$4 sm:$0xff]  }
 0x27c   :  { %v2870_v60 = vmax.f32 %v2720_v55, 0.0  ;;  %v2724_v61 = vadd.f32 %v2723_v58, %v575_v42  ;;  %v2889_v62 = vmax.f32 %v2679_v22, 0.0  ;;  %v10624_v33 = vld [vmem:[#allocation8 + $0x34c] ss:$16 sps:$4 sm:$0xff]   ;;  %v10622_v39 = vld [vmem:[#allocation8 + $0x348] ss:$16 sps:$4 sm:$0xff]  }
 0x27d   :  { %v2891_v1 = vmax.f32 %v2722_v57, 0.0  ;;  %v2890_v3 = vmax.f32 %v2681_v59, 0.0  ;;  %7696 = vmatpush1.bf16.msra.mxu0 %v10598_v48  ;;  %v10627_v40 = vld [vmem:[#allocation8 + $0x564] ss:$16 sps:$4 sm:$0xff]   ;;  %v10625_v41 = vld [vmem:[#allocation8 + $0x560] ss:$16 sps:$4 sm:$0xff]  }
 0x27e   :  { %7266 = vmatpush1.bf16.msra.mxu1 %v10595_v47  ;;  %v2892_v4 = vmax.f32 %v2724_v61, 0.0  ;;  %v12047_v12 = vpack.c.bf16 %v2889_v62, %v2867_v34  ;;  %7697 = vmatprep.subr.bf16.mxu0 %v10606_v54  ;;  %v10630_v42 = vld [vmem:[#allocation8 + $0x36c] ss:$16 sps:$4 sm:$0xff]   ;;  %v10631_v45 = vld [vmem:[#allocation8 + $0x580] ss:$16 sps:$4 sm:$0xff]  }
 0x27f   :  { %7267 = vmatprep.subr.bf16.mxu1 %v10603_v53  ;;  %v12049_v15 = vpack.c.bf16 %v2891_v1, %v2869_v56  ;;  %v12051_v16 = vpack.c.bf16 %v2890_v3, %v2868_v2  ;;  %v10636_v46 = vld [vmem:[#allocation8 + $0x38c] ss:$16 sps:$4 sm:$0xff]   ;;  %v10634_v47 = vld [vmem:[#allocation8 + $0x388] ss:$16 sps:$4 sm:$0xff]   ;;  %v10639_v48 = vld [vmem:[#allocation8 + $0x5a4] ss:$16 sps:$4 sm:$0xff]  }
 0x280   :  { %v12053_v24 = vpack.c.bf16 %v2892_v4, %v2870_v60  ;;  %v10637_v49 = vld [vmem:[#allocation8 + $0x5a0] ss:$16 sps:$4 sm:$0xff]   ;;  %v10642_v51 = vld [vmem:[#allocation8 + $0x3ac] ss:$16 sps:$4 sm:$0xff]   ;;  %v10640_v50 = vld [vmem:[#allocation8 + $0x3a8] ss:$16 sps:$4 sm:$0xff]  }
 0x281   :  { %7698 = vmatpush1.bf16.msra.mxu0 %v10604_v0  ;;  %v10645_v52 = vld [vmem:[#allocation8 + $0x5c4] ss:$16 sps:$4 sm:$0xff]   ;;  %v10643_v53 = vld [vmem:[#allocation8 + $0x5c0] ss:$16 sps:$4 sm:$0xff]   ;;  %v10648_v54 = vld [vmem:[#allocation8 + $0x3cc] ss:$16 sps:$4 sm:$0xff]  }
 0x282   :  { %7268 = vmatpush1.bf16.msra.mxu1 %v10601_v63  ;;  %7699 = vmatprep.subr.bf16.mxu0 %v10612_v19  ;;  %v10646_v55 = vld [vmem:[#allocation8 + $0x3c8] ss:$16 sps:$4 sm:$0xff]   ;;  %v10651_v29 = vld [vmem:[#allocation8 + $0x5e4] ss:$16 sps:$4 sm:$0xff]   ;;  %v10649_v34 = vld [vmem:[#allocation8 + $0x5e0] ss:$16 sps:$4 sm:$0xff]  }
 0x283   :  { %7269 = vmatprep.subr.bf16.mxu1 %v10609_v7  ;;  %v10654_v22 = vld [vmem:[#allocation8 + $0x3ec] ss:$16 sps:$4 sm:$0xff]   ;;  %v10652_v14 = vld [vmem:[#allocation8 + $0x3e8] ss:$16 sps:$4 sm:$0xff]   ;;  %v10657_v56 = vld [vmem:[#allocation8 + $0x604] ss:$16 sps:$4 sm:$0xff]  }
 0x284   :  { %v10655_v57 = vld [vmem:[#allocation8 + $0x600] ss:$16 sps:$4 sm:$0xff]   ;;  %v10660_v58 = vld [vmem:[#allocation8 + $0x40c] ss:$16 sps:$4 sm:$0xff]   ;;  %v10658_v59 = vld [vmem:[#allocation8 + $0x408] ss:$16 sps:$4 sm:$0xff]  }
 0x285   :  { %7700 = vmatpush1.bf16.msra.mxu0 %v10610_v23  ;;  %v10663_v60 = vld [vmem:[#allocation8 + $0x624] ss:$16 sps:$4 sm:$0xff]   ;;  %v10661_v61 = vld [vmem:[#allocation8 + $0x620] ss:$16 sps:$4 sm:$0xff]   ;;  %v10664_v62 = vld [vmem:[#allocation8 + $0x428] ss:$16 sps:$4 sm:$0xff]  }
 0x286   :  { %7270 = vmatpush1.bf16.msra.mxu1 %v10607_v25  ;;  %7701 = vmatprep.subr.bf16.mxu0 %v10618_v28  ;;  %v10666_v63 = vld [vmem:[#allocation8 + $0x42c] ss:$16 sps:$4 sm:$0xff]   ;;  %v10669_v0 = vld [vmem:[#allocation8 + $0x644] ss:$16 sps:$4 sm:$0xff]   ;;  %v10667_v2 = vld [vmem:[#allocation8 + $0x640] ss:$16 sps:$4 sm:$0xff]  }
 0x287   :  { %7271 = vmatprep.subr.bf16.mxu1 %v10615_v26  ;;  %v10672_v1 = vld [vmem:[#allocation8 + $0x44c] ss:$16 sps:$4 sm:$0xff]   ;;  %v10670_v3 = vld [vmem:[#allocation8 + $0x448] ss:$16 sps:$4 sm:$0xff]   ;;  %v10675_v7 = vld [vmem:[#allocation8 + $0x664] ss:$16 sps:$4 sm:$0xff]  }
 0x288   :  { %v10673_v4 = vld [vmem:[#allocation8 + $0x660] ss:$16 sps:$4 sm:$0xff]   ;;  %v10678_v19 = vld [vmem:[#allocation8 + $0x46c] ss:$16 sps:$4 sm:$0xff]   ;;  %v10681_v25 = vld [vmem:[#allocation8 + $0x684] ss:$16 sps:$4 sm:$0xff]  }
 0x289   :  { %7702 = vmatpush1.bf16.msra.mxu0 %v10616_v30  ;;  %v10684_v23 = vld [vmem:[#allocation8 + $0x48c] ss:$16 sps:$4 sm:$0xff]   ;;  %v10687_v28 = vld [vmem:[#allocation8 + $0x6a4] ss:$16 sps:$4 sm:$0xff]  }
 0x28a   :  { %7272 = vmatpush1.bf16.msra.mxu1 %v10613_v27  ;;  %7703 = vmatprep.subr.bf16.mxu0 %v10624_v33  ;;  %v12059_v26 = vld [vmem:[#allocation7 + $0x10] sm:$0x3f] }
 0x28b   :  { %7273 = vmatprep.subr.bf16.mxu1 %v10621_v31  ;;  %v10682_v27 = vld [vmem:[#allocation8 + $0x488] ss:$16 sps:$4 sm:$0xff]   ;;  %v10690_v30 = vld [vmem:[#allocation8 + $0x4ac] ss:$16 sps:$4 sm:$0xff]   ;;  %v10685_v31 = vld [vmem:[#allocation8 + $0x6a0] ss:$16 sps:$4 sm:$0xff]   ;;  %v587_v33 = vrot.slane %v12059_v26, %v11957_v36 }
 0x28d   :  { %7704 = vmatpush1.bf16.msra.mxu0 %v10622_v39  ;;  %v583_v39 = vrot.slane %v12059_v26, %v11960_v37 }
 0x28e   :  { %7274 = vmatpush1.bf16.msra.mxu1 %v10619_v32  ;;  %7705 = vmatprep.subr.bf16.mxu0 %v10630_v42  ;;  %v579_v32 = vrot.slane %v12059_v26, %v11954_v35  ;;  %v10693_v42 = vld [vmem:[#allocation8 + $0x6c4] ss:$16 sps:$4 sm:$0xff]  }
 0x28f   :  { %7275 = vmatprep.subr.bf16.mxu1 %v10627_v40  ;;  %v591_v40 = vrot.slane %v12059_v26, %v11963_v38 }
 0x291   :  { %7706 = vmatpush1.bf16.msra.mxu0 %v10628_v43  ;;  %v10696_v43 = vld [vmem:[#allocation8 + $0x4cc] ss:$16 sps:$4 sm:$0xff]  }
 0x292   :  { %7276 = vmatpush1.bf16.msra.mxu1 %v10625_v41  ;;  %7707 = vmatprep.subr.bf16.mxu0 %v10636_v46  ;;  %v10688_v41 = vld [vmem:[#allocation8 + $0x4a8] ss:$16 sps:$4 sm:$0xff]  }
 0x293   :  { %7277 = vmatprep.subr.bf16.mxu1 %v10633_v44 }
 0x295   :  { %7708 = vmatpush1.bf16.msra.mxu0 %v10634_v47 }
 0x296   :  { %7278 = vmatpush1.bf16.msra.mxu1 %v10631_v45  ;;  %7709 = vmatprep.subr.bf16.mxu0 %v10642_v51  ;;  %v10691_v45 = vld [vmem:[#allocation8 + $0x6c0] ss:$16 sps:$4 sm:$0xff]  }
 0x297   :  { %7279 = vmatprep.subr.bf16.mxu1 %v10639_v48 }
 0x299   :  { %7710 = vmatpush1.bf16.msra.mxu0 %v10640_v50 }
 0x29a   :  { %7280 = vmatpush1.bf16.msra.mxu1 %v10637_v49  ;;  %7711 = vmatprep.subr.bf16.mxu0 %v10648_v54  ;;  %v10694_v49 = vld [vmem:[#allocation8 + $0x4c8] ss:$16 sps:$4 sm:$0xff]  }
 0x29b   :  { %7281 = vmatprep.subr.bf16.mxu1 %v10645_v52 }
 0x29d   :  { %7712 = vmatpush1.bf16.msra.mxu0 %v10646_v55 }
 0x29e   :  { %7282 = vmatpush1.bf16.msra.mxu1 %v10643_v53  ;;  %7713 = vmatprep.subr.bf16.mxu0 %v10654_v22 }
 0x29f   :  { %7283 = vmatprep.subr.bf16.mxu1 %v10651_v29 }
 0x2a1   :  { %7714 = vmatpush1.bf16.msra.mxu0 %v10652_v14  ;;  %v10699_v14 = vld [vmem:[#allocation8 + $0x6e4] ss:$16 sps:$4 sm:$0xff]  }
 0x2a2   :  { %7284 = vmatpush1.bf16.msra.mxu1 %v10649_v34  ;;  %7726 = vmatprep.subr.bf16.mxu0 %v10660_v58 }
 0x2a3   :  { %7296 = vmatprep.subr.bf16.mxu1 %v10657_v56 }
 0x2a4   :  { %7716 = vmatmul.mubr.bf16.vlgmr.msra.gmra.mrb[24].mxu0 %v11975_v20  ;;  %v10676_v20 = vld [vmem:[#allocation8 + $0x468] ss:$16 sps:$4 sm:$0xff]  }
 0x2a5   :  { %7286 = vmatmul.mubr.bf16.vlgmr.msra.gmra.mrb[20].mxu1 %v12003_v9  ;;  %7727 = vmatpush1.bf16.msra.mxu0 %v10658_v59 }
 0x2a6   :  { %7297 = vmatpush1.bf16.msra.mxu1 %v10655_v57  ;;  %7328 = vmatprep.mubr.bf16.mxu1 %v12009_v13 }
 0x2a7   :  { %7758 = vmatprep.mubr.bf16.mxu0 %v12007_v11  ;;  %7298 = vmatprep.subr.bf16.mxu1 %v10663_v60  ;;  %v10679_v11 = vld [vmem:[#allocation8 + $0x680] ss:$16 sps:$4 sm:$0xff]   ;;  %v10702_v60 = vld [vmem:[#allocation8 + $0x4ec] ss:$16 sps:$4 sm:$0xff]  }
 0x2a8   :  { %7728 = vmatprep.subr.bf16.mxu0 %v10666_v63 }
 0x2a9   :  { %7729 = vmatpush1.bf16.msra.mxu0 %v10664_v62 }
 0x2aa   :  { %7299 = vmatpush1.bf16.msra.mxu1 %v10661_v61  ;;  %7730 = vmatprep.subr.bf16.mxu0 %v10672_v1 }
 0x2ab   :  { %7300 = vmatprep.subr.bf16.mxu1 %v10669_v0  ;;  %v10697_v0 = vld [vmem:[#allocation8 + $0x6e0] ss:$16 sps:$4 sm:$0xff]  }
 0x2ad   :  { %7731 = vmatpush1.bf16.msra.mxu0 %v10670_v3 }
 0x2ae   :  { %7301 = vmatpush1.bf16.msra.mxu1 %v10667_v2  ;;  %7732 = vmatprep.subr.bf16.mxu0 %v10678_v19  ;;  %v10700_v19 = vld [vmem:[#allocation8 + $0x4e8] ss:$16 sps:$4 sm:$0xff]  }
 0x2af   :  { %7302 = vmatprep.subr.bf16.mxu1 %v10675_v7 }
 0x2b1   :  { %7733 = vmatpush1.bf16.msra.mxu0 %v10676_v20  ;;  %v10705_v20 = vld [vmem:[#allocation8 + $0x704] ss:$16 sps:$4 sm:$0xff]  }
 0x2b2   :  { %7303 = vmatpush1.bf16.msra.mxu1 %v10673_v4  ;;  %7734 = vmatprep.subr.bf16.mxu0 %v10684_v23 }
 0x2b3   :  { %7304 = vmatprep.subr.bf16.mxu1 %v10681_v25 }
 0x2b5   :  { %7735 = vmatpush1.bf16.msra.mxu0 %v10682_v27  ;;  %v10708_v27 = vld [vmem:[#allocation8 + $0x50c] ss:$16 sps:$4 sm:$0xff]  }
 0x2b6   :  { %7305 = vmatpush1.bf16.msra.mxu1 %v10679_v11  ;;  %7736 = vmatprep.subr.bf16.mxu0 %v10690_v30  ;;  %v10703_v11 = vld [vmem:[#allocation8 + $0x700] ss:$16 sps:$4 sm:$0xff]   ;;  %v10706_v30 = vld [vmem:[#allocation8 + $0x508] ss:$16 sps:$4 sm:$0xff]  }
 0x2b7   :  { %7306 = vmatprep.subr.bf16.mxu1 %v10687_v28  ;;  %v2760_v44 = vpop.f32.mrb[16].mxu0 }
 0x2b8   :  { %v2803_v46 = vpop.f32.mrb[16].mxu1  ;;  %v2761_v47 = vadd.f32 %v2760_v44, %v579_v32  ;;  %v2762_v48 = vpop.f32.mrb[17].mxu0  ;;  %v10723_v44 = vld [vmem:[#allocation8 + $0x764] ss:$16 sps:$4 sm:$0xff]  }
 0x2b9   :  { %v2804_v51 = vadd.f32 %v2803_v46, %v587_v33  ;;  %v2805_v50 = vpop.f32.mrb[17].mxu1  ;;  %v2763_v52 = vadd.f32 %v2762_v48, %v583_v39  ;;  %v2764_v53 = vpop.f32.mrb[18].mxu0  ;;  %7737 = vmatpush1.bf16.msra.mxu0 %v10688_v41  ;;  %v10715_v41 = vld [vmem:[#allocation8 + $0x740] ss:$16 sps:$4 sm:$0xff]   ;;  %v10726_v46 = vld [vmem:[#allocation8 + $0x56c] ss:$16 sps:$4 sm:$0xff]  }
 0x2ba   :  { %7307 = vmatpush1.bf16.msra.mxu1 %v10685_v31  ;;  %v2806_v54 = vadd.f32 %v2805_v50, %v591_v40  ;;  %v2807_v55 = vpop.f32.mrb[18].mxu1  ;;  %v2871_v29 = vmax.f32 %v2761_v47, 0.0  ;;  %v2765_v34 = vadd.f32 %v2764_v53, %v579_v32  ;;  %v2766_v22 = vpop.f32.mrb[19].mxu0  ;;  %7738 = vmatprep.subr.bf16.mxu0 %v10696_v43  ;;  %v10711_v31 = vld [vmem:[#allocation8 + $0x724] ss:$16 sps:$4 sm:$0xff]  }
 0x2bb   :  { %7308 = vmatprep.subr.bf16.mxu1 %v10693_v42  ;;  %v2873_v56 = vmax.f32 %v2804_v51, 0.0  ;;  %v2808_v57 = vadd.f32 %v2807_v55, %v587_v33  ;;  %v2809_v58 = vpop.f32.mrb[19].mxu1  ;;  %v2767_v59 = vadd.f32 %v2766_v22, %v583_v39  ;;  %v2872_v2 = vmax.f32 %v2763_v52, 0.0  ;;  %v10709_v32 = vld [vmem:[#allocation8 + $0x720] ss:$16 sps:$4 sm:$0xff]  }
 0x2bc   :  { %v2874_v61 = vmax.f32 %v2806_v54, 0.0  ;;  %v2810_v62 = vadd.f32 %v2809_v58, %v591_v40  ;;  %v2893_v63 = vmax.f32 %v2765_v34, 0.0  ;;  %v10714_v33 = vld [vmem:[#allocation8 + $0x52c] ss:$16 sps:$4 sm:$0xff]   ;;  %v10712_v39 = vld [vmem:[#allocation8 + $0x528] ss:$16 sps:$4 sm:$0xff]  }
 0x2bd   :  { %v2895_v1 = vmax.f32 %v2808_v57, 0.0  ;;  %v2894_v3 = vmax.f32 %v2767_v59, 0.0  ;;  %7739 = vmatpush1.bf16.msra.mxu0 %v10694_v49  ;;  %v10717_v40 = vld [vmem:[#allocation8 + $0x744] ss:$16 sps:$4 sm:$0xff]   ;;  %v10720_v42 = vld [vmem:[#allocation8 + $0x54c] ss:$16 sps:$4 sm:$0xff]  }
 0x2be   :  { %7309 = vmatpush1.bf16.msra.mxu1 %v10691_v45  ;;  %v2896_v7 = vmax.f32 %v2810_v62, 0.0  ;;  %v12069_v4 = vpack.c.bf16 %v2893_v63, %v2871_v29  ;;  %7740 = vmatprep.subr.bf16.mxu0 %v10702_v60  ;;  %v10718_v43 = vld [vmem:[#allocation8 + $0x548] ss:$16 sps:$4 sm:$0xff]   ;;  %v10721_v45 = vld [vmem:[#allocation8 + $0x760] ss:$16 sps:$4 sm:$0xff]  }
 0x2bf   :  { %7310 = vmatprep.subr.bf16.mxu1 %v10699_v14  ;;  %v12071_v25 = vpack.c.bf16 %v2895_v1, %v2873_v56  ;;  %v12073_v23 = vpack.c.bf16 %v2894_v3, %v2872_v2  ;;  %v10724_v47 = vld [vmem:[#allocation8 + $0x568] ss:$16 sps:$4 sm:$0xff]   ;;  %v10729_v48 = vld [vmem:[#allocation8 + $0x784] ss:$16 sps:$4 sm:$0xff]   ;;  %v10727_v49 = vld [vmem:[#allocation8 + $0x780] ss:$16 sps:$4 sm:$0xff]  }
 0x2c0   :  { %v12075_v28 = vpack.c.bf16 %v2896_v7, %v2874_v61  ;;  %v10732_v51 = vld [vmem:[#allocation8 + $0x58c] ss:$16 sps:$4 sm:$0xff]   ;;  %v10730_v50 = vld [vmem:[#allocation8 + $0x588] ss:$16 sps:$4 sm:$0xff]   ;;  %v10735_v52 = vld [vmem:[#allocation8 + $0x7a4] ss:$16 sps:$4 sm:$0xff]  }
 0x2c1   :  { %7741 = vmatpush1.bf16.msra.mxu0 %v10700_v19  ;;  %v10733_v53 = vld [vmem:[#allocation8 + $0x7a0] ss:$16 sps:$4 sm:$0xff]   ;;  %v10738_v54 = vld [vmem:[#allocation8 + $0x5ac] ss:$16 sps:$4 sm:$0xff]   ;;  %v10736_v55 = vld [vmem:[#allocation8 + $0x5a8] ss:$16 sps:$4 sm:$0xff]  }
 0x2c2   :  { %7311 = vmatpush1.bf16.msra.mxu1 %v10697_v0  ;;  %7742 = vmatprep.subr.bf16.mxu0 %v10708_v27  ;;  %v10741_v29 = vld [vmem:[#allocation8 + $0x7c4] ss:$16 sps:$4 sm:$0xff]   ;;  %v10739_v34 = vld [vmem:[#allocation8 + $0x7c0] ss:$16 sps:$4 sm:$0xff]   ;;  %v10744_v22 = vld [vmem:[#allocation8 + $0x5cc] ss:$16 sps:$4 sm:$0xff]  }
 0x2c3   :  { %7312 = vmatprep.subr.bf16.mxu1 %v10705_v20  ;;  %v10742_v14 = vld [vmem:[#allocation8 + $0x5c8] ss:$16 sps:$4 sm:$0xff]   ;;  %v10747_v56 = vld [vmem:[#allocation8 + $0x7e4] ss:$16 sps:$4 sm:$0xff]   ;;  %v10745_v57 = vld [vmem:[#allocation8 + $0x7e0] ss:$16 sps:$4 sm:$0xff]  }
 0x2c4   :  { %v10750_v58 = vld [vmem:[#allocation8 + $0x5ec] ss:$16 sps:$4 sm:$0xff]   ;;  %v10748_v59 = vld [vmem:[#allocation8 + $0x5e8] ss:$16 sps:$4 sm:$0xff]   ;;  %v10753_v60 = vld [vmem:[#allocation8 + $0x804] ss:$16 sps:$4 sm:$0xff]  }
 0x2c5   :  { %7743 = vmatpush1.bf16.msra.mxu0 %v10706_v30  ;;  %v10751_v61 = vld [vmem:[#allocation8 + $0x800] ss:$16 sps:$4 sm:$0xff]   ;;  %v10756_v62 = vld [vmem:[#allocation8 + $0x60c] ss:$16 sps:$4 sm:$0xff]   ;;  %v10754_v63 = vld [vmem:[#allocation8 + $0x608] ss:$16 sps:$4 sm:$0xff]  }
 0x2c6   :  { %7313 = vmatpush1.bf16.msra.mxu1 %v10703_v11  ;;  %7744 = vmatprep.subr.bf16.mxu0 %v10714_v33  ;;  %v10759_v0 = vld [vmem:[#allocation8 + $0x824] ss:$16 sps:$4 sm:$0xff]   ;;  %v10757_v1 = vld [vmem:[#allocation8 + $0x820] ss:$16 sps:$4 sm:$0xff]   ;;  %v10760_v2 = vld [vmem:[#allocation8 + $0x628] ss:$16 sps:$4 sm:$0xff]  }
 0x2c7   :  { %7314 = vmatprep.subr.bf16.mxu1 %v10711_v31  ;;  %v10762_v3 = vld [vmem:[#allocation8 + $0x62c] ss:$16 sps:$4 sm:$0xff]   ;;  %v10765_v7 = vld [vmem:[#allocation8 + $0x844] ss:$16 sps:$4 sm:$0xff]   ;;  %v10763_v20 = vld [vmem:[#allocation8 + $0x840] ss:$16 sps:$4 sm:$0xff]  }
 0x2c8   :  { %v10768_v19 = vld [vmem:[#allocation8 + $0x64c] ss:$16 sps:$4 sm:$0xff]   ;;  %v10766_v11 = vld [vmem:[#allocation8 + $0x648] ss:$16 sps:$4 sm:$0xff]   ;;  %v10771_v27 = vld [vmem:[#allocation8 + $0x864] ss:$16 sps:$4 sm:$0xff]  }
 0x2c9   :  { %7745 = vmatpush1.bf16.msra.mxu0 %v10712_v39  ;;  %v10769_v30 = vld [vmem:[#allocation8 + $0x860] ss:$16 sps:$4 sm:$0xff]   ;;  %v10774_v31 = vld [vmem:[#allocation8 + $0x66c] ss:$16 sps:$4 sm:$0xff]   ;;  %v10778_v39 = vld [vmem:[#allocation8 + $0x688] ss:$16 sps:$4 sm:$0xff]  }
 0x2ca   :  { %7315 = vmatpush1.bf16.msra.mxu1 %v10709_v32  ;;  %7746 = vmatprep.subr.bf16.mxu0 %v10720_v42  ;;  %v10777_v32 = vld [vmem:[#allocation8 + $0x884] ss:$16 sps:$4 sm:$0xff]   ;;  %v10775_v33 = vld [vmem:[#allocation8 + $0x880] ss:$16 sps:$4 sm:$0xff]  }
 0x2cb   :  { %7316 = vmatprep.subr.bf16.mxu1 %v10717_v40  ;;  %v10783_v40 = vld [vmem:[#allocation8 + $0x8a4] ss:$16 sps:$4 sm:$0xff]   ;;  %v10781_v42 = vld [vmem:[#allocation8 + $0x8a0] ss:$16 sps:$4 sm:$0xff]  }
 0x2cd   :  { %7747 = vmatpush1.bf16.msra.mxu0 %v10718_v43  ;;  %v595_v43 = vrot.slane %v12059_v26, %v11986_v17 }
 0x2ce   :  { %7317 = vmatpush1.bf16.msra.mxu1 %v10715_v41  ;;  %7748 = vmatprep.subr.bf16.mxu0 %v10726_v46  ;;  %v10786_v41 = vld [vmem:[#allocation8 + $0x6ac] ss:$16 sps:$4 sm:$0xff]   ;;  %v10789_v46 = vld [vmem:[#allocation8 + $0x8c4] ss:$16 sps:$4 sm:$0xff]  }
 0x2cf   :  { %7318 = vmatprep.subr.bf16.mxu1 %v10723_v44  ;;  %v599_v44 = vrot.slane %v12059_v26, %v11990_v18  ;;  %v10795_v18 = vld [vmem:[#allocation8 + $0x8e4] ss:$16 sps:$4 sm:$0xff]  }
 0x2d1   :  { %7749 = vmatpush1.bf16.msra.mxu0 %v10724_v47  ;;  %v10792_v47 = vld [vmem:[#allocation8 + $0x6cc] ss:$16 sps:$4 sm:$0xff]  }
 0x2d2   :  { %7319 = vmatpush1.bf16.msra.mxu1 %v10721_v45  ;;  %7750 = vmatprep.subr.bf16.mxu0 %v10732_v51  ;;  %v10784_v45 = vld [vmem:[#allocation8 + $0x6a8] ss:$16 sps:$4 sm:$0xff]  }
 0x2d3   :  { %7320 = vmatprep.subr.bf16.mxu1 %v10729_v48 }
 0x2d5   :  { %7751 = vmatpush1.bf16.msra.mxu0 %v10730_v50 }
 0x2d6   :  { %7321 = vmatpush1.bf16.msra.mxu1 %v10727_v49  ;;  %7752 = vmatprep.subr.bf16.mxu0 %v10738_v54  ;;  %v10787_v49 = vld [vmem:[#allocation8 + $0x8c0] ss:$16 sps:$4 sm:$0xff]  }
 0x2d7   :  { %7322 = vmatprep.subr.bf16.mxu1 %v10735_v52 }
 0x2d9   :  { %7753 = vmatpush1.bf16.msra.mxu0 %v10736_v55 }
 0x2da   :  { %7323 = vmatpush1.bf16.msra.mxu1 %v10733_v53  ;;  %7754 = vmatprep.subr.bf16.mxu0 %v10744_v22  ;;  %v10798_v22 = vld [vmem:[#allocation8 + $0x6ec] ss:$16 sps:$4 sm:$0xff]  }
 0x2db   :  { %7324 = vmatprep.subr.bf16.mxu1 %v10741_v29  ;;  %v10790_v29 = vld [vmem:[#allocation8 + $0x6c8] ss:$16 sps:$4 sm:$0xff]  }
 0x2dd   :  { %7755 = vmatpush1.bf16.msra.mxu0 %v10742_v14 }
 0x2de   :  { %7325 = vmatpush1.bf16.msra.mxu1 %v10739_v34  ;;  %7756 = vmatprep.subr.bf16.mxu0 %v10750_v58  ;;  %v10793_v34 = vld [vmem:[#allocation8 + $0x8e0] ss:$16 sps:$4 sm:$0xff]  }
 0x2df   :  { %7326 = vmatprep.subr.bf16.mxu1 %v10747_v56 }
 0x2e1   :  { %7757 = vmatpush1.bf16.msra.mxu0 %v10748_v59  ;;  %v10796_v59 = vld [vmem:[#allocation8 + $0x6e8] ss:$16 sps:$4 sm:$0xff]  }
 0x2e2   :  { %7327 = vmatpush1.bf16.msra.mxu1 %v10745_v57  ;;  %7769 = vmatprep.subr.bf16.mxu0 %v10756_v62  ;;  %v10799_v62 = vld [vmem:[#allocation8 + $0x900] ss:$16 sps:$4 sm:$0xff]  }
 0x2e3   :  { %7339 = vmatprep.subr.bf16.mxu1 %v10753_v60  ;;  %v10801_v60 = vld [vmem:[#allocation8 + $0x904] ss:$16 sps:$4 sm:$0xff]  }
 0x2e4   :  { %7759 = vmatmul.mubr.bf16.vlgmr.msra.gmra.mrb[24].mxu0 %v12003_v9  ;;  %v10772_v9 = vld [vmem:[#allocation8 + $0x668] ss:$16 sps:$4 sm:$0xff]  }
 0x2e5   :  { %7329 = vmatmul.mubr.bf16.vlgmr.msra.gmra.mrb[20].mxu1 %v12005_v10  ;;  %7770 = vmatpush1.bf16.msra.mxu0 %v10754_v63  ;;  %v10804_v63 = vld [vmem:[#allocation8 + $0x70c] ss:$16 sps:$4 sm:$0xff]  }
 0x2e6   :  { %7340 = vmatpush1.bf16.msra.mxu1 %v10751_v61  ;;  %7371 = vmatprep.mubr.bf16.mxu1 %v12029_v8 }
 0x2e7   :  { %7801 = vmatprep.mubr.bf16.mxu0 %v12009_v13  ;;  %7341 = vmatprep.subr.bf16.mxu1 %v10759_v0  ;;  %v10780_v13 = vld [vmem:[#allocation8 + $0x68c] ss:$16 sps:$4 sm:$0xff]   ;;  %v10802_v0 = vld [vmem:[#allocation8 + $0x708] ss:$16 sps:$4 sm:$0xff]  }
 0x2e8   :  { %7771 = vmatprep.subr.bf16.mxu0 %v10762_v3  ;;  %v10810_v3 = vld [vmem:[#allocation8 + $0x72c] ss:$16 sps:$4 sm:$0xff]  }
 0x2e9   :  { %7772 = vmatpush1.bf16.msra.mxu0 %v10760_v2  ;;  %v10805_v2 = vld [vmem:[#allocation8 + $0x920] ss:$16 sps:$4 sm:$0xff]  }
 0x2ea   :  { %7342 = vmatpush1.bf16.msra.mxu1 %v10757_v1  ;;  %7773 = vmatprep.subr.bf16.mxu0 %v10768_v19  ;;  %v10807_v1 = vld [vmem:[#allocation8 + $0x924] ss:$16 sps:$4 sm:$0xff]  }
 0x2eb   :  { %7343 = vmatprep.subr.bf16.mxu1 %v10765_v7  ;;  %v10808_v7 = vld [vmem:[#allocation8 + $0x728] ss:$16 sps:$4 sm:$0xff]   ;;  %v10813_v19 = vld [vmem:[#allocation8 + $0x944] ss:$16 sps:$4 sm:$0xff]  }
 0x2ed   :  { %7774 = vmatpush1.bf16.msra.mxu0 %v10766_v11  ;;  %v10816_v11 = vld [vmem:[#allocation8 + $0x74c] ss:$16 sps:$4 sm:$0xff]  }
 0x2ee   :  { %7344 = vmatpush1.bf16.msra.mxu1 %v10763_v20  ;;  %7775 = vmatprep.subr.bf16.mxu0 %v10774_v31  ;;  %v10811_v20 = vld [vmem:[#allocation8 + $0x940] ss:$16 sps:$4 sm:$0xff]  }
 0x2ef   :  { %7345 = vmatprep.subr.bf16.mxu1 %v10771_v27  ;;  %v10814_v27 = vld [vmem:[#allocation8 + $0x748] ss:$16 sps:$4 sm:$0xff]   ;;  %v10817_v31 = vld [vmem:[#allocation8 + $0x960] ss:$16 sps:$4 sm:$0xff]  }
 0x2f1   :  { %7776 = vmatpush1.bf16.msra.mxu0 %v10772_v9  ;;  %v10822_v9 = vld [vmem:[#allocation8 + $0x76c] ss:$16 sps:$4 sm:$0xff]  }
 0x2f2   :  { %7346 = vmatpush1.bf16.msra.mxu1 %v10769_v30  ;;  %7777 = vmatprep.subr.bf16.mxu0 %v10780_v13  ;;  %v10819_v30 = vld [vmem:[#allocation8 + $0x964] ss:$16 sps:$4 sm:$0xff]   ;;  %v10823_v13 = vld [vmem:[#allocation8 + $0x980] ss:$16 sps:$4 sm:$0xff]  }
 0x2f3   :  { %7347 = vmatprep.subr.bf16.mxu1 %v10777_v32  ;;  %v10820_v32 = vld [vmem:[#allocation8 + $0x768] ss:$16 sps:$4 sm:$0xff]  }
 0x2f5   :  { %7778 = vmatpush1.bf16.msra.mxu0 %v10778_v39  ;;  %v10828_v39 = vld [vmem:[#allocation8 + $0x78c] ss:$16 sps:$4 sm:$0xff]  }
 0x2f6   :  { %7348 = vmatpush1.bf16.msra.mxu1 %v10775_v33  ;;  %7779 = vmatprep.subr.bf16.mxu0 %v10786_v41  ;;  %v10825_v33 = vld [vmem:[#allocation8 + $0x984] ss:$16 sps:$4 sm:$0xff]  }
 0x2f7   :  { %7349 = vmatprep.subr.bf16.mxu1 %v10783_v40  ;;  %v2846_v48 = vpop.f32.mrb[20].mxu0  ;;  %v10826_v40 = vld [vmem:[#allocation8 + $0x788] ss:$16 sps:$4 sm:$0xff]   ;;  %v10831_v41 = vld [vmem:[#allocation8 + $0x9a4] ss:$16 sps:$4 sm:$0xff]  }
 0x2f8   :  { %v2847_v51 = vadd.f32 %v2846_v48, %v595_v43  ;;  %v2848_v50 = vpop.f32.mrb[21].mxu0  ;;  %v10838_v48 = vld [vmem:[#allocation8 + $0x7c8] ss:$16 sps:$4 sm:$0xff]  }
 0x2f9   :  { %v2849_v52 = vadd.f32 %v2848_v50, %v599_v44  ;;  %v2850_v53 = vpop.f32.mrb[22].mxu0  ;;  %7780 = vmatpush1.bf16.msra.mxu0 %v10784_v45  ;;  %v10837_v45 = vld [vmem:[#allocation8 + $0x9c4] ss:$16 sps:$4 sm:$0xff]   ;;  %v10846_v50 = vld [vmem:[#allocation8 + $0x7ec] ss:$16 sps:$4 sm:$0xff]  }
 0x2fa   :  { %7350 = vmatpush1.bf16.msra.mxu1 %v10781_v42  ;;  %v2875_v54 = vmax.f32 %v2847_v51, 0.0  ;;  %v2851_v55 = vadd.f32 %v2850_v53, %v595_v43  ;;  %v2852_v17 = vpop.f32.mrb[23].mxu0  ;;  %7781 = vmatprep.subr.bf16.mxu0 %v10792_v47  ;;  %v10829_v42 = vld [vmem:[#allocation8 + $0x9a0] ss:$16 sps:$4 sm:$0xff]   ;;  %v10834_v43 = vld [vmem:[#allocation8 + $0x7ac] ss:$16 sps:$4 sm:$0xff]  }
 0x2fb   :  { %7351 = vmatprep.subr.bf16.mxu1 %v10789_v46  ;;  %v2853_v26 = vadd.f32 %v2852_v17, %v599_v44  ;;  %v2876_v56 = vmax.f32 %v2849_v52, 0.0  ;;  %v10832_v44 = vld [vmem:[#allocation8 + $0x7a8] ss:$16 sps:$4 sm:$0xff]   ;;  %v10835_v46 = vld [vmem:[#allocation8 + $0x9c0] ss:$16 sps:$4 sm:$0xff]  }
 0x2fc   :  { %v2897_v14 = vmax.f32 %v2851_v55, 0.0  ;;  %v10840_v47 = vld [vmem:[#allocation8 + $0x7cc] ss:$16 sps:$4 sm:$0xff]   ;;  %v10841_v51 = vld [vmem:[#allocation8 + $0x9e0] ss:$16 sps:$4 sm:$0xff]  }
 0x2fd   :  { %v2898_v57 = vmax.f32 %v2853_v26, 0.0  ;;  %7782 = vmatpush1.bf16.msra.mxu0 %v10790_v29  ;;  %v10844_v52 = vld [vmem:[#allocation8 + $0x7e8] ss:$16 sps:$4 sm:$0xff]   ;;  %v10849_v53 = vld [vmem:[#allocation8 + $0xa04] ss:$16 sps:$4 sm:$0xff]  }
 0x2fe   :  { %7352 = vmatpush1.bf16.msra.mxu1 %v10787_v49  ;;  %v12085_v58 = vpack.c.bf16 %v2897_v14, %v2875_v54  ;;  %7783 = vmatprep.subr.bf16.mxu0 %v10798_v22  ;;  %v10843_v49 = vld [vmem:[#allocation8 + $0x9e4] ss:$16 sps:$4 sm:$0xff]   ;;  %v10847_v54 = vld [vmem:[#allocation8 + $0xa00] ss:$16 sps:$4 sm:$0xff]   ;;  %v10852_v55 = vld [vmem:[#allocation8 + $0x80c] ss:$16 sps:$4 sm:$0xff]  }
 0x2ff   :  { %7353 = vmatprep.subr.bf16.mxu1 %v10795_v18  ;;  %v12087_v61 = vpack.c.bf16 %v2898_v57, %v2876_v56  ;;  %v10850_v17 = vld [vmem:[#allocation8 + $0x808] ss:$16 sps:$4 sm:$0xff]   ;;  %v10855_v29 = vld [vmem:[#allocation8 + $0xa24] ss:$16 sps:$4 sm:$0xff]   ;;  %v10853_v18 = vld [vmem:[#allocation8 + $0xa20] ss:$16 sps:$4 sm:$0xff]  }
 0x300   :  { %v10856_v26 = vld [vmem:[#allocation8 + $0x828] ss:$16 sps:$4 sm:$0xff]   ;;  %v10861_v22 = vld [vmem:[#allocation8 + $0xa44] ss:$16 sps:$4 sm:$0xff]   ;;  %v10864_v14 = vld [vmem:[#allocation8 + $0x84c] ss:$16 sps:$4 sm:$0xff]  }
 0x301   :  { %7784 = vmatpush1.bf16.msra.mxu0 %v10796_v59  ;;  %v10859_v56 = vld [vmem:[#allocation8 + $0xa40] ss:$16 sps:$4 sm:$0xff]   ;;  %v10862_v57 = vld [vmem:[#allocation8 + $0x848] ss:$16 sps:$4 sm:$0xff]   ;;  %v10867_v59 = vld [vmem:[#allocation8 + $0xa64] ss:$16 sps:$4 sm:$0xff]  }
 0x302   :  { %7354 = vmatpush1.bf16.msra.mxu1 %v10793_v34  ;;  %7785 = vmatprep.subr.bf16.mxu0 %v10804_v63  ;;  %v10858_v34 = vld [vmem:[#allocation8 + $0x82c] ss:$16 sps:$4 sm:$0xff]   ;;  %v10873_v63 = vld [vmem:[#allocation8 + $0xa84] ss:$16 sps:$4 sm:$0xff]  }
 0x303   :  { %7355 = vmatprep.subr.bf16.mxu1 %v10801_v60  ;;  %v10870_v60 = vld [vmem:[#allocation8 + $0x86c] ss:$16 sps:$4 sm:$0xff]  }
 0x305   :  { %7786 = vmatpush1.bf16.msra.mxu0 %v10802_v0  ;;  %v10876_v0 = vld [vmem:[#allocation8 + $0x88c] ss:$16 sps:$4 sm:$0xff]  }
 0x306   :  { %7356 = vmatpush1.bf16.msra.mxu1 %v10799_v62  ;;  %7787 = vmatprep.subr.bf16.mxu0 %v10810_v3  ;;  %v10868_v62 = vld [vmem:[#allocation8 + $0x868] ss:$16 sps:$4 sm:$0xff]   ;;  %v10882_v3 = vld [vmem:[#allocation8 + $0x8ac] ss:$16 sps:$4 sm:$0xff]  }
 0x307   :  { %7357 = vmatprep.subr.bf16.mxu1 %v10807_v1  ;;  %v10874_v1 = vld [vmem:[#allocation8 + $0x888] ss:$16 sps:$4 sm:$0xff]  }
 0x309   :  { %7788 = vmatpush1.bf16.msra.mxu0 %v10808_v7  ;;  %v10877_v7 = vld [vmem:[#allocation8 + $0xaa0] ss:$16 sps:$4 sm:$0xff]  }
 0x30a   :  { %7358 = vmatpush1.bf16.msra.mxu1 %v10805_v2  ;;  %7789 = vmatprep.subr.bf16.mxu0 %v10816_v11  ;;  %v10879_v2 = vld [vmem:[#allocation8 + $0xaa4] ss:$16 sps:$4 sm:$0xff]   ;;  %v10888_v11 = vld [vmem:[#allocation8 + $0x8cc] ss:$16 sps:$4 sm:$0xff]  }
 0x30b   :  { %7359 = vmatprep.subr.bf16.mxu1 %v10813_v19  ;;  %v10880_v19 = vld [vmem:[#allocation8 + $0x8a8] ss:$16 sps:$4 sm:$0xff]  }
 0x30d   :  { %7790 = vmatpush1.bf16.msra.mxu0 %v10814_v27  ;;  %v10883_v27 = vld [vmem:[#allocation8 + $0xac0] ss:$16 sps:$4 sm:$0xff]  }
 0x30e   :  { %7360 = vmatpush1.bf16.msra.mxu1 %v10811_v20  ;;  %7791 = vmatprep.subr.bf16.mxu0 %v10822_v9  ;;  %v10885_v20 = vld [vmem:[#allocation8 + $0xac4] ss:$16 sps:$4 sm:$0xff]   ;;  %v10894_v9 = vld [vmem:[#allocation8 + $0x8ec] ss:$16 sps:$4 sm:$0xff]  }
 0x30f   :  { %7361 = vmatprep.subr.bf16.mxu1 %v10819_v30  ;;  %v10886_v30 = vld [vmem:[#allocation8 + $0x8c8] ss:$16 sps:$4 sm:$0xff]  }
 0x311   :  { %7792 = vmatpush1.bf16.msra.mxu0 %v10820_v32  ;;  %v10889_v32 = vld [vmem:[#allocation8 + $0xae0] ss:$16 sps:$4 sm:$0xff]  }
 0x312   :  { %7362 = vmatpush1.bf16.msra.mxu1 %v10817_v31  ;;  %7793 = vmatprep.subr.bf16.mxu0 %v10828_v39  ;;  %v10891_v31 = vld [vmem:[#allocation8 + $0xae4] ss:$16 sps:$4 sm:$0xff]   ;;  %v10900_v39 = vld [vmem:[#allocation8 + $0x90c] ss:$16 sps:$4 sm:$0xff]  }
 0x313   :  { %7363 = vmatprep.subr.bf16.mxu1 %v10825_v33  ;;  %v10892_v33 = vld [vmem:[#allocation8 + $0x8e8] ss:$16 sps:$4 sm:$0xff]  }
 0x315   :  { %7794 = vmatpush1.bf16.msra.mxu0 %v10826_v40  ;;  %v10895_v40 = vld [vmem:[#allocation8 + $0xb00] ss:$16 sps:$4 sm:$0xff]  }
 0x316   :  { %7364 = vmatpush1.bf16.msra.mxu1 %v10823_v13  ;;  %7795 = vmatprep.subr.bf16.mxu0 %v10834_v43  ;;  %v10897_v13 = vld [vmem:[#allocation8 + $0xb04] ss:$16 sps:$4 sm:$0xff]   ;;  %v10906_v43 = vld [vmem:[#allocation8 + $0x92c] ss:$16 sps:$4 sm:$0xff]  }
 0x317   :  { %7365 = vmatprep.subr.bf16.mxu1 %v10831_v41  ;;  %v10898_v41 = vld [vmem:[#allocation8 + $0x908] ss:$16 sps:$4 sm:$0xff]  }
 0x319   :  { %7796 = vmatpush1.bf16.msra.mxu0 %v10832_v44  ;;  %v10901_v44 = vld [vmem:[#allocation8 + $0xb20] ss:$16 sps:$4 sm:$0xff]  }
 0x31a   :  { %7366 = vmatpush1.bf16.msra.mxu1 %v10829_v42  ;;  %7797 = vmatprep.subr.bf16.mxu0 %v10840_v47  ;;  %v10903_v42 = vld [vmem:[#allocation8 + $0xb24] ss:$16 sps:$4 sm:$0xff]   ;;  %v10912_v47 = vld [vmem:[#allocation8 + $0x94c] ss:$16 sps:$4 sm:$0xff]  }
 0x31b   :  { %7367 = vmatprep.subr.bf16.mxu1 %v10837_v45  ;;  %v10904_v45 = vld [vmem:[#allocation8 + $0x928] ss:$16 sps:$4 sm:$0xff]  }
 0x31d   :  { %7798 = vmatpush1.bf16.msra.mxu0 %v10838_v48  ;;  %v10907_v48 = vld [vmem:[#allocation8 + $0xb40] ss:$16 sps:$4 sm:$0xff]  }
 0x31e   :  { %7368 = vmatpush1.bf16.msra.mxu1 %v10835_v46  ;;  %7799 = vmatprep.subr.bf16.mxu0 %v10846_v50  ;;  %v10909_v46 = vld [vmem:[#allocation8 + $0xb44] ss:$16 sps:$4 sm:$0xff]   ;;  %v10918_v50 = vld [vmem:[#allocation8 + $0x96c] ss:$16 sps:$4 sm:$0xff]  }
 0x31f   :  { %7369 = vmatprep.subr.bf16.mxu1 %v10843_v49  ;;  %v10910_v49 = vld [vmem:[#allocation8 + $0x948] ss:$16 sps:$4 sm:$0xff]  }
 0x321   :  { %7800 = vmatpush1.bf16.msra.mxu0 %v10844_v52  ;;  %v10913_v52 = vld [vmem:[#allocation8 + $0xb60] ss:$16 sps:$4 sm:$0xff]  }
 0x322   :  { %7370 = vmatpush1.bf16.msra.mxu1 %v10841_v51  ;;  %7812 = vmatprep.subr.bf16.mxu0 %v10852_v55  ;;  %v10915_v51 = vld [vmem:[#allocation8 + $0xb64] ss:$16 sps:$4 sm:$0xff]   ;;  %v10924_v55 = vld [vmem:[#allocation8 + $0x98c] ss:$16 sps:$4 sm:$0xff]  }
 0x323   :  { %7382 = vmatprep.subr.bf16.mxu1 %v10849_v53  ;;  %v10916_v53 = vld [vmem:[#allocation8 + $0x968] ss:$16 sps:$4 sm:$0xff]  }
 0x324   :  { %7802 = vmatmul.mubr.bf16.vlgmr.msra.gmra.mrb[24].mxu0 %v12005_v10  ;;  %v10865_v10 = vld [vmem:[#allocation8 + $0xa60] ss:$16 sps:$4 sm:$0xff]  }
 0x325   :  { %7372 = vmatmul.mubr.bf16.vlgmr.msra.gmra.mrb[20].mxu1 %v12025_v5  ;;  %7813 = vmatpush1.bf16.msra.mxu0 %v10850_v17  ;;  %v10919_v17 = vld [vmem:[#allocation8 + $0xb80] ss:$16 sps:$4 sm:$0xff]  }
 0x326   :  { %7383 = vmatpush1.bf16.msra.mxu1 %v10847_v54  ;;  %7414 = vmatprep.mubr.bf16.mxu1 %v12031_v21  ;;  %v10921_v54 = vld [vmem:[#allocation8 + $0xb84] ss:$16 sps:$4 sm:$0xff]  }
 0x327   :  { %7844 = vmatprep.mubr.bf16.mxu0 %v12029_v8  ;;  %7384 = vmatprep.subr.bf16.mxu1 %v10855_v29  ;;  %v10871_v8 = vld [vmem:[#allocation8 + $0xa80] ss:$16 sps:$4 sm:$0xff]   ;;  %v10922_v29 = vld [vmem:[#allocation8 + $0x988] ss:$16 sps:$4 sm:$0xff]  }
 0x328   :  { %7814 = vmatprep.subr.bf16.mxu0 %v10858_v34  ;;  %v10925_v34 = vld [vmem:[#allocation8 + $0xba0] ss:$16 sps:$4 sm:$0xff]  }
 0x329   :  { %7815 = vmatpush1.bf16.msra.mxu0 %v10856_v26  ;;  %v10930_v26 = vld [vmem:[#allocation8 + $0x9ac] ss:$16 sps:$4 sm:$0xff]  }
 0x32a   :  { %7385 = vmatpush1.bf16.msra.mxu1 %v10853_v18  ;;  %7816 = vmatprep.subr.bf16.mxu0 %v10864_v14  ;;  %v10927_v18 = vld [vmem:[#allocation8 + $0xba4] ss:$16 sps:$4 sm:$0xff]  }
 0x32b   :  { %7386 = vmatprep.subr.bf16.mxu1 %v10861_v22  ;;  %v10928_v22 = vld [vmem:[#allocation8 + $0x9a8] ss:$16 sps:$4 sm:$0xff]   ;;  %v10933_v14 = vld [vmem:[#allocation8 + $0xbc4] ss:$16 sps:$4 sm:$0xff]  }
 0x32d   :  { %7817 = vmatpush1.bf16.msra.mxu0 %v10862_v57  ;;  %v10931_v57 = vld [vmem:[#allocation8 + $0xbc0] ss:$16 sps:$4 sm:$0xff]  }
 0x32e   :  { %7387 = vmatpush1.bf16.msra.mxu1 %v10859_v56  ;;  %7818 = vmatprep.subr.bf16.mxu0 %v10870_v60  ;;  %v10936_v56 = vld [vmem:[#allocation8 + $0x9cc] ss:$16 sps:$4 sm:$0xff]   ;;  %v10939_v60 = vld [vmem:[#allocation8 + $0xbe4] ss:$16 sps:$4 sm:$0xff]  }
 0x32f   :  { %7388 = vmatprep.subr.bf16.mxu1 %v10867_v59  ;;  %v10934_v59 = vld [vmem:[#allocation8 + $0x9c8] ss:$16 sps:$4 sm:$0xff]  }
 0x331   :  { %7819 = vmatpush1.bf16.msra.mxu0 %v10868_v62  ;;  %v10937_v62 = vld [vmem:[#allocation8 + $0xbe0] ss:$16 sps:$4 sm:$0xff]  }
 0x332   :  { %7389 = vmatpush1.bf16.msra.mxu1 %v10865_v10  ;;  %7820 = vmatprep.subr.bf16.mxu0 %v10876_v0  ;;  %v10942_v10 = vld [vmem:[#allocation8 + $0x9ec] ss:$16 sps:$4 sm:$0xff]   ;;  %v10945_v0 = vld [vmem:[#allocation8 + $0xc04] ss:$16 sps:$4 sm:$0xff]  }
 0x333   :  { %7390 = vmatprep.subr.bf16.mxu1 %v10873_v63  ;;  %v10940_v63 = vld [vmem:[#allocation8 + $0x9e8] ss:$16 sps:$4 sm:$0xff]  }
 0x335   :  { %7821 = vmatpush1.bf16.msra.mxu0 %v10874_v1  ;;  %v10943_v1 = vld [vmem:[#allocation8 + $0xc00] ss:$16 sps:$4 sm:$0xff]  }
 0x336   :  { %7391 = vmatpush1.bf16.msra.mxu1 %v10871_v8  ;;  %7822 = vmatprep.subr.bf16.mxu0 %v10882_v3  ;;  %v10948_v8 = vld [vmem:[#allocation8 + $0xa0c] ss:$16 sps:$4 sm:$0xff]   ;;  %v10951_v3 = vld [vmem:[#allocation8 + $0xc24] ss:$16 sps:$4 sm:$0xff]  }
 0x337   :  { %7392 = vmatprep.subr.bf16.mxu1 %v10879_v2  ;;  %v10946_v2 = vld [vmem:[#allocation8 + $0xa08] ss:$16 sps:$4 sm:$0xff]  }
 0x339   :  { %7823 = vmatpush1.bf16.msra.mxu0 %v10880_v19  ;;  %v10949_v19 = vld [vmem:[#allocation8 + $0xc20] ss:$16 sps:$4 sm:$0xff]  }
 0x33a   :  { %7393 = vmatpush1.bf16.msra.mxu1 %v10877_v7  ;;  %7824 = vmatprep.subr.bf16.mxu0 %v10888_v11  ;;  %v10954_v7 = vld [vmem:[#allocation8 + $0xa2c] ss:$16 sps:$4 sm:$0xff]   ;;  %v10957_v11 = vld [vmem:[#allocation8 + $0xc44] ss:$16 sps:$4 sm:$0xff]  }
 0x33b   :  { %7394 = vmatprep.subr.bf16.mxu1 %v10885_v20  ;;  %v10952_v20 = vld [vmem:[#allocation8 + $0xa28] ss:$16 sps:$4 sm:$0xff]  }
 0x33d   :  { %7825 = vmatpush1.bf16.msra.mxu0 %v10886_v30  ;;  %v10955_v30 = vld [vmem:[#allocation8 + $0xc40] ss:$16 sps:$4 sm:$0xff]  }
 0x33e   :  { %7395 = vmatpush1.bf16.msra.mxu1 %v10883_v27  ;;  %7826 = vmatprep.subr.bf16.mxu0 %v10894_v9  ;;  %v10960_v27 = vld [vmem:[#allocation8 + $0xa4c] ss:$16 sps:$4 sm:$0xff]   ;;  %v10963_v9 = vld [vmem:[#allocation8 + $0xc64] ss:$16 sps:$4 sm:$0xff]  }
 0x33f   :  { %7396 = vmatprep.subr.bf16.mxu1 %v10891_v31  ;;  %v10958_v31 = vld [vmem:[#allocation8 + $0xa48] ss:$16 sps:$4 sm:$0xff]  }
 0x341   :  { %7827 = vmatpush1.bf16.msra.mxu0 %v10892_v33  ;;  %v10964_v33 = vld [vmem:[#allocation8 + $0xa68] ss:$16 sps:$4 sm:$0xff]  }
 0x342   :  { %7397 = vmatpush1.bf16.msra.mxu1 %v10889_v32  ;;  %7828 = vmatprep.subr.bf16.mxu0 %v10900_v39  ;;  %v10961_v32 = vld [vmem:[#allocation8 + $0xc60] ss:$16 sps:$4 sm:$0xff]   ;;  %v10972_v39 = vld [vmem:[#allocation8 + $0xa8c] ss:$16 sps:$4 sm:$0xff]  }
 0x343   :  { %7398 = vmatprep.subr.bf16.mxu1 %v10897_v13  ;;  %v10969_v13 = vld [vmem:[#allocation8 + $0xc84] ss:$16 sps:$4 sm:$0xff]  }
 0x345   :  { %7829 = vmatpush1.bf16.msra.mxu0 %v10898_v41  ;;  %v10975_v41 = vld [vmem:[#allocation8 + $0xca4] ss:$16 sps:$4 sm:$0xff]  }
 0x346   :  { %7399 = vmatpush1.bf16.msra.mxu1 %v10895_v40  ;;  %7830 = vmatprep.subr.bf16.mxu0 %v10906_v43  ;;  %v10970_v40 = vld [vmem:[#allocation8 + $0xa88] ss:$16 sps:$4 sm:$0xff]   ;;  %v10973_v43 = vld [vmem:[#allocation8 + $0xca0] ss:$16 sps:$4 sm:$0xff]  }
 0x347   :  { %7400 = vmatprep.subr.bf16.mxu1 %v10903_v42  ;;  %v10978_v42 = vld [vmem:[#allocation8 + $0xaac] ss:$16 sps:$4 sm:$0xff]  }
 0x349   :  { %7831 = vmatpush1.bf16.msra.mxu0 %v10904_v45  ;;  %v10981_v45 = vld [vmem:[#allocation8 + $0xcc4] ss:$16 sps:$4 sm:$0xff]  }
 0x34a   :  { %7401 = vmatpush1.bf16.msra.mxu1 %v10901_v44  ;;  %7832 = vmatprep.subr.bf16.mxu0 %v10912_v47  ;;  %v10976_v44 = vld [vmem:[#allocation8 + $0xaa8] ss:$16 sps:$4 sm:$0xff]   ;;  %v10979_v47 = vld [vmem:[#allocation8 + $0xcc0] ss:$16 sps:$4 sm:$0xff]  }
 0x34b   :  { %7402 = vmatprep.subr.bf16.mxu1 %v10909_v46  ;;  %v10984_v46 = vld [vmem:[#allocation8 + $0xacc] ss:$16 sps:$4 sm:$0xff]  }
 0x34d   :  { %7833 = vmatpush1.bf16.msra.mxu0 %v10910_v49  ;;  %v10987_v49 = vld [vmem:[#allocation8 + $0xce4] ss:$16 sps:$4 sm:$0xff]  }
 0x34e   :  { %7403 = vmatpush1.bf16.msra.mxu1 %v10907_v48  ;;  %7834 = vmatprep.subr.bf16.mxu0 %v10918_v50  ;;  %v10982_v48 = vld [vmem:[#allocation8 + $0xac8] ss:$16 sps:$4 sm:$0xff]   ;;  %v10985_v50 = vld [vmem:[#allocation8 + $0xce0] ss:$16 sps:$4 sm:$0xff]  }
 0x34f   :  { %7404 = vmatprep.subr.bf16.mxu1 %v10915_v51  ;;  %v10990_v51 = vld [vmem:[#allocation8 + $0xaec] ss:$16 sps:$4 sm:$0xff]  }
 0x351   :  { %7835 = vmatpush1.bf16.msra.mxu0 %v10916_v53  ;;  %v10993_v53 = vld [vmem:[#allocation8 + $0xd04] ss:$16 sps:$4 sm:$0xff]  }
 0x352   :  { %7405 = vmatpush1.bf16.msra.mxu1 %v10913_v52  ;;  %7836 = vmatprep.subr.bf16.mxu0 %v10924_v55  ;;  %v10988_v52 = vld [vmem:[#allocation8 + $0xae8] ss:$16 sps:$4 sm:$0xff]   ;;  %v10991_v55 = vld [vmem:[#allocation8 + $0xd00] ss:$16 sps:$4 sm:$0xff]  }
 0x353   :  { %7406 = vmatprep.subr.bf16.mxu1 %v10921_v54  ;;  %v10996_v54 = vld [vmem:[#allocation8 + $0xb0c] ss:$16 sps:$4 sm:$0xff]  }
 0x355   :  { %7837 = vmatpush1.bf16.msra.mxu0 %v10922_v29  ;;  %v10999_v29 = vld [vmem:[#allocation8 + $0xd24] ss:$16 sps:$4 sm:$0xff]  }
 0x356   :  { %7407 = vmatpush1.bf16.msra.mxu1 %v10919_v17  ;;  %7838 = vmatprep.subr.bf16.mxu0 %v10930_v26  ;;  %v10994_v17 = vld [vmem:[#allocation8 + $0xb08] ss:$16 sps:$4 sm:$0xff]   ;;  %v10997_v26 = vld [vmem:[#allocation8 + $0xd20] ss:$16 sps:$4 sm:$0xff]  }
 0x357   :  { %7408 = vmatprep.subr.bf16.mxu1 %v10927_v18  ;;  %v11002_v18 = vld [vmem:[#allocation8 + $0xb2c] ss:$16 sps:$4 sm:$0xff]  }
 0x359   :  { %7839 = vmatpush1.bf16.msra.mxu0 %v10928_v22  ;;  %v11005_v22 = vld [vmem:[#allocation8 + $0xd44] ss:$16 sps:$4 sm:$0xff]  }
 0x35a   :  { %7409 = vmatpush1.bf16.msra.mxu1 %v10925_v34  ;;  %7840 = vmatprep.subr.bf16.mxu0 %v10936_v56  ;;  %v11000_v34 = vld [vmem:[#allocation8 + $0xb28] ss:$16 sps:$4 sm:$0xff]   ;;  %v11003_v56 = vld [vmem:[#allocation8 + $0xd40] ss:$16 sps:$4 sm:$0xff]  }
 0x35b   :  { %7410 = vmatprep.subr.bf16.mxu1 %v10933_v14  ;;  %v11008_v14 = vld [vmem:[#allocation8 + $0xb4c] ss:$16 sps:$4 sm:$0xff]  }
 0x35d   :  { %7841 = vmatpush1.bf16.msra.mxu0 %v10934_v59  ;;  %v11011_v59 = vld [vmem:[#allocation8 + $0xd64] ss:$16 sps:$4 sm:$0xff]  }
 0x35e   :  { %7411 = vmatpush1.bf16.msra.mxu1 %v10931_v57  ;;  %7842 = vmatprep.subr.bf16.mxu0 %v10942_v10  ;;  %v11006_v57 = vld [vmem:[#allocation8 + $0xb48] ss:$16 sps:$4 sm:$0xff]   ;;  %v11009_v10 = vld [vmem:[#allocation8 + $0xd60] ss:$16 sps:$4 sm:$0xff]  }
 0x35f   :  { %7412 = vmatprep.subr.bf16.mxu1 %v10939_v60  ;;  %v11014_v60 = vld [vmem:[#allocation8 + $0xb6c] ss:$16 sps:$4 sm:$0xff]  }
 0x361   :  { %7843 = vmatpush1.bf16.msra.mxu0 %v10940_v63  ;;  %v11017_v63 = vld [vmem:[#allocation8 + $0xd84] ss:$16 sps:$4 sm:$0xff]  }
 0x362   :  { %7413 = vmatpush1.bf16.msra.mxu1 %v10937_v62  ;;  %7855 = vmatprep.subr.bf16.mxu0 %v10948_v8  ;;  %v11012_v62 = vld [vmem:[#allocation8 + $0xb68] ss:$16 sps:$4 sm:$0xff]   ;;  %v11015_v8 = vld [vmem:[#allocation8 + $0xd80] ss:$16 sps:$4 sm:$0xff]  }
 0x363   :  { %7425 = vmatprep.subr.bf16.mxu1 %v10945_v0  ;;  %v11020_v0 = vld [vmem:[#allocation8 + $0xb8c] ss:$16 sps:$4 sm:$0xff]  }
 0x364   :  { %7845 = vmatmul.mubr.bf16.vlgmr.msra.gmra.mrb[24].mxu0 %v12025_v5  ;;  %v10966_v5 = vld [vmem:[#allocation8 + $0xa6c] ss:$16 sps:$4 sm:$0xff]  }
 0x365   :  { %7415 = vmatmul.mubr.bf16.vlgmr.msra.gmra.mrb[20].mxu1 %v12027_v6  ;;  %7856 = vmatpush1.bf16.msra.mxu0 %v10946_v2  ;;  %v11023_v2 = vld [vmem:[#allocation8 + $0xda4] ss:$16 sps:$4 sm:$0xff]  }
 0x366   :  { %7426 = vmatpush1.bf16.msra.mxu1 %v10943_v1  ;;  %7457 = vmatprep.mubr.bf16.mxu1 %v12051_v16  ;;  %v11018_v1 = vld [vmem:[#allocation8 + $0xb88] ss:$16 sps:$4 sm:$0xff]  }
 0x367   :  { %7887 = vmatprep.mubr.bf16.mxu0 %v12031_v21  ;;  %7427 = vmatprep.subr.bf16.mxu1 %v10951_v3  ;;  %v10967_v21 = vld [vmem:[#allocation8 + $0xc80] ss:$16 sps:$4 sm:$0xff]   ;;  %v11026_v3 = vld [vmem:[#allocation8 + $0xbac] ss:$16 sps:$4 sm:$0xff]  }
 0x368   :  { %7857 = vmatprep.subr.bf16.mxu0 %v10954_v7  ;;  %v11021_v7 = vld [vmem:[#allocation8 + $0xda0] ss:$16 sps:$4 sm:$0xff]  }
 0x369   :  { %7858 = vmatpush1.bf16.msra.mxu0 %v10952_v20  ;;  %v11029_v20 = vld [vmem:[#allocation8 + $0xdc4] ss:$16 sps:$4 sm:$0xff]  }
 0x36a   :  { %7428 = vmatpush1.bf16.msra.mxu1 %v10949_v19  ;;  %7859 = vmatprep.subr.bf16.mxu0 %v10960_v27  ;;  %v11024_v19 = vld [vmem:[#allocation8 + $0xba8] ss:$16 sps:$4 sm:$0xff]   ;;  %v11027_v27 = vld [vmem:[#allocation8 + $0xdc0] ss:$16 sps:$4 sm:$0xff]  }
 0x36b   :  { %7429 = vmatprep.subr.bf16.mxu1 %v10957_v11  ;;  %v11032_v11 = vld [vmem:[#allocation8 + $0xbcc] ss:$16 sps:$4 sm:$0xff]  }
 0x36d   :  { %7860 = vmatpush1.bf16.msra.mxu0 %v10958_v31  ;;  %v11035_v31 = vld [vmem:[#allocation8 + $0xde4] ss:$16 sps:$4 sm:$0xff]  }
 0x36e   :  { %7430 = vmatpush1.bf16.msra.mxu1 %v10955_v30  ;;  %7861 = vmatprep.subr.bf16.mxu0 %v10966_v5  ;;  %v11030_v30 = vld [vmem:[#allocation8 + $0xbc8] ss:$16 sps:$4 sm:$0xff]   ;;  %v11033_v5 = vld [vmem:[#allocation8 + $0xde0] ss:$16 sps:$4 sm:$0xff]  }
 0x36f   :  { %7431 = vmatprep.subr.bf16.mxu1 %v10963_v9  ;;  %v11038_v9 = vld [vmem:[#allocation8 + $0xbec] ss:$16 sps:$4 sm:$0xff]  }
 0x371   :  { %7862 = vmatpush1.bf16.msra.mxu0 %v10964_v33  ;;  %v11041_v33 = vld [vmem:[#allocation8 + $0xe04] ss:$16 sps:$4 sm:$0xff]  }
 0x372   :  { %7432 = vmatpush1.bf16.msra.mxu1 %v10961_v32  ;;  %7863 = vmatprep.subr.bf16.mxu0 %v10972_v39  ;;  %v11036_v32 = vld [vmem:[#allocation8 + $0xbe8] ss:$16 sps:$4 sm:$0xff]   ;;  %v11039_v39 = vld [vmem:[#allocation8 + $0xe00] ss:$16 sps:$4 sm:$0xff]  }
 0x373   :  { %7433 = vmatprep.subr.bf16.mxu1 %v10969_v13  ;;  %v11044_v13 = vld [vmem:[#allocation8 + $0xc0c] ss:$16 sps:$4 sm:$0xff]  }
 0x375   :  { %7864 = vmatpush1.bf16.msra.mxu0 %v10970_v40  ;;  %v11047_v40 = vld [vmem:[#allocation8 + $0xe24] ss:$16 sps:$4 sm:$0xff]  }
 0x376   :  { %7434 = vmatpush1.bf16.msra.mxu1 %v10967_v21  ;;  %7865 = vmatprep.subr.bf16.mxu0 %v10978_v42  ;;  %v11042_v21 = vld [vmem:[#allocation8 + $0xc08] ss:$16 sps:$4 sm:$0xff]   ;;  %v11045_v42 = vld [vmem:[#allocation8 + $0xe20] ss:$16 sps:$4 sm:$0xff]  }
 0x377   :  { %7435 = vmatprep.subr.bf16.mxu1 %v10975_v41  ;;  %v11050_v41 = vld [vmem:[#allocation8 + $0xc2c] ss:$16 sps:$4 sm:$0xff]  }
 0x379   :  { %7866 = vmatpush1.bf16.msra.mxu0 %v10976_v44  ;;  %v11053_v44 = vld [vmem:[#allocation8 + $0xe44] ss:$16 sps:$4 sm:$0xff]  }
 0x37a   :  { %7436 = vmatpush1.bf16.msra.mxu1 %v10973_v43  ;;  %7867 = vmatprep.subr.bf16.mxu0 %v10984_v46  ;;  %v11048_v43 = vld [vmem:[#allocation8 + $0xc28] ss:$16 sps:$4 sm:$0xff]   ;;  %v11051_v46 = vld [vmem:[#allocation8 + $0xe40] ss:$16 sps:$4 sm:$0xff]  }
 0x37b   :  { %7437 = vmatprep.subr.bf16.mxu1 %v10981_v45  ;;  %v11056_v45 = vld [vmem:[#allocation8 + $0xc4c] ss:$16 sps:$4 sm:$0xff]  }
 0x37d   :  { %7868 = vmatpush1.bf16.msra.mxu0 %v10982_v48  ;;  %v11059_v48 = vld [vmem:[#allocation8 + $0xe64] ss:$16 sps:$4 sm:$0xff]  }
 0x37e   :  { %7438 = vmatpush1.bf16.msra.mxu1 %v10979_v47  ;;  %7869 = vmatprep.subr.bf16.mxu0 %v10990_v51  ;;  %v11054_v47 = vld [vmem:[#allocation8 + $0xc48] ss:$16 sps:$4 sm:$0xff]  }
 0x37f   :  { %7439 = vmatprep.subr.bf16.mxu1 %v10987_v49  ;;  %v11057_v49 = vld [vmem:[#allocation8 + $0xe60] ss:$16 sps:$4 sm:$0xff]   ;;  %v11060_v51 = vld [vmem:[#allocation8 + $0xc68] ss:$16 sps:$4 sm:$0xff]  }
 0x381   :  { %7870 = vmatpush1.bf16.msra.mxu0 %v10988_v52  ;;  %v11068_v52 = vld [vmem:[#allocation8 + $0xc8c] ss:$16 sps:$4 sm:$0xff]  }
 0x382   :  { %7440 = vmatpush1.bf16.msra.mxu1 %v10985_v50  ;;  %7871 = vmatprep.subr.bf16.mxu0 %v10996_v54  ;;  %v11065_v50 = vld [vmem:[#allocation8 + $0xe84] ss:$16 sps:$4 sm:$0xff]  }
 0x383   :  { %7441 = vmatprep.subr.bf16.mxu1 %v10993_v53  ;;  %v11066_v53 = vld [vmem:[#allocation8 + $0xc88] ss:$16 sps:$4 sm:$0xff]   ;;  %v11071_v54 = vld [vmem:[#allocation8 + $0xea4] ss:$16 sps:$4 sm:$0xff]  }
 0x385   :  { %7872 = vmatpush1.bf16.msra.mxu0 %v10994_v17  ;;  %v11069_v17 = vld [vmem:[#allocation8 + $0xea0] ss:$16 sps:$4 sm:$0xff]  }
 0x386   :  { %7442 = vmatpush1.bf16.msra.mxu1 %v10991_v55  ;;  %7873 = vmatprep.subr.bf16.mxu0 %v11002_v18  ;;  %v11074_v55 = vld [vmem:[#allocation8 + $0xcac] ss:$16 sps:$4 sm:$0xff]   ;;  %v11077_v18 = vld [vmem:[#allocation8 + $0xec4] ss:$16 sps:$4 sm:$0xff]  }
 0x387   :  { %7443 = vmatprep.subr.bf16.mxu1 %v10999_v29  ;;  %v11072_v29 = vld [vmem:[#allocation8 + $0xca8] ss:$16 sps:$4 sm:$0xff]  }
 0x389   :  { %7874 = vmatpush1.bf16.msra.mxu0 %v11000_v34  ;;  %v11075_v34 = vld [vmem:[#allocation8 + $0xec0] ss:$16 sps:$4 sm:$0xff]  }
 0x38a   :  { %7444 = vmatpush1.bf16.msra.mxu1 %v10997_v26  ;;  %7875 = vmatprep.subr.bf16.mxu0 %v11008_v14  ;;  %v11080_v26 = vld [vmem:[#allocation8 + $0xccc] ss:$16 sps:$4 sm:$0xff]   ;;  %v11083_v14 = vld [vmem:[#allocation8 + $0xee4] ss:$16 sps:$4 sm:$0xff]  }
 0x38b   :  { %7445 = vmatprep.subr.bf16.mxu1 %v11005_v22  ;;  %v11078_v22 = vld [vmem:[#allocation8 + $0xcc8] ss:$16 sps:$4 sm:$0xff]  }
 0x38d   :  { %7876 = vmatpush1.bf16.msra.mxu0 %v11006_v57  ;;  %v11081_v57 = vld [vmem:[#allocation8 + $0xee0] ss:$16 sps:$4 sm:$0xff]  }
 0x38e   :  { %7446 = vmatpush1.bf16.msra.mxu1 %v11003_v56  ;;  %7877 = vmatprep.subr.bf16.mxu0 %v11014_v60  ;;  %v11086_v56 = vld [vmem:[#allocation8 + $0xcec] ss:$16 sps:$4 sm:$0xff]   ;;  %v11089_v60 = vld [vmem:[#allocation8 + $0xf04] ss:$16 sps:$4 sm:$0xff]  }
 0x38f   :  { %7447 = vmatprep.subr.bf16.mxu1 %v11011_v59  ;;  %v11084_v59 = vld [vmem:[#allocation8 + $0xce8] ss:$16 sps:$4 sm:$0xff]  }
 0x391   :  { %7878 = vmatpush1.bf16.msra.mxu0 %v11012_v62  ;;  %v11087_v62 = vld [vmem:[#allocation8 + $0xf00] ss:$16 sps:$4 sm:$0xff]  }
 0x392   :  { %7448 = vmatpush1.bf16.msra.mxu1 %v11009_v10  ;;  %7879 = vmatprep.subr.bf16.mxu0 %v11020_v0  ;;  %v11092_v10 = vld [vmem:[#allocation8 + $0xd0c] ss:$16 sps:$4 sm:$0xff]   ;;  %v11095_v0 = vld [vmem:[#allocation8 + $0xf24] ss:$16 sps:$4 sm:$0xff]  }
 0x393   :  { %7449 = vmatprep.subr.bf16.mxu1 %v11017_v63  ;;  %v11090_v63 = vld [vmem:[#allocation8 + $0xd08] ss:$16 sps:$4 sm:$0xff]  }
 0x395   :  { %7880 = vmatpush1.bf16.msra.mxu0 %v11018_v1  ;;  %v11093_v1 = vld [vmem:[#allocation8 + $0xf20] ss:$16 sps:$4 sm:$0xff]  }
 0x396   :  { %7450 = vmatpush1.bf16.msra.mxu1 %v11015_v8  ;;  %7881 = vmatprep.subr.bf16.mxu0 %v11026_v3  ;;  %v11098_v8 = vld [vmem:[#allocation8 + $0xd2c] ss:$16 sps:$4 sm:$0xff]   ;;  %v11101_v3 = vld [vmem:[#allocation8 + $0xf44] ss:$16 sps:$4 sm:$0xff]  }
 0x397   :  { %7451 = vmatprep.subr.bf16.mxu1 %v11023_v2  ;;  %v11096_v2 = vld [vmem:[#allocation8 + $0xd28] ss:$16 sps:$4 sm:$0xff]  }
 0x399   :  { %7882 = vmatpush1.bf16.msra.mxu0 %v11024_v19  ;;  %v11099_v19 = vld [vmem:[#allocation8 + $0xf40] ss:$16 sps:$4 sm:$0xff]  }
 0x39a   :  { %7452 = vmatpush1.bf16.msra.mxu1 %v11021_v7  ;;  %7883 = vmatprep.subr.bf16.mxu0 %v11032_v11  ;;  %v11104_v7 = vld [vmem:[#allocation8 + $0xd4c] ss:$16 sps:$4 sm:$0xff]   ;;  %v11107_v11 = vld [vmem:[#allocation8 + $0xf64] ss:$16 sps:$4 sm:$0xff]  }
 0x39b   :  { %7453 = vmatprep.subr.bf16.mxu1 %v11029_v20  ;;  %v11102_v20 = vld [vmem:[#allocation8 + $0xd48] ss:$16 sps:$4 sm:$0xff]  }
 0x39d   :  { %7884 = vmatpush1.bf16.msra.mxu0 %v11030_v30  ;;  %v11105_v30 = vld [vmem:[#allocation8 + $0xf60] ss:$16 sps:$4 sm:$0xff]  }
 0x39e   :  { %7454 = vmatpush1.bf16.msra.mxu1 %v11027_v27  ;;  %7885 = vmatprep.subr.bf16.mxu0 %v11038_v9  ;;  %v11110_v27 = vld [vmem:[#allocation8 + $0xd6c] ss:$16 sps:$4 sm:$0xff]   ;;  %v11113_v9 = vld [vmem:[#allocation8 + $0xf84] ss:$16 sps:$4 sm:$0xff]  }
 0x39f   :  { %7455 = vmatprep.subr.bf16.mxu1 %v11035_v31  ;;  %v11108_v31 = vld [vmem:[#allocation8 + $0xd68] ss:$16 sps:$4 sm:$0xff]  }
 0x3a1   :  { %7886 = vmatpush1.bf16.msra.mxu0 %v11036_v32  ;;  %v11111_v32 = vld [vmem:[#allocation8 + $0xf80] ss:$16 sps:$4 sm:$0xff]  }
 0x3a2   :  { %7456 = vmatpush1.bf16.msra.mxu1 %v11033_v5  ;;  %7898 = vmatprep.subr.bf16.mxu0 %v11044_v13  ;;  %v11116_v5 = vld [vmem:[#allocation8 + $0xd8c] ss:$16 sps:$4 sm:$0xff]   ;;  %v11119_v13 = vld [vmem:[#allocation8 + $0xfa4] ss:$16 sps:$4 sm:$0xff]  }
 0x3a3   :  { %7468 = vmatprep.subr.bf16.mxu1 %v11041_v33  ;;  %v11114_v33 = vld [vmem:[#allocation8 + $0xd88] ss:$16 sps:$4 sm:$0xff]  }
 0x3a4   :  { %7888 = vmatmul.mubr.bf16.vlgmr.msra.gmra.mrb[24].mxu0 %v12027_v6  ;;  %v11062_v6 = vld [vmem:[#allocation8 + $0xc6c] ss:$16 sps:$4 sm:$0xff]  }
 0x3a5   :  { %7458 = vmatmul.mubr.bf16.vlgmr.msra.gmra.mrb[20].mxu1 %v12047_v12  ;;  %7899 = vmatpush1.bf16.msra.mxu0 %v11042_v21  ;;  %v11117_v21 = vld [vmem:[#allocation8 + $0xfa0] ss:$16 sps:$4 sm:$0xff]  }
 0x3a6   :  { %7469 = vmatpush1.bf16.msra.mxu1 %v11039_v39  ;;  %7500 = vmatprep.mubr.bf16.mxu1 %v12053_v24  ;;  %v11122_v39 = vld [vmem:[#allocation8 + $0xdac] ss:$16 sps:$4 sm:$0xff]  }
 0x3a7   :  { %7930 = vmatprep.mubr.bf16.mxu0 %v12051_v16  ;;  %7470 = vmatprep.subr.bf16.mxu1 %v11047_v40  ;;  %v11063_v16 = vld [vmem:[#allocation8 + $0xe80] ss:$16 sps:$4 sm:$0xff]   ;;  %v11120_v40 = vld [vmem:[#allocation8 + $0xda8] ss:$16 sps:$4 sm:$0xff]  }
 0x3a8   :  { %7900 = vmatprep.subr.bf16.mxu0 %v11050_v41  ;;  %v11125_v41 = vld [vmem:[#allocation8 + $0xfc4] ss:$16 sps:$4 sm:$0xff]  }
 0x3a9   :  { %7901 = vmatpush1.bf16.msra.mxu0 %v11048_v43  ;;  %v11123_v43 = vld [vmem:[#allocation8 + $0xfc0] ss:$16 sps:$4 sm:$0xff]  }
 0x3aa   :  { %7471 = vmatpush1.bf16.msra.mxu1 %v11045_v42  ;;  %7902 = vmatprep.subr.bf16.mxu0 %v11056_v45  ;;  %v11128_v42 = vld [vmem:[#allocation8 + $0xdcc] ss:$16 sps:$4 sm:$0xff]   ;;  %v11131_v45 = vld [vmem:[#allocation8 + $0xfe4] ss:$16 sps:$4 sm:$0xff]  }
 0x3ab   :  { %7472 = vmatprep.subr.bf16.mxu1 %v11053_v44  ;;  %v11126_v44 = vld [vmem:[#allocation8 + $0xdc8] ss:$16 sps:$4 sm:$0xff]  }
 0x3ad   :  { %7903 = vmatpush1.bf16.msra.mxu0 %v11054_v47  ;;  %v11129_v47 = vld [vmem:[#allocation8 + $0xfe0] ss:$16 sps:$4 sm:$0xff]  }
 0x3ae   :  { %7473 = vmatpush1.bf16.msra.mxu1 %v11051_v46  ;;  %7904 = vmatprep.subr.bf16.mxu0 %v11062_v6  ;;  %v11134_v46 = vld [vmem:[#allocation8 + $0xdec] ss:$16 sps:$4 sm:$0xff]   ;;  %v11137_v6 = vld [vmem:[#allocation8 + $0x1004] ss:$16 sps:$4 sm:$0xff]  }
 0x3af   :  { %7474 = vmatprep.subr.bf16.mxu1 %v11059_v48  ;;  %v11132_v48 = vld [vmem:[#allocation8 + $0xde8] ss:$16 sps:$4 sm:$0xff]  }
 0x3b1   :  { %7905 = vmatpush1.bf16.msra.mxu0 %v11060_v51  ;;  %v11135_v51 = vld [vmem:[#allocation8 + $0x1000] ss:$16 sps:$4 sm:$0xff]  }
 0x3b2   :  { %7475 = vmatpush1.bf16.msra.mxu1 %v11057_v49  ;;  %7906 = vmatprep.subr.bf16.mxu0 %v11068_v52  ;;  %v11140_v49 = vld [vmem:[#allocation8 + $0xe0c] ss:$16 sps:$4 sm:$0xff]   ;;  %v11143_v52 = vld [vmem:[#allocation8 + $0x1024] ss:$16 sps:$4 sm:$0xff]  }
 0x3b3   :  { %7476 = vmatprep.subr.bf16.mxu1 %v11065_v50  ;;  %v11138_v50 = vld [vmem:[#allocation8 + $0xe08] ss:$16 sps:$4 sm:$0xff]  }
 0x3b5   :  { %7907 = vmatpush1.bf16.msra.mxu0 %v11066_v53  ;;  %v11141_v53 = vld [vmem:[#allocation8 + $0x1020] ss:$16 sps:$4 sm:$0xff]  }
 0x3b6   :  { %7477 = vmatpush1.bf16.msra.mxu1 %v11063_v16  ;;  %7908 = vmatprep.subr.bf16.mxu0 %v11074_v55  ;;  %v11146_v16 = vld [vmem:[#allocation8 + $0xe2c] ss:$16 sps:$4 sm:$0xff]   ;;  %v11149_v55 = vld [vmem:[#allocation8 + $0x1044] ss:$16 sps:$4 sm:$0xff]  }
 0x3b7   :  { %7478 = vmatprep.subr.bf16.mxu1 %v11071_v54  ;;  %v11144_v54 = vld [vmem:[#allocation8 + $0xe28] ss:$16 sps:$4 sm:$0xff]  }
 0x3b9   :  { %7909 = vmatpush1.bf16.msra.mxu0 %v11072_v29  ;;  %v11147_v29 = vld [vmem:[#allocation8 + $0x1040] ss:$16 sps:$4 sm:$0xff]  }
 0x3ba   :  { %7479 = vmatpush1.bf16.msra.mxu1 %v11069_v17  ;;  %7910 = vmatprep.subr.bf16.mxu0 %v11080_v26  ;;  %v11152_v17 = vld [vmem:[#allocation8 + $0xe4c] ss:$16 sps:$4 sm:$0xff]   ;;  %v11155_v26 = vld [vmem:[#allocation8 + $0x1064] ss:$16 sps:$4 sm:$0xff]  }
 0x3bb   :  { %7480 = vmatprep.subr.bf16.mxu1 %v11077_v18  ;;  %v11150_v18 = vld [vmem:[#allocation8 + $0xe48] ss:$16 sps:$4 sm:$0xff]  }
 0x3bd   :  { %7911 = vmatpush1.bf16.msra.mxu0 %v11078_v22  ;;  %v11156_v22 = vld [vmem:[#allocation8 + $0xe68] ss:$16 sps:$4 sm:$0xff]  }
 0x3be   :  { %7481 = vmatpush1.bf16.msra.mxu1 %v11075_v34  ;;  %7912 = vmatprep.subr.bf16.mxu0 %v11086_v56  ;;  %v11153_v34 = vld [vmem:[#allocation8 + $0x1060] ss:$16 sps:$4 sm:$0xff]   ;;  %v11164_v56 = vld [vmem:[#allocation8 + $0xe8c] ss:$16 sps:$4 sm:$0xff]  }
 0x3bf   :  { %7482 = vmatprep.subr.bf16.mxu1 %v11083_v14  ;;  %v11161_v14 = vld [vmem:[#allocation8 + $0x1084] ss:$16 sps:$4 sm:$0xff]  }
 0x3c1   :  { %7913 = vmatpush1.bf16.msra.mxu0 %v11084_v59  ;;  %v11167_v59 = vld [vmem:[#allocation8 + $0x10a4] ss:$16 sps:$4 sm:$0xff]  }
 0x3c2   :  { %7483 = vmatpush1.bf16.msra.mxu1 %v11081_v57  ;;  %7914 = vmatprep.subr.bf16.mxu0 %v11092_v10  ;;  %v11162_v57 = vld [vmem:[#allocation8 + $0xe88] ss:$16 sps:$4 sm:$0xff]   ;;  %v11165_v10 = vld [vmem:[#allocation8 + $0x10a0] ss:$16 sps:$4 sm:$0xff]  }
 0x3c3   :  { %7484 = vmatprep.subr.bf16.mxu1 %v11089_v60  ;;  %v11170_v60 = vld [vmem:[#allocation8 + $0xeac] ss:$16 sps:$4 sm:$0xff]  }
 0x3c5   :  { %7915 = vmatpush1.bf16.msra.mxu0 %v11090_v63  ;;  %v11173_v63 = vld [vmem:[#allocation8 + $0x10c4] ss:$16 sps:$4 sm:$0xff]  }
 0x3c6   :  { %7485 = vmatpush1.bf16.msra.mxu1 %v11087_v62  ;;  %7916 = vmatprep.subr.bf16.mxu0 %v11098_v8  ;;  %v11168_v62 = vld [vmem:[#allocation8 + $0xea8] ss:$16 sps:$4 sm:$0xff]   ;;  %v11171_v8 = vld [vmem:[#allocation8 + $0x10c0] ss:$16 sps:$4 sm:$0xff]  }
 0x3c7   :  { %7486 = vmatprep.subr.bf16.mxu1 %v11095_v0  ;;  %v11176_v0 = vld [vmem:[#allocation8 + $0xecc] ss:$16 sps:$4 sm:$0xff]  }
 0x3c9   :  { %7917 = vmatpush1.bf16.msra.mxu0 %v11096_v2  ;;  %v11179_v2 = vld [vmem:[#allocation8 + $0x10e4] ss:$16 sps:$4 sm:$0xff]  }
 0x3ca   :  { %7487 = vmatpush1.bf16.msra.mxu1 %v11093_v1  ;;  %7918 = vmatprep.subr.bf16.mxu0 %v11104_v7  ;;  %v11174_v1 = vld [vmem:[#allocation8 + $0xec8] ss:$16 sps:$4 sm:$0xff]   ;;  %v11177_v7 = vld [vmem:[#allocation8 + $0x10e0] ss:$16 sps:$4 sm:$0xff]  }
 0x3cb   :  { %7488 = vmatprep.subr.bf16.mxu1 %v11101_v3  ;;  %v11182_v3 = vld [vmem:[#allocation8 + $0xeec] ss:$16 sps:$4 sm:$0xff]  }
 0x3cd   :  { %7919 = vmatpush1.bf16.msra.mxu0 %v11102_v20  ;;  %v11185_v20 = vld [vmem:[#allocation8 + $0x1104] ss:$16 sps:$4 sm:$0xff]  }
 0x3ce   :  { %7489 = vmatpush1.bf16.msra.mxu1 %v11099_v19  ;;  %7920 = vmatprep.subr.bf16.mxu0 %v11110_v27  ;;  %v11180_v19 = vld [vmem:[#allocation8 + $0xee8] ss:$16 sps:$4 sm:$0xff]   ;;  %v11183_v27 = vld [vmem:[#allocation8 + $0x1100] ss:$16 sps:$4 sm:$0xff]  }
 0x3cf   :  { %7490 = vmatprep.subr.bf16.mxu1 %v11107_v11  ;;  %v11188_v11 = vld [vmem:[#allocation8 + $0xf0c] ss:$16 sps:$4 sm:$0xff]  }
 0x3d1   :  { %7921 = vmatpush1.bf16.msra.mxu0 %v11108_v31  ;;  %v11191_v31 = vld [vmem:[#allocation8 + $0x1124] ss:$16 sps:$4 sm:$0xff]  }
 0x3d2   :  { %7491 = vmatpush1.bf16.msra.mxu1 %v11105_v30  ;;  %7922 = vmatprep.subr.bf16.mxu0 %v11116_v5  ;;  %v11186_v30 = vld [vmem:[#allocation8 + $0xf08] ss:$16 sps:$4 sm:$0xff]   ;;  %v11189_v5 = vld [vmem:[#allocation8 + $0x1120] ss:$16 sps:$4 sm:$0xff]  }
 0x3d3   :  { %7492 = vmatprep.subr.bf16.mxu1 %v11113_v9  ;;  %v11194_v9 = vld [vmem:[#allocation8 + $0xf2c] ss:$16 sps:$4 sm:$0xff]  }
 0x3d5   :  { %7923 = vmatpush1.bf16.msra.mxu0 %v11114_v33  ;;  %v11197_v33 = vld [vmem:[#allocation8 + $0x1144] ss:$16 sps:$4 sm:$0xff]  }
 0x3d6   :  { %7493 = vmatpush1.bf16.msra.mxu1 %v11111_v32  ;;  %7924 = vmatprep.subr.bf16.mxu0 %v11122_v39  ;;  %v11192_v32 = vld [vmem:[#allocation8 + $0xf28] ss:$16 sps:$4 sm:$0xff]   ;;  %v11195_v39 = vld [vmem:[#allocation8 + $0x1140] ss:$16 sps:$4 sm:$0xff]  }
 0x3d7   :  { %7494 = vmatprep.subr.bf16.mxu1 %v11119_v13  ;;  %v11200_v13 = vld [vmem:[#allocation8 + $0xf4c] ss:$16 sps:$4 sm:$0xff]  }
 0x3d9   :  { %7925 = vmatpush1.bf16.msra.mxu0 %v11120_v40  ;;  %v11203_v40 = vld [vmem:[#allocation8 + $0x1164] ss:$16 sps:$4 sm:$0xff]  }
 0x3da   :  { %7495 = vmatpush1.bf16.msra.mxu1 %v11117_v21  ;;  %7926 = vmatprep.subr.bf16.mxu0 %v11128_v42  ;;  %v11198_v21 = vld [vmem:[#allocation8 + $0xf48] ss:$16 sps:$4 sm:$0xff]   ;;  %v11201_v42 = vld [vmem:[#allocation8 + $0x1160] ss:$16 sps:$4 sm:$0xff]  }
 0x3db   :  { %7496 = vmatprep.subr.bf16.mxu1 %v11125_v41  ;;  %v11206_v41 = vld [vmem:[#allocation8 + $0xf6c] ss:$16 sps:$4 sm:$0xff]  }
 0x3dd   :  { %7927 = vmatpush1.bf16.msra.mxu0 %v11126_v44  ;;  %v11209_v44 = vld [vmem:[#allocation8 + $0x1184] ss:$16 sps:$4 sm:$0xff]  }
 0x3de   :  { %7497 = vmatpush1.bf16.msra.mxu1 %v11123_v43  ;;  %7928 = vmatprep.subr.bf16.mxu0 %v11134_v46  ;;  %v11204_v43 = vld [vmem:[#allocation8 + $0xf68] ss:$16 sps:$4 sm:$0xff]   ;;  %v11207_v46 = vld [vmem:[#allocation8 + $0x1180] ss:$16 sps:$4 sm:$0xff]  }
 0x3df   :  { %7498 = vmatprep.subr.bf16.mxu1 %v11131_v45  ;;  %v11212_v45 = vld [vmem:[#allocation8 + $0xf8c] ss:$16 sps:$4 sm:$0xff]  }
 0x3e1   :  { %7929 = vmatpush1.bf16.msra.mxu0 %v11132_v48  ;;  %v11215_v48 = vld [vmem:[#allocation8 + $0x11a4] ss:$16 sps:$4 sm:$0xff]  }
 0x3e2   :  { %7499 = vmatpush1.bf16.msra.mxu1 %v11129_v47  ;;  %7941 = vmatprep.subr.bf16.mxu0 %v11140_v49  ;;  %v11210_v47 = vld [vmem:[#allocation8 + $0xf88] ss:$16 sps:$4 sm:$0xff]   ;;  %v11213_v49 = vld [vmem:[#allocation8 + $0x11a0] ss:$16 sps:$4 sm:$0xff]  }
 0x3e3   :  { %7511 = vmatprep.subr.bf16.mxu1 %v11137_v6  ;;  %v11218_v6 = vld [vmem:[#allocation8 + $0xfac] ss:$16 sps:$4 sm:$0xff]  }
 0x3e4   :  { %7931 = vmatmul.mubr.bf16.vlgmr.msra.gmra.mrb[24].mxu0 %v12047_v12  ;;  %v11158_v12 = vld [vmem:[#allocation8 + $0xe6c] ss:$16 sps:$4 sm:$0xff]  }
 0x3e5   :  { %7501 = vmatmul.mubr.bf16.vlgmr.msra.gmra.mrb[20].mxu1 %v12049_v15  ;;  %7942 = vmatpush1.bf16.msra.mxu0 %v11138_v50  ;;  %v11221_v50 = vld [vmem:[#allocation8 + $0x11c4] ss:$16 sps:$4 sm:$0xff]  }
 0x3e6   :  { %7512 = vmatpush1.bf16.msra.mxu1 %v11135_v51  ;;  %7543 = vmatprep.mubr.bf16.mxu1 %v12073_v23  ;;  %v11216_v51 = vld [vmem:[#allocation8 + $0xfa8] ss:$16 sps:$4 sm:$0xff]  }
 0x3e7   :  { %7973 = vmatprep.mubr.bf16.mxu0 %v12053_v24  ;;  %7513 = vmatprep.subr.bf16.mxu1 %v11143_v52  ;;  %v11159_v24 = vld [vmem:[#allocation8 + $0x1080] ss:$16 sps:$4 sm:$0xff]   ;;  %v11224_v52 = vld [vmem:[#allocation8 + $0xfcc] ss:$16 sps:$4 sm:$0xff]  }
 0x3e8   :  { %7943 = vmatprep.subr.bf16.mxu0 %v11146_v16  ;;  %v11219_v16 = vld [vmem:[#allocation8 + $0x11c0] ss:$16 sps:$4 sm:$0xff]  }
 0x3e9   :  { %7944 = vmatpush1.bf16.msra.mxu0 %v11144_v54  ;;  %v11227_v54 = vld [vmem:[#allocation8 + $0x11e4] ss:$16 sps:$4 sm:$0xff]  }
 0x3ea   :  { %7514 = vmatpush1.bf16.msra.mxu1 %v11141_v53  ;;  %7945 = vmatprep.subr.bf16.mxu0 %v11152_v17  ;;  %v11222_v53 = vld [vmem:[#allocation8 + $0xfc8] ss:$16 sps:$4 sm:$0xff]   ;;  %v11225_v17 = vld [vmem:[#allocation8 + $0x11e0] ss:$16 sps:$4 sm:$0xff]  }
 0x3eb   :  { %7515 = vmatprep.subr.bf16.mxu1 %v11149_v55  ;;  %v11230_v55 = vld [vmem:[#allocation8 + $0xfec] ss:$16 sps:$4 sm:$0xff]  }
 0x3ed   :  { %7946 = vmatpush1.bf16.msra.mxu0 %v11150_v18  ;;  %v11233_v18 = vld [vmem:[#allocation8 + $0x1204] ss:$16 sps:$4 sm:$0xff]  }
 0x3ee   :  { %7516 = vmatpush1.bf16.msra.mxu1 %v11147_v29  ;;  %7947 = vmatprep.subr.bf16.mxu0 %v11158_v12  ;;  %v11228_v29 = vld [vmem:[#allocation8 + $0xfe8] ss:$16 sps:$4 sm:$0xff]   ;;  %v11231_v12 = vld [vmem:[#allocation8 + $0x1200] ss:$16 sps:$4 sm:$0xff]  }
 0x3ef   :  { %7517 = vmatprep.subr.bf16.mxu1 %v11155_v26  ;;  %v11236_v26 = vld [vmem:[#allocation8 + $0x100c] ss:$16 sps:$4 sm:$0xff]  }
 0x3f1   :  { %7948 = vmatpush1.bf16.msra.mxu0 %v11156_v22  ;;  %v11239_v22 = vld [vmem:[#allocation8 + $0x1224] ss:$16 sps:$4 sm:$0xff]  }
 0x3f2   :  { %7518 = vmatpush1.bf16.msra.mxu1 %v11153_v34  ;;  %7949 = vmatprep.subr.bf16.mxu0 %v11164_v56  ;;  %v11234_v34 = vld [vmem:[#allocation8 + $0x1008] ss:$16 sps:$4 sm:$0xff]   ;;  %v11237_v56 = vld [vmem:[#allocation8 + $0x1220] ss:$16 sps:$4 sm:$0xff]  }
 0x3f3   :  { %7519 = vmatprep.subr.bf16.mxu1 %v11161_v14  ;;  %v11242_v14 = vld [vmem:[#allocation8 + $0x102c] ss:$16 sps:$4 sm:$0xff]  }
 0x3f5   :  { %7950 = vmatpush1.bf16.msra.mxu0 %v11162_v57  ;;  %v11245_v57 = vld [vmem:[#allocation8 + $0x1244] ss:$16 sps:$4 sm:$0xff]  }
 0x3f6   :  { %7520 = vmatpush1.bf16.msra.mxu1 %v11159_v24  ;;  %7951 = vmatprep.subr.bf16.mxu0 %v11170_v60  ;;  %v11240_v24 = vld [vmem:[#allocation8 + $0x1028] ss:$16 sps:$4 sm:$0xff]   ;;  %v11243_v60 = vld [vmem:[#allocation8 + $0x1240] ss:$16 sps:$4 sm:$0xff]  }
 0x3f7   :  { %7521 = vmatprep.subr.bf16.mxu1 %v11167_v59  ;;  %v11248_v59 = vld [vmem:[#allocation8 + $0x104c] ss:$16 sps:$4 sm:$0xff]  }
 0x3f9   :  { %7952 = vmatpush1.bf16.msra.mxu0 %v11168_v62  ;;  %v11251_v62 = vld [vmem:[#allocation8 + $0x1264] ss:$16 sps:$4 sm:$0xff]  }
 0x3fa   :  { %7522 = vmatpush1.bf16.msra.mxu1 %v11165_v10  ;;  %7953 = vmatprep.subr.bf16.mxu0 %v11176_v0  ;;  %v11246_v10 = vld [vmem:[#allocation8 + $0x1048] ss:$16 sps:$4 sm:$0xff]  }
 0x3fb   :  { %7523 = vmatprep.subr.bf16.mxu1 %v11173_v63  ;;  %v11249_v63 = vld [vmem:[#allocation8 + $0x1260] ss:$16 sps:$4 sm:$0xff]   ;;  %v11252_v0 = vld [vmem:[#allocation8 + $0x1068] ss:$16 sps:$4 sm:$0xff]  }
 0x3fd   :  { %7954 = vmatpush1.bf16.msra.mxu0 %v11174_v1  ;;  %v11260_v1 = vld [vmem:[#allocation8 + $0x108c] ss:$16 sps:$4 sm:$0xff]  }
 0x3fe   :  { %7524 = vmatpush1.bf16.msra.mxu1 %v11171_v8  ;;  %7955 = vmatprep.subr.bf16.mxu0 %v11182_v3  ;;  %v11257_v8 = vld [vmem:[#allocation8 + $0x1284] ss:$16 sps:$4 sm:$0xff]  }
 0x3ff   :  { %7525 = vmatprep.subr.bf16.mxu1 %v11179_v2  ;;  %v11258_v2 = vld [vmem:[#allocation8 + $0x1088] ss:$16 sps:$4 sm:$0xff]   ;;  %v11263_v3 = vld [vmem:[#allocation8 + $0x12a4] ss:$16 sps:$4 sm:$0xff]  }
 0x401   :  { %7956 = vmatpush1.bf16.msra.mxu0 %v11180_v19  ;;  %v11261_v19 = vld [vmem:[#allocation8 + $0x12a0] ss:$16 sps:$4 sm:$0xff]  }
 0x402   :  { %7526 = vmatpush1.bf16.msra.mxu1 %v11177_v7  ;;  %7957 = vmatprep.subr.bf16.mxu0 %v11188_v11  ;;  %v11266_v7 = vld [vmem:[#allocation8 + $0x10ac] ss:$16 sps:$4 sm:$0xff]   ;;  %v11269_v11 = vld [vmem:[#allocation8 + $0x12c4] ss:$16 sps:$4 sm:$0xff]  }
 0x403   :  { %7527 = vmatprep.subr.bf16.mxu1 %v11185_v20  ;;  %v11264_v20 = vld [vmem:[#allocation8 + $0x10a8] ss:$16 sps:$4 sm:$0xff]  }
 0x405   :  { %7958 = vmatpush1.bf16.msra.mxu0 %v11186_v30  ;;  %v11267_v30 = vld [vmem:[#allocation8 + $0x12c0] ss:$16 sps:$4 sm:$0xff]  }
 0x406   :  { %7528 = vmatpush1.bf16.msra.mxu1 %v11183_v27  ;;  %7959 = vmatprep.subr.bf16.mxu0 %v11194_v9  ;;  %v11272_v27 = vld [vmem:[#allocation8 + $0x10cc] ss:$16 sps:$4 sm:$0xff]   ;;  %v11275_v9 = vld [vmem:[#allocation8 + $0x12e4] ss:$16 sps:$4 sm:$0xff]  }
 0x407   :  { %7529 = vmatprep.subr.bf16.mxu1 %v11191_v31  ;;  %v11270_v31 = vld [vmem:[#allocation8 + $0x10c8] ss:$16 sps:$4 sm:$0xff]  }
 0x409   :  { %7960 = vmatpush1.bf16.msra.mxu0 %v11192_v32  ;;  %v11273_v32 = vld [vmem:[#allocation8 + $0x12e0] ss:$16 sps:$4 sm:$0xff]  }
 0x40a   :  { %7530 = vmatpush1.bf16.msra.mxu1 %v11189_v5  ;;  %7961 = vmatprep.subr.bf16.mxu0 %v11200_v13  ;;  %v11278_v5 = vld [vmem:[#allocation8 + $0x10ec] ss:$16 sps:$4 sm:$0xff]   ;;  %v11281_v13 = vld [vmem:[#allocation8 + $0x1304] ss:$16 sps:$4 sm:$0xff]  }
 0x40b   :  { %7531 = vmatprep.subr.bf16.mxu1 %v11197_v33  ;;  %v11276_v33 = vld [vmem:[#allocation8 + $0x10e8] ss:$16 sps:$4 sm:$0xff]  }
 0x40d   :  { %7962 = vmatpush1.bf16.msra.mxu0 %v11198_v21  ;;  %v11279_v21 = vld [vmem:[#allocation8 + $0x1300] ss:$16 sps:$4 sm:$0xff]  }
 0x40e   :  { %7532 = vmatpush1.bf16.msra.mxu1 %v11195_v39  ;;  %7963 = vmatprep.subr.bf16.mxu0 %v11206_v41  ;;  %v11284_v39 = vld [vmem:[#allocation8 + $0x110c] ss:$16 sps:$4 sm:$0xff]   ;;  %v11287_v41 = vld [vmem:[#allocation8 + $0x1324] ss:$16 sps:$4 sm:$0xff]  }
 0x40f   :  { %7533 = vmatprep.subr.bf16.mxu1 %v11203_v40  ;;  %v11282_v40 = vld [vmem:[#allocation8 + $0x1108] ss:$16 sps:$4 sm:$0xff]  }
 0x411   :  { %7964 = vmatpush1.bf16.msra.mxu0 %v11204_v43  ;;  %v11285_v43 = vld [vmem:[#allocation8 + $0x1320] ss:$16 sps:$4 sm:$0xff]  }
 0x412   :  { %7534 = vmatpush1.bf16.msra.mxu1 %v11201_v42  ;;  %7965 = vmatprep.subr.bf16.mxu0 %v11212_v45  ;;  %v11290_v42 = vld [vmem:[#allocation8 + $0x112c] ss:$16 sps:$4 sm:$0xff]   ;;  %v11293_v45 = vld [vmem:[#allocation8 + $0x1344] ss:$16 sps:$4 sm:$0xff]  }
 0x413   :  { %7535 = vmatprep.subr.bf16.mxu1 %v11209_v44  ;;  %v11288_v44 = vld [vmem:[#allocation8 + $0x1128] ss:$16 sps:$4 sm:$0xff]  }
 0x415   :  { %7966 = vmatpush1.bf16.msra.mxu0 %v11210_v47  ;;  %v11291_v47 = vld [vmem:[#allocation8 + $0x1340] ss:$16 sps:$4 sm:$0xff]  }
 0x416   :  { %7536 = vmatpush1.bf16.msra.mxu1 %v11207_v46  ;;  %7967 = vmatprep.subr.bf16.mxu0 %v11218_v6  ;;  %v11296_v46 = vld [vmem:[#allocation8 + $0x114c] ss:$16 sps:$4 sm:$0xff]   ;;  %v11299_v6 = vld [vmem:[#allocation8 + $0x1364] ss:$16 sps:$4 sm:$0xff]  }
 0x417   :  { %7537 = vmatprep.subr.bf16.mxu1 %v11215_v48  ;;  %v11294_v48 = vld [vmem:[#allocation8 + $0x1148] ss:$16 sps:$4 sm:$0xff]  }
 0x419   :  { %7968 = vmatpush1.bf16.msra.mxu0 %v11216_v51  ;;  %v11297_v51 = vld [vmem:[#allocation8 + $0x1360] ss:$16 sps:$4 sm:$0xff]  }
 0x41a   :  { %7538 = vmatpush1.bf16.msra.mxu1 %v11213_v49  ;;  %7969 = vmatprep.subr.bf16.mxu0 %v11224_v52  ;;  %v11302_v49 = vld [vmem:[#allocation8 + $0x116c] ss:$16 sps:$4 sm:$0xff]   ;;  %v11305_v52 = vld [vmem:[#allocation8 + $0x1384] ss:$16 sps:$4 sm:$0xff]  }
 0x41b   :  { %7539 = vmatprep.subr.bf16.mxu1 %v11221_v50  ;;  %v11300_v50 = vld [vmem:[#allocation8 + $0x1168] ss:$16 sps:$4 sm:$0xff]  }
 0x41d   :  { %7970 = vmatpush1.bf16.msra.mxu0 %v11222_v53  ;;  %v11303_v53 = vld [vmem:[#allocation8 + $0x1380] ss:$16 sps:$4 sm:$0xff]  }
 0x41e   :  { %7540 = vmatpush1.bf16.msra.mxu1 %v11219_v16  ;;  %7971 = vmatprep.subr.bf16.mxu0 %v11230_v55  ;;  %v11308_v16 = vld [vmem:[#allocation8 + $0x118c] ss:$16 sps:$4 sm:$0xff]   ;;  %v11311_v55 = vld [vmem:[#allocation8 + $0x13a4] ss:$16 sps:$4 sm:$0xff]  }
 0x41f   :  { %7541 = vmatprep.subr.bf16.mxu1 %v11227_v54  ;;  %v11306_v54 = vld [vmem:[#allocation8 + $0x1188] ss:$16 sps:$4 sm:$0xff]  }
 0x421   :  { %7972 = vmatpush1.bf16.msra.mxu0 %v11228_v29  ;;  %v11309_v29 = vld [vmem:[#allocation8 + $0x13a0] ss:$16 sps:$4 sm:$0xff]  }
 0x422   :  { %7542 = vmatpush1.bf16.msra.mxu1 %v11225_v17  ;;  %7984 = vmatprep.subr.bf16.mxu0 %v11236_v26  ;;  %v11314_v17 = vld [vmem:[#allocation8 + $0x11ac] ss:$16 sps:$4 sm:$0xff]   ;;  %v11317_v26 = vld [vmem:[#allocation8 + $0x13c4] ss:$16 sps:$4 sm:$0xff]  }
 0x423   :  { %7554 = vmatprep.subr.bf16.mxu1 %v11233_v18  ;;  %v11312_v18 = vld [vmem:[#allocation8 + $0x11a8] ss:$16 sps:$4 sm:$0xff]  }
 0x424   :  { %7974 = vmatmul.mubr.bf16.vlgmr.msra.gmra.mrb[24].mxu0 %v12049_v15  ;;  %v11254_v15 = vld [vmem:[#allocation8 + $0x106c] ss:$16 sps:$4 sm:$0xff]  }
 0x425   :  { %7544 = vmatmul.mubr.bf16.vlgmr.msra.gmra.mrb[20].mxu1 %v12069_v4  ;;  %7985 = vmatpush1.bf16.msra.mxu0 %v11234_v34  ;;  %v11315_v34 = vld [vmem:[#allocation8 + $0x13c0] ss:$16 sps:$4 sm:$0xff]  }
 0x426   :  { %7555 = vmatpush1.bf16.msra.mxu1 %v11231_v12  ;;  %7586 = vmatprep.mubr.bf16.mxu1 %v12075_v28  ;;  %v11320_v12 = vld [vmem:[#allocation8 + $0x11cc] ss:$16 sps:$4 sm:$0xff]  }
 0x427   :  { %8016 = vmatprep.mubr.bf16.mxu0 %v12073_v23  ;;  %7556 = vmatprep.subr.bf16.mxu1 %v11239_v22  ;;  %v11255_v23 = vld [vmem:[#allocation8 + $0x1280] ss:$16 sps:$4 sm:$0xff]   ;;  %v11318_v22 = vld [vmem:[#allocation8 + $0x11c8] ss:$16 sps:$4 sm:$0xff]  }
 0x428   :  { %7986 = vmatprep.subr.bf16.mxu0 %v11242_v14  ;;  %v11323_v14 = vld [vmem:[#allocation8 + $0x13e4] ss:$16 sps:$4 sm:$0xff]  }
 0x429   :  { %7987 = vmatpush1.bf16.msra.mxu0 %v11240_v24  ;;  %v11321_v24 = vld [vmem:[#allocation8 + $0x13e0] ss:$16 sps:$4 sm:$0xff]  }
 0x42a   :  { %7557 = vmatpush1.bf16.msra.mxu1 %v11237_v56  ;;  %7988 = vmatprep.subr.bf16.mxu0 %v11248_v59  ;;  %v11326_v56 = vld [vmem:[#allocation8 + $0x11ec] ss:$16 sps:$4 sm:$0xff]   ;;  %v11329_v59 = vld [vmem:[#allocation8 + $0x1404] ss:$16 sps:$4 sm:$0xff]  }
 0x42b   :  { %7558 = vmatprep.subr.bf16.mxu1 %v11245_v57  ;;  %v11324_v57 = vld [vmem:[#allocation8 + $0x11e8] ss:$16 sps:$4 sm:$0xff]  }
 0x42d   :  { %7989 = vmatpush1.bf16.msra.mxu0 %v11246_v10  ;;  %v11327_v10 = vld [vmem:[#allocation8 + $0x1400] ss:$16 sps:$4 sm:$0xff]  }
 0x42e   :  { %7559 = vmatpush1.bf16.msra.mxu1 %v11243_v60  ;;  %7990 = vmatprep.subr.bf16.mxu0 %v11254_v15  ;;  %v11332_v60 = vld [vmem:[#allocation8 + $0x120c] ss:$16 sps:$4 sm:$0xff]   ;;  %v11335_v15 = vld [vmem:[#allocation8 + $0x1424] ss:$16 sps:$4 sm:$0xff]  }
 0x42f   :  { %7560 = vmatprep.subr.bf16.mxu1 %v11251_v62  ;;  %v11330_v62 = vld [vmem:[#allocation8 + $0x1208] ss:$16 sps:$4 sm:$0xff]  }
 0x431   :  { %7991 = vmatpush1.bf16.msra.mxu0 %v11252_v0  ;;  %v11333_v0 = vld [vmem:[#allocation8 + $0x1420] ss:$16 sps:$4 sm:$0xff]  }
 0x432   :  { %7561 = vmatpush1.bf16.msra.mxu1 %v11249_v63  ;;  %7992 = vmatprep.subr.bf16.mxu0 %v11260_v1  ;;  %v11338_v63 = vld [vmem:[#allocation8 + $0x122c] ss:$16 sps:$4 sm:$0xff]   ;;  %v11341_v1 = vld [vmem:[#allocation8 + $0x1444] ss:$16 sps:$4 sm:$0xff]  }
 0x433   :  { %7562 = vmatprep.subr.bf16.mxu1 %v11257_v8  ;;  %v11336_v8 = vld [vmem:[#allocation8 + $0x1228] ss:$16 sps:$4 sm:$0xff]  }
 0x435   :  { %7993 = vmatpush1.bf16.msra.mxu0 %v11258_v2  ;;  %v11339_v2 = vld [vmem:[#allocation8 + $0x1440] ss:$16 sps:$4 sm:$0xff]  }
 0x436   :  { %7563 = vmatpush1.bf16.msra.mxu1 %v11255_v23  ;;  %7994 = vmatprep.subr.bf16.mxu0 %v11266_v7  ;;  %v11344_v23 = vld [vmem:[#allocation8 + $0x124c] ss:$16 sps:$4 sm:$0xff]   ;;  %v11347_v7 = vld [vmem:[#allocation8 + $0x1464] ss:$16 sps:$4 sm:$0xff]  }
 0x437   :  { %7564 = vmatprep.subr.bf16.mxu1 %v11263_v3  ;;  %v11342_v3 = vld [vmem:[#allocation8 + $0x1248] ss:$16 sps:$4 sm:$0xff]  }
 0x439   :  { %7995 = vmatpush1.bf16.msra.mxu0 %v11264_v20  ;;  %v11348_v20 = vld [vmem:[#allocation8 + $0x1268] ss:$16 sps:$4 sm:$0xff]  }
 0x43a   :  { %7565 = vmatpush1.bf16.msra.mxu1 %v11261_v19  ;;  %7996 = vmatprep.subr.bf16.mxu0 %v11272_v27  ;;  %v11345_v19 = vld [vmem:[#allocation8 + $0x1460] ss:$16 sps:$4 sm:$0xff]   ;;  %v11356_v27 = vld [vmem:[#allocation8 + $0x128c] ss:$16 sps:$4 sm:$0xff]  }
 0x43b   :  { %7566 = vmatprep.subr.bf16.mxu1 %v11269_v11  ;;  %v11353_v11 = vld [vmem:[#allocation8 + $0x1484] ss:$16 sps:$4 sm:$0xff]  }
 0x43d   :  { %7997 = vmatpush1.bf16.msra.mxu0 %v11270_v31  ;;  %v11359_v31 = vld [vmem:[#allocation8 + $0x14a4] ss:$16 sps:$4 sm:$0xff]  }
 0x43e   :  { %7567 = vmatpush1.bf16.msra.mxu1 %v11267_v30  ;;  %7998 = vmatprep.subr.bf16.mxu0 %v11278_v5  ;;  %v11354_v30 = vld [vmem:[#allocation8 + $0x1288] ss:$16 sps:$4 sm:$0xff]   ;;  %v11357_v5 = vld [vmem:[#allocation8 + $0x14a0] ss:$16 sps:$4 sm:$0xff]  }
 0x43f   :  { %7568 = vmatprep.subr.bf16.mxu1 %v11275_v9  ;;  %v11362_v9 = vld [vmem:[#allocation8 + $0x12ac] ss:$16 sps:$4 sm:$0xff]  }
 0x441   :  { %7999 = vmatpush1.bf16.msra.mxu0 %v11276_v33  ;;  %v11365_v33 = vld [vmem:[#allocation8 + $0x14c4] ss:$16 sps:$4 sm:$0xff]  }
 0x442   :  { %7569 = vmatpush1.bf16.msra.mxu1 %v11273_v32  ;;  %8000 = vmatprep.subr.bf16.mxu0 %v11284_v39  ;;  %v11360_v32 = vld [vmem:[#allocation8 + $0x12a8] ss:$16 sps:$4 sm:$0xff]   ;;  %v11363_v39 = vld [vmem:[#allocation8 + $0x14c0] ss:$16 sps:$4 sm:$0xff]  }
 0x443   :  { %7570 = vmatprep.subr.bf16.mxu1 %v11281_v13  ;;  %v11368_v13 = vld [vmem:[#allocation8 + $0x12cc] ss:$16 sps:$4 sm:$0xff]  }
 0x445   :  { %8001 = vmatpush1.bf16.msra.mxu0 %v11282_v40  ;;  %v11371_v40 = vld [vmem:[#allocation8 + $0x14e4] ss:$16 sps:$4 sm:$0xff]  }
 0x446   :  { %7571 = vmatpush1.bf16.msra.mxu1 %v11279_v21  ;;  %8002 = vmatprep.subr.bf16.mxu0 %v11290_v42  ;;  %v11366_v21 = vld [vmem:[#allocation8 + $0x12c8] ss:$16 sps:$4 sm:$0xff]   ;;  %v11369_v42 = vld [vmem:[#allocation8 + $0x14e0] ss:$16 sps:$4 sm:$0xff]  }
 0x447   :  { %7572 = vmatprep.subr.bf16.mxu1 %v11287_v41  ;;  %v11374_v41 = vld [vmem:[#allocation8 + $0x12ec] ss:$16 sps:$4 sm:$0xff]  }
 0x449   :  { %8003 = vmatpush1.bf16.msra.mxu0 %v11288_v44  ;;  %v11377_v44 = vld [vmem:[#allocation8 + $0x1504] ss:$16 sps:$4 sm:$0xff]  }
 0x44a   :  { %7573 = vmatpush1.bf16.msra.mxu1 %v11285_v43  ;;  %8004 = vmatprep.subr.bf16.mxu0 %v11296_v46  ;;  %v11372_v43 = vld [vmem:[#allocation8 + $0x12e8] ss:$16 sps:$4 sm:$0xff]   ;;  %v11375_v46 = vld [vmem:[#allocation8 + $0x1500] ss:$16 sps:$4 sm:$0xff]  }
 0x44b   :  { %7574 = vmatprep.subr.bf16.mxu1 %v11293_v45  ;;  %v11380_v45 = vld [vmem:[#allocation8 + $0x130c] ss:$16 sps:$4 sm:$0xff]  }
 0x44d   :  { %8005 = vmatpush1.bf16.msra.mxu0 %v11294_v48  ;;  %v11383_v48 = vld [vmem:[#allocation8 + $0x1524] ss:$16 sps:$4 sm:$0xff]  }
 0x44e   :  { %7575 = vmatpush1.bf16.msra.mxu1 %v11291_v47  ;;  %8006 = vmatprep.subr.bf16.mxu0 %v11302_v49  ;;  %v11378_v47 = vld [vmem:[#allocation8 + $0x1308] ss:$16 sps:$4 sm:$0xff]   ;;  %v11381_v49 = vld [vmem:[#allocation8 + $0x1520] ss:$16 sps:$4 sm:$0xff]  }
 0x44f   :  { %7576 = vmatprep.subr.bf16.mxu1 %v11299_v6  ;;  %v11386_v6 = vld [vmem:[#allocation8 + $0x132c] ss:$16 sps:$4 sm:$0xff]  }
 0x451   :  { %8007 = vmatpush1.bf16.msra.mxu0 %v11300_v50  ;;  %v11389_v50 = vld [vmem:[#allocation8 + $0x1544] ss:$16 sps:$4 sm:$0xff]  }
 0x452   :  { %7577 = vmatpush1.bf16.msra.mxu1 %v11297_v51  ;;  %8008 = vmatprep.subr.bf16.mxu0 %v11308_v16  ;;  %v11384_v51 = vld [vmem:[#allocation8 + $0x1328] ss:$16 sps:$4 sm:$0xff]   ;;  %v11387_v16 = vld [vmem:[#allocation8 + $0x1540] ss:$16 sps:$4 sm:$0xff]  }
 0x453   :  { %7578 = vmatprep.subr.bf16.mxu1 %v11305_v52  ;;  %v11392_v52 = vld [vmem:[#allocation8 + $0x134c] ss:$16 sps:$4 sm:$0xff]  }
 0x455   :  { %8009 = vmatpush1.bf16.msra.mxu0 %v11306_v54  ;;  %v11395_v54 = vld [vmem:[#allocation8 + $0x1564] ss:$16 sps:$4 sm:$0xff]  }
 0x456   :  { %7579 = vmatpush1.bf16.msra.mxu1 %v11303_v53  ;;  %8010 = vmatprep.subr.bf16.mxu0 %v11314_v17  ;;  %v11390_v53 = vld [vmem:[#allocation8 + $0x1348] ss:$16 sps:$4 sm:$0xff]   ;;  %v11393_v17 = vld [vmem:[#allocation8 + $0x1560] ss:$16 sps:$4 sm:$0xff]  }
 0x457   :  { %7580 = vmatprep.subr.bf16.mxu1 %v11311_v55  ;;  %v11398_v55 = vld [vmem:[#allocation8 + $0x136c] ss:$16 sps:$4 sm:$0xff]  }
 0x459   :  { %8011 = vmatpush1.bf16.msra.mxu0 %v11312_v18  ;;  %v11401_v18 = vld [vmem:[#allocation8 + $0x1584] ss:$16 sps:$4 sm:$0xff]  }
 0x45a   :  { %7581 = vmatpush1.bf16.msra.mxu1 %v11309_v29  ;;  %8012 = vmatprep.subr.bf16.mxu0 %v11320_v12  ;;  %v11396_v29 = vld [vmem:[#allocation8 + $0x1368] ss:$16 sps:$4 sm:$0xff]   ;;  %v11399_v12 = vld [vmem:[#allocation8 + $0x1580] ss:$16 sps:$4 sm:$0xff]  }
 0x45b   :  { %7582 = vmatprep.subr.bf16.mxu1 %v11317_v26  ;;  %v11404_v26 = vld [vmem:[#allocation8 + $0x138c] ss:$16 sps:$4 sm:$0xff]  }
 0x45d   :  { %8013 = vmatpush1.bf16.msra.mxu0 %v11318_v22  ;;  %v11407_v22 = vld [vmem:[#allocation8 + $0x15a4] ss:$16 sps:$4 sm:$0xff]  }
 0x45e   :  { %7583 = vmatpush1.bf16.msra.mxu1 %v11315_v34  ;;  %8014 = vmatprep.subr.bf16.mxu0 %v11326_v56  ;;  %v11402_v34 = vld [vmem:[#allocation8 + $0x1388] ss:$16 sps:$4 sm:$0xff]   ;;  %v11405_v56 = vld [vmem:[#allocation8 + $0x15a0] ss:$16 sps:$4 sm:$0xff]  }
 0x45f   :  { %7584 = vmatprep.subr.bf16.mxu1 %v11323_v14  ;;  %v11410_v14 = vld [vmem:[#allocation8 + $0x13ac] ss:$16 sps:$4 sm:$0xff]  }
 0x461   :  { %8015 = vmatpush1.bf16.msra.mxu0 %v11324_v57  ;;  %v11413_v57 = vld [vmem:[#allocation8 + $0x15c4] ss:$16 sps:$4 sm:$0xff]  }
 0x462   :  { %7585 = vmatpush1.bf16.msra.mxu1 %v11321_v24  ;;  %8027 = vmatprep.subr.bf16.mxu0 %v11332_v60  ;;  %v11408_v24 = vld [vmem:[#allocation8 + $0x13a8] ss:$16 sps:$4 sm:$0xff]   ;;  %v11411_v60 = vld [vmem:[#allocation8 + $0x15c0] ss:$16 sps:$4 sm:$0xff]  }
 0x463   :  { %7597 = vmatprep.subr.bf16.mxu1 %v11329_v59  ;;  %v11416_v59 = vld [vmem:[#allocation8 + $0x13cc] ss:$16 sps:$4 sm:$0xff]  }
 0x464   :  { %8017 = vmatmul.mubr.bf16.vlgmr.msra.gmra.mrb[24].mxu0 %v12069_v4  ;;  %v11350_v4 = vld [vmem:[#allocation8 + $0x126c] ss:$16 sps:$4 sm:$0xff]  }
 0x465   :  { %7587 = vmatmul.mubr.bf16.vlgmr.msra.gmra.mrb[20].mxu1 %v12071_v25  ;;  %8028 = vmatpush1.bf16.msra.mxu0 %v11330_v62  ;;  %v11419_v62 = vld [vmem:[#allocation8 + $0x15e4] ss:$16 sps:$4 sm:$0xff]  }
 0x466   :  { %7598 = vmatpush1.bf16.msra.mxu1 %v11327_v10  ;;  %7629 = vmatprep.mubr.bf16.mxu1 %v12087_v61  ;;  %v11414_v10 = vld [vmem:[#allocation8 + $0x13c8] ss:$16 sps:$4 sm:$0xff]  }
 0x467   :  { %8059 = vmatprep.mubr.bf16.mxu0 %v12075_v28  ;;  %7599 = vmatprep.subr.bf16.mxu1 %v11335_v15  ;;  %v11351_v28 = vld [vmem:[#allocation8 + $0x1480] ss:$16 sps:$4 sm:$0xff]   ;;  %v11422_v15 = vld [vmem:[#allocation8 + $0x13ec] ss:$16 sps:$4 sm:$0xff]  }
 0x468   :  { %8029 = vmatprep.subr.bf16.mxu0 %v11338_v63  ;;  %v11417_v63 = vld [vmem:[#allocation8 + $0x15e0] ss:$16 sps:$4 sm:$0xff]  }
 0x469   :  { %8030 = vmatpush1.bf16.msra.mxu0 %v11336_v8  ;;  %v11471_v8 = vld [vmem:[#allocation11 + $0x40] sm:$0xff]  }
 0x46a   :  { %7600 = vmatpush1.bf16.msra.mxu1 %v11333_v0  ;;  %8031 = vmatprep.subr.bf16.mxu0 %v11344_v23  ;;  %v11420_v0 = vld [vmem:[#allocation8 + $0x13e8] ss:$16 sps:$4 sm:$0xff]  }
 0x46b   :  { %7601 = vmatprep.subr.bf16.mxu1 %v11341_v1  ;;  %v11425_v1 = vld [vmem:[#allocation8 + $0x140c] ss:$16 sps:$4 sm:$0xff]   ;;  %v11472_v23 = vld [vmem:[#allocation11] sm:$0xff]  }
 0x46d   :  { %8032 = vmatpush1.bf16.msra.mxu0 %v11342_v3  ;;  %v11428_v3 = vld [vmem:[#allocation8 + $0x142c] ss:$16 sps:$4 sm:$0xff]  }
 0x46e   :  { %7602 = vmatpush1.bf16.msra.mxu1 %v11339_v2  ;;  %8033 = vmatprep.subr.bf16.mxu0 %v11350_v4  ;;  %v11423_v2 = vld [vmem:[#allocation8 + $0x1408] ss:$16 sps:$4 sm:$0xff]   ;;  %v11474_v4 = vld [vmem:[#allocation11 + $0x8] sm:$0xff]  }
 0x46f   :  { %7603 = vmatprep.subr.bf16.mxu1 %v11347_v7  ;;  %v11473_v7 = vld [vmem:[#allocation11 + $0x48] sm:$0xff]  }
 0x471   :  { %8034 = vmatpush1.bf16.msra.mxu0 %v11348_v20  ;;  %v11475_v20 = vld [vmem:[#allocation11 + $0x50] sm:$0xff]  }
 0x472   :  { %7604 = vmatpush1.bf16.msra.mxu1 %v11345_v19  ;;  %8035 = vmatprep.subr.bf16.mxu0 %v11356_v27  ;;  %v11426_v19 = vld [vmem:[#allocation8 + $0x1428] ss:$16 sps:$4 sm:$0xff]  }
 0x473   :  { %7605 = vmatprep.subr.bf16.mxu1 %v11353_v11  ;;  %v11431_v11 = vld [vmem:[#allocation8 + $0x144c] ss:$16 sps:$4 sm:$0xff]   ;;  %v11476_v27 = vld [vmem:[#allocation11 + $0x10] sm:$0xff]  }
 0x475   :  { %8036 = vmatpush1.bf16.msra.mxu0 %v11354_v30  ;;  %v11477_v30 = vld [vmem:[#allocation11 + $0x58] sm:$0xff]  }
 0x476   :  { %7606 = vmatpush1.bf16.msra.mxu1 %v11351_v28  ;;  %8037 = vmatprep.subr.bf16.mxu0 %v11362_v9  ;;  %v11429_v28 = vld [vmem:[#allocation8 + $0x1448] ss:$16 sps:$4 sm:$0xff]  }
 0x477   :  { %7607 = vmatprep.subr.bf16.mxu1 %v11359_v31  ;;  %v11434_v31 = vld [vmem:[#allocation8 + $0x146c] ss:$16 sps:$4 sm:$0xff]   ;;  %v11432_v9 = vld [vmem:[#allocation8 + $0x1468] ss:$16 sps:$4 sm:$0xff]  }
 0x479   :  { %8038 = vmatpush1.bf16.msra.mxu0 %v11360_v32  ;;  %v11480_v32 = vld [vmem:[#allocation11 + $0x20] sm:$0xff]  }
 0x47a   :  { %7608 = vmatpush1.bf16.msra.mxu1 %v11357_v5  ;;  %8039 = vmatprep.subr.bf16.mxu0 %v11368_v13  ;;  %v11479_v5 = vld [vmem:[#allocation11 + $0x60] sm:$0xff]   ;;  %v11481_v13 = vld [vmem:[#allocation11 + $0x68] sm:$0xff]  }
 0x47b   :  { %7609 = vmatprep.subr.bf16.mxu1 %v11365_v33  ;;  %v11435_v33 = vld [vmem:[#allocation8 + $0x1488] ss:$16 sps:$4 sm:$0xff]  }
 0x47d   :  { %8040 = vmatpush1.bf16.msra.mxu0 %v11366_v21  ;;  %v11438_v21 = vld [vmem:[#allocation8 + $0x14a8] ss:$16 sps:$4 sm:$0xff]  }
 0x47e   :  { %7610 = vmatpush1.bf16.msra.mxu1 %v11363_v39  ;;  %8041 = vmatprep.subr.bf16.mxu0 %v11374_v41  ;;  %v11440_v39 = vld [vmem:[#allocation8 + $0x14ac] ss:$16 sps:$4 sm:$0xff]   ;;  %v11441_v41 = vld [vmem:[#allocation8 + $0x14c8] ss:$16 sps:$4 sm:$0xff]  }
 0x47f   :  { %7611 = vmatprep.subr.bf16.mxu1 %v11371_v40  ;;  %v11443_v40 = vld [vmem:[#allocation8 + $0x14cc] ss:$16 sps:$4 sm:$0xff]  }
 0x481   :  { %8042 = vmatpush1.bf16.msra.mxu0 %v11372_v43  ;;  %v11444_v43 = vld [vmem:[#allocation8 + $0x14e8] ss:$16 sps:$4 sm:$0xff]  }
 0x482   :  { %7612 = vmatpush1.bf16.msra.mxu1 %v11369_v42  ;;  %8043 = vmatprep.subr.bf16.mxu0 %v11380_v45  ;;  %v11446_v42 = vld [vmem:[#allocation8 + $0x14ec] ss:$16 sps:$4 sm:$0xff]   ;;  %v11447_v45 = vld [vmem:[#allocation8 + $0x1508] ss:$16 sps:$4 sm:$0xff]  }
 0x483   :  { %7613 = vmatprep.subr.bf16.mxu1 %v11377_v44  ;;  %v11449_v44 = vld [vmem:[#allocation8 + $0x150c] ss:$16 sps:$4 sm:$0xff]  }
 0x485   :  { %8044 = vmatpush1.bf16.msra.mxu0 %v11378_v47  ;;  %v11450_v47 = vld [vmem:[#allocation8 + $0x1528] ss:$16 sps:$4 sm:$0xff]  }
 0x486   :  { %7614 = vmatpush1.bf16.msra.mxu1 %v11375_v46  ;;  %8045 = vmatprep.subr.bf16.mxu0 %v11386_v6  ;;  %v11452_v46 = vld [vmem:[#allocation8 + $0x152c] ss:$16 sps:$4 sm:$0xff]   ;;  %v11453_v6 = vld [vmem:[#allocation8 + $0x1548] ss:$16 sps:$4 sm:$0xff]  }
 0x487   :  { %7615 = vmatprep.subr.bf16.mxu1 %v11383_v48  ;;  %v11455_v48 = vld [vmem:[#allocation8 + $0x154c] ss:$16 sps:$4 sm:$0xff]  }
 0x489   :  { %8046 = vmatpush1.bf16.msra.mxu0 %v11384_v51  ;;  %v11456_v51 = vld [vmem:[#allocation8 + $0x1568] ss:$16 sps:$4 sm:$0xff]  }
 0x48a   :  { %7616 = vmatpush1.bf16.msra.mxu1 %v11381_v49  ;;  %8047 = vmatprep.subr.bf16.mxu0 %v11392_v52  ;;  %v11458_v49 = vld [vmem:[#allocation8 + $0x156c] ss:$16 sps:$4 sm:$0xff]   ;;  %v11459_v52 = vld [vmem:[#allocation8 + $0x1588] ss:$16 sps:$4 sm:$0xff]  }
 0x48b   :  { %7617 = vmatprep.subr.bf16.mxu1 %v11389_v50  ;;  %v11461_v50 = vld [vmem:[#allocation8 + $0x158c] ss:$16 sps:$4 sm:$0xff]  }
 0x48d   :  { %8048 = vmatpush1.bf16.msra.mxu0 %v11390_v53  ;;  %v11462_v53 = vld [vmem:[#allocation8 + $0x15a8] ss:$16 sps:$4 sm:$0xff]  }
 0x48e   :  { %7618 = vmatpush1.bf16.msra.mxu1 %v11387_v16  ;;  %8049 = vmatprep.subr.bf16.mxu0 %v11398_v55  ;;  %v11464_v16 = vld [vmem:[#allocation8 + $0x15ac] ss:$16 sps:$4 sm:$0xff]   ;;  %v11465_v55 = vld [vmem:[#allocation8 + $0x15c8] ss:$16 sps:$4 sm:$0xff]  }
 0x48f   :  { %7619 = vmatprep.subr.bf16.mxu1 %v11395_v54  ;;  %v11467_v54 = vld [vmem:[#allocation8 + $0x15cc] ss:$16 sps:$4 sm:$0xff]  }
 0x491   :  { %8050 = vmatpush1.bf16.msra.mxu0 %v11396_v29  ;;  %v11468_v29 = vld [vmem:[#allocation8 + $0x15e8] ss:$16 sps:$4 sm:$0xff]  }
 0x492   :  { %7620 = vmatpush1.bf16.msra.mxu1 %v11393_v17  ;;  %8051 = vmatprep.subr.bf16.mxu0 %v11404_v26  ;;  %v11470_v17 = vld [vmem:[#allocation8 + $0x15ec] ss:$16 sps:$4 sm:$0xff]   ;;  %v11483_v26 = vld [vmem:[#allocation11 + $0x70] sm:$0xff]  }
 0x493   :  { %7621 = vmatprep.subr.bf16.mxu1 %v11401_v18  ;;  %v11482_v18 = vld [vmem:[#allocation11 + $0x28] sm:$0xff]  }
 0x495   :  { %8052 = vmatpush1.bf16.msra.mxu0 %v11402_v34  ;;  %v11485_v34 = vld [vmem:[#allocation11 + $0x78] sm:$0xff]  }
 0x496   :  { %7622 = vmatpush1.bf16.msra.mxu1 %v11399_v12  ;;  %8053 = vmatprep.subr.bf16.mxu0 %v11410_v14  ;;  %v11484_v12 = vld [vmem:[#allocation11 + $0x30] sm:$0xff]   ;;  %v11487_v14 = vld [vmem:[#allocation11 + $0xc0] sm:$0xff]  }
 0x497   :  { %7623 = vmatprep.subr.bf16.mxu1 %v11407_v22  ;;  %v11486_v22 = vld [vmem:[#allocation11 + $0x38] sm:$0xff]  }
 0x499   :  { %8054 = vmatpush1.bf16.msra.mxu0 %v11408_v24 }
 0x49a   :  { %7624 = vmatpush1.bf16.msra.mxu1 %v11405_v56  ;;  %8055 = vmatprep.subr.bf16.mxu0 %v11416_v59  ;;  %v3625_v56 = vld [vmem:[#allocation10] sm:$0xf] }
 0x49b   :  { %7625 = vmatprep.subr.bf16.mxu1 %v11413_v57  ;;  %v3630_v24 = vrot.slane %v3625_v56, %v11954_v35  ;;  %v3634_v57 = vrot.slane %v3625_v56, %v11960_v37  ;;  %v11490_v35 = vld [vmem:[#allocation11 + $0x88] sm:$0xff]   ;;  %v11491_v37 = vld [vmem:[#allocation11 + $0xd0] sm:$0xff]  }
 0x49d   :  { %8056 = vmatpush1.bf16.msra.mxu0 %v11414_v10 }
 0x49e   :  { %7626 = vmatpush1.bf16.msra.mxu1 %v11411_v60  ;;  %8057 = vmatprep.subr.bf16.mxu0 %v11422_v15 }
 0x49f   :  { %7627 = vmatprep.subr.bf16.mxu1 %v11419_v62 }
 0x4a1   :  { %8058 = vmatpush1.bf16.msra.mxu0 %v11420_v0 }
 0x4a2   :  { %7628 = vmatpush1.bf16.msra.mxu1 %v11417_v63  ;;  %8070 = vmatprep.subr.bf16.mxu0 %v11425_v1 }
 0x4a3   :  { %9706 = vmatprep.subr.bf16.mxu1 %v11471_v8 }
 0x4a4   :  { %8060 = vmatmul.mubr.bf16.vlgmr.msra.gmra.mrb[24].mxu0 %v12071_v25  ;;  %v11478_v25 = vld [vmem:[#allocation11 + $0x18] sm:$0xff]  }
 0x4a5   :  { %7630 = vmatmul.mubr.bf16.vlgmr.msra.gmra.mrb[20].mxu1 %v12085_v58  ;;  %8071 = vmatpush1.bf16.msra.mxu0 %v11423_v2 }
 0x4a6   :  { %9707 = vmatpush3.bf16.msra.mxu1 %v11472_v23  ;;  %8102 = vmatprep.mubr.bf16.mxu0 %v12087_v61  ;;  %v11437_v61 = vld [vmem:[#allocation8 + $0x148c] ss:$16 sps:$4 sm:$0xff]  }
 0x4a7   :  { %8072 = vmatprep.subr.bf16.mxu0 %v11428_v3  ;;  %9708 = vmatprep.subr.bf16.mxu1 %v11473_v7 }
 0x4a9   :  { %8073 = vmatpush1.bf16.msra.mxu0 %v11426_v19  ;;  %v11489_v19 = vld [vmem:[#allocation11 + $0xc8] sm:$0xff]  }
 0x4aa   :  { %9709 = vmatpush3.bf16.msra.mxu1 %v11474_v4  ;;  %8074 = vmatprep.subr.bf16.mxu0 %v11431_v11  ;;  %v11488_v4 = vld [vmem:[#allocation11 + $0x80] sm:$0xff]   ;;  %v11493_v11 = vld [vmem:[#allocation11 + $0xd8] sm:$0xff]  }
 0x4ab   :  { %9710 = vmatprep.subr.bf16.mxu1 %v11475_v20  ;;  %v11492_v20 = vld [vmem:[#allocation11 + $0x90] sm:$0xff]  }
 0x4ad   :  { %8075 = vmatpush1.bf16.msra.mxu0 %v11429_v28  ;;  %v11495_v28 = vld [vmem:[#allocation11 + $0xe0] sm:$0xff]  }
 0x4ae   :  { %9711 = vmatpush3.bf16.msra.mxu1 %v11476_v27  ;;  %8076 = vmatprep.subr.bf16.mxu0 %v11434_v31  ;;  %v11494_v27 = vld [vmem:[#allocation11 + $0x98] sm:$0xff]   ;;  %v11497_v31 = vld [vmem:[#allocation11 + $0xe8] sm:$0xff]  }
 0x4af   :  { %9712 = vmatprep.subr.bf16.mxu1 %v11477_v30  ;;  %v11496_v30 = vld [vmem:[#allocation11 + $0xa0] sm:$0xff]  }
 0x4b1   :  { %8077 = vmatpush1.bf16.msra.mxu0 %v11432_v9  ;;  %v11499_v9 = vld [vmem:[#allocation11 + $0xf0] sm:$0xff]  }
 0x4b2   :  { %9713 = vmatpush3.bf16.msra.mxu1 %v11478_v25  ;;  %8078 = vmatprep.subr.bf16.mxu0 %v11437_v61  ;;  %v11498_v25 = vld [vmem:[#allocation11 + $0xa8] sm:$0xff]   ;;  %v11501_v61 = vld [vmem:[#allocation11 + $0xf8] sm:$0xff]  }
 0x4b3   :  { %9714 = vmatprep.subr.bf16.mxu1 %v11479_v5  ;;  %v11500_v5 = vld [vmem:[#allocation11 + $0xb0] sm:$0xff]  }
 0x4b5   :  { %8079 = vmatpush1.bf16.msra.mxu0 %v11435_v33  ;;  %v3638_v33 = vrot.slane %v3625_v56, %v11957_v36  ;;  %v11758_v36 = vmov 0.0  }
 0x4b6   :  { %9715 = vmatpush3.bf16.msra.mxu1 %v11480_v32  ;;  %8080 = vmatprep.subr.bf16.mxu0 %v11440_v39  ;;  %v11502_v32 = vld [vmem:[#allocation11 + $0xb8] sm:$0xff]  }
 0x4b7   :  { %9716 = vmatprep.subr.bf16.mxu1 %v11481_v13  ;;  %v3642_v13 = vrot.slane %v3625_v56, %v11963_v38  ;;  %v11504_v38 = vld [vmem:[#allocation14 + $0x8] sm:$0xff]  }
 0x4b9   :  { %8081 = vmatpush1.bf16.msra.mxu0 %v11438_v21 }
 0x4ba   :  { %8082 = vmatprep.subr.bf16.mxu0 %v11443_v40  ;;  %9717 = vmatpush3.bf16.msra.mxu1 %v11482_v18 }
 0x4bb   :  { %9718 = vmatprep.subr.bf16.mxu1 %v11483_v26 }
 0x4bd   :  { %8083 = vmatpush1.bf16.msra.mxu0 %v11441_v41 }
 0x4be   :  { %8084 = vmatprep.subr.bf16.mxu0 %v11446_v42  ;;  %9719 = vmatpush3.bf16.msra.mxu1 %v11484_v12 }
 0x4bf   :  { %9720 = vmatprep.subr.bf16.mxu1 %v11485_v34 }
 0x4c1   :  { %8085 = vmatpush1.bf16.msra.mxu0 %v11444_v43 }
 0x4c2   :  { %8086 = vmatprep.subr.bf16.mxu0 %v11449_v44  ;;  %9721 = vmatpush3.bf16.msra.mxu1 %v11486_v22 }
 0x4c3   :  { %9728 = vmatprep.subr.bf16.mxu1 %v11487_v14  ;;  %v9664_v14 = vld [vmem:[#allocation13] ss:$0 sm:$0xff] }
 0x4c5   :  { %8087 = vmatpush1.bf16.msra.mxu0 %v11447_v45 }
 0x4c6   :  { %8088 = vmatprep.subr.bf16.mxu0 %v11452_v46 }
 0x4c9   :  { %8089 = vmatpush1.bf16.msra.mxu0 %v11450_v47 }
 0x4ca   :  { %8090 = vmatprep.subr.bf16.mxu0 %v11455_v48 }
 0x4cd   :  { %8091 = vmatpush1.bf16.msra.mxu0 %v11453_v6 }
 0x4ce   :  { %8092 = vmatprep.subr.bf16.mxu0 %v11458_v49 }
 0x4d1   :  { %8093 = vmatpush1.bf16.msra.mxu0 %v11456_v51 }
 0x4d2   :  { %8094 = vmatprep.subr.bf16.mxu0 %v11461_v50  ;;  %v11503_v50 = vld [vmem:[#allocation14] sm:$0xff]  }
 0x4d5   :  { %8095 = vmatpush1.bf16.msra.mxu0 %v11459_v52  ;;  %v11505_v52 = vld [vmem:[#allocation14 + $0x10] sm:$0xff]  }
 0x4d6   :  { %8096 = vmatprep.subr.bf16.mxu0 %v11464_v16  ;;  %v11506_v16 = vld [vmem:[#allocation14 + $0x18] sm:$0xff]  }
 0x4d9   :  { %8097 = vmatpush1.bf16.msra.mxu0 %v11462_v53  ;;  %v11507_v53 = vld [vmem:[#allocation14 + $0x20] sm:$0xff]  }
 0x4da   :  { %8098 = vmatprep.subr.bf16.mxu0 %v11467_v54  ;;  %v11508_v54 = vld [vmem:[#allocation14 + $0x28] sm:$0xff]  }
 0x4dd   :  { %8099 = vmatpush1.bf16.msra.mxu0 %v11465_v55  ;;  %v11509_v55 = vld [vmem:[#allocation14 + $0x30] sm:$0xff]  }
 0x4de   :  { %8100 = vmatprep.subr.bf16.mxu0 %v11470_v17  ;;  %v11510_v17 = vld [vmem:[#allocation14 + $0x38] sm:$0xff]  }
 0x4e1   :  { %8101 = vmatpush1.bf16.msra.mxu0 %v11468_v29 }
 0x4e2   :  { %9759 = vmatprep.subr.bf16.mxu0 %v11758_v36 }
 0x4e4   :  { %8103 = vmatmul.mubr.bf16.vlgmr.msra.gmra.mrb[24].mxu0 %v12085_v58 }
 0x4e5   :  { %9760 = vmatpush3.bf16.msra.mxu0 %v11503_v50  ;;  %9775 = vmatprep.mubr.msk.bf16.mxu0 %vm11759_vm0, %v11758_v36 }
 0x4e6   :  { %9761 = vmatprep.subr.bf16.mxu0 %v11758_v36 }
 0x4e9   :  { %9762 = vmatpush3.bf16.msra.mxu0 %v11504_v38 }
 0x4ea   :  { %9763 = vmatprep.subr.bf16.mxu0 %v11758_v36 }
 0x4ed   :  { %9764 = vmatpush3.bf16.msra.mxu0 %v11505_v52 }
 0x4ee   :  { %9765 = vmatprep.subr.bf16.mxu0 %v11758_v36 }
 0x4f1   :  { %9766 = vmatpush3.bf16.msra.mxu0 %v11506_v16 }
 0x4f2   :  { %9767 = vmatprep.subr.bf16.mxu0 %v11758_v36 }
 0x4f5   :  { %9768 = vmatpush3.bf16.msra.mxu0 %v11507_v53 }
 0x4f6   :  { %9769 = vmatprep.subr.bf16.mxu0 %v11758_v36 }
 0x4f9   :  { %9770 = vmatpush3.bf16.msra.mxu0 %v11508_v54 }
 0x4fa   :  { %9771 = vmatprep.subr.bf16.mxu0 %v11758_v36 }
 0x4fd   :  { %9772 = vmatpush3.bf16.msra.mxu0 %v11509_v55 }
 0x4fe   :  { %9773 = vmatprep.subr.bf16.mxu0 %v11758_v36 }
 0x501   :  { %9774 = vmatpush3.bf16.msra.mxu0 %v11510_v17 }
 0x578   :  { %v7631_v59 = vpop.f32.mrb[20].mxu1 }
 0x579   :  { %v9779_v60 = vadd.f32 %v7631_v59, %v3630_v24  ;;  %v7633_v58 = vpop.f32.mrb[21].mxu1 }
 0x57a   :  { %v9780_v10 = vadd.f32 %v7633_v58, %v3634_v57  ;;  %v7635_v62 = vpop.f32.mrb[22].mxu1 }
 0x57b   :  { %v9781_v15 = vadd.f32 %v7635_v62, %v3630_v24  ;;  %v7637_v63 = vpop.f32.mrb[23].mxu1  ;;  %v8113_v8 = vmax.f32 %v9779_v60, 0.0 }
 0x57c   :  { %v9782_v0 = vadd.f32 %v7637_v63, %v3634_v57  ;;  %v8114_v23 = vmax.f32 %v9780_v10, 0.0 }
 0x57d   :  { %v8117_v1 = vmax.f32 %v9781_v15, 0.0 }
 0x57e   :  { %v8118_v2 = vmax.f32 %v9782_v0, 0.0 }
 0x57f   :  { %v8121_v3 = vpack.c.bf16 %v8117_v1, %v8113_v8 }
 0x580   :  { %v8122_v7 = vpack.c.bf16 %v8118_v2, %v8114_v23  ;;  %v9697_v23 = vld [vmem:[#allocation16] ss:$0 sm:$0xff] }
 0x582   :  { %8420 = vmatprep.mubr.bf16.mxu1 %v8122_v7 }
 0x583   :  { %8421 = vmatmul.mubr.bf16.vlgmr.msra.gmra.mrb[24].mxu1 %v8121_v3 }
 0x584   :  { %9729 = vmatpush3.bf16.msra.mxu1 %v11488_v4 }
 0x585   :  { %9730 = vmatprep.subr.bf16.mxu1 %v11489_v19 }
 0x588   :  { %9731 = vmatpush3.bf16.msra.mxu1 %v11490_v35 }
 0x589   :  { %9732 = vmatprep.subr.bf16.mxu1 %v11491_v37 }
 0x58c   :  { %9733 = vmatpush3.bf16.msra.mxu1 %v11492_v20 }
 0x58d   :  { %9734 = vmatprep.subr.bf16.mxu1 %v11493_v11 }
 0x590   :  { %9735 = vmatpush3.bf16.msra.mxu1 %v11494_v27 }
 0x591   :  { %9736 = vmatprep.subr.bf16.mxu1 %v11495_v28 }
 0x594   :  { %9737 = vmatpush3.bf16.msra.mxu1 %v11496_v30 }
 0x595   :  { %9738 = vmatprep.subr.bf16.mxu1 %v11497_v31 }
 0x598   :  { %9739 = vmatpush3.bf16.msra.mxu1 %v11498_v25 }
 0x599   :  { %9740 = vmatprep.subr.bf16.mxu1 %v11499_v9 }
 0x59c   :  { %9741 = vmatpush3.bf16.msra.mxu1 %v11500_v5 }
 0x59d   :  { %9742 = vmatprep.subr.bf16.mxu1 %v11501_v61 }
 0x5a0   :  { %9743 = vmatpush3.bf16.msra.mxu1 %v11502_v32 }
 0x5b7   :  { %v8104_v39 = vpop.f32.mrb[24].mxu0 }
 0x5b8   :  { %v9783_v21 = vadd.f32 %v8104_v39, %v3638_v33  ;;  %v8106_v40 = vpop.f32.mrb[25].mxu0 }
 0x5b9   :  { %v9784_v41 = vadd.f32 %v8106_v40, %v3642_v13  ;;  %v8108_v42 = vpop.f32.mrb[26].mxu0 }
 0x5ba   :  { %v9785_v43 = vadd.f32 %v8108_v42, %v3638_v33  ;;  %v8110_v44 = vpop.f32.mrb[27].mxu0  ;;  %v8115_v46 = vmax.f32 %v9783_v21, 0.0 }
 0x5bb   :  { %v9786_v45 = vadd.f32 %v8110_v44, %v3642_v13  ;;  %v8116_v48 = vmax.f32 %v9784_v41, 0.0 }
 0x5bc   :  { %v8119_v47 = vmax.f32 %v9785_v43, 0.0 }
 0x5bd   :  { %v8120_v6 = vmax.f32 %v9786_v45, 0.0 }
 0x5be   :  { %v8123_v49 = vpack.c.bf16 %v8119_v47, %v8115_v46 }
 0x5bf   :  { %v8124_v51 = vpack.c.bf16 %v8120_v6, %v8116_v48 }
 0x5c1   :  { %8461 = vmatprep.mubr.bf16.mxu1 %v8124_v51 }
 0x5c2   :  { %8462 = vmatmul.mubr.bf16.vlgmr.msra.gmra.mrb[28].mxu1 %v8123_v49 }
 0x656   :  { %v9722_v29 = vpop.f32.mrb[24].mxu1 }
 0x657   :  { %v9723_v18 = vpop.f32.mrb[25].mxu1 }
 0x658   :  { %v9724_v26 = vadd.f32 %v9723_v18, %v9722_v29  ;;  %v9725_v12 = vpop.f32.mrb[26].mxu1 }
 0x659   :  { %v9726_v34 = vpop.f32.mrb[27].mxu1 }
 0x65a   :  { %v9727_v22 = vadd.f32 %v9726_v34, %v9725_v12  ;;  %v8423_v57 = vadd.f32 %v9724_v26, %v9664_v14 }
 0x65c   :  { %v8426_v10 = vadd.f32 %v9727_v22, %v9664_v14 }
 0x695   :  { %v9744_v56 = vpop.f32.mrb[28].mxu1 }
 0x696   :  { %v9745_v24 = vpop.f32.mrb[29].mxu1 }
 0x697   :  { %v9746_v59 = vadd.f32 %v9745_v24, %v9744_v56  ;;  %v9747_v60 = vpop.f32.mrb[30].mxu1 }
 0x698   :  { %v9748_v58 = vpop.f32.mrb[31].mxu1 }
 0x699   :  { %v8464_v62 = vadd.f32 %v9746_v59, %v8423_v57  ;;  %v9749_v15 = vadd.f32 %v9748_v58, %v9747_v60 }
 0x69b   :  { %v8467_v63 = vadd.f32 %v9749_v15, %v8426_v10  ;;  %v8470_v0 = vmax.f32 %v8464_v62, 0.0 }
 0x69d   :  { %v8471_v8 = vmax.f32 %v8467_v63, 0.0 }
 0x69f   :  { %v8472_v1 = vpack.c.bf16 %v8471_v8, %v8470_v0 }
 0x6a1   :  { %9776 = vmatmul.mubr.bf16.vlgmr.msra.gmra.mrb[28].mxu0 %v8472_v1 }
 0x774   :  { %v8578_v2 = vpop.f32.mrb[28].mxu0 }
 0x775   :  { %v8579_v3 = vadd.f32 %v9697_v23, %v8578_v2  ;;  %v9777_v7 = vpop.f32.mrb[29].mxu0 }
 0x776   :  { %v8581_v4 = vpop.f32.mrb[30].mxu0 }
 0x777   :  { %8585 = vst [vmem:[#allocation17] sm:$0xff] %v8579_v3  ;;  %v8582_v19 = vadd.f32 %v9697_v23, %v8581_v4  ;;  %v9778_v35 = vpop.f32.mrb[31].mxu0 }
 0x779   :  { %8586 = vst [vmem:[#allocation17 + $0x8] sm:$0xff] %v8582_v19 }
 0x77a   :  { %11720 = shalt.err (!%p11717_p6)
}
 0x77b   :  { %s11721_s7 = scalar_lea.hbm %s12142_s9, 256 }
 0x77c   :  { %p11722_p7 = scmp.ne.s32.totalorder %s12142_s9, %s11721_s7  ;;  %p11725_p8 = scmp.lt.u32.totalorder %s11721_s7, %s12142_s9 }
 0x77e   :  { %p11727_p9 = pnand %p11725_p8, %p11722_p7 }
 0x780   :  { %11730 = shalt.err (!%p11727_p9)
}
 0x781   :  { %s11761_s15 = smov 128   ;;  %s11762_s16 = smov 8  }
 0x782   :  { %8598 = dma.vmem_to_hbm [thread:$0]  %s8593_s28, 256, %s12142_s9, [#allocation4], %s11761_s15, %s11761_s15, %s11762_s16  }
 0x783   :  { %11741 = dma.done.wait [#allocation4], 256  }
 0x784   :  { %11742 = vsyncadd [#allocation4], 4294967040 }
 0x785   :  { %8602 = vsyncpa [#allocation3], 1 }
 0x786   :  { %8603 = vsyncpa [#allocation6], 1 }
 0x787   :  { %8604 = vsyncpa [#allocation9], 1 }
 0x788   :  { %8605 = vsyncpa [#allocation12], 1 }
 0x789   :  { %8606 = vsyncpa [#allocation15], 1 }
 0x78a   :  { %8607 = vsyncpa [#allocation4], 1 }

// kernel: fwd.1
= control target key start
LH: loop header
LB: loop body
LE: loop exit
PB: predicated region body
PF: predicated region fallthrough
CT: control target
= control target key end

     0   :  { %14 = vsyncpa [#allocation3], 0  ;;  %s12133_s0 = inlined_call_operand.hbm [shape: f32[16,256], index: 0, kind: input, shape index: {}]   ;;  %s12134_s1 = inlined_call_operand.hbm [shape: bf16[256,2816], index: 1, kind: input, shape index: {}]   ;;  %s12135_s2 = inlined_call_operand.hbm [shape: f32[1,2816], index: 2, kind: input, shape index: {}]   ;;  %s12136_s3 = inlined_call_operand.hbm [shape: bf16[2816,512], index: 3, kind: input, shape index: {}]   ;;  %s12137_s4 = inlined_call_operand.hbm [shape: f32[1,512], index: 4, kind: input, shape index: {}]   ;;  %s12138_s5 = inlined_call_operand.hbm [shape: bf16[512,128], index: 5, kind: input, shape index: {}]   ;;  %s12139_s6 = inlined_call_operand.hbm [shape: f32[1,128], index: 6, kind: input, shape index: {}]   ;;  %s12140_s7 = inlined_call_operand.hbm [shape: bf16[128,128], index: 7, kind: input, shape index: {}]   ;;  %s12141_s8 = inlined_call_operand.hbm [shape: f32[1,128], index: 8, kind: input, shape index: {}]   ;;  %s12142_s9 = inlined_call_operand.hbm [shape: f32[16,128], index: 9, kind: output, shape index: {}]  }
   0x1   :  { %15 = vsyncpa [#allocation6], 0 }
   0x2   :  { %16 = vsyncpa [#allocation9], 0 }
   0x3   :  { %17 = vsyncpa [#allocation12], 0 }
   0x4   :  { %18 = vsyncpa [#allocation15], 0 }
   0x5   :  { %19 = vsyncpa [#allocation4], 0  ;;  %s11743_s30 = smov [#allocation5]   ;;  %s11511_s13 = scalar_lea.hbm %s12134_s1, 45056 }
   0x6   :  { %s37_s10 = sshll.u32 %s11743_s30, 4  ;;  %p11512_p0 = scmp.ne.s32.totalorder %s12134_s1, %s11511_s13  ;;  %s38_s10 = int_to_ptr.vmem [resolvable:$true] %s37_s10 }
   0x7   :  { %p11515_p1 = scmp.lt.u32.totalorder %s11511_s13, %s12134_s1 }
   0x9   :  { %p11517_p2 = pnand %p11515_p1, %p11512_p0 }
   0xb   :  { %11520 = shalt.err (!%p11517_p2)
}
   0xc   :  { %s11521_s18 = scalar_lea.vmem %s38_s10, 45056  ;;  %p11526_p4 = scmp.lt.s32.totalorder %s38_s10, %s38_s10 }
   0xd   :  { %p11522_p3 = scmp.ne.s32.totalorder %s38_s10, %s11521_s18  ;;  %p11527_p5 = scmp.lt.s32.totalorder %s11521_s18, %s11521_s18 }
   0xf   :  { %p11528_p6 = por %p11527_p5, %p11526_p4 }
  0x11   :  { %p11529_p7 = pnand %p11528_p6, %p11522_p3 }
  0x13   :  { %11532 = shalt.err (!%p11529_p7)
}
  0x14   :  { %s11744_s19 = smov 1408   ;;  %s11745_s20 = smov 88  }
  0x15   :  { %43 = dma.hbm_to_vmem [thread:$0]  %s12134_s1, 45056, %s38_s10, [#allocation6], %s11744_s19, %s11744_s19, %s11745_s20  }
  0x16   :  { %s11746_s23 = smov [#allocation8]   ;;  %s11747_s25 = smov [#allocation11]  }
  0x17   :  { %s59_s24 = sshll.u32 %s11746_s23, 4  ;;  %s81_s26 = sshll.u32 %s11747_s25, 4  ;;  %s60_s24 = int_to_ptr.vmem [resolvable:$true] %s59_s24  ;;  %s82_s26 = int_to_ptr.vmem [resolvable:$true] %s81_s26 }
  0x18   :  { %s11533_s29 = scalar_lea.hbm %s12136_s3, 90112 }
  0x19   :  { %p11534_p8 = scmp.ne.s32.totalorder %s12136_s3, %s11533_s29  ;;  %p11537_p9 = scmp.lt.u32.totalorder %s11533_s29, %s12136_s3 }
  0x1b   :  { %p11539_p10 = pnand %p11537_p9, %p11534_p8 }
  0x1d   :  { %11542 = shalt.err (!%p11539_p10)
}
  0x1e   :  { %s11543_s1 = scalar_lea.vmem %s60_s24, 90112  ;;  %p11548_p12 = scmp.lt.s32.totalorder %s60_s24, %s60_s24 }
  0x1f   :  { %p11544_p11 = scmp.ne.s32.totalorder %s60_s24, %s11543_s1  ;;  %p11549_p13 = scmp.lt.s32.totalorder %s11543_s1, %s11543_s1 }
  0x21   :  { %p11550_p0 = por %p11549_p13, %p11548_p12 }
  0x23   :  { %p11551_p1 = pnand %p11550_p0, %p11544_p11 }
  0x25   :  { %11554 = shalt.err (!%p11551_p1)
}
  0x26   :  { %s11748_s10 = smov 256   ;;  %s11749_s14 = smov 16  }
  0x27   :  { %65 = dma.hbm_to_vmem [thread:$0]  %s12136_s3, 90112, %s60_s24, [#allocation9], %s11748_s10, %s11748_s10, %s11749_s14  }
  0x28   :  { %s11555_s19 = scalar_lea.hbm %s12138_s5, 4096 }
  0x29   :  { %p11556_p2 = scmp.ne.s32.totalorder %s12138_s5, %s11555_s19  ;;  %p11559_p3 = scmp.lt.u32.totalorder %s11555_s19, %s12138_s5 }
  0x2b   :  { %p11561_p4 = pnand %p11559_p3, %p11556_p2 }
  0x2d   :  { %11564 = shalt.err (!%p11561_p4)
}
  0x2e   :  { %s11565_s25 = scalar_lea.vmem %s82_s26, 4096  ;;  %p11570_p6 = scmp.lt.s32.totalorder %s82_s26, %s82_s26 }
  0x2f   :  { %p11566_p5 = scmp.ne.s32.totalorder %s82_s26, %s11565_s25  ;;  %p11571_p7 = scmp.lt.s32.totalorder %s11565_s25, %s11565_s25 }
  0x31   :  { %p11572_p8 = por %p11571_p7, %p11570_p6 }
  0x33   :  { %p11573_p9 = pnand %p11572_p8, %p11566_p5 }
  0x35   :  { %11576 = shalt.err (!%p11573_p9)
}
  0x36   :  { %s11750_s3 = smov 64   ;;  %s11751_s24 = smov 4  }
  0x37   :  { %87 = dma.hbm_to_vmem [thread:$0]  %s12138_s5, 4096, %s82_s26, [#allocation12], %s11750_s3, %s11750_s3, %s11751_s24  }
  0x38   :  { %s11752_s29 = smov [#allocation14]   ;;  %s11753_s11 = smov [#allocation2]  }
  0x39   :  { %s103_s30 = sshll.u32 %s11752_s29, 4  ;;  %s25_s12 = sshll.u32 %s11753_s11, 4  ;;  %s104_s30 = int_to_ptr.vmem [resolvable:$true] %s103_s30  ;;  %s26_s12 = int_to_ptr.vmem [resolvable:$true] %s25_s12 }
  0x3a   :  { %s11577_s15 = scalar_lea.hbm %s12140_s7, 1024 }
  0x3b   :  { %p11578_p10 = scmp.ne.s32.totalorder %s12140_s7, %s11577_s15  ;;  %p11581_p11 = scmp.lt.u32.totalorder %s11577_s15, %s12140_s7 }
  0x3d   :  { %p11583_p12 = pnand %p11581_p11, %p11578_p10 }
  0x3f   :  { %11586 = shalt.err (!%p11583_p12)
}
  0x40   :  { %s11587_s5 = scalar_lea.vmem %s104_s30, 1024  ;;  %p11592_p0 = scmp.lt.s32.totalorder %s104_s30, %s104_s30 }
  0x41   :  { %p11588_p13 = scmp.ne.s32.totalorder %s104_s30, %s11587_s5  ;;  %p11593_p1 = scmp.lt.s32.totalorder %s11587_s5, %s11587_s5 }
  0x43   :  { %p11594_p2 = por %p11593_p1, %p11592_p0 }
  0x45   :  { %p11595_p3 = pnand %p11594_p2, %p11588_p13 }
  0x47   :  { %11598 = shalt.err (!%p11595_p3)
}
  0x48   :  { %109 = dma.hbm_to_vmem [thread:$0]  %s12140_s7, 1024, %s104_s30, [#allocation15], %s11750_s3, %s11750_s3, %s11751_s24  }
  0x49   :  { %s11599_s23 = scalar_lea.hbm %s12133_s0, 512 }
  0x4a   :  { %p11600_p4 = scmp.ne.s32.totalorder %s12133_s0, %s11599_s23  ;;  %p11603_p5 = scmp.lt.u32.totalorder %s11599_s23, %s12133_s0 }
  0x4c   :  { %p11605_p6 = pnand %p11603_p5, %p11600_p4 }
  0x4e   :  { %11608 = shalt.err (!%p11605_p6)
}
  0x4f   :  { %s11609_s11 = scalar_lea.vmem %s26_s12, 512  ;;  %p11614_p8 = scmp.lt.s32.totalorder %s26_s12, %s26_s12 }
  0x50   :  { %p11610_p7 = scmp.ne.s32.totalorder %s26_s12, %s11609_s11  ;;  %p11615_p9 = scmp.lt.s32.totalorder %s11609_s11, %s11609_s11 }
  0x52   :  { %p11616_p10 = por %p11615_p9, %p11614_p8 }
  0x54   :  { %p11617_p11 = pnand %p11616_p10, %p11610_p7 }
  0x56   :  { %11620 = shalt.err (!%p11617_p11)
}
  0x57   :  { %31 = dma.hbm_to_vmem [thread:$0]  %s12133_s0, 512, %s26_s12, [#allocation3], %s11748_s10, %s11748_s10, %s11749_s14  }
  0x58   :  { %s11754_s24 = smov [#allocation7]   ;;  %s11755_s13 = smov [#allocation10]  }
  0x59   :  { %s50_s30 = sshll.u32 %s11754_s24, 4  ;;  %s72_s1 = sshll.u32 %s11755_s13, 4  ;;  %s51_s30 = int_to_ptr.vmem [resolvable:$true] %s50_s30  ;;  %s73_s1 = int_to_ptr.vmem [resolvable:$true] %s72_s1 }
  0x5a   :  { %s11621_s17 = scalar_lea.hbm %s12135_s2, 352 }
  0x5b   :  { %p11622_p12 = scmp.ne.s32.totalorder %s12135_s2, %s11621_s17  ;;  %p11625_p13 = scmp.lt.u32.totalorder %s11621_s17, %s12135_s2 }
  0x5d   :  { %p11627_p0 = pnand %p11625_p13, %p11622_p12 }
  0x5f   :  { %11630 = shalt.err (!%p11627_p0)
}
  0x60   :  { %s11631_s0 = scalar_lea.vmem %s51_s30, 352  ;;  %p11636_p2 = scmp.lt.s32.totalorder %s51_s30, %s51_s30 }
  0x61   :  { %p11632_p1 = scmp.ne.s32.totalorder %s51_s30, %s11631_s0  ;;  %p11637_p3 = scmp.lt.s32.totalorder %s11631_s0, %s11631_s0 }
  0x63   :  { %p11638_p4 = por %p11637_p3, %p11636_p2 }
  0x65   :  { %p11639_p5 = pnand %p11638_p4, %p11632_p1 }
  0x67   :  { %11642 = shalt.err (!%p11639_p5)
}
  0x68   :  { %53 = dma.hbm_to_vmem [thread:$0]  %s12135_s2, 352, %s51_s30, [#allocation6]  }
  0x69   :  { %s11643_s21 = scalar_lea.hbm %s12137_s4, 64 }
  0x6a   :  { %p11644_p6 = scmp.ne.s32.totalorder %s12137_s4, %s11643_s21  ;;  %p11647_p7 = scmp.lt.u32.totalorder %s11643_s21, %s12137_s4 }
  0x6c   :  { %p11649_p8 = pnand %p11647_p7, %p11644_p6 }
  0x6e   :  { %11652 = shalt.err (!%p11649_p8)
}
  0x6f   :  { %s11653_s28 = scalar_lea.vmem %s73_s1, 64  ;;  %p11658_p10 = scmp.lt.s32.totalorder %s73_s1, %s73_s1 }
  0x70   :  { %p11654_p9 = scmp.ne.s32.totalorder %s73_s1, %s11653_s28  ;;  %p11659_p11 = scmp.lt.s32.totalorder %s11653_s28, %s11653_s28 }
  0x72   :  { %p11660_p12 = por %p11659_p11, %p11658_p10 }
  0x74   :  { %p11661_p13 = pnand %p11660_p12, %p11654_p9 }
  0x76   :  { %11664 = shalt.err (!%p11661_p13)
}
  0x77   :  { %75 = dma.hbm_to_vmem [thread:$0]  %s12137_s4, 64, %s73_s1, [#allocation9]  }
  0x78   :  { %s11756_s11 = smov [#allocation13]   ;;  %s11757_s3 = smov [#allocation16]  }
  0x79   :  { %s94_s7 = sshll.u32 %s11756_s11, 4  ;;  %s116_s24 = sshll.u32 %s11757_s3, 4  ;;  %s95_s7 = int_to_ptr.vmem [resolvable:$true] %s94_s7  ;;  %s117_s24 = int_to_ptr.vmem [resolvable:$true] %s116_s24 }
  0x7a   :  { %s11665_s15 = scalar_lea.hbm %s12139_s6, 16 }
  0x7b   :  { %p11666_p0 = scmp.ne.s32.totalorder %s12139_s6, %s11665_s15  ;;  %p11669_p1 = scmp.lt.u32.totalorder %s11665_s15, %s12139_s6 }
  0x7d   :  { %p11671_p2 = pnand %p11669_p1, %p11666_p0 }
  0x7f   :  { %11674 = shalt.err (!%p11671_p2)
}
  0x80   :  { %s11675_s4 = scalar_lea.vmem %s95_s7, 16  ;;  %s11679_s1 = scalar_lea.vmem %s95_s7, 32 }
  0x81   :  { %p11676_p3 = scmp.ne.s32.totalorder %s95_s7, %s11675_s4  ;;  %p11680_p4 = scmp.lt.s32.totalorder %s95_s7, %s95_s7 }
  0x82   :  { %p11681_p5 = scmp.lt.s32.totalorder %s11679_s1, %s11675_s4 }
  0x84   :  { %p11682_p6 = por %p11681_p5, %p11680_p4 }
  0x86   :  { %p11683_p7 = pnand %p11682_p6, %p11676_p3 }
  0x88   :  { %11686 = shalt.err (!%p11683_p7)
}
  0x89   :  { %97 = dma.hbm_to_vmem [thread:$0]  %s12139_s6, 16, %s95_s7, [#allocation12]  }
  0x8a   :  { %s11687_s14 = scalar_lea.hbm %s12141_s8, 16 }
  0x8b   :  { %p11688_p8 = scmp.ne.s32.totalorder %s12141_s8, %s11687_s14  ;;  %p11691_p9 = scmp.lt.u32.totalorder %s11687_s14, %s12141_s8 }
  0x8d   :  { %p11693_p10 = pnand %p11691_p9, %p11688_p8 }
  0x8f   :  { %11696 = shalt.err (!%p11693_p10)
}
  0x90   :  { %s11697_s23 = scalar_lea.vmem %s117_s24, 16  ;;  %s11701_s25 = scalar_lea.vmem %s117_s24, 32 }
  0x91   :  { %p11698_p11 = scmp.ne.s32.totalorder %s117_s24, %s11697_s23  ;;  %p11702_p12 = scmp.lt.s32.totalorder %s117_s24, %s117_s24 }
  0x92   :  { %p11703_p13 = scmp.lt.s32.totalorder %s11701_s25, %s11697_s23 }
  0x94   :  { %p11704_p0 = por %p11703_p13, %p11702_p12 }
  0x96   :  { %p11705_p1 = pnand %p11704_p0, %p11698_p11 }
  0x98   :  { %11708 = shalt.err (!%p11705_p1)
}
  0x99   :  { %119 = dma.hbm_to_vmem [thread:$0]  %s12141_s8, 16, %s117_s24, [#allocation15]  }
  0x9a   :  { %11731 = dma.done.wait [#allocation3], 512  }
  0x9b   :  { %11732 = vsyncadd [#allocation3], 4294966784 }
  0x9c   :  { %11733 = dma.done.wait [#allocation6], 45408  }
  0x9d   :  { %11734 = vsyncadd [#allocation6], 4294921888 }
  0x9e   :  { %11735 = dma.done.wait [#allocation9], 90176  }
  0x9f   :  { %11736 = vsyncadd [#allocation9], 4294877120 }
  0xa0   :  { %11737 = dma.done.wait [#allocation12], 4112  }
  0xa1   :  { %11738 = vsyncadd [#allocation12], 4294963184 }
  0xa2   :  { %11739 = dma.done.wait [#allocation15], 1040  }
  0xa3   :  { %11740 = vsyncadd [#allocation15], 4294966256  ;;  %v9887_v0 = vld [vmem:[#allocation5 + $0x4] ss:$88 sps:$4 sm:$0xff]   ;;  %v9891_v2 = vld [vmem:[#allocation5] ss:$88 sps:$4 sm:$0xff]  }
  0xa4   :  { %v9889_v1 = vld [vmem:[#allocation5 + $0xc] ss:$88 sps:$4 sm:$0xff]   ;;  %2382 = vmatprep.subr.bf16.mxu0 %v9887_v0  ;;  %v9892_v3 = vld [vmem:[#allocation5 + $0x8] ss:$88 sps:$4 sm:$0xff]   ;;  %v9895_v5 = vld [vmem:[#allocation5 + $0xbc] ss:$88 sps:$4 sm:$0xff]  }
  0xa5   :  { %2425 = vmatprep.subr.bf16.mxu1 %v9889_v1  ;;  %v9893_v4 = vld [vmem:[#allocation5 + $0xb4] ss:$88 sps:$4 sm:$0xff]   ;;  %2383 = vmatpush1.bf16.msra.mxu0 %v9891_v2  ;;  %v9897_v6 = vld [vmem:[#allocation5 + $0xb0] ss:$88 sps:$4 sm:$0xff]   ;;  %v9899_v8 = vld [vmem:[#allocation5 + $0x164] ss:$88 sps:$4 sm:$0xff]  }
  0xa6   :  { %2426 = vmatpush1.bf16.msra.mxu1 %v9892_v3  ;;  %2384 = vmatprep.subr.bf16.mxu0 %v9893_v4  ;;  %v9898_v7 = vld [vmem:[#allocation5 + $0xb8] ss:$88 sps:$4 sm:$0xff]   ;;  %v9901_v9 = vld [vmem:[#allocation5 + $0x16c] ss:$88 sps:$4 sm:$0xff]   ;;  %v9904_v11 = vld [vmem:[#allocation5 + $0x168] ss:$88 sps:$4 sm:$0xff]  }
  0xa7   :  { %2427 = vmatprep.subr.bf16.mxu1 %v9895_v5  ;;  %v9903_v10 = vld [vmem:[#allocation5 + $0x160] ss:$88 sps:$4 sm:$0xff]   ;;  %v9905_v12 = vld [vmem:[#allocation5 + $0x214] ss:$88 sps:$4 sm:$0xff]   ;;  %v9909_v14 = vld [vmem:[#allocation5 + $0x210] ss:$88 sps:$4 sm:$0xff]  }
  0xa8   :  { %v9907_v13 = vld [vmem:[#allocation5 + $0x21c] ss:$88 sps:$4 sm:$0xff]   ;;  %v9910_v15 = vld [vmem:[#allocation5 + $0x218] ss:$88 sps:$4 sm:$0xff]   ;;  %v9913_v17 = vld [vmem:[#allocation5 + $0x2cc] ss:$88 sps:$4 sm:$0xff]  }
  0xa9   :  { %2385 = vmatpush1.bf16.msra.mxu0 %v9897_v6  ;;  %v9911_v16 = vld [vmem:[#allocation5 + $0x2c4] ss:$88 sps:$4 sm:$0xff]   ;;  %v9915_v18 = vld [vmem:[#allocation5 + $0x2c0] ss:$88 sps:$4 sm:$0xff]   ;;  %v9917_v20 = vld [vmem:[#allocation5 + $0x374] ss:$88 sps:$4 sm:$0xff]  }
  0xaa   :  { %2428 = vmatpush1.bf16.msra.mxu1 %v9898_v7  ;;  %2386 = vmatprep.subr.bf16.mxu0 %v9899_v8  ;;  %v9916_v19 = vld [vmem:[#allocation5 + $0x2c8] ss:$88 sps:$4 sm:$0xff]   ;;  %v9919_v21 = vld [vmem:[#allocation5 + $0x37c] ss:$88 sps:$4 sm:$0xff]   ;;  %v9922_v23 = vld [vmem:[#allocation5 + $0x378] ss:$88 sps:$4 sm:$0xff]  }
  0xab   :  { %2429 = vmatprep.subr.bf16.mxu1 %v9901_v9  ;;  %v9921_v22 = vld [vmem:[#allocation5 + $0x370] ss:$88 sps:$4 sm:$0xff]   ;;  %v9923_v24 = vld [vmem:[#allocation5 + $0x424] ss:$88 sps:$4 sm:$0xff]   ;;  %v9927_v26 = vld [vmem:[#allocation5 + $0x420] ss:$88 sps:$4 sm:$0xff]  }
  0xac   :  { %v9925_v25 = vld [vmem:[#allocation5 + $0x42c] ss:$88 sps:$4 sm:$0xff]   ;;  %v9928_v27 = vld [vmem:[#allocation5 + $0x428] ss:$88 sps:$4 sm:$0xff]   ;;  %v9931_v29 = vld [vmem:[#allocation5 + $0x4dc] ss:$88 sps:$4 sm:$0xff]  }
  0xad   :  { %2387 = vmatpush1.bf16.msra.mxu0 %v9903_v10  ;;  %v9929_v28 = vld [vmem:[#allocation5 + $0x4d4] ss:$88 sps:$4 sm:$0xff]   ;;  %v9933_v30 = vld [vmem:[#allocation5 + $0x4d0] ss:$88 sps:$4 sm:$0xff]   ;;  %v9935_v32 = vld [vmem:[#allocation5 + $0x584] ss:$88 sps:$4 sm:$0xff]  }
  0xae   :  { %2430 = vmatpush1.bf16.msra.mxu1 %v9904_v11  ;;  %2388 = vmatprep.subr.bf16.mxu0 %v9905_v12  ;;  %v9934_v31 = vld [vmem:[#allocation5 + $0x4d8] ss:$88 sps:$4 sm:$0xff]   ;;  %v9937_v33 = vld [vmem:[#allocation5 + $0x58c] ss:$88 sps:$4 sm:$0xff]   ;;  %v9940_v35 = vld [vmem:[#allocation5 + $0x588] ss:$88 sps:$4 sm:$0xff]  }
  0xaf   :  { %2431 = vmatprep.subr.bf16.mxu1 %v9907_v13  ;;  %v9939_v34 = vld [vmem:[#allocation5 + $0x580] ss:$88 sps:$4 sm:$0xff]   ;;  %v9941_v36 = vld [vmem:[#allocation5 + $0x634] ss:$88 sps:$4 sm:$0xff]   ;;  %v9945_v38 = vld [vmem:[#allocation5 + $0x630] ss:$88 sps:$4 sm:$0xff]  }
  0xb0   :  { %v9943_v37 = vld [vmem:[#allocation5 + $0x63c] ss:$88 sps:$4 sm:$0xff]   ;;  %v9946_v39 = vld [vmem:[#allocation5 + $0x638] ss:$88 sps:$4 sm:$0xff]   ;;  %v9949_v41 = vld [vmem:[#allocation5 + $0x6ec] ss:$88 sps:$4 sm:$0xff]  }
  0xb1   :  { %2389 = vmatpush1.bf16.msra.mxu0 %v9909_v14  ;;  %v9947_v40 = vld [vmem:[#allocation5 + $0x6e4] ss:$88 sps:$4 sm:$0xff]   ;;  %v9951_v42 = vld [vmem:[#allocation5 + $0x6e0] ss:$88 sps:$4 sm:$0xff]   ;;  %v9953_v44 = vld [vmem:[#allocation5 + $0x794] ss:$88 sps:$4 sm:$0xff]  }
  0xb2   :  { %2432 = vmatpush1.bf16.msra.mxu1 %v9910_v15  ;;  %2390 = vmatprep.subr.bf16.mxu0 %v9911_v16  ;;  %v9952_v43 = vld [vmem:[#allocation5 + $0x6e8] ss:$88 sps:$4 sm:$0xff]   ;;  %v9955_v45 = vld [vmem:[#allocation5 + $0x79c] ss:$88 sps:$4 sm:$0xff]   ;;  %v9958_v48 = vld [vmem:[#allocation5 + $0x798] ss:$88 sps:$4 sm:$0xff]  }
  0xb3   :  { %2433 = vmatprep.subr.bf16.mxu1 %v9913_v17  ;;  %v149_v46 = vld [vmem:[#allocation2 + $0x8] sm:$0xff]  ;;  %v151_v49 = vld [vmem:[#allocation2 + $0x18] sm:$0xff]  ;;  %v148_v3 = vld [vmem:[#allocation2] sm:$0xff]  ;;  %vm11759_vm0 = vmmov 0   ;;  %s11760_s8 = smov [#allocation17]  }
  0xb4   :  { %v9957_v47 = vld [vmem:[#allocation5 + $0x790] ss:$88 sps:$4 sm:$0xff]   ;;  %v9959_v50 = vld [vmem:[#allocation5 + $0x844] ss:$88 sps:$4 sm:$0xff]   ;;  %v11927_v51 = vpack.c.bf16 %v151_v49, %v149_v46  ;;  %v9963_v53 = vld [vmem:[#allocation5 + $0x840] ss:$88 sps:$4 sm:$0xff]  }
  0xb5   :  { %2391 = vmatpush1.bf16.msra.mxu0 %v9915_v18  ;;  %v9961_v52 = vld [vmem:[#allocation5 + $0x84c] ss:$88 sps:$4 sm:$0xff]   ;;  %v9964_v54 = vld [vmem:[#allocation5 + $0x848] ss:$88 sps:$4 sm:$0xff]   ;;  %v9967_v56 = vld [vmem:[#allocation5 + $0x8fc] ss:$88 sps:$4 sm:$0xff]  }
  0xb6   :  { %2434 = vmatpush1.bf16.msra.mxu1 %v9916_v19  ;;  %2392 = vmatprep.subr.bf16.mxu0 %v9917_v20  ;;  %v9965_v55 = vld [vmem:[#allocation5 + $0x8f4] ss:$88 sps:$4 sm:$0xff]   ;;  %v9969_v57 = vld [vmem:[#allocation5 + $0x8f0] ss:$88 sps:$4 sm:$0xff]   ;;  %v9971_v59 = vld [vmem:[#allocation5 + $0x9a4] ss:$88 sps:$4 sm:$0xff]  }
  0xb7   :  { %2435 = vmatprep.subr.bf16.mxu1 %v9919_v21  ;;  %2414 = vmatprep.mubr.bf16.mxu0 %v11927_v51  ;;  %v9970_v58 = vld [vmem:[#allocation5 + $0x8f8] ss:$88 sps:$4 sm:$0xff]   ;;  %v9973_v60 = vld [vmem:[#allocation5 + $0x9ac] ss:$88 sps:$4 sm:$0xff]   ;;  %v9976_v62 = vld [vmem:[#allocation5 + $0x9a8] ss:$88 sps:$4 sm:$0xff]  }
  0xb8   :  { %2457 = vmatprep.mubr.bf16.mxu1 %v11927_v51  ;;  %v9975_v61 = vld [vmem:[#allocation5 + $0x9a0] ss:$88 sps:$4 sm:$0xff]   ;;  %v9977_v63 = vld [vmem:[#allocation5 + $0xa54] ss:$88 sps:$4 sm:$0xff]   ;;  %v9981_v1 = vld [vmem:[#allocation5 + $0xa50] ss:$88 sps:$4 sm:$0xff]  }
  0xb9   :  { %2393 = vmatpush1.bf16.msra.mxu0 %v9921_v22  ;;  %v9979_v0 = vld [vmem:[#allocation5 + $0xa5c] ss:$88 sps:$4 sm:$0xff]   ;;  %v9982_v2 = vld [vmem:[#allocation5 + $0xa58] ss:$88 sps:$4 sm:$0xff]   ;;  %v9994_v11 = vld [vmem:[#allocation5 + $0xcc] ss:$88 sps:$4 sm:$0xff]  }
  0xba   :  { %2436 = vmatpush1.bf16.msra.mxu1 %v9922_v23  ;;  %2394 = vmatprep.subr.bf16.mxu0 %v9923_v24  ;;  %v150_v4 = vld [vmem:[#allocation2 + $0x10] sm:$0xff]  ;;  %v9991_v10 = vld [vmem:[#allocation5 + $0xc4] ss:$88 sps:$4 sm:$0xff]   ;;  %v9989_v12 = vld [vmem:[#allocation5 + $0xc0] ss:$88 sps:$4 sm:$0xff]   ;;  %s8592_s28 = sshll.u32 %s11760_s8, 4  ;;  %s8593_s28 = int_to_ptr.vmem [resolvable:$true] %s8592_s28 }
  0xbb   :  { %2437 = vmatprep.subr.bf16.mxu1 %v9925_v25  ;;  %v9985_v5 = vld [vmem:[#allocation5 + $0x14] ss:$88 sps:$4 sm:$0xff]   ;;  %v11931_v7 = vpack.c.bf16 %v150_v4, %v148_v3  ;;  %v9983_v8 = vld [vmem:[#allocation5 + $0x10] ss:$88 sps:$4 sm:$0xff]   ;;  %v10003_v18 = vld [vmem:[#allocation5 + $0x224] ss:$88 sps:$4 sm:$0xff]   ;;  %p11714_p3 = scmp.lt.s32.totalorder %s8593_s28, %s8593_s28 }
  0xbc   :  { %v9988_v6 = vld [vmem:[#allocation5 + $0x1c] ss:$88 sps:$4 sm:$0xff]   ;;  %v9986_v9 = vld [vmem:[#allocation5 + $0x18] ss:$88 sps:$4 sm:$0xff]   ;;  %v9992_v13 = vld [vmem:[#allocation5 + $0xc8] ss:$88 sps:$4 sm:$0xff]  }
  0xbd   :  { %2395 = vmatpush1.bf16.msra.mxu0 %v9927_v26  ;;  %v9997_v14 = vld [vmem:[#allocation5 + $0x174] ss:$88 sps:$4 sm:$0xff]   ;;  %v9995_v16 = vld [vmem:[#allocation5 + $0x170] ss:$88 sps:$4 sm:$0xff]   ;;  %v10001_v20 = vld [vmem:[#allocation5 + $0x220] ss:$88 sps:$4 sm:$0xff]  }
  0xbe   :  { %2438 = vmatpush1.bf16.msra.mxu1 %v9928_v27  ;;  %2396 = vmatprep.subr.bf16.mxu0 %v9929_v28  ;;  %v10000_v15 = vld [vmem:[#allocation5 + $0x17c] ss:$88 sps:$4 sm:$0xff]   ;;  %v9998_v17 = vld [vmem:[#allocation5 + $0x178] ss:$88 sps:$4 sm:$0xff]   ;;  %v10006_v19 = vld [vmem:[#allocation5 + $0x22c] ss:$88 sps:$4 sm:$0xff]  }
  0xbf   :  { %2439 = vmatprep.subr.bf16.mxu1 %v9931_v29  ;;  %v10004_v21 = vld [vmem:[#allocation5 + $0x228] ss:$88 sps:$4 sm:$0xff]   ;;  %v10009_v22 = vld [vmem:[#allocation5 + $0x2d4] ss:$88 sps:$4 sm:$0xff]   ;;  %v10010_v25 = vld [vmem:[#allocation5 + $0x2d8] ss:$88 sps:$4 sm:$0xff]  }
  0xc0   :  { %v10012_v23 = vld [vmem:[#allocation5 + $0x2dc] ss:$88 sps:$4 sm:$0xff]   ;;  %v10007_v24 = vld [vmem:[#allocation5 + $0x2d0] ss:$88 sps:$4 sm:$0xff]   ;;  %v10018_v27 = vld [vmem:[#allocation5 + $0x38c] ss:$88 sps:$4 sm:$0xff]  }
  0xc1   :  { %2397 = vmatpush1.bf16.msra.mxu0 %v9933_v30  ;;  %v10015_v26 = vld [vmem:[#allocation5 + $0x384] ss:$88 sps:$4 sm:$0xff]   ;;  %v10013_v28 = vld [vmem:[#allocation5 + $0x380] ss:$88 sps:$4 sm:$0xff]   ;;  %v10021_v30 = vld [vmem:[#allocation5 + $0x434] ss:$88 sps:$4 sm:$0xff]  }
  0xc2   :  { %2440 = vmatpush1.bf16.msra.mxu1 %v9934_v31  ;;  %2398 = vmatprep.subr.bf16.mxu0 %v9935_v32  ;;  %v10016_v29 = vld [vmem:[#allocation5 + $0x388] ss:$88 sps:$4 sm:$0xff]   ;;  %v10024_v31 = vld [vmem:[#allocation5 + $0x43c] ss:$88 sps:$4 sm:$0xff]   ;;  %v10046_v49 = vld [vmem:[#allocation5 + $0x6f8] ss:$88 sps:$4 sm:$0xff]  }
  0xc3   :  { %2441 = vmatprep.subr.bf16.mxu1 %v9937_v33  ;;  %v10019_v32 = vld [vmem:[#allocation5 + $0x430] ss:$88 sps:$4 sm:$0xff]   ;;  %v10045_v46 = vld [vmem:[#allocation5 + $0x6f4] ss:$88 sps:$4 sm:$0xff]   ;;  %v10075_v3 = vld [vmem:[#allocation5 + $0xa64] ss:$88 sps:$4 sm:$0xff]  }
  0xc4   :  { %v10022_v33 = vld [vmem:[#allocation5 + $0x438] ss:$88 sps:$4 sm:$0xff]   ;;  %v10078_v4 = vld [vmem:[#allocation5 + $0xa6c] ss:$88 sps:$4 sm:$0xff]   ;;  %s11709_s2 = scalar_lea.vmem %s8593_s28, 256 }
  0xc5   :  { %2399 = vmatpush1.bf16.msra.mxu0 %v9939_v34  ;;  %v10027_v34 = vld [vmem:[#allocation5 + $0x4e4] ss:$88 sps:$4 sm:$0xff]   ;;  %p11710_p2 = scmp.ne.s32.totalorder %s8593_s28, %s11709_s2  ;;  %p11715_p4 = scmp.lt.s32.totalorder %s11709_s2, %s11709_s2 }
  0xc6   :  { %2442 = vmatpush1.bf16.msra.mxu1 %v9940_v35  ;;  %2400 = vmatprep.subr.bf16.mxu0 %v9941_v36  ;;  %v10030_v35 = vld [vmem:[#allocation5 + $0x4ec] ss:$88 sps:$4 sm:$0xff]   ;;  %v10025_v36 = vld [vmem:[#allocation5 + $0x4e0] ss:$88 sps:$4 sm:$0xff]  }
  0xc7   :  { %2443 = vmatprep.subr.bf16.mxu1 %v9943_v37  ;;  %v10028_v37 = vld [vmem:[#allocation5 + $0x4e8] ss:$88 sps:$4 sm:$0xff]   ;;  %p11716_p5 = por %p11715_p4, %p11714_p3 }
  0xc9   :  { %2401 = vmatpush1.bf16.msra.mxu0 %v9945_v38  ;;  %v10033_v38 = vld [vmem:[#allocation5 + $0x594] ss:$88 sps:$4 sm:$0xff]   ;;  %p11717_p6 = pnand %p11716_p5, %p11710_p2 }
  0xca   :  { %2444 = vmatpush1.bf16.msra.mxu1 %v9946_v39  ;;  %2402 = vmatprep.subr.bf16.mxu0 %v9947_v40  ;;  %v10036_v39 = vld [vmem:[#allocation5 + $0x59c] ss:$88 sps:$4 sm:$0xff]   ;;  %v10031_v40 = vld [vmem:[#allocation5 + $0x590] ss:$88 sps:$4 sm:$0xff]  }
  0xcb   :  { %2445 = vmatprep.subr.bf16.mxu1 %v9949_v41  ;;  %v10034_v41 = vld [vmem:[#allocation5 + $0x598] ss:$88 sps:$4 sm:$0xff]  }
  0xcd   :  { %2403 = vmatpush1.bf16.msra.mxu0 %v9951_v42  ;;  %v10039_v42 = vld [vmem:[#allocation5 + $0x644] ss:$88 sps:$4 sm:$0xff]  }
  0xce   :  { %2446 = vmatpush1.bf16.msra.mxu1 %v9952_v43  ;;  %2404 = vmatprep.subr.bf16.mxu0 %v9953_v44  ;;  %v10042_v43 = vld [vmem:[#allocation5 + $0x64c] ss:$88 sps:$4 sm:$0xff]   ;;  %v10037_v44 = vld [vmem:[#allocation5 + $0x640] ss:$88 sps:$4 sm:$0xff]  }
  0xcf   :  { %2447 = vmatprep.subr.bf16.mxu1 %v9955_v45  ;;  %v10040_v45 = vld [vmem:[#allocation5 + $0x648] ss:$88 sps:$4 sm:$0xff]  }
  0xd1   :  { %2405 = vmatpush1.bf16.msra.mxu0 %v9957_v47  ;;  %v10048_v47 = vld [vmem:[#allocation5 + $0x6fc] ss:$88 sps:$4 sm:$0xff]  }
  0xd2   :  { %2448 = vmatpush1.bf16.msra.mxu1 %v9958_v48  ;;  %2406 = vmatprep.subr.bf16.mxu0 %v9959_v50  ;;  %v10043_v48 = vld [vmem:[#allocation5 + $0x6f0] ss:$88 sps:$4 sm:$0xff]   ;;  %v10051_v50 = vld [vmem:[#allocation5 + $0x7a4] ss:$88 sps:$4 sm:$0xff]  }
  0xd3   :  { %2449 = vmatprep.subr.bf16.mxu1 %v9961_v52  ;;  %v10054_v52 = vld [vmem:[#allocation5 + $0x7ac] ss:$88 sps:$4 sm:$0xff]  }
  0xd5   :  { %2407 = vmatpush1.bf16.msra.mxu0 %v9963_v53  ;;  %v10049_v53 = vld [vmem:[#allocation5 + $0x7a0] ss:$88 sps:$4 sm:$0xff]  }
  0xd6   :  { %2450 = vmatpush1.bf16.msra.mxu1 %v9964_v54  ;;  %2408 = vmatprep.subr.bf16.mxu0 %v9965_v55  ;;  %v10052_v54 = vld [vmem:[#allocation5 + $0x7a8] ss:$88 sps:$4 sm:$0xff]   ;;  %v10057_v55 = vld [vmem:[#allocation5 + $0x854] ss:$88 sps:$4 sm:$0xff]  }
  0xd7   :  { %2451 = vmatprep.subr.bf16.mxu1 %v9967_v56  ;;  %v10060_v56 = vld [vmem:[#allocation5 + $0x85c] ss:$88 sps:$4 sm:$0xff]  }
  0xd9   :  { %2409 = vmatpush1.bf16.msra.mxu0 %v9969_v57  ;;  %v10055_v57 = vld [vmem:[#allocation5 + $0x850] ss:$88 sps:$4 sm:$0xff]  }
  0xda   :  { %2452 = vmatpush1.bf16.msra.mxu1 %v9970_v58  ;;  %2410 = vmatprep.subr.bf16.mxu0 %v9971_v59  ;;  %v10058_v58 = vld [vmem:[#allocation5 + $0x858] ss:$88 sps:$4 sm:$0xff]   ;;  %v10063_v59 = vld [vmem:[#allocation5 + $0x904] ss:$88 sps:$4 sm:$0xff]  }
  0xdb   :  { %2453 = vmatprep.subr.bf16.mxu1 %v9973_v60  ;;  %v10066_v60 = vld [vmem:[#allocation5 + $0x90c] ss:$88 sps:$4 sm:$0xff]  }
  0xdd   :  { %2411 = vmatpush1.bf16.msra.mxu0 %v9975_v61  ;;  %v10061_v61 = vld [vmem:[#allocation5 + $0x900] ss:$88 sps:$4 sm:$0xff]  }
  0xde   :  { %2454 = vmatpush1.bf16.msra.mxu1 %v9976_v62  ;;  %2412 = vmatprep.subr.bf16.mxu0 %v9977_v63  ;;  %v10064_v62 = vld [vmem:[#allocation5 + $0x908] ss:$88 sps:$4 sm:$0xff]   ;;  %v10069_v63 = vld [vmem:[#allocation5 + $0x9b4] ss:$88 sps:$4 sm:$0xff]  }
  0xdf   :  { %2455 = vmatprep.subr.bf16.mxu1 %v9979_v0  ;;  %v10072_v0 = vld [vmem:[#allocation5 + $0x9bc] ss:$88 sps:$4 sm:$0xff]  }
  0xe1   :  { %2413 = vmatpush1.bf16.msra.mxu0 %v9981_v1  ;;  %v10067_v1 = vld [vmem:[#allocation5 + $0x9b0] ss:$88 sps:$4 sm:$0xff]  }
  0xe2   :  { %2456 = vmatpush1.bf16.msra.mxu1 %v9982_v2  ;;  %2468 = vmatprep.subr.bf16.mxu0 %v9985_v5  ;;  %v10070_v2 = vld [vmem:[#allocation5 + $0x9b8] ss:$88 sps:$4 sm:$0xff]  }
  0xe3   :  { %2511 = vmatprep.subr.bf16.mxu1 %v9988_v6  ;;  %v10073_v5 = vld [vmem:[#allocation5 + $0xa60] ss:$88 sps:$4 sm:$0xff]  }
  0xe4   :  { %2415 = vmatmul.mubr.bf16.vlgmr.msra.gmra.mrb[0].mxu0 %v11931_v7  ;;  %v10076_v6 = vld [vmem:[#allocation5 + $0xa68] ss:$88 sps:$4 sm:$0xff]  }
  0xe5   :  { %2458 = vmatmul.mubr.bf16.vlgmr.msra.gmra.mrb[0].mxu1 %v11931_v7  ;;  %2469 = vmatpush1.bf16.msra.mxu0 %v9983_v8  ;;  %v10081_v8 = vld [vmem:[#allocation5 + $0x24] ss:$88 sps:$4 sm:$0xff]  }
  0xe6   :  { %2512 = vmatpush1.bf16.msra.mxu1 %v9986_v9  ;;  %2470 = vmatprep.subr.bf16.mxu0 %v9991_v10  ;;  %v10084_v9 = vld [vmem:[#allocation5 + $0x2c] ss:$88 sps:$4 sm:$0xff]   ;;  %v10079_v10 = vld [vmem:[#allocation5 + $0x20] ss:$88 sps:$4 sm:$0xff]  }
  0xe7   :  { %2513 = vmatprep.subr.bf16.mxu1 %v9994_v11  ;;  %2500 = vmatprep.mubr.bf16.mxu0 %v11927_v51  ;;  %v10082_v11 = vld [vmem:[#allocation5 + $0x28] ss:$88 sps:$4 sm:$0xff]  }
  0xe8   :  { %2543 = vmatprep.mubr.bf16.mxu1 %v11927_v51 }
  0xe9   :  { %2471 = vmatpush1.bf16.msra.mxu0 %v9989_v12  ;;  %v10087_v12 = vld [vmem:[#allocation5 + $0xd4] ss:$88 sps:$4 sm:$0xff]  }
  0xea   :  { %2514 = vmatpush1.bf16.msra.mxu1 %v9992_v13  ;;  %2472 = vmatprep.subr.bf16.mxu0 %v9997_v14  ;;  %v10090_v13 = vld [vmem:[#allocation5 + $0xdc] ss:$88 sps:$4 sm:$0xff]   ;;  %v10085_v14 = vld [vmem:[#allocation5 + $0xd0] ss:$88 sps:$4 sm:$0xff]  }
  0xeb   :  { %2515 = vmatprep.subr.bf16.mxu1 %v10000_v15  ;;  %v10088_v15 = vld [vmem:[#allocation5 + $0xd8] ss:$88 sps:$4 sm:$0xff]  }
  0xed   :  { %2473 = vmatpush1.bf16.msra.mxu0 %v9995_v16  ;;  %v10093_v16 = vld [vmem:[#allocation5 + $0x184] ss:$88 sps:$4 sm:$0xff]  }
  0xee   :  { %2516 = vmatpush1.bf16.msra.mxu1 %v9998_v17  ;;  %2474 = vmatprep.subr.bf16.mxu0 %v10003_v18  ;;  %v10096_v17 = vld [vmem:[#allocation5 + $0x18c] ss:$88 sps:$4 sm:$0xff]   ;;  %v10091_v18 = vld [vmem:[#allocation5 + $0x180] ss:$88 sps:$4 sm:$0xff]  }
  0xef   :  { %2517 = vmatprep.subr.bf16.mxu1 %v10006_v19  ;;  %v10094_v19 = vld [vmem:[#allocation5 + $0x188] ss:$88 sps:$4 sm:$0xff]  }
  0xf1   :  { %2475 = vmatpush1.bf16.msra.mxu0 %v10001_v20  ;;  %v10099_v20 = vld [vmem:[#allocation5 + $0x234] ss:$88 sps:$4 sm:$0xff]  }
  0xf2   :  { %2518 = vmatpush1.bf16.msra.mxu1 %v10004_v21  ;;  %2476 = vmatprep.subr.bf16.mxu0 %v10009_v22  ;;  %v10102_v21 = vld [vmem:[#allocation5 + $0x23c] ss:$88 sps:$4 sm:$0xff]   ;;  %v10097_v22 = vld [vmem:[#allocation5 + $0x230] ss:$88 sps:$4 sm:$0xff]  }
  0xf3   :  { %2519 = vmatprep.subr.bf16.mxu1 %v10012_v23  ;;  %v10100_v23 = vld [vmem:[#allocation5 + $0x238] ss:$88 sps:$4 sm:$0xff]  }
  0xf5   :  { %2477 = vmatpush1.bf16.msra.mxu0 %v10007_v24  ;;  %v10105_v24 = vld [vmem:[#allocation5 + $0x2e4] ss:$88 sps:$4 sm:$0xff]  }
  0xf6   :  { %2520 = vmatpush1.bf16.msra.mxu1 %v10010_v25  ;;  %2478 = vmatprep.subr.bf16.mxu0 %v10015_v26  ;;  %v10108_v25 = vld [vmem:[#allocation5 + $0x2ec] ss:$88 sps:$4 sm:$0xff]   ;;  %v10103_v26 = vld [vmem:[#allocation5 + $0x2e0] ss:$88 sps:$4 sm:$0xff]  }
  0xf7   :  { %2521 = vmatprep.subr.bf16.mxu1 %v10018_v27  ;;  %v10106_v27 = vld [vmem:[#allocation5 + $0x2e8] ss:$88 sps:$4 sm:$0xff]  }
  0xf9   :  { %2479 = vmatpush1.bf16.msra.mxu0 %v10013_v28  ;;  %v10111_v28 = vld [vmem:[#allocation5 + $0x394] ss:$88 sps:$4 sm:$0xff]  }
  0xfa   :  { %2522 = vmatpush1.bf16.msra.mxu1 %v10016_v29  ;;  %2480 = vmatprep.subr.bf16.mxu0 %v10021_v30  ;;  %v10114_v29 = vld [vmem:[#allocation5 + $0x39c] ss:$88 sps:$4 sm:$0xff]   ;;  %v10109_v30 = vld [vmem:[#allocation5 + $0x390] ss:$88 sps:$4 sm:$0xff]  }
  0xfb   :  { %2523 = vmatprep.subr.bf16.mxu1 %v10024_v31  ;;  %v10112_v31 = vld [vmem:[#allocation5 + $0x398] ss:$88 sps:$4 sm:$0xff]  }
  0xfd   :  { %2481 = vmatpush1.bf16.msra.mxu0 %v10019_v32  ;;  %v10117_v32 = vld [vmem:[#allocation5 + $0x444] ss:$88 sps:$4 sm:$0xff]  }
  0xfe   :  { %2524 = vmatpush1.bf16.msra.mxu1 %v10022_v33  ;;  %2482 = vmatprep.subr.bf16.mxu0 %v10027_v34  ;;  %v10120_v33 = vld [vmem:[#allocation5 + $0x44c] ss:$88 sps:$4 sm:$0xff]   ;;  %v10115_v34 = vld [vmem:[#allocation5 + $0x440] ss:$88 sps:$4 sm:$0xff]  }
  0xff   :  { %2525 = vmatprep.subr.bf16.mxu1 %v10030_v35  ;;  %v10118_v35 = vld [vmem:[#allocation5 + $0x448] ss:$88 sps:$4 sm:$0xff]  }
 0x101   :  { %2483 = vmatpush1.bf16.msra.mxu0 %v10025_v36  ;;  %v10123_v36 = vld [vmem:[#allocation5 + $0x4f4] ss:$88 sps:$4 sm:$0xff]  }
 0x102   :  { %2526 = vmatpush1.bf16.msra.mxu1 %v10028_v37  ;;  %2484 = vmatprep.subr.bf16.mxu0 %v10033_v38  ;;  %v10126_v37 = vld [vmem:[#allocation5 + $0x4fc] ss:$88 sps:$4 sm:$0xff]   ;;  %v10121_v38 = vld [vmem:[#allocation5 + $0x4f0] ss:$88 sps:$4 sm:$0xff]  }
 0x103   :  { %2527 = vmatprep.subr.bf16.mxu1 %v10036_v39  ;;  %v10124_v39 = vld [vmem:[#allocation5 + $0x4f8] ss:$88 sps:$4 sm:$0xff]  }
 0x105   :  { %2485 = vmatpush1.bf16.msra.mxu0 %v10031_v40  ;;  %v10129_v40 = vld [vmem:[#allocation5 + $0x5a4] ss:$88 sps:$4 sm:$0xff]  }
 0x106   :  { %2528 = vmatpush1.bf16.msra.mxu1 %v10034_v41  ;;  %2486 = vmatprep.subr.bf16.mxu0 %v10039_v42  ;;  %v10132_v41 = vld [vmem:[#allocation5 + $0x5ac] ss:$88 sps:$4 sm:$0xff]   ;;  %v10127_v42 = vld [vmem:[#allocation5 + $0x5a0] ss:$88 sps:$4 sm:$0xff]  }
 0x107   :  { %2529 = vmatprep.subr.bf16.mxu1 %v10042_v43  ;;  %v10130_v43 = vld [vmem:[#allocation5 + $0x5a8] ss:$88 sps:$4 sm:$0xff]  }
 0x109   :  { %2487 = vmatpush1.bf16.msra.mxu0 %v10037_v44  ;;  %v10135_v44 = vld [vmem:[#allocation5 + $0x654] ss:$88 sps:$4 sm:$0xff]  }
 0x10a   :  { %2530 = vmatpush1.bf16.msra.mxu1 %v10040_v45  ;;  %2488 = vmatprep.subr.bf16.mxu0 %v10045_v46  ;;  %v10138_v45 = vld [vmem:[#allocation5 + $0x65c] ss:$88 sps:$4 sm:$0xff]   ;;  %v10133_v46 = vld [vmem:[#allocation5 + $0x650] ss:$88 sps:$4 sm:$0xff]  }
 0x10b   :  { %2531 = vmatprep.subr.bf16.mxu1 %v10048_v47  ;;  %v10136_v47 = vld [vmem:[#allocation5 + $0x658] ss:$88 sps:$4 sm:$0xff]  }
 0x10d   :  { %2489 = vmatpush1.bf16.msra.mxu0 %v10043_v48  ;;  %v10141_v48 = vld [vmem:[#allocation5 + $0x704] ss:$88 sps:$4 sm:$0xff]  }
 0x10e   :  { %2532 = vmatpush1.bf16.msra.mxu1 %v10046_v49  ;;  %2490 = vmatprep.subr.bf16.mxu0 %v10051_v50  ;;  %v10144_v49 = vld [vmem:[#allocation5 + $0x70c] ss:$88 sps:$4 sm:$0xff]   ;;  %v10139_v50 = vld [vmem:[#allocation5 + $0x700] ss:$88 sps:$4 sm:$0xff]  }
 0x10f   :  { %2533 = vmatprep.subr.bf16.mxu1 %v10054_v52  ;;  %v10142_v52 = vld [vmem:[#allocation5 + $0x708] ss:$88 sps:$4 sm:$0xff]  }
 0x111   :  { %2491 = vmatpush1.bf16.msra.mxu0 %v10049_v53  ;;  %v10147_v53 = vld [vmem:[#allocation5 + $0x7b4] ss:$88 sps:$4 sm:$0xff]  }
 0x112   :  { %2534 = vmatpush1.bf16.msra.mxu1 %v10052_v54  ;;  %2492 = vmatprep.subr.bf16.mxu0 %v10057_v55  ;;  %v10150_v54 = vld [vmem:[#allocation5 + $0x7bc] ss:$88 sps:$4 sm:$0xff]   ;;  %v10145_v55 = vld [vmem:[#allocation5 + $0x7b0] ss:$88 sps:$4 sm:$0xff]  }
 0x113   :  { %2535 = vmatprep.subr.bf16.mxu1 %v10060_v56  ;;  %v10148_v56 = vld [vmem:[#allocation5 + $0x7b8] ss:$88 sps:$4 sm:$0xff]  }
 0x115   :  { %2493 = vmatpush1.bf16.msra.mxu0 %v10055_v57  ;;  %v10153_v57 = vld [vmem:[#allocation5 + $0x864] ss:$88 sps:$4 sm:$0xff]  }
 0x116   :  { %2536 = vmatpush1.bf16.msra.mxu1 %v10058_v58  ;;  %2494 = vmatprep.subr.bf16.mxu0 %v10063_v59  ;;  %v10156_v58 = vld [vmem:[#allocation5 + $0x86c] ss:$88 sps:$4 sm:$0xff]   ;;  %v10151_v59 = vld [vmem:[#allocation5 + $0x860] ss:$88 sps:$4 sm:$0xff]  }
 0x117   :  { %2537 = vmatprep.subr.bf16.mxu1 %v10066_v60  ;;  %v10154_v60 = vld [vmem:[#allocation5 + $0x868] ss:$88 sps:$4 sm:$0xff]  }
 0x119   :  { %2495 = vmatpush1.bf16.msra.mxu0 %v10061_v61  ;;  %v10159_v61 = vld [vmem:[#allocation5 + $0x914] ss:$88 sps:$4 sm:$0xff]  }
 0x11a   :  { %2538 = vmatpush1.bf16.msra.mxu1 %v10064_v62  ;;  %2496 = vmatprep.subr.bf16.mxu0 %v10069_v63  ;;  %v10162_v62 = vld [vmem:[#allocation5 + $0x91c] ss:$88 sps:$4 sm:$0xff]   ;;  %v10157_v63 = vld [vmem:[#allocation5 + $0x910] ss:$88 sps:$4 sm:$0xff]  }
 0x11b   :  { %2539 = vmatprep.subr.bf16.mxu1 %v10072_v0  ;;  %v10160_v0 = vld [vmem:[#allocation5 + $0x918] ss:$88 sps:$4 sm:$0xff]  }
 0x11d   :  { %2497 = vmatpush1.bf16.msra.mxu0 %v10067_v1  ;;  %v10165_v1 = vld [vmem:[#allocation5 + $0x9c4] ss:$88 sps:$4 sm:$0xff]  }
 0x11e   :  { %2540 = vmatpush1.bf16.msra.mxu1 %v10070_v2  ;;  %2498 = vmatprep.subr.bf16.mxu0 %v10075_v3  ;;  %v10168_v2 = vld [vmem:[#allocation5 + $0x9cc] ss:$88 sps:$4 sm:$0xff]   ;;  %v10163_v3 = vld [vmem:[#allocation5 + $0x9c0] ss:$88 sps:$4 sm:$0xff]  }
 0x11f   :  { %2541 = vmatprep.subr.bf16.mxu1 %v10078_v4  ;;  %v10166_v4 = vld [vmem:[#allocation5 + $0x9c8] ss:$88 sps:$4 sm:$0xff]  }
 0x121   :  { %2499 = vmatpush1.bf16.msra.mxu0 %v10073_v5  ;;  %v10171_v5 = vld [vmem:[#allocation5 + $0xa74] ss:$88 sps:$4 sm:$0xff]  }
 0x122   :  { %2542 = vmatpush1.bf16.msra.mxu1 %v10076_v6  ;;  %2554 = vmatprep.subr.bf16.mxu0 %v10081_v8  ;;  %v10174_v6 = vld [vmem:[#allocation5 + $0xa7c] ss:$88 sps:$4 sm:$0xff]   ;;  %v10169_v8 = vld [vmem:[#allocation5 + $0xa70] ss:$88 sps:$4 sm:$0xff]  }
 0x123   :  { %2597 = vmatprep.subr.bf16.mxu1 %v10084_v9  ;;  %v10172_v9 = vld [vmem:[#allocation5 + $0xa78] ss:$88 sps:$4 sm:$0xff]  }
 0x124   :  { %2501 = vmatmul.mubr.bf16.vlgmr.msra.gmra.mrb[4].mxu0 %v11931_v7 }
 0x125   :  { %2544 = vmatmul.mubr.bf16.vlgmr.msra.gmra.mrb[4].mxu1 %v11931_v7  ;;  %2555 = vmatpush1.bf16.msra.mxu0 %v10079_v10  ;;  %v10177_v10 = vld [vmem:[#allocation5 + $0x34] ss:$88 sps:$4 sm:$0xff]  }
 0x126   :  { %2598 = vmatpush1.bf16.msra.mxu1 %v10082_v11  ;;  %2556 = vmatprep.subr.bf16.mxu0 %v10087_v12  ;;  %v10180_v11 = vld [vmem:[#allocation5 + $0x3c] ss:$88 sps:$4 sm:$0xff]   ;;  %v10175_v12 = vld [vmem:[#allocation5 + $0x30] ss:$88 sps:$4 sm:$0xff]  }
 0x127   :  { %2599 = vmatprep.subr.bf16.mxu1 %v10090_v13  ;;  %2586 = vmatprep.mubr.bf16.mxu0 %v11927_v51  ;;  %v10178_v13 = vld [vmem:[#allocation5 + $0x38] ss:$88 sps:$4 sm:$0xff]  }
 0x128   :  { %2629 = vmatprep.mubr.bf16.mxu1 %v11927_v51 }
 0x129   :  { %2557 = vmatpush1.bf16.msra.mxu0 %v10085_v14  ;;  %v10183_v14 = vld [vmem:[#allocation5 + $0xe4] ss:$88 sps:$4 sm:$0xff]  }
 0x12a   :  { %2600 = vmatpush1.bf16.msra.mxu1 %v10088_v15  ;;  %2558 = vmatprep.subr.bf16.mxu0 %v10093_v16  ;;  %v10186_v15 = vld [vmem:[#allocation5 + $0xec] ss:$88 sps:$4 sm:$0xff]   ;;  %v10181_v16 = vld [vmem:[#allocation5 + $0xe0] ss:$88 sps:$4 sm:$0xff]  }
 0x12b   :  { %2601 = vmatprep.subr.bf16.mxu1 %v10096_v17  ;;  %v10184_v17 = vld [vmem:[#allocation5 + $0xe8] ss:$88 sps:$4 sm:$0xff]  }
 0x12d   :  { %2559 = vmatpush1.bf16.msra.mxu0 %v10091_v18  ;;  %v10189_v18 = vld [vmem:[#allocation5 + $0x194] ss:$88 sps:$4 sm:$0xff]  }
 0x12e   :  { %2602 = vmatpush1.bf16.msra.mxu1 %v10094_v19  ;;  %2560 = vmatprep.subr.bf16.mxu0 %v10099_v20  ;;  %v10192_v19 = vld [vmem:[#allocation5 + $0x19c] ss:$88 sps:$4 sm:$0xff]   ;;  %v10187_v20 = vld [vmem:[#allocation5 + $0x190] ss:$88 sps:$4 sm:$0xff]  }
 0x12f   :  { %2603 = vmatprep.subr.bf16.mxu1 %v10102_v21  ;;  %v10190_v21 = vld [vmem:[#allocation5 + $0x198] ss:$88 sps:$4 sm:$0xff]  }
 0x131   :  { %2561 = vmatpush1.bf16.msra.mxu0 %v10097_v22  ;;  %v10195_v22 = vld [vmem:[#allocation5 + $0x244] ss:$88 sps:$4 sm:$0xff]  }
 0x132   :  { %2604 = vmatpush1.bf16.msra.mxu1 %v10100_v23  ;;  %2562 = vmatprep.subr.bf16.mxu0 %v10105_v24  ;;  %v10198_v23 = vld [vmem:[#allocation5 + $0x24c] ss:$88 sps:$4 sm:$0xff]   ;;  %v10193_v24 = vld [vmem:[#allocation5 + $0x240] ss:$88 sps:$4 sm:$0xff]  }
 0x133   :  { %2605 = vmatprep.subr.bf16.mxu1 %v10108_v25  ;;  %v10196_v25 = vld [vmem:[#allocation5 + $0x248] ss:$88 sps:$4 sm:$0xff]  }
 0x135   :  { %2563 = vmatpush1.bf16.msra.mxu0 %v10103_v26  ;;  %v10201_v26 = vld [vmem:[#allocation5 + $0x2f4] ss:$88 sps:$4 sm:$0xff]  }
 0x136   :  { %2606 = vmatpush1.bf16.msra.mxu1 %v10106_v27  ;;  %2564 = vmatprep.subr.bf16.mxu0 %v10111_v28  ;;  %v10204_v27 = vld [vmem:[#allocation5 + $0x2fc] ss:$88 sps:$4 sm:$0xff]   ;;  %v10199_v28 = vld [vmem:[#allocation5 + $0x2f0] ss:$88 sps:$4 sm:$0xff]  }
 0x137   :  { %2607 = vmatprep.subr.bf16.mxu1 %v10114_v29  ;;  %v10202_v29 = vld [vmem:[#allocation5 + $0x2f8] ss:$88 sps:$4 sm:$0xff]  }
 0x139   :  { %2565 = vmatpush1.bf16.msra.mxu0 %v10109_v30  ;;  %v10207_v30 = vld [vmem:[#allocation5 + $0x3a4] ss:$88 sps:$4 sm:$0xff]  }
 0x13a   :  { %2608 = vmatpush1.bf16.msra.mxu1 %v10112_v31  ;;  %2566 = vmatprep.subr.bf16.mxu0 %v10117_v32  ;;  %v10210_v31 = vld [vmem:[#allocation5 + $0x3ac] ss:$88 sps:$4 sm:$0xff]   ;;  %v10205_v32 = vld [vmem:[#allocation5 + $0x3a0] ss:$88 sps:$4 sm:$0xff]  }
 0x13b   :  { %2609 = vmatprep.subr.bf16.mxu1 %v10120_v33  ;;  %v10208_v33 = vld [vmem:[#allocation5 + $0x3a8] ss:$88 sps:$4 sm:$0xff]  }
 0x13d   :  { %2567 = vmatpush1.bf16.msra.mxu0 %v10115_v34  ;;  %v10213_v34 = vld [vmem:[#allocation5 + $0x454] ss:$88 sps:$4 sm:$0xff]  }
 0x13e   :  { %2610 = vmatpush1.bf16.msra.mxu1 %v10118_v35  ;;  %2568 = vmatprep.subr.bf16.mxu0 %v10123_v36  ;;  %v10216_v35 = vld [vmem:[#allocation5 + $0x45c] ss:$88 sps:$4 sm:$0xff]   ;;  %v10211_v36 = vld [vmem:[#allocation5 + $0x450] ss:$88 sps:$4 sm:$0xff]  }
 0x13f   :  { %2611 = vmatprep.subr.bf16.mxu1 %v10126_v37  ;;  %v10214_v37 = vld [vmem:[#allocation5 + $0x458] ss:$88 sps:$4 sm:$0xff]  }
 0x141   :  { %2569 = vmatpush1.bf16.msra.mxu0 %v10121_v38  ;;  %v10219_v38 = vld [vmem:[#allocation5 + $0x504] ss:$88 sps:$4 sm:$0xff]  }
 0x142   :  { %2612 = vmatpush1.bf16.msra.mxu1 %v10124_v39  ;;  %2570 = vmatprep.subr.bf16.mxu0 %v10129_v40  ;;  %v10222_v39 = vld [vmem:[#allocation5 + $0x50c] ss:$88 sps:$4 sm:$0xff]   ;;  %v10217_v40 = vld [vmem:[#allocation5 + $0x500] ss:$88 sps:$4 sm:$0xff]  }
 0x143   :  { %2613 = vmatprep.subr.bf16.mxu1 %v10132_v41  ;;  %v10220_v41 = vld [vmem:[#allocation5 + $0x508] ss:$88 sps:$4 sm:$0xff]  }
 0x145   :  { %2571 = vmatpush1.bf16.msra.mxu0 %v10127_v42  ;;  %v10225_v42 = vld [vmem:[#allocation5 + $0x5b4] ss:$88 sps:$4 sm:$0xff]  }
 0x146   :  { %2614 = vmatpush1.bf16.msra.mxu1 %v10130_v43  ;;  %2572 = vmatprep.subr.bf16.mxu0 %v10135_v44  ;;  %v10228_v43 = vld [vmem:[#allocation5 + $0x5bc] ss:$88 sps:$4 sm:$0xff]   ;;  %v10223_v44 = vld [vmem:[#allocation5 + $0x5b0] ss:$88 sps:$4 sm:$0xff]  }
 0x147   :  { %2615 = vmatprep.subr.bf16.mxu1 %v10138_v45  ;;  %v10226_v45 = vld [vmem:[#allocation5 + $0x5b8] ss:$88 sps:$4 sm:$0xff]  }
 0x149   :  { %2573 = vmatpush1.bf16.msra.mxu0 %v10133_v46  ;;  %v10231_v46 = vld [vmem:[#allocation5 + $0x664] ss:$88 sps:$4 sm:$0xff]  }
 0x14a   :  { %2616 = vmatpush1.bf16.msra.mxu1 %v10136_v47  ;;  %2574 = vmatprep.subr.bf16.mxu0 %v10141_v48  ;;  %v10234_v47 = vld [vmem:[#allocation5 + $0x66c] ss:$88 sps:$4 sm:$0xff]   ;;  %v10229_v48 = vld [vmem:[#allocation5 + $0x660] ss:$88 sps:$4 sm:$0xff]  }
 0x14b   :  { %2617 = vmatprep.subr.bf16.mxu1 %v10144_v49  ;;  %v10232_v49 = vld [vmem:[#allocation5 + $0x668] ss:$88 sps:$4 sm:$0xff]  }
 0x14d   :  { %2575 = vmatpush1.bf16.msra.mxu0 %v10139_v50  ;;  %v10237_v50 = vld [vmem:[#allocation5 + $0x714] ss:$88 sps:$4 sm:$0xff]  }
 0x14e   :  { %2618 = vmatpush1.bf16.msra.mxu1 %v10142_v52  ;;  %2576 = vmatprep.subr.bf16.mxu0 %v10147_v53  ;;  %v10240_v52 = vld [vmem:[#allocation5 + $0x71c] ss:$88 sps:$4 sm:$0xff]   ;;  %v10235_v53 = vld [vmem:[#allocation5 + $0x710] ss:$88 sps:$4 sm:$0xff]  }
 0x14f   :  { %2619 = vmatprep.subr.bf16.mxu1 %v10150_v54  ;;  %v10238_v54 = vld [vmem:[#allocation5 + $0x718] ss:$88 sps:$4 sm:$0xff]  }
 0x151   :  { %2577 = vmatpush1.bf16.msra.mxu0 %v10145_v55  ;;  %v10243_v55 = vld [vmem:[#allocation5 + $0x7c4] ss:$88 sps:$4 sm:$0xff]  }
 0x152   :  { %2620 = vmatpush1.bf16.msra.mxu1 %v10148_v56  ;;  %2578 = vmatprep.subr.bf16.mxu0 %v10153_v57  ;;  %v10246_v56 = vld [vmem:[#allocation5 + $0x7cc] ss:$88 sps:$4 sm:$0xff]   ;;  %v10241_v57 = vld [vmem:[#allocation5 + $0x7c0] ss:$88 sps:$4 sm:$0xff]  }
 0x153   :  { %2621 = vmatprep.subr.bf16.mxu1 %v10156_v58  ;;  %v10244_v58 = vld [vmem:[#allocation5 + $0x7c8] ss:$88 sps:$4 sm:$0xff]  }
 0x155   :  { %2579 = vmatpush1.bf16.msra.mxu0 %v10151_v59  ;;  %v10249_v59 = vld [vmem:[#allocation5 + $0x874] ss:$88 sps:$4 sm:$0xff]  }
 0x156   :  { %2622 = vmatpush1.bf16.msra.mxu1 %v10154_v60  ;;  %2580 = vmatprep.subr.bf16.mxu0 %v10159_v61  ;;  %v10252_v60 = vld [vmem:[#allocation5 + $0x87c] ss:$88 sps:$4 sm:$0xff]   ;;  %v10247_v61 = vld [vmem:[#allocation5 + $0x870] ss:$88 sps:$4 sm:$0xff]  }
 0x157   :  { %2623 = vmatprep.subr.bf16.mxu1 %v10162_v62  ;;  %v10250_v62 = vld [vmem:[#allocation5 + $0x878] ss:$88 sps:$4 sm:$0xff]  }
 0x159   :  { %2581 = vmatpush1.bf16.msra.mxu0 %v10157_v63  ;;  %v10255_v63 = vld [vmem:[#allocation5 + $0x924] ss:$88 sps:$4 sm:$0xff]  }
 0x15a   :  { %2624 = vmatpush1.bf16.msra.mxu1 %v10160_v0  ;;  %2582 = vmatprep.subr.bf16.mxu0 %v10165_v1  ;;  %v10258_v0 = vld [vmem:[#allocation5 + $0x92c] ss:$88 sps:$4 sm:$0xff]   ;;  %v10253_v1 = vld [vmem:[#allocation5 + $0x920] ss:$88 sps:$4 sm:$0xff]  }
 0x15b   :  { %2625 = vmatprep.subr.bf16.mxu1 %v10168_v2  ;;  %v10256_v2 = vld [vmem:[#allocation5 + $0x928] ss:$88 sps:$4 sm:$0xff]  }
 0x15d   :  { %2583 = vmatpush1.bf16.msra.mxu0 %v10163_v3  ;;  %v10261_v3 = vld [vmem:[#allocation5 + $0x9d4] ss:$88 sps:$4 sm:$0xff]  }
 0x15e   :  { %2626 = vmatpush1.bf16.msra.mxu1 %v10166_v4  ;;  %2584 = vmatprep.subr.bf16.mxu0 %v10171_v5  ;;  %v10264_v4 = vld [vmem:[#allocation5 + $0x9dc] ss:$88 sps:$4 sm:$0xff]   ;;  %v10259_v5 = vld [vmem:[#allocation5 + $0x9d0] ss:$88 sps:$4 sm:$0xff]  }
 0x15f   :  { %2627 = vmatprep.subr.bf16.mxu1 %v10174_v6  ;;  %v10262_v6 = vld [vmem:[#allocation5 + $0x9d8] ss:$88 sps:$4 sm:$0xff]  }
 0x161   :  { %2585 = vmatpush1.bf16.msra.mxu0 %v10169_v8  ;;  %v10267_v8 = vld [vmem:[#allocation5 + $0xa84] ss:$88 sps:$4 sm:$0xff]  }
 0x162   :  { %2628 = vmatpush1.bf16.msra.mxu1 %v10172_v9  ;;  %2640 = vmatprep.subr.bf16.mxu0 %v10177_v10  ;;  %v10270_v9 = vld [vmem:[#allocation5 + $0xa8c] ss:$88 sps:$4 sm:$0xff]   ;;  %v10265_v10 = vld [vmem:[#allocation5 + $0xa80] ss:$88 sps:$4 sm:$0xff]  }
 0x163   :  { %2683 = vmatprep.subr.bf16.mxu1 %v10180_v11  ;;  %v10268_v11 = vld [vmem:[#allocation5 + $0xa88] ss:$88 sps:$4 sm:$0xff]  }
 0x164   :  { %2587 = vmatmul.mubr.bf16.vlgmr.msra.gmra.mrb[8].mxu0 %v11931_v7 }
 0x165   :  { %2630 = vmatmul.mubr.bf16.vlgmr.msra.gmra.mrb[8].mxu1 %v11931_v7  ;;  %2641 = vmatpush1.bf16.msra.mxu0 %v10175_v12  ;;  %v10273_v12 = vld [vmem:[#allocation5 + $0x44] ss:$88 sps:$4 sm:$0xff]  }
 0x166   :  { %2684 = vmatpush1.bf16.msra.mxu1 %v10178_v13  ;;  %2642 = vmatprep.subr.bf16.mxu0 %v10183_v14  ;;  %v10276_v13 = vld [vmem:[#allocation5 + $0x4c] ss:$88 sps:$4 sm:$0xff]   ;;  %v10271_v14 = vld [vmem:[#allocation5 + $0x40] ss:$88 sps:$4 sm:$0xff]  }
 0x167   :  { %2685 = vmatprep.subr.bf16.mxu1 %v10186_v15  ;;  %2672 = vmatprep.mubr.bf16.mxu0 %v11927_v51  ;;  %v10274_v15 = vld [vmem:[#allocation5 + $0x48] ss:$88 sps:$4 sm:$0xff]  }
 0x168   :  { %2715 = vmatprep.mubr.bf16.mxu1 %v11927_v51 }
 0x169   :  { %2643 = vmatpush1.bf16.msra.mxu0 %v10181_v16  ;;  %v10279_v16 = vld [vmem:[#allocation5 + $0xf4] ss:$88 sps:$4 sm:$0xff]  }
 0x16a   :  { %2686 = vmatpush1.bf16.msra.mxu1 %v10184_v17  ;;  %2644 = vmatprep.subr.bf16.mxu0 %v10189_v18  ;;  %v10282_v17 = vld [vmem:[#allocation5 + $0xfc] ss:$88 sps:$4 sm:$0xff]   ;;  %v10277_v18 = vld [vmem:[#allocation5 + $0xf0] ss:$88 sps:$4 sm:$0xff]  }
 0x16b   :  { %2687 = vmatprep.subr.bf16.mxu1 %v10192_v19  ;;  %v10280_v19 = vld [vmem:[#allocation5 + $0xf8] ss:$88 sps:$4 sm:$0xff]  }
 0x16d   :  { %2645 = vmatpush1.bf16.msra.mxu0 %v10187_v20  ;;  %v10285_v20 = vld [vmem:[#allocation5 + $0x1a4] ss:$88 sps:$4 sm:$0xff]  }
 0x16e   :  { %2688 = vmatpush1.bf16.msra.mxu1 %v10190_v21  ;;  %2646 = vmatprep.subr.bf16.mxu0 %v10195_v22  ;;  %v10288_v21 = vld [vmem:[#allocation5 + $0x1ac] ss:$88 sps:$4 sm:$0xff]   ;;  %v10283_v22 = vld [vmem:[#allocation5 + $0x1a0] ss:$88 sps:$4 sm:$0xff]  }
 0x16f   :  { %2689 = vmatprep.subr.bf16.mxu1 %v10198_v23  ;;  %v10286_v23 = vld [vmem:[#allocation5 + $0x1a8] ss:$88 sps:$4 sm:$0xff]  }
 0x171   :  { %2647 = vmatpush1.bf16.msra.mxu0 %v10193_v24  ;;  %v512_v24 = vlaneseq }
 0x172   :  { %2690 = vmatpush1.bf16.msra.mxu1 %v10196_v25  ;;  %2648 = vmatprep.subr.bf16.mxu0 %v10201_v26  ;;  %v10291_v25 = vld [vmem:[#allocation5 + $0x254] ss:$88 sps:$4 sm:$0xff]  }
 0x173   :  { %2691 = vmatprep.subr.bf16.mxu1 %v10204_v27  ;;  %v10294_v26 = vld [vmem:[#allocation5 + $0x25c] ss:$88 sps:$4 sm:$0xff]   ;;  %v10289_v27 = vld [vmem:[#allocation5 + $0x250] ss:$88 sps:$4 sm:$0xff]  }
 0x175   :  { %2649 = vmatpush1.bf16.msra.mxu0 %v10199_v28  ;;  %v10292_v28 = vld [vmem:[#allocation5 + $0x258] ss:$88 sps:$4 sm:$0xff]  }
 0x176   :  { %2692 = vmatpush1.bf16.msra.mxu1 %v10202_v29  ;;  %2650 = vmatprep.subr.bf16.mxu0 %v10207_v30  ;;  %v11949_v29 = vshrl.u32 %v512_v24, 7  ;;  %v10297_v30 = vld [vmem:[#allocation5 + $0x304] ss:$88 sps:$4 sm:$0xff]   ;;  %v10322_v24 = vld [vmem:[#allocation5 + $0x5c8] ss:$88 sps:$4 sm:$0xff]  }
 0x177   :  { %2693 = vmatprep.subr.bf16.mxu1 %v10210_v31  ;;  %v10300_v31 = vld [vmem:[#allocation5 + $0x30c] ss:$88 sps:$4 sm:$0xff]  }
 0x179   :  { %2651 = vmatpush1.bf16.msra.mxu0 %v10205_v32  ;;  %v10295_v32 = vld [vmem:[#allocation5 + $0x300] ss:$88 sps:$4 sm:$0xff]  }
 0x17a   :  { %2694 = vmatpush1.bf16.msra.mxu1 %v10208_v33  ;;  %2652 = vmatprep.subr.bf16.mxu0 %v10213_v34  ;;  %v10298_v33 = vld [vmem:[#allocation5 + $0x308] ss:$88 sps:$4 sm:$0xff]  }
 0x17b   :  { %2695 = vmatprep.subr.bf16.mxu1 %v10216_v35  ;;  %v11951_v34 = vld [vmem:[#allocation7] sm:$0xff]  ;;  %v11954_v35 = vsub.s32 0, %v11949_v29 }
 0x17d   :  { %2653 = vmatpush1.bf16.msra.mxu0 %v10211_v36  ;;  %v11957_v36 = vsub.s32 2, %v11949_v29 }
 0x17e   :  { %2696 = vmatpush1.bf16.msra.mxu1 %v10214_v37  ;;  %2654 = vmatprep.subr.bf16.mxu0 %v10219_v38  ;;  %v11960_v37 = vsub.s32 1, %v11949_v29  ;;  %v11963_v38 = vsub.s32 3, %v11949_v29 }
 0x17f   :  { %2697 = vmatprep.subr.bf16.mxu1 %v10222_v39  ;;  %v10303_v39 = vld [vmem:[#allocation5 + $0x3b4] ss:$88 sps:$4 sm:$0xff]  }
 0x181   :  { %2655 = vmatpush1.bf16.msra.mxu0 %v10217_v40  ;;  %v10306_v40 = vld [vmem:[#allocation5 + $0x3bc] ss:$88 sps:$4 sm:$0xff]  }
 0x182   :  { %2698 = vmatpush1.bf16.msra.mxu1 %v10220_v41  ;;  %2656 = vmatprep.subr.bf16.mxu0 %v10225_v42  ;;  %v10301_v41 = vld [vmem:[#allocation5 + $0x3b0] ss:$88 sps:$4 sm:$0xff]  }
 0x183   :  { %2699 = vmatprep.subr.bf16.mxu1 %v10228_v43  ;;  %v10304_v42 = vld [vmem:[#allocation5 + $0x3b8] ss:$88 sps:$4 sm:$0xff]   ;;  %v515_v43 = vrot.slane %v11951_v34, %v11954_v35 }
 0x185   :  { %2657 = vmatpush1.bf16.msra.mxu0 %v10223_v44  ;;  %v10309_v44 = vld [vmem:[#allocation5 + $0x464] ss:$88 sps:$4 sm:$0xff]  }
 0x186   :  { %2700 = vmatpush1.bf16.msra.mxu1 %v10226_v45  ;;  %2658 = vmatprep.subr.bf16.mxu0 %v10231_v46  ;;  %v523_v45 = vrot.slane %v11951_v34, %v11957_v36  ;;  %v519_v46 = vrot.slane %v11951_v34, %v11960_v37 }
 0x187   :  { %2701 = vmatprep.subr.bf16.mxu1 %v10234_v47  ;;  %v527_v47 = vrot.slane %v11951_v34, %v11963_v38 }
 0x189   :  { %2659 = vmatpush1.bf16.msra.mxu0 %v10229_v48  ;;  %v10312_v48 = vld [vmem:[#allocation5 + $0x46c] ss:$88 sps:$4 sm:$0xff]  }
 0x18a   :  { %2702 = vmatpush1.bf16.msra.mxu1 %v10232_v49  ;;  %2660 = vmatprep.subr.bf16.mxu0 %v10237_v50  ;;  %v10307_v50 = vld [vmem:[#allocation5 + $0x460] ss:$88 sps:$4 sm:$0xff]  }
 0x18b   :  { %2703 = vmatprep.subr.bf16.mxu1 %v10240_v52  ;;  %v10310_v52 = vld [vmem:[#allocation5 + $0x468] ss:$88 sps:$4 sm:$0xff]  }
 0x18d   :  { %2661 = vmatpush1.bf16.msra.mxu0 %v10235_v53 }
 0x18e   :  { %2704 = vmatpush1.bf16.msra.mxu1 %v10238_v54  ;;  %2662 = vmatprep.subr.bf16.mxu0 %v10243_v55 }
 0x18f   :  { %2705 = vmatprep.subr.bf16.mxu1 %v10246_v56  ;;  %v10315_v56 = vld [vmem:[#allocation5 + $0x514] ss:$88 sps:$4 sm:$0xff]  }
 0x191   :  { %2663 = vmatpush1.bf16.msra.mxu0 %v10241_v57  ;;  %v10318_v57 = vld [vmem:[#allocation5 + $0x51c] ss:$88 sps:$4 sm:$0xff]  }
 0x192   :  { %2706 = vmatpush1.bf16.msra.mxu1 %v10244_v58  ;;  %2664 = vmatprep.subr.bf16.mxu0 %v10249_v59 }
 0x193   :  { %2707 = vmatprep.subr.bf16.mxu1 %v10252_v60 }
 0x195   :  { %2665 = vmatpush1.bf16.msra.mxu0 %v10247_v61 }
 0x196   :  { %2708 = vmatpush1.bf16.msra.mxu1 %v10250_v62  ;;  %2666 = vmatprep.subr.bf16.mxu0 %v10255_v63 }
 0x197   :  { %2709 = vmatprep.subr.bf16.mxu1 %v10258_v0 }
 0x199   :  { %2667 = vmatpush1.bf16.msra.mxu0 %v10253_v1 }
 0x19a   :  { %2710 = vmatpush1.bf16.msra.mxu1 %v10256_v2  ;;  %2668 = vmatprep.subr.bf16.mxu0 %v10261_v3 }
 0x19b   :  { %2711 = vmatprep.subr.bf16.mxu1 %v10264_v4 }
 0x19d   :  { %2669 = vmatpush1.bf16.msra.mxu0 %v10259_v5 }
 0x19e   :  { %2712 = vmatpush1.bf16.msra.mxu1 %v10262_v6  ;;  %2670 = vmatprep.subr.bf16.mxu0 %v10267_v8  ;;  %v10313_v8 = vld [vmem:[#allocation5 + $0x510] ss:$88 sps:$4 sm:$0xff]  }
 0x19f   :  { %2713 = vmatprep.subr.bf16.mxu1 %v10270_v9  ;;  %v10316_v9 = vld [vmem:[#allocation5 + $0x518] ss:$88 sps:$4 sm:$0xff]  }
 0x1a1   :  { %2671 = vmatpush1.bf16.msra.mxu0 %v10265_v10 }
 0x1a2   :  { %2714 = vmatpush1.bf16.msra.mxu1 %v10268_v11  ;;  %2726 = vmatprep.subr.bf16.mxu0 %v10273_v12 }
 0x1a3   :  { %2769 = vmatprep.subr.bf16.mxu1 %v10276_v13  ;;  %v10321_v13 = vld [vmem:[#allocation5 + $0x5c4] ss:$88 sps:$4 sm:$0xff]  }
 0x1a4   :  { %2673 = vmatmul.mubr.bf16.vlgmr.msra.gmra.mrb[12].mxu0 %v11931_v7 }
 0x1a5   :  { %2716 = vmatmul.mubr.bf16.vlgmr.msra.gmra.mrb[12].mxu1 %v11931_v7  ;;  %2727 = vmatpush1.bf16.msra.mxu0 %v10271_v14  ;;  %v10324_v14 = vld [vmem:[#allocation5 + $0x5cc] ss:$88 sps:$4 sm:$0xff]  }
 0x1a6   :  { %2770 = vmatpush1.bf16.msra.mxu1 %v10274_v15  ;;  %2728 = vmatprep.subr.bf16.mxu0 %v10279_v16 }
 0x1a7   :  { %2771 = vmatprep.subr.bf16.mxu1 %v10282_v17  ;;  %2758 = vmatprep.mubr.bf16.mxu0 %v11927_v51 }
 0x1a8   :  { %2801 = vmatprep.mubr.bf16.mxu1 %v11927_v51 }
 0x1a9   :  { %2729 = vmatpush1.bf16.msra.mxu0 %v10277_v18 }
 0x1aa   :  { %2772 = vmatpush1.bf16.msra.mxu1 %v10280_v19  ;;  %2730 = vmatprep.subr.bf16.mxu0 %v10285_v20 }
 0x1ab   :  { %2773 = vmatprep.subr.bf16.mxu1 %v10288_v21 }
 0x1ad   :  { %2731 = vmatpush1.bf16.msra.mxu0 %v10283_v22  ;;  %v10319_v22 = vld [vmem:[#allocation5 + $0x5c0] ss:$88 sps:$4 sm:$0xff]  }
 0x1ae   :  { %2774 = vmatpush1.bf16.msra.mxu1 %v10286_v23  ;;  %2732 = vmatprep.subr.bf16.mxu0 %v10291_v25  ;;  %v10327_v25 = vld [vmem:[#allocation5 + $0x674] ss:$88 sps:$4 sm:$0xff]  }
 0x1af   :  { %2775 = vmatprep.subr.bf16.mxu1 %v10294_v26  ;;  %v10330_v26 = vld [vmem:[#allocation5 + $0x67c] ss:$88 sps:$4 sm:$0xff]  }
 0x1b1   :  { %2733 = vmatpush1.bf16.msra.mxu0 %v10289_v27  ;;  %v10325_v27 = vld [vmem:[#allocation5 + $0x670] ss:$88 sps:$4 sm:$0xff]  }
 0x1b2   :  { %2776 = vmatpush1.bf16.msra.mxu1 %v10292_v28  ;;  %2734 = vmatprep.subr.bf16.mxu0 %v10297_v30  ;;  %v10328_v28 = vld [vmem:[#allocation5 + $0x678] ss:$88 sps:$4 sm:$0xff]   ;;  %v10333_v30 = vld [vmem:[#allocation5 + $0x724] ss:$88 sps:$4 sm:$0xff]  }
 0x1b3   :  { %2777 = vmatprep.subr.bf16.mxu1 %v10300_v31  ;;  %v10336_v31 = vld [vmem:[#allocation5 + $0x72c] ss:$88 sps:$4 sm:$0xff]  }
 0x1b5   :  { %2735 = vmatpush1.bf16.msra.mxu0 %v10295_v32  ;;  %v10331_v32 = vld [vmem:[#allocation5 + $0x720] ss:$88 sps:$4 sm:$0xff]  }
 0x1b6   :  { %2778 = vmatpush1.bf16.msra.mxu1 %v10298_v33  ;;  %2736 = vmatprep.subr.bf16.mxu0 %v10303_v39  ;;  %v10334_v33 = vld [vmem:[#allocation5 + $0x728] ss:$88 sps:$4 sm:$0xff]   ;;  %v10339_v39 = vld [vmem:[#allocation5 + $0x7d4] ss:$88 sps:$4 sm:$0xff]  }
 0x1b7   :  { %2779 = vmatprep.subr.bf16.mxu1 %v10306_v40  ;;  %v2416_v49 = vpop.f32.mrb[0].mxu0  ;;  %v10342_v40 = vld [vmem:[#allocation5 + $0x7dc] ss:$88 sps:$4 sm:$0xff]  }
 0x1b8   :  { %v2459_v53 = vpop.f32.mrb[0].mxu1  ;;  %v2417_v54 = vadd.f32 %v2416_v49, %v515_v43  ;;  %v2418_v55 = vpop.f32.mrb[1].mxu0  ;;  %v10349_v49 = vld [vmem:[#allocation5 + $0x930] ss:$88 sps:$4 sm:$0xff]  }
 0x1b9   :  { %v2460_v58 = vadd.f32 %v2459_v53, %v523_v45  ;;  %v2461_v59 = vpop.f32.mrb[1].mxu1  ;;  %v2419_v60 = vadd.f32 %v2418_v55, %v519_v46  ;;  %v2420_v61 = vpop.f32.mrb[2].mxu0  ;;  %2737 = vmatpush1.bf16.msra.mxu0 %v10301_v41  ;;  %v10337_v41 = vld [vmem:[#allocation5 + $0x7d0] ss:$88 sps:$4 sm:$0xff]   ;;  %v10360_v53 = vld [vmem:[#allocation5 + $0x9ec] ss:$88 sps:$4 sm:$0xff]  }
 0x1ba   :  { %2780 = vmatpush1.bf16.msra.mxu1 %v10304_v42  ;;  %v2462_v62 = vadd.f32 %v2461_v59, %v527_v47  ;;  %v2463_v63 = vpop.f32.mrb[2].mxu1  ;;  %v2855_v0 = vmax.f32 %v2417_v54, 0.0  ;;  %v2421_v1 = vadd.f32 %v2420_v61, %v515_v43  ;;  %v2422_v2 = vpop.f32.mrb[3].mxu0  ;;  %2738 = vmatprep.subr.bf16.mxu0 %v10309_v44  ;;  %v10340_v42 = vld [vmem:[#allocation5 + $0x7d8] ss:$88 sps:$4 sm:$0xff]  }
 0x1bb   :  { %2781 = vmatprep.subr.bf16.mxu1 %v10312_v48  ;;  %v2857_v3 = vmax.f32 %v2460_v58, 0.0  ;;  %v2464_v4 = vadd.f32 %v2463_v63, %v523_v45  ;;  %v2465_v5 = vpop.f32.mrb[3].mxu1  ;;  %v2423_v6 = vadd.f32 %v2422_v2, %v519_v46  ;;  %v2856_v16 = vmax.f32 %v2419_v60, 0.0  ;;  %v10345_v43 = vld [vmem:[#allocation5 + $0x884] ss:$88 sps:$4 sm:$0xff]  }
 0x1bc   :  { %v2858_v10 = vmax.f32 %v2462_v62, 0.0  ;;  %v2466_v11 = vadd.f32 %v2465_v5, %v527_v47  ;;  %v2877_v12 = vmax.f32 %v2421_v1, 0.0  ;;  %v10348_v44 = vld [vmem:[#allocation5 + $0x88c] ss:$88 sps:$4 sm:$0xff]   ;;  %v10343_v45 = vld [vmem:[#allocation5 + $0x880] ss:$88 sps:$4 sm:$0xff]  }
 0x1bd   :  { %v2879_v15 = vmax.f32 %v2464_v4, 0.0  ;;  %v2878_v17 = vmax.f32 %v2423_v6, 0.0  ;;  %2739 = vmatpush1.bf16.msra.mxu0 %v10307_v50  ;;  %v10346_v46 = vld [vmem:[#allocation5 + $0x888] ss:$88 sps:$4 sm:$0xff]   ;;  %v10351_v47 = vld [vmem:[#allocation5 + $0x934] ss:$88 sps:$4 sm:$0xff]  }
 0x1be   :  { %2782 = vmatpush1.bf16.msra.mxu1 %v10310_v52  ;;  %v2880_v18 = vmax.f32 %v2466_v11, 0.0  ;;  %v11973_v19 = vpack.c.bf16 %v2877_v12, %v2855_v0  ;;  %2740 = vmatprep.subr.bf16.mxu0 %v10315_v56  ;;  %v10354_v48 = vld [vmem:[#allocation5 + $0x93c] ss:$88 sps:$4 sm:$0xff]   ;;  %v10352_v50 = vld [vmem:[#allocation5 + $0x938] ss:$88 sps:$4 sm:$0xff]  }
 0x1bf   :  { %2783 = vmatprep.subr.bf16.mxu1 %v10318_v57  ;;  %v11975_v20 = vpack.c.bf16 %v2879_v15, %v2857_v3  ;;  %v11977_v21 = vpack.c.bf16 %v2878_v17, %v2856_v16  ;;  %v10357_v52 = vld [vmem:[#allocation5 + $0x9e4] ss:$88 sps:$4 sm:$0xff]   ;;  %v10355_v54 = vld [vmem:[#allocation5 + $0x9e0] ss:$88 sps:$4 sm:$0xff]   ;;  %v10363_v56 = vld [vmem:[#allocation5 + $0xa94] ss:$88 sps:$4 sm:$0xff]  }
 0x1c0   :  { %v11979_v23 = vpack.c.bf16 %v2880_v18, %v2858_v10  ;;  %v10358_v55 = vld [vmem:[#allocation5 + $0x9e8] ss:$88 sps:$4 sm:$0xff]   ;;  %v10366_v57 = vld [vmem:[#allocation5 + $0xa9c] ss:$88 sps:$4 sm:$0xff]   ;;  %v10364_v59 = vld [vmem:[#allocation5 + $0xa98] ss:$88 sps:$4 sm:$0xff]  }
 0x1c1   :  { %2741 = vmatpush1.bf16.msra.mxu0 %v10313_v8  ;;  %v10361_v58 = vld [vmem:[#allocation5 + $0xa90] ss:$88 sps:$4 sm:$0xff]   ;;  %v10369_v60 = vld [vmem:[#allocation5 + $0x54] ss:$88 sps:$4 sm:$0xff]   ;;  %v10375_v0 = vld [vmem:[#allocation5 + $0x104] ss:$88 sps:$4 sm:$0xff]  }
 0x1c2   :  { %2784 = vmatpush1.bf16.msra.mxu1 %v10316_v9  ;;  %2742 = vmatprep.subr.bf16.mxu0 %v10321_v13  ;;  %v10372_v61 = vld [vmem:[#allocation8 + $0x4] ss:$16 sps:$4 sm:$0xff]   ;;  %v10370_v63 = vld [vmem:[#allocation8] ss:$16 sps:$4 sm:$0xff]   ;;  %v11986_v17 = vsub.s32 4, %v11949_v29  ;;  %v11990_v18 = vsub.s32 5, %v11949_v29 }
 0x1c3   :  { %2785 = vmatprep.subr.bf16.mxu1 %v10324_v14  ;;  %v10367_v62 = vld [vmem:[#allocation5 + $0x50] ss:$88 sps:$4 sm:$0xff]   ;;  %v10373_v1 = vld [vmem:[#allocation5 + $0x100] ss:$88 sps:$4 sm:$0xff]   ;;  %v10381_v4 = vld [vmem:[#allocation5 + $0x1b4] ss:$88 sps:$4 sm:$0xff]  }
 0x1c4   :  { %v10376_v2 = vld [vmem:[#allocation8 + $0x20] ss:$16 sps:$4 sm:$0xff]   ;;  %v10378_v3 = vld [vmem:[#allocation8 + $0x24] ss:$16 sps:$4 sm:$0xff]  }
 0x1c5   :  { %2743 = vmatpush1.bf16.msra.mxu0 %v10319_v22  ;;  %v10384_v5 = vld [vmem:[#allocation8 + $0x44] ss:$16 sps:$4 sm:$0xff]   ;;  %v10382_v8 = vld [vmem:[#allocation8 + $0x40] ss:$16 sps:$4 sm:$0xff]   ;;  %v542_v22 = vsub.s32 7, %v11949_v29 }
 0x1c6   :  { %2786 = vmatpush1.bf16.msra.mxu1 %v10322_v24  ;;  %2744 = vmatprep.subr.bf16.mxu0 %v10327_v25  ;;  %v10379_v6 = vld [vmem:[#allocation5 + $0x1b0] ss:$88 sps:$4 sm:$0xff]   ;;  %v10387_v9 = vld [vmem:[#allocation5 + $0x264] ss:$88 sps:$4 sm:$0xff]   ;;  %v10385_v11 = vld [vmem:[#allocation5 + $0x260] ss:$88 sps:$4 sm:$0xff]  }
 0x1c7   :  { %2787 = vmatprep.subr.bf16.mxu1 %v10330_v26  ;;  %v10390_v10 = vld [vmem:[#allocation8 + $0x64] ss:$16 sps:$4 sm:$0xff]   ;;  %v10388_v12 = vld [vmem:[#allocation8 + $0x60] ss:$16 sps:$4 sm:$0xff]  }
 0x1c8   :  { %v10393_v13 = vld [vmem:[#allocation5 + $0x314] ss:$88 sps:$4 sm:$0xff]   ;;  %v10391_v15 = vld [vmem:[#allocation5 + $0x310] ss:$88 sps:$4 sm:$0xff]   ;;  %v10399_v24 = vld [vmem:[#allocation5 + $0x3c4] ss:$88 sps:$4 sm:$0xff]  }
 0x1c9   :  { %2745 = vmatpush1.bf16.msra.mxu0 %v10325_v27  ;;  %v10396_v14 = vld [vmem:[#allocation8 + $0x84] ss:$16 sps:$4 sm:$0xff]   ;;  %v10394_v16 = vld [vmem:[#allocation8 + $0x80] ss:$16 sps:$4 sm:$0xff]  }
 0x1ca   :  { %2788 = vmatpush1.bf16.msra.mxu1 %v10328_v28  ;;  %2746 = vmatprep.subr.bf16.mxu0 %v10333_v30  ;;  %v10402_v25 = vld [vmem:[#allocation8 + $0xa4] ss:$16 sps:$4 sm:$0xff]   ;;  %v10400_v27 = vld [vmem:[#allocation8 + $0xa0] ss:$16 sps:$4 sm:$0xff]   ;;  %v531_v28 = vrot.slane %v11951_v34, %v11986_v17 }
 0x1cb   :  { %2789 = vmatprep.subr.bf16.mxu1 %v10336_v31  ;;  %v10397_v26 = vld [vmem:[#allocation5 + $0x3c0] ss:$88 sps:$4 sm:$0xff]   ;;  %v10405_v30 = vld [vmem:[#allocation5 + $0x474] ss:$88 sps:$4 sm:$0xff]  }
 0x1cc   :  { %v10408_v31 = vld [vmem:[#allocation8 + $0xc4] ss:$16 sps:$4 sm:$0xff]  }
 0x1cd   :  { %2747 = vmatpush1.bf16.msra.mxu0 %v10331_v32 }
 0x1ce   :  { %2790 = vmatpush1.bf16.msra.mxu1 %v10334_v33  ;;  %2748 = vmatprep.subr.bf16.mxu0 %v10339_v39  ;;  %v535_v33 = vrot.slane %v11951_v34, %v11990_v18  ;;  %v543_v39 = vrot.slane %v11951_v34, %v542_v22 }
 0x1cf   :  { %2791 = vmatprep.subr.bf16.mxu1 %v10342_v40 }
 0x1d1   :  { %2749 = vmatpush1.bf16.msra.mxu0 %v10337_v41 }
 0x1d2   :  { %2792 = vmatpush1.bf16.msra.mxu1 %v10340_v42  ;;  %2750 = vmatprep.subr.bf16.mxu0 %v10345_v43 }
 0x1d3   :  { %2793 = vmatprep.subr.bf16.mxu1 %v10348_v44  ;;  %v10403_v44 = vld [vmem:[#allocation5 + $0x470] ss:$88 sps:$4 sm:$0xff]  }
 0x1d5   :  { %2751 = vmatpush1.bf16.msra.mxu0 %v10343_v45  ;;  %v10406_v45 = vld [vmem:[#allocation8 + $0xc0] ss:$16 sps:$4 sm:$0xff]  }
 0x1d6   :  { %2794 = vmatpush1.bf16.msra.mxu1 %v10346_v46  ;;  %2752 = vmatprep.subr.bf16.mxu0 %v10351_v47 }
 0x1d7   :  { %2795 = vmatprep.subr.bf16.mxu1 %v10354_v48 }
 0x1d9   :  { %2753 = vmatpush1.bf16.msra.mxu0 %v10349_v49 }
 0x1da   :  { %2796 = vmatpush1.bf16.msra.mxu1 %v10352_v50  ;;  %2754 = vmatprep.subr.bf16.mxu0 %v10357_v52  ;;  %v10411_v50 = vld [vmem:[#allocation5 + $0x524] ss:$88 sps:$4 sm:$0xff]  }
 0x1db   :  { %2797 = vmatprep.subr.bf16.mxu1 %v10360_v53  ;;  %v10414_v52 = vld [vmem:[#allocation8 + $0xe4] ss:$16 sps:$4 sm:$0xff]  }
 0x1dd   :  { %2755 = vmatpush1.bf16.msra.mxu0 %v10355_v54 }
 0x1de   :  { %2798 = vmatpush1.bf16.msra.mxu1 %v10358_v55  ;;  %2756 = vmatprep.subr.bf16.mxu0 %v10363_v56 }
 0x1df   :  { %2799 = vmatprep.subr.bf16.mxu1 %v10366_v57 }
 0x1e1   :  { %2757 = vmatpush1.bf16.msra.mxu0 %v10361_v58 }
 0x1e2   :  { %2800 = vmatpush1.bf16.msra.mxu1 %v10364_v59  ;;  %2812 = vmatprep.subr.bf16.mxu0 %v10369_v60 }
 0x1e3   :  { %7167 = vmatprep.subr.bf16.mxu1 %v10372_v61  ;;  %v10409_v61 = vld [vmem:[#allocation5 + $0x520] ss:$88 sps:$4 sm:$0xff]  }
 0x1e4   :  { %2759 = vmatmul.mubr.bf16.vlgmr.msra.gmra.mrb[16].mxu0 %v11931_v7 }
 0x1e5   :  { %2802 = vmatmul.mubr.bf16.vlgmr.msra.gmra.mrb[16].mxu1 %v11931_v7  ;;  %2813 = vmatpush1.bf16.msra.mxu0 %v10367_v62 }
 0x1e6   :  { %7168 = vmatpush1.bf16.msra.mxu1 %v10370_v63  ;;  %7199 = vmatprep.mubr.bf16.mxu1 %v11977_v21 }
 0x1e7   :  { %2814 = vmatprep.subr.bf16.mxu0 %v10375_v0  ;;  %7169 = vmatprep.subr.bf16.mxu1 %v10378_v3 }
 0x1e8   :  { %2844 = vmatprep.mubr.bf16.mxu0 %v11927_v51  ;;  %v538_v51 = vsub.s32 6, %v11949_v29 }
 0x1e9   :  { %2815 = vmatpush1.bf16.msra.mxu0 %v10373_v1  ;;  %v10412_v1 = vld [vmem:[#allocation8 + $0xe0] ss:$16 sps:$4 sm:$0xff]  }
 0x1ea   :  { %7170 = vmatpush1.bf16.msra.mxu1 %v10376_v2  ;;  %2816 = vmatprep.subr.bf16.mxu0 %v10381_v4  ;;  %v539_v32 = vrot.slane %v11951_v34, %v538_v51  ;;  %v10417_v2 = vld [vmem:[#allocation5 + $0x5d4] ss:$88 sps:$4 sm:$0xff]  }
 0x1eb   :  { %7171 = vmatprep.subr.bf16.mxu1 %v10384_v5 }
 0x1ed   :  { %2817 = vmatpush1.bf16.msra.mxu0 %v10379_v6  ;;  %v10420_v6 = vld [vmem:[#allocation8 + $0x104] ss:$16 sps:$4 sm:$0xff]  }
 0x1ee   :  { %7172 = vmatpush1.bf16.msra.mxu1 %v10382_v8  ;;  %2818 = vmatprep.subr.bf16.mxu0 %v10387_v9 }
 0x1ef   :  { %7173 = vmatprep.subr.bf16.mxu1 %v10390_v10 }
 0x1f1   :  { %2819 = vmatpush1.bf16.msra.mxu0 %v10385_v11 }
 0x1f2   :  { %7174 = vmatpush1.bf16.msra.mxu1 %v10388_v12  ;;  %2820 = vmatprep.subr.bf16.mxu0 %v10393_v13  ;;  %v10415_v12 = vld [vmem:[#allocation5 + $0x5d0] ss:$88 sps:$4 sm:$0xff]  }
 0x1f3   :  { %7175 = vmatprep.subr.bf16.mxu1 %v10396_v14  ;;  %v10418_v14 = vld [vmem:[#allocation8 + $0x100] ss:$16 sps:$4 sm:$0xff]  }
 0x1f5   :  { %2821 = vmatpush1.bf16.msra.mxu0 %v10391_v15  ;;  %v10423_v15 = vld [vmem:[#allocation5 + $0x684] ss:$88 sps:$4 sm:$0xff]  }
 0x1f6   :  { %7176 = vmatpush1.bf16.msra.mxu1 %v10394_v16  ;;  %2822 = vmatprep.subr.bf16.mxu0 %v10399_v24  ;;  %v10426_v16 = vld [vmem:[#allocation8 + $0x124] ss:$16 sps:$4 sm:$0xff]  }
 0x1f7   :  { %7177 = vmatprep.subr.bf16.mxu1 %v10402_v25  ;;  %v2502_v40 = vpop.f32.mrb[4].mxu0  ;;  %v10421_v24 = vld [vmem:[#allocation5 + $0x680] ss:$88 sps:$4 sm:$0xff]  }
 0x1f8   :  { %v2545_v41 = vpop.f32.mrb[4].mxu1  ;;  %v2503_v42 = vadd.f32 %v2502_v40, %v531_v28  ;;  %v2504_v43 = vpop.f32.mrb[5].mxu0  ;;  %v10424_v25 = vld [vmem:[#allocation8 + $0x120] ss:$16 sps:$4 sm:$0xff]  }
 0x1f9   :  { %v2546_v46 = vadd.f32 %v2545_v41, %v539_v32  ;;  %v2547_v47 = vpop.f32.mrb[5].mxu1  ;;  %v2505_v48 = vadd.f32 %v2504_v43, %v535_v33  ;;  %v2506_v49 = vpop.f32.mrb[6].mxu0  ;;  %2823 = vmatpush1.bf16.msra.mxu0 %v10397_v26  ;;  %v10429_v26 = vld [vmem:[#allocation5 + $0x734] ss:$88 sps:$4 sm:$0xff]  }
 0x1fa   :  { %7178 = vmatpush1.bf16.msra.mxu1 %v10400_v27  ;;  %v2548_v53 = vadd.f32 %v2547_v47, %v543_v39  ;;  %v2549_v54 = vpop.f32.mrb[6].mxu1  ;;  %v2859_v55 = vmax.f32 %v2503_v42, 0.0  ;;  %v2507_v34 = vadd.f32 %v2506_v49, %v531_v28  ;;  %v2508_v56 = vpop.f32.mrb[7].mxu0  ;;  %2824 = vmatprep.subr.bf16.mxu0 %v10405_v30  ;;  %v10432_v27 = vld [vmem:[#allocation8 + $0x144] ss:$16 sps:$4 sm:$0xff]  }
 0x1fb   :  { %7179 = vmatprep.subr.bf16.mxu1 %v10408_v31  ;;  %v2861_v57 = vmax.f32 %v2546_v46, 0.0  ;;  %v2550_v58 = vadd.f32 %v2549_v54, %v539_v32  ;;  %v2551_v59 = vpop.f32.mrb[7].mxu1  ;;  %v2509_v60 = vadd.f32 %v2508_v56, %v535_v33  ;;  %v2860_v4 = vmax.f32 %v2505_v48, 0.0  ;;  %v10427_v28 = vld [vmem:[#allocation5 + $0x730] ss:$88 sps:$4 sm:$0xff]  }
 0x1fc   :  { %v2862_v62 = vmax.f32 %v2548_v53, 0.0  ;;  %v2552_v63 = vadd.f32 %v2551_v59, %v543_v39  ;;  %v2881_v0 = vmax.f32 %v2507_v34, 0.0  ;;  %v10430_v30 = vld [vmem:[#allocation8 + $0x140] ss:$16 sps:$4 sm:$0xff]   ;;  %v10438_v32 = vld [vmem:[#allocation8 + $0x164] ss:$16 sps:$4 sm:$0xff]  }
 0x1fd   :  { %v2883_v3 = vmax.f32 %v2550_v58, 0.0  ;;  %v2882_v5 = vmax.f32 %v2509_v60, 0.0  ;;  %2825 = vmatpush1.bf16.msra.mxu0 %v10403_v44  ;;  %v10435_v31 = vld [vmem:[#allocation5 + $0x7e4] ss:$88 sps:$4 sm:$0xff]   ;;  %v10433_v33 = vld [vmem:[#allocation5 + $0x7e0] ss:$88 sps:$4 sm:$0xff]  }
 0x1fe   :  { %7180 = vmatpush1.bf16.msra.mxu1 %v10406_v45  ;;  %v2884_v8 = vmax.f32 %v2552_v63, 0.0  ;;  %v12003_v9 = vpack.c.bf16 %v2881_v0, %v2859_v55  ;;  %2826 = vmatprep.subr.bf16.mxu0 %v10411_v50  ;;  %v10436_v39 = vld [vmem:[#allocation8 + $0x160] ss:$16 sps:$4 sm:$0xff]   ;;  %v10444_v41 = vld [vmem:[#allocation8 + $0x184] ss:$16 sps:$4 sm:$0xff]  }
 0x1ff   :  { %7181 = vmatprep.subr.bf16.mxu1 %v10414_v52  ;;  %v12005_v10 = vpack.c.bf16 %v2883_v3, %v2861_v57  ;;  %v12007_v11 = vpack.c.bf16 %v2882_v5, %v2860_v4  ;;  %v10441_v40 = vld [vmem:[#allocation5 + $0x894] ss:$88 sps:$4 sm:$0xff]   ;;  %v10439_v42 = vld [vmem:[#allocation5 + $0x890] ss:$88 sps:$4 sm:$0xff]   ;;  %v10447_v44 = vld [vmem:[#allocation5 + $0x944] ss:$88 sps:$4 sm:$0xff]  }
 0x200   :  { %v12009_v13 = vpack.c.bf16 %v2884_v8, %v2862_v62  ;;  %v10442_v43 = vld [vmem:[#allocation8 + $0x180] ss:$16 sps:$4 sm:$0xff]   ;;  %v10450_v45 = vld [vmem:[#allocation8 + $0x1a4] ss:$16 sps:$4 sm:$0xff]   ;;  %v10468_v57 = vld [vmem:[#allocation8 + $0xc] ss:$16 sps:$4 sm:$0xff]  }
 0x201   :  { %2827 = vmatpush1.bf16.msra.mxu0 %v10409_v61  ;;  %v10445_v46 = vld [vmem:[#allocation5 + $0x940] ss:$88 sps:$4 sm:$0xff]   ;;  %v10453_v48 = vld [vmem:[#allocation5 + $0x9f4] ss:$88 sps:$4 sm:$0xff]   ;;  %v10451_v50 = vld [vmem:[#allocation5 + $0x9f0] ss:$88 sps:$4 sm:$0xff]  }
 0x202   :  { %7182 = vmatpush1.bf16.msra.mxu1 %v10412_v1  ;;  %2828 = vmatprep.subr.bf16.mxu0 %v10417_v2  ;;  %v10448_v47 = vld [vmem:[#allocation8 + $0x1a0] ss:$16 sps:$4 sm:$0xff]   ;;  %v10456_v49 = vld [vmem:[#allocation8 + $0x1c4] ss:$16 sps:$4 sm:$0xff]   ;;  %v10466_v59 = vld [vmem:[#allocation8 + $0x8] ss:$16 sps:$4 sm:$0xff]  }
 0x203   :  { %7183 = vmatprep.subr.bf16.mxu1 %v10420_v6  ;;  %v10454_v52 = vld [vmem:[#allocation8 + $0x1c0] ss:$16 sps:$4 sm:$0xff]   ;;  %v10462_v54 = vld [vmem:[#allocation8 + $0x1e4] ss:$16 sps:$4 sm:$0xff]   ;;  %v10474_v61 = vld [vmem:[#allocation8 + $0x2c] ss:$16 sps:$4 sm:$0xff]  }
 0x204   :  { %v10459_v53 = vld [vmem:[#allocation5 + $0xaa4] ss:$88 sps:$4 sm:$0xff]   ;;  %v10457_v55 = vld [vmem:[#allocation5 + $0xaa0] ss:$88 sps:$4 sm:$0xff]  }
 0x205   :  { %2829 = vmatpush1.bf16.msra.mxu0 %v10415_v12  ;;  %v10460_v34 = vld [vmem:[#allocation8 + $0x1e0] ss:$16 sps:$4 sm:$0xff]   ;;  %v10465_v56 = vld [vmem:[#allocation8 + $0x204] ss:$16 sps:$4 sm:$0xff]   ;;  %v10472_v63 = vld [vmem:[#allocation8 + $0x28] ss:$16 sps:$4 sm:$0xff]  }
 0x206   :  { %7184 = vmatpush1.bf16.msra.mxu1 %v10418_v14  ;;  %2830 = vmatprep.subr.bf16.mxu0 %v10423_v15  ;;  %v10463_v58 = vld [vmem:[#allocation8 + $0x200] ss:$16 sps:$4 sm:$0xff]   ;;  %v10471_v60 = vld [vmem:[#allocation8 + $0x224] ss:$16 sps:$4 sm:$0xff]   ;;  %v10480_v1 = vld [vmem:[#allocation8 + $0x4c] ss:$16 sps:$4 sm:$0xff]  }
 0x207   :  { %7185 = vmatprep.subr.bf16.mxu1 %v10426_v16  ;;  %v10469_v62 = vld [vmem:[#allocation8 + $0x220] ss:$16 sps:$4 sm:$0xff]   ;;  %v10477_v0 = vld [vmem:[#allocation8 + $0x244] ss:$16 sps:$4 sm:$0xff]   ;;  %v10478_v3 = vld [vmem:[#allocation8 + $0x48] ss:$16 sps:$4 sm:$0xff]  }
 0x208   :  { %v10475_v2 = vld [vmem:[#allocation8 + $0x240] ss:$16 sps:$4 sm:$0xff]   ;;  %v10486_v5 = vld [vmem:[#allocation8 + $0x6c] ss:$16 sps:$4 sm:$0xff]   ;;  %v10484_v6 = vld [vmem:[#allocation8 + $0x68] ss:$16 sps:$4 sm:$0xff]  }
 0x209   :  { %2831 = vmatpush1.bf16.msra.mxu0 %v10421_v24  ;;  %v10481_v4 = vld [vmem:[#allocation8 + $0x260] ss:$16 sps:$4 sm:$0xff]   ;;  %v10489_v8 = vld [vmem:[#allocation8 + $0x284] ss:$16 sps:$4 sm:$0xff]   ;;  %v10492_v12 = vld [vmem:[#allocation8 + $0x8c] ss:$16 sps:$4 sm:$0xff]  }
 0x20a   :  { %7186 = vmatpush1.bf16.msra.mxu1 %v10424_v25  ;;  %2832 = vmatprep.subr.bf16.mxu0 %v10429_v26  ;;  %v12015_v14 = vld [vmem:[#allocation7 + $0x8] sm:$0xff]  ;;  %v10498_v24 = vld [vmem:[#allocation8 + $0xac] ss:$16 sps:$4 sm:$0xff]  }
 0x20b   :  { %7187 = vmatprep.subr.bf16.mxu1 %v10432_v27  ;;  %v10490_v15 = vld [vmem:[#allocation8 + $0x88] ss:$16 sps:$4 sm:$0xff]   ;;  %v10495_v16 = vld [vmem:[#allocation8 + $0x2a4] ss:$16 sps:$4 sm:$0xff]   ;;  %v10493_v25 = vld [vmem:[#allocation8 + $0x2a0] ss:$16 sps:$4 sm:$0xff]   ;;  %v547_v26 = vrot.slane %v12015_v14, %v11954_v35 }
 0x20c   :  { %v10496_v27 = vld [vmem:[#allocation8 + $0xa8] ss:$16 sps:$4 sm:$0xff]  }
 0x20d   :  { %2833 = vmatpush1.bf16.msra.mxu0 %v10427_v28  ;;  %v10501_v28 = vld [vmem:[#allocation8 + $0x2c4] ss:$16 sps:$4 sm:$0xff]  }
 0x20e   :  { %7188 = vmatpush1.bf16.msra.mxu1 %v10430_v30  ;;  %2834 = vmatprep.subr.bf16.mxu0 %v10435_v31  ;;  %v555_v30 = vrot.slane %v12015_v14, %v11957_v36  ;;  %v551_v31 = vrot.slane %v12015_v14, %v11960_v37 }
 0x20f   :  { %7189 = vmatprep.subr.bf16.mxu1 %v10438_v32  ;;  %v559_v32 = vrot.slane %v12015_v14, %v11963_v38 }
 0x211   :  { %2835 = vmatpush1.bf16.msra.mxu0 %v10433_v33  ;;  %v10504_v33 = vld [vmem:[#allocation8 + $0xcc] ss:$16 sps:$4 sm:$0xff]  }
 0x212   :  { %7190 = vmatpush1.bf16.msra.mxu1 %v10436_v39  ;;  %2836 = vmatprep.subr.bf16.mxu0 %v10441_v40 }
 0x213   :  { %7191 = vmatprep.subr.bf16.mxu1 %v10444_v41 }
 0x215   :  { %2837 = vmatpush1.bf16.msra.mxu0 %v10439_v42 }
 0x216   :  { %7192 = vmatpush1.bf16.msra.mxu1 %v10442_v43  ;;  %2838 = vmatprep.subr.bf16.mxu0 %v10447_v44  ;;  %v10499_v43 = vld [vmem:[#allocation8 + $0x2c0] ss:$16 sps:$4 sm:$0xff]   ;;  %v10502_v44 = vld [vmem:[#allocation8 + $0xc8] ss:$16 sps:$4 sm:$0xff]  }
 0x217   :  { %7193 = vmatprep.subr.bf16.mxu1 %v10450_v45 }
 0x219   :  { %2839 = vmatpush1.bf16.msra.mxu0 %v10445_v46 }
 0x21a   :  { %7194 = vmatpush1.bf16.msra.mxu1 %v10448_v47  ;;  %2840 = vmatprep.subr.bf16.mxu0 %v10453_v48 }
 0x21b   :  { %7195 = vmatprep.subr.bf16.mxu1 %v10456_v49  ;;  %v10507_v49 = vld [vmem:[#allocation8 + $0x2e4] ss:$16 sps:$4 sm:$0xff]  }
 0x21d   :  { %2841 = vmatpush1.bf16.msra.mxu0 %v10451_v50  ;;  %v10510_v50 = vld [vmem:[#allocation8 + $0xec] ss:$16 sps:$4 sm:$0xff]  }
 0x21e   :  { %7196 = vmatpush1.bf16.msra.mxu1 %v10454_v52  ;;  %2842 = vmatprep.subr.bf16.mxu0 %v10459_v53 }
 0x21f   :  { %7197 = vmatprep.subr.bf16.mxu1 %v10462_v54 }
 0x221   :  { %2843 = vmatpush1.bf16.msra.mxu0 %v10457_v55 }
 0x222   :  { %7198 = vmatpush1.bf16.msra.mxu1 %v10460_v34  ;;  %7640 = vmatprep.subr.bf16.mxu0 %v10468_v57 }
 0x223   :  { %7210 = vmatprep.subr.bf16.mxu1 %v10465_v56 }
 0x224   :  { %2845 = vmatmul.mubr.bf16.vlgmr.msra.gmra.mrb[20].mxu0 %v11931_v7  ;;  %v10483_v7 = vld [vmem:[#allocation8 + $0x264] ss:$16 sps:$4 sm:$0xff]  }
 0x225   :  { %7200 = vmatmul.mubr.bf16.vlgmr.msra.gmra.mrb[20].mxu1 %v11973_v19  ;;  %7641 = vmatpush1.bf16.msra.mxu0 %v10466_v59 }
 0x226   :  { %7211 = vmatpush1.bf16.msra.mxu1 %v10463_v58  ;;  %7242 = vmatprep.mubr.bf16.mxu1 %v11979_v23 }
 0x227   :  { %7672 = vmatprep.mubr.bf16.mxu0 %v11977_v21  ;;  %7212 = vmatprep.subr.bf16.mxu1 %v10471_v60  ;;  %v10487_v21 = vld [vmem:[#allocation8 + $0x280] ss:$16 sps:$4 sm:$0xff]  }
 0x228   :  { %7642 = vmatprep.subr.bf16.mxu0 %v10474_v61 }
 0x229   :  { %7643 = vmatpush1.bf16.msra.mxu0 %v10472_v63  ;;  %v10505_v63 = vld [vmem:[#allocation8 + $0x2e0] ss:$16 sps:$4 sm:$0xff]  }
 0x22a   :  { %7213 = vmatpush1.bf16.msra.mxu1 %v10469_v62  ;;  %7644 = vmatprep.subr.bf16.mxu0 %v10480_v1 }
 0x22b   :  { %7214 = vmatprep.subr.bf16.mxu1 %v10477_v0  ;;  %v10508_v0 = vld [vmem:[#allocation8 + $0xe8] ss:$16 sps:$4 sm:$0xff]  }
 0x22d   :  { %7645 = vmatpush1.bf16.msra.mxu0 %v10478_v3 }
 0x22e   :  { %7215 = vmatpush1.bf16.msra.mxu1 %v10475_v2  ;;  %7646 = vmatprep.subr.bf16.mxu0 %v10486_v5 }
 0x22f   :  { %7216 = vmatprep.subr.bf16.mxu1 %v10483_v7  ;;  %v10513_v7 = vld [vmem:[#allocation8 + $0x304] ss:$16 sps:$4 sm:$0xff]  }
 0x231   :  { %7647 = vmatpush1.bf16.msra.mxu0 %v10484_v6 }
 0x232   :  { %7217 = vmatpush1.bf16.msra.mxu1 %v10481_v4  ;;  %7648 = vmatprep.subr.bf16.mxu0 %v10492_v12  ;;  %v10516_v12 = vld [vmem:[#allocation8 + $0x10c] ss:$16 sps:$4 sm:$0xff]  }
 0x233   :  { %7218 = vmatprep.subr.bf16.mxu1 %v10489_v8 }
 0x235   :  { %7649 = vmatpush1.bf16.msra.mxu0 %v10490_v15  ;;  %v10511_v15 = vld [vmem:[#allocation8 + $0x300] ss:$16 sps:$4 sm:$0xff]  }
 0x236   :  { %7219 = vmatpush1.bf16.msra.mxu1 %v10487_v21  ;;  %7650 = vmatprep.subr.bf16.mxu0 %v10498_v24  ;;  %v10519_v24 = vld [vmem:[#allocation8 + $0x324] ss:$16 sps:$4 sm:$0xff]  }
 0x237   :  { %7220 = vmatprep.subr.bf16.mxu1 %v10495_v16  ;;  %v2588_v39 = vpop.f32.mrb[8].mxu0  ;;  %v10514_v16 = vld [vmem:[#allocation8 + $0x108] ss:$16 sps:$4 sm:$0xff]  }
 0x238   :  { %v2631_v40 = vpop.f32.mrb[8].mxu1  ;;  %v2589_v41 = vadd.f32 %v2588_v39, %v547_v26  ;;  %v2590_v42 = vpop.f32.mrb[9].mxu0  ;;  %v10529_v39 = vld [vmem:[#allocation8 + $0x360] ss:$16 sps:$4 sm:$0xff]  }
 0x239   :  { %v2632_v45 = vadd.f32 %v2631_v40, %v555_v30  ;;  %v2633_v46 = vpop.f32.mrb[9].mxu1  ;;  %v2591_v47 = vadd.f32 %v2590_v42, %v551_v31  ;;  %v2592_v48 = vpop.f32.mrb[10].mxu0  ;;  %7651 = vmatpush1.bf16.msra.mxu0 %v10496_v27  ;;  %v10520_v27 = vld [vmem:[#allocation8 + $0x128] ss:$16 sps:$4 sm:$0xff]   ;;  %v10534_v40 = vld [vmem:[#allocation8 + $0x16c] ss:$16 sps:$4 sm:$0xff]  }
 0x23a   :  { %7221 = vmatpush1.bf16.msra.mxu1 %v10493_v25  ;;  %v2634_v52 = vadd.f32 %v2633_v46, %v559_v32  ;;  %v2635_v53 = vpop.f32.mrb[10].mxu1  ;;  %v2863_v54 = vmax.f32 %v2589_v41, 0.0  ;;  %v2593_v55 = vadd.f32 %v2592_v48, %v547_v26  ;;  %v2594_v34 = vpop.f32.mrb[11].mxu0  ;;  %7652 = vmatprep.subr.bf16.mxu0 %v10504_v33  ;;  %v10517_v25 = vld [vmem:[#allocation8 + $0x320] ss:$16 sps:$4 sm:$0xff]  }
 0x23b   :  { %7222 = vmatprep.subr.bf16.mxu1 %v10501_v28  ;;  %v2865_v56 = vmax.f32 %v2632_v45, 0.0  ;;  %v2636_v57 = vadd.f32 %v2635_v53, %v555_v30  ;;  %v2637_v58 = vpop.f32.mrb[11].mxu1  ;;  %v2595_v59 = vadd.f32 %v2594_v34, %v551_v31  ;;  %v2864_v2 = vmax.f32 %v2591_v47, 0.0  ;;  %v10522_v26 = vld [vmem:[#allocation8 + $0x12c] ss:$16 sps:$4 sm:$0xff]  }
 0x23c   :  { %v2866_v60 = vmax.f32 %v2634_v52, 0.0  ;;  %v2638_v61 = vadd.f32 %v2637_v58, %v559_v32  ;;  %v2885_v62 = vmax.f32 %v2593_v55, 0.0  ;;  %v10525_v28 = vld [vmem:[#allocation8 + $0x344] ss:$16 sps:$4 sm:$0xff]   ;;  %v10523_v30 = vld [vmem:[#allocation8 + $0x340] ss:$16 sps:$4 sm:$0xff]  }
 0x23d   :  { %v2887_v1 = vmax.f32 %v2636_v57, 0.0  ;;  %v2886_v3 = vmax.f32 %v2595_v59, 0.0  ;;  %7653 = vmatpush1.bf16.msra.mxu0 %v10502_v44  ;;  %v10528_v31 = vld [vmem:[#allocation8 + $0x14c] ss:$16 sps:$4 sm:$0xff]   ;;  %v10526_v32 = vld [vmem:[#allocation8 + $0x148] ss:$16 sps:$4 sm:$0xff]  }
 0x23e   :  { %7223 = vmatpush1.bf16.msra.mxu1 %v10499_v43  ;;  %v2888_v4 = vmax.f32 %v2638_v61, 0.0  ;;  %v12025_v5 = vpack.c.bf16 %v2885_v62, %v2863_v54  ;;  %7654 = vmatprep.subr.bf16.mxu0 %v10510_v50  ;;  %v10531_v33 = vld [vmem:[#allocation8 + $0x364] ss:$16 sps:$4 sm:$0xff]   ;;  %v10532_v41 = vld [vmem:[#allocation8 + $0x168] ss:$16 sps:$4 sm:$0xff]  }
 0x23f   :  { %7224 = vmatprep.subr.bf16.mxu1 %v10507_v49  ;;  %v12027_v6 = vpack.c.bf16 %v2887_v1, %v2865_v56  ;;  %v12029_v8 = vpack.c.bf16 %v2886_v3, %v2864_v2  ;;  %v10537_v42 = vld [vmem:[#allocation8 + $0x384] ss:$16 sps:$4 sm:$0xff]   ;;  %v10535_v43 = vld [vmem:[#allocation8 + $0x380] ss:$16 sps:$4 sm:$0xff]   ;;  %v10540_v44 = vld [vmem:[#allocation8 + $0x18c] ss:$16 sps:$4 sm:$0xff]  }
 0x240   :  { %v12031_v21 = vpack.c.bf16 %v2888_v4, %v2866_v60  ;;  %v10538_v45 = vld [vmem:[#allocation8 + $0x188] ss:$16 sps:$4 sm:$0xff]   ;;  %v10543_v46 = vld [vmem:[#allocation8 + $0x3a4] ss:$16 sps:$4 sm:$0xff]   ;;  %v10541_v47 = vld [vmem:[#allocation8 + $0x3a0] ss:$16 sps:$4 sm:$0xff]  }
 0x241   :  { %7655 = vmatpush1.bf16.msra.mxu0 %v10508_v0  ;;  %v10546_v48 = vld [vmem:[#allocation8 + $0x1ac] ss:$16 sps:$4 sm:$0xff]   ;;  %v10544_v49 = vld [vmem:[#allocation8 + $0x1a8] ss:$16 sps:$4 sm:$0xff]   ;;  %v10549_v50 = vld [vmem:[#allocation8 + $0x3c4] ss:$16 sps:$4 sm:$0xff]  }
 0x242   :  { %7225 = vmatpush1.bf16.msra.mxu1 %v10505_v63  ;;  %7656 = vmatprep.subr.bf16.mxu0 %v10516_v12  ;;  %v10547_v52 = vld [vmem:[#allocation8 + $0x3c0] ss:$16 sps:$4 sm:$0xff]   ;;  %v10552_v53 = vld [vmem:[#allocation8 + $0x1cc] ss:$16 sps:$4 sm:$0xff]   ;;  %v10550_v54 = vld [vmem:[#allocation8 + $0x1c8] ss:$16 sps:$4 sm:$0xff]  }
 0x243   :  { %7226 = vmatprep.subr.bf16.mxu1 %v10513_v7  ;;  %v10555_v55 = vld [vmem:[#allocation8 + $0x3e4] ss:$16 sps:$4 sm:$0xff]   ;;  %v10553_v34 = vld [vmem:[#allocation8 + $0x3e0] ss:$16 sps:$4 sm:$0xff]   ;;  %v10558_v56 = vld [vmem:[#allocation8 + $0x1ec] ss:$16 sps:$4 sm:$0xff]  }
 0x244   :  { %v10556_v57 = vld [vmem:[#allocation8 + $0x1e8] ss:$16 sps:$4 sm:$0xff]   ;;  %v10561_v58 = vld [vmem:[#allocation8 + $0x404] ss:$16 sps:$4 sm:$0xff]   ;;  %v10564_v59 = vld [vmem:[#allocation8 + $0x20c] ss:$16 sps:$4 sm:$0xff]  }
 0x245   :  { %7657 = vmatpush1.bf16.msra.mxu0 %v10514_v16  ;;  %v10559_v60 = vld [vmem:[#allocation8 + $0x400] ss:$16 sps:$4 sm:$0xff]   ;;  %v10562_v61 = vld [vmem:[#allocation8 + $0x208] ss:$16 sps:$4 sm:$0xff]   ;;  %v10567_v62 = vld [vmem:[#allocation8 + $0x424] ss:$16 sps:$4 sm:$0xff]  }
 0x246   :  { %7227 = vmatpush1.bf16.msra.mxu1 %v10511_v15  ;;  %7658 = vmatprep.subr.bf16.mxu0 %v10522_v26  ;;  %v10565_v63 = vld [vmem:[#allocation8 + $0x420] ss:$16 sps:$4 sm:$0xff]   ;;  %v10568_v0 = vld [vmem:[#allocation8 + $0x228] ss:$16 sps:$4 sm:$0xff]   ;;  %v10570_v1 = vld [vmem:[#allocation8 + $0x22c] ss:$16 sps:$4 sm:$0xff]  }
 0x247   :  { %7228 = vmatprep.subr.bf16.mxu1 %v10519_v24  ;;  %v10573_v2 = vld [vmem:[#allocation8 + $0x444] ss:$16 sps:$4 sm:$0xff]   ;;  %v10576_v3 = vld [vmem:[#allocation8 + $0x24c] ss:$16 sps:$4 sm:$0xff]   ;;  %v10571_v7 = vld [vmem:[#allocation8 + $0x440] ss:$16 sps:$4 sm:$0xff]  }
 0x248   :  { %v10574_v4 = vld [vmem:[#allocation8 + $0x248] ss:$16 sps:$4 sm:$0xff]   ;;  %v10579_v12 = vld [vmem:[#allocation8 + $0x464] ss:$16 sps:$4 sm:$0xff]   ;;  %v10577_v15 = vld [vmem:[#allocation8 + $0x460] ss:$16 sps:$4 sm:$0xff]  }
 0x249   :  { %7659 = vmatpush1.bf16.msra.mxu0 %v10520_v27  ;;  %v10582_v16 = vld [vmem:[#allocation8 + $0x26c] ss:$16 sps:$4 sm:$0xff]   ;;  %v10585_v24 = vld [vmem:[#allocation8 + $0x484] ss:$16 sps:$4 sm:$0xff]   ;;  %v10586_v26 = vld [vmem:[#allocation8 + $0x288] ss:$16 sps:$4 sm:$0xff]  }
 0x24a   :  { %7229 = vmatpush1.bf16.msra.mxu1 %v10517_v25  ;;  %7660 = vmatprep.subr.bf16.mxu0 %v10528_v31  ;;  %v10583_v25 = vld [vmem:[#allocation8 + $0x480] ss:$16 sps:$4 sm:$0xff]   ;;  %v10591_v27 = vld [vmem:[#allocation8 + $0x4a4] ss:$16 sps:$4 sm:$0xff]   ;;  %v563_v31 = vrot.slane %v12015_v14, %v11986_v17 }
 0x24b   :  { %7230 = vmatprep.subr.bf16.mxu1 %v10525_v28  ;;  %v10594_v28 = vld [vmem:[#allocation8 + $0x2ac] ss:$16 sps:$4 sm:$0xff]  }
 0x24d   :  { %7661 = vmatpush1.bf16.msra.mxu0 %v10526_v32  ;;  %v10592_v32 = vld [vmem:[#allocation8 + $0x2a8] ss:$16 sps:$4 sm:$0xff]  }
 0x24e   :  { %7231 = vmatpush1.bf16.msra.mxu1 %v10523_v30  ;;  %7662 = vmatprep.subr.bf16.mxu0 %v10534_v40  ;;  %v10589_v30 = vld [vmem:[#allocation8 + $0x4a0] ss:$16 sps:$4 sm:$0xff]   ;;  %v567_v40 = vrot.slane %v12015_v14, %v11990_v18 }
 0x24f   :  { %7232 = vmatprep.subr.bf16.mxu1 %v10531_v33  ;;  %v10597_v33 = vld [vmem:[#allocation8 + $0x4c4] ss:$16 sps:$4 sm:$0xff]  }
 0x251   :  { %7663 = vmatpush1.bf16.msra.mxu0 %v10532_v41  ;;  %v10600_v41 = vld [vmem:[#allocation8 + $0x2cc] ss:$16 sps:$4 sm:$0xff]  }
 0x252   :  { %7233 = vmatpush1.bf16.msra.mxu1 %v10529_v39  ;;  %7664 = vmatprep.subr.bf16.mxu0 %v10540_v44  ;;  %v571_v39 = vrot.slane %v12015_v14, %v538_v51 }
 0x253   :  { %7234 = vmatprep.subr.bf16.mxu1 %v10537_v42  ;;  %v575_v42 = vrot.slane %v12015_v14, %v542_v22 }
 0x255   :  { %7665 = vmatpush1.bf16.msra.mxu0 %v10538_v45 }
 0x256   :  { %7235 = vmatpush1.bf16.msra.mxu1 %v10535_v43  ;;  %7666 = vmatprep.subr.bf16.mxu0 %v10546_v48  ;;  %v10598_v48 = vld [vmem:[#allocation8 + $0x2c8] ss:$16 sps:$4 sm:$0xff]  }
 0x257   :  { %7236 = vmatprep.subr.bf16.mxu1 %v10543_v46 }
 0x259   :  { %7667 = vmatpush1.bf16.msra.mxu0 %v10544_v49 }
 0x25a   :  { %7237 = vmatpush1.bf16.msra.mxu1 %v10541_v47  ;;  %7668 = vmatprep.subr.bf16.mxu0 %v10552_v53  ;;  %v10595_v47 = vld [vmem:[#allocation8 + $0x4c0] ss:$16 sps:$4 sm:$0xff]   ;;  %v10603_v53 = vld [vmem:[#allocation8 + $0x4e4] ss:$16 sps:$4 sm:$0xff]  }
 0x25b   :  { %7238 = vmatprep.subr.bf16.mxu1 %v10549_v50 }
 0x25d   :  { %7669 = vmatpush1.bf16.msra.mxu0 %v10550_v54  ;;  %v10606_v54 = vld [vmem:[#allocation8 + $0x2ec] ss:$16 sps:$4 sm:$0xff]  }
 0x25e   :  { %7239 = vmatpush1.bf16.msra.mxu1 %v10547_v52  ;;  %7670 = vmatprep.subr.bf16.mxu0 %v10558_v56 }
 0x25f   :  { %7240 = vmatprep.subr.bf16.mxu1 %v10555_v55 }
 0x261   :  { %7671 = vmatpush1.bf16.msra.mxu0 %v10556_v57 }
 0x262   :  { %7241 = vmatpush1.bf16.msra.mxu1 %v10553_v34  ;;  %7683 = vmatprep.subr.bf16.mxu0 %v10564_v59 }
 0x263   :  { %7253 = vmatprep.subr.bf16.mxu1 %v10561_v58 }
 0x264   :  { %7673 = vmatmul.mubr.bf16.vlgmr.msra.gmra.mrb[24].mxu0 %v11973_v19  ;;  %v10580_v19 = vld [vmem:[#allocation8 + $0x268] ss:$16 sps:$4 sm:$0xff]  }
 0x265   :  { %7243 = vmatmul.mubr.bf16.vlgmr.msra.gmra.mrb[20].mxu1 %v11975_v20  ;;  %7684 = vmatpush1.bf16.msra.mxu0 %v10562_v61 }
 0x266   :  { %7254 = vmatpush1.bf16.msra.mxu1 %v10559_v60  ;;  %7285 = vmatprep.mubr.bf16.mxu1 %v12007_v11 }
 0x267   :  { %7715 = vmatprep.mubr.bf16.mxu0 %v11979_v23  ;;  %7255 = vmatprep.subr.bf16.mxu1 %v10567_v62  ;;  %v10588_v23 = vld [vmem:[#allocation8 + $0x28c] ss:$16 sps:$4 sm:$0xff]  }
 0x268   :  { %7685 = vmatprep.subr.bf16.mxu0 %v10570_v1 }
 0x269   :  { %7686 = vmatpush1.bf16.msra.mxu0 %v10568_v0  ;;  %v10604_v0 = vld [vmem:[#allocation8 + $0x2e8] ss:$16 sps:$4 sm:$0xff]  }
 0x26a   :  { %7256 = vmatpush1.bf16.msra.mxu1 %v10565_v63  ;;  %7687 = vmatprep.subr.bf16.mxu0 %v10576_v3  ;;  %v10601_v63 = vld [vmem:[#allocation8 + $0x4e0] ss:$16 sps:$4 sm:$0xff]  }
 0x26b   :  { %7257 = vmatprep.subr.bf16.mxu1 %v10573_v2 }
 0x26d   :  { %7688 = vmatpush1.bf16.msra.mxu0 %v10574_v4 }
 0x26e   :  { %7258 = vmatpush1.bf16.msra.mxu1 %v10571_v7  ;;  %7689 = vmatprep.subr.bf16.mxu0 %v10582_v16  ;;  %v10609_v7 = vld [vmem:[#allocation8 + $0x504] ss:$16 sps:$4 sm:$0xff]  }
 0x26f   :  { %7259 = vmatprep.subr.bf16.mxu1 %v10579_v12 }
 0x271   :  { %7690 = vmatpush1.bf16.msra.mxu0 %v10580_v19  ;;  %v10612_v19 = vld [vmem:[#allocation8 + $0x30c] ss:$16 sps:$4 sm:$0xff]  }
 0x272   :  { %7260 = vmatpush1.bf16.msra.mxu1 %v10577_v15  ;;  %7691 = vmatprep.subr.bf16.mxu0 %v10588_v23  ;;  %v10610_v23 = vld [vmem:[#allocation8 + $0x308] ss:$16 sps:$4 sm:$0xff]  }
 0x273   :  { %7261 = vmatprep.subr.bf16.mxu1 %v10585_v24 }
 0x275   :  { %7692 = vmatpush1.bf16.msra.mxu0 %v10586_v26  ;;  %v10615_v26 = vld [vmem:[#allocation8 + $0x524] ss:$16 sps:$4 sm:$0xff]  }
 0x276   :  { %7262 = vmatpush1.bf16.msra.mxu1 %v10583_v25  ;;  %7693 = vmatprep.subr.bf16.mxu0 %v10594_v28  ;;  %v10607_v25 = vld [vmem:[#allocation8 + $0x500] ss:$16 sps:$4 sm:$0xff]   ;;  %v10618_v28 = vld [vmem:[#allocation8 + $0x32c] ss:$16 sps:$4 sm:$0xff]  }
 0x277   :  { %7263 = vmatprep.subr.bf16.mxu1 %v10591_v27  ;;  %v2674_v43 = vpop.f32.mrb[12].mxu0  ;;  %v10613_v27 = vld [vmem:[#allocation8 + $0x520] ss:$16 sps:$4 sm:$0xff]  }
 0x278   :  { %v2717_v44 = vpop.f32.mrb[12].mxu1  ;;  %v2675_v45 = vadd.f32 %v2674_v43, %v563_v31  ;;  %v2676_v46 = vpop.f32.mrb[13].mxu0  ;;  %v10628_v43 = vld [vmem:[#allocation8 + $0x368] ss:$16 sps:$4 sm:$0xff]  }
 0x279   :  { %v2718_v49 = vadd.f32 %v2717_v44, %v571_v39  ;;  %v2719_v51 = vpop.f32.mrb[13].mxu1  ;;  %v2677_v50 = vadd.f32 %v2676_v46, %v567_v40  ;;  %v2678_v52 = vpop.f32.mrb[14].mxu0  ;;  %7694 = vmatpush1.bf16.msra.mxu0 %v10592_v32  ;;  %v10619_v32 = vld [vmem:[#allocation8 + $0x540] ss:$16 sps:$4 sm:$0xff]   ;;  %v10633_v44 = vld [vmem:[#allocation8 + $0x584] ss:$16 sps:$4 sm:$0xff]  }
 0x27a   :  { %7264 = vmatpush1.bf16.msra.mxu1 %v10589_v30  ;;  %v2720_v55 = vadd.f32 %v2719_v51, %v575_v42  ;;  %v2721_v29 = vpop.f32.mrb[14].mxu1  ;;  %v2867_v34 = vmax.f32 %v2675_v45, 0.0  ;;  %v2679_v22 = vadd.f32 %v2678_v52, %v563_v31  ;;  %v2680_v14 = vpop.f32.mrb[15].mxu0  ;;  %7695 = vmatprep.subr.bf16.mxu0 %v10600_v41  ;;  %v10616_v30 = vld [vmem:[#allocation8 + $0x328] ss:$16 sps:$4 sm:$0xff]  }
 0x27b   :  { %7265 = vmatprep.subr.bf16.mxu1 %v10597_v33  ;;  %v2869_v56 = vmax.f32 %v2718_v49, 0.0  ;;  %v2722_v57 = vadd.f32 %v2721_v29, %v571_v39  ;;  %v2723_v58 = vpop.f32.mrb[15].mxu1  ;;  %v2681_v59 = vadd.f32 %v2680_v14, %v567_v40  ;;  %v2868_v2 = vmax.f32 %v2677_v50, 0.0  ;;  %v10621_v31 = vld [vmem:[#allocation8 + $0x544] ss:$16 sps:$4 sm:$0xff]  }
 0x27c   :  { %v2870_v60 = vmax.f32 %v2720_v55, 0.0  ;;  %v2724_v61 = vadd.f32 %v2723_v58, %v575_v42  ;;  %v2889_v62 = vmax.f32 %v2679_v22, 0.0  ;;  %v10624_v33 = vld [vmem:[#allocation8 + $0x34c] ss:$16 sps:$4 sm:$0xff]   ;;  %v10622_v39 = vld [vmem:[#allocation8 + $0x348] ss:$16 sps:$4 sm:$0xff]  }
 0x27d   :  { %v2891_v1 = vmax.f32 %v2722_v57, 0.0  ;;  %v2890_v3 = vmax.f32 %v2681_v59, 0.0  ;;  %7696 = vmatpush1.bf16.msra.mxu0 %v10598_v48  ;;  %v10627_v40 = vld [vmem:[#allocation8 + $0x564] ss:$16 sps:$4 sm:$0xff]   ;;  %v10625_v41 = vld [vmem:[#allocation8 + $0x560] ss:$16 sps:$4 sm:$0xff]  }
 0x27e   :  { %7266 = vmatpush1.bf16.msra.mxu1 %v10595_v47  ;;  %v2892_v4 = vmax.f32 %v2724_v61, 0.0  ;;  %v12047_v12 = vpack.c.bf16 %v2889_v62, %v2867_v34  ;;  %7697 = vmatprep.subr.bf16.mxu0 %v10606_v54  ;;  %v10630_v42 = vld [vmem:[#allocation8 + $0x36c] ss:$16 sps:$4 sm:$0xff]   ;;  %v10631_v45 = vld [vmem:[#allocation8 + $0x580] ss:$16 sps:$4 sm:$0xff]  }
 0x27f   :  { %7267 = vmatprep.subr.bf16.mxu1 %v10603_v53  ;;  %v12049_v15 = vpack.c.bf16 %v2891_v1, %v2869_v56  ;;  %v12051_v16 = vpack.c.bf16 %v2890_v3, %v2868_v2  ;;  %v10636_v46 = vld [vmem:[#allocation8 + $0x38c] ss:$16 sps:$4 sm:$0xff]   ;;  %v10634_v47 = vld [vmem:[#allocation8 + $0x388] ss:$16 sps:$4 sm:$0xff]   ;;  %v10639_v48 = vld [vmem:[#allocation8 + $0x5a4] ss:$16 sps:$4 sm:$0xff]  }
 0x280   :  { %v12053_v24 = vpack.c.bf16 %v2892_v4, %v2870_v60  ;;  %v10637_v49 = vld [vmem:[#allocation8 + $0x5a0] ss:$16 sps:$4 sm:$0xff]   ;;  %v10642_v51 = vld [vmem:[#allocation8 + $0x3ac] ss:$16 sps:$4 sm:$0xff]   ;;  %v10640_v50 = vld [vmem:[#allocation8 + $0x3a8] ss:$16 sps:$4 sm:$0xff]  }
 0x281   :  { %7698 = vmatpush1.bf16.msra.mxu0 %v10604_v0  ;;  %v10645_v52 = vld [vmem:[#allocation8 + $0x5c4] ss:$16 sps:$4 sm:$0xff]   ;;  %v10643_v53 = vld [vmem:[#allocation8 + $0x5c0] ss:$16 sps:$4 sm:$0xff]   ;;  %v10648_v54 = vld [vmem:[#allocation8 + $0x3cc] ss:$16 sps:$4 sm:$0xff]  }
 0x282   :  { %7268 = vmatpush1.bf16.msra.mxu1 %v10601_v63  ;;  %7699 = vmatprep.subr.bf16.mxu0 %v10612_v19  ;;  %v10646_v55 = vld [vmem:[#allocation8 + $0x3c8] ss:$16 sps:$4 sm:$0xff]   ;;  %v10651_v29 = vld [vmem:[#allocation8 + $0x5e4] ss:$16 sps:$4 sm:$0xff]   ;;  %v10649_v34 = vld [vmem:[#allocation8 + $0x5e0] ss:$16 sps:$4 sm:$0xff]  }
 0x283   :  { %7269 = vmatprep.subr.bf16.mxu1 %v10609_v7  ;;  %v10654_v22 = vld [vmem:[#allocation8 + $0x3ec] ss:$16 sps:$4 sm:$0xff]   ;;  %v10652_v14 = vld [vmem:[#allocation8 + $0x3e8] ss:$16 sps:$4 sm:$0xff]   ;;  %v10657_v56 = vld [vmem:[#allocation8 + $0x604] ss:$16 sps:$4 sm:$0xff]  }
 0x284   :  { %v10655_v57 = vld [vmem:[#allocation8 + $0x600] ss:$16 sps:$4 sm:$0xff]   ;;  %v10660_v58 = vld [vmem:[#allocation8 + $0x40c] ss:$16 sps:$4 sm:$0xff]   ;;  %v10658_v59 = vld [vmem:[#allocation8 + $0x408] ss:$16 sps:$4 sm:$0xff]  }
 0x285   :  { %7700 = vmatpush1.bf16.msra.mxu0 %v10610_v23  ;;  %v10663_v60 = vld [vmem:[#allocation8 + $0x624] ss:$16 sps:$4 sm:$0xff]   ;;  %v10661_v61 = vld [vmem:[#allocation8 + $0x620] ss:$16 sps:$4 sm:$0xff]   ;;  %v10664_v62 = vld [vmem:[#allocation8 + $0x428] ss:$16 sps:$4 sm:$0xff]  }
 0x286   :  { %7270 = vmatpush1.bf16.msra.mxu1 %v10607_v25  ;;  %7701 = vmatprep.subr.bf16.mxu0 %v10618_v28  ;;  %v10666_v63 = vld [vmem:[#allocation8 + $0x42c] ss:$16 sps:$4 sm:$0xff]   ;;  %v10669_v0 = vld [vmem:[#allocation8 + $0x644] ss:$16 sps:$4 sm:$0xff]   ;;  %v10667_v2 = vld [vmem:[#allocation8 + $0x640] ss:$16 sps:$4 sm:$0xff]  }
 0x287   :  { %7271 = vmatprep.subr.bf16.mxu1 %v10615_v26  ;;  %v10672_v1 = vld [vmem:[#allocation8 + $0x44c] ss:$16 sps:$4 sm:$0xff]   ;;  %v10670_v3 = vld [vmem:[#allocation8 + $0x448] ss:$16 sps:$4 sm:$0xff]   ;;  %v10675_v7 = vld [vmem:[#allocation8 + $0x664] ss:$16 sps:$4 sm:$0xff]  }
 0x288   :  { %v10673_v4 = vld [vmem:[#allocation8 + $0x660] ss:$16 sps:$4 sm:$0xff]   ;;  %v10678_v19 = vld [vmem:[#allocation8 + $0x46c] ss:$16 sps:$4 sm:$0xff]   ;;  %v10681_v25 = vld [vmem:[#allocation8 + $0x684] ss:$16 sps:$4 sm:$0xff]  }
 0x289   :  { %7702 = vmatpush1.bf16.msra.mxu0 %v10616_v30  ;;  %v10684_v23 = vld [vmem:[#allocation8 + $0x48c] ss:$16 sps:$4 sm:$0xff]   ;;  %v10687_v28 = vld [vmem:[#allocation8 + $0x6a4] ss:$16 sps:$4 sm:$0xff]  }
 0x28a   :  { %7272 = vmatpush1.bf16.msra.mxu1 %v10613_v27  ;;  %7703 = vmatprep.subr.bf16.mxu0 %v10624_v33  ;;  %v12059_v26 = vld [vmem:[#allocation7 + $0x10] sm:$0x3f] }
 0x28b   :  { %7273 = vmatprep.subr.bf16.mxu1 %v10621_v31  ;;  %v10682_v27 = vld [vmem:[#allocation8 + $0x488] ss:$16 sps:$4 sm:$0xff]   ;;  %v10690_v30 = vld [vmem:[#allocation8 + $0x4ac] ss:$16 sps:$4 sm:$0xff]   ;;  %v10685_v31 = vld [vmem:[#allocation8 + $0x6a0] ss:$16 sps:$4 sm:$0xff]   ;;  %v587_v33 = vrot.slane %v12059_v26, %v11957_v36 }
 0x28d   :  { %7704 = vmatpush1.bf16.msra.mxu0 %v10622_v39  ;;  %v583_v39 = vrot.slane %v12059_v26, %v11960_v37 }
 0x28e   :  { %7274 = vmatpush1.bf16.msra.mxu1 %v10619_v32  ;;  %7705 = vmatprep.subr.bf16.mxu0 %v10630_v42  ;;  %v579_v32 = vrot.slane %v12059_v26, %v11954_v35  ;;  %v10693_v42 = vld [vmem:[#allocation8 + $0x6c4] ss:$16 sps:$4 sm:$0xff]  }
 0x28f   :  { %7275 = vmatprep.subr.bf16.mxu1 %v10627_v40  ;;  %v591_v40 = vrot.slane %v12059_v26, %v11963_v38 }
 0x291   :  { %7706 = vmatpush1.bf16.msra.mxu0 %v10628_v43  ;;  %v10696_v43 = vld [vmem:[#allocation8 + $0x4cc] ss:$16 sps:$4 sm:$0xff]  }
 0x292   :  { %7276 = vmatpush1.bf16.msra.mxu1 %v10625_v41  ;;  %7707 = vmatprep.subr.bf16.mxu0 %v10636_v46  ;;  %v10688_v41 = vld [vmem:[#allocation8 + $0x4a8] ss:$16 sps:$4 sm:$0xff]  }
 0x293   :  { %7277 = vmatprep.subr.bf16.mxu1 %v10633_v44 }
 0x295   :  { %7708 = vmatpush1.bf16.msra.mxu0 %v10634_v47 }
 0x296   :  { %7278 = vmatpush1.bf16.msra.mxu1 %v10631_v45  ;;  %7709 = vmatprep.subr.bf16.mxu0 %v10642_v51  ;;  %v10691_v45 = vld [vmem:[#allocation8 + $0x6c0] ss:$16 sps:$4 sm:$0xff]  }
 0x297   :  { %7279 = vmatprep.subr.bf16.mxu1 %v10639_v48 }
 0x299   :  { %7710 = vmatpush1.bf16.msra.mxu0 %v10640_v50 }
 0x29a   :  { %7280 = vmatpush1.bf16.msra.mxu1 %v10637_v49  ;;  %7711 = vmatprep.subr.bf16.mxu0 %v10648_v54  ;;  %v10694_v49 = vld [vmem:[#allocation8 + $0x4c8] ss:$16 sps:$4 sm:$0xff]  }
 0x29b   :  { %7281 = vmatprep.subr.bf16.mxu1 %v10645_v52 }
 0x29d   :  { %7712 = vmatpush1.bf16.msra.mxu0 %v10646_v55 }
 0x29e   :  { %7282 = vmatpush1.bf16.msra.mxu1 %v10643_v53  ;;  %7713 = vmatprep.subr.bf16.mxu0 %v10654_v22 }
 0x29f   :  { %7283 = vmatprep.subr.bf16.mxu1 %v10651_v29 }
 0x2a1   :  { %7714 = vmatpush1.bf16.msra.mxu0 %v10652_v14  ;;  %v10699_v14 = vld [vmem:[#allocation8 + $0x6e4] ss:$16 sps:$4 sm:$0xff]  }
 0x2a2   :  { %7284 = vmatpush1.bf16.msra.mxu1 %v10649_v34  ;;  %7726 = vmatprep.subr.bf16.mxu0 %v10660_v58 }
 0x2a3   :  { %7296 = vmatprep.subr.bf16.mxu1 %v10657_v56 }
 0x2a4   :  { %7716 = vmatmul.mubr.bf16.vlgmr.msra.gmra.mrb[24].mxu0 %v11975_v20  ;;  %v10676_v20 = vld [vmem:[#allocation8 + $0x468] ss:$16 sps:$4 sm:$0xff]  }
 0x2a5   :  { %7286 = vmatmul.mubr.bf16.vlgmr.msra.gmra.mrb[20].mxu1 %v12003_v9  ;;  %7727 = vmatpush1.bf16.msra.mxu0 %v10658_v59 }
 0x2a6   :  { %7297 = vmatpush1.bf16.msra.mxu1 %v10655_v57  ;;  %7328 = vmatprep.mubr.bf16.mxu1 %v12009_v13 }
 0x2a7   :  { %7758 = vmatprep.mubr.bf16.mxu0 %v12007_v11  ;;  %7298 = vmatprep.subr.bf16.mxu1 %v10663_v60  ;;  %v10679_v11 = vld [vmem:[#allocation8 + $0x680] ss:$16 sps:$4 sm:$0xff]   ;;  %v10702_v60 = vld [vmem:[#allocation8 + $0x4ec] ss:$16 sps:$4 sm:$0xff]  }
 0x2a8   :  { %7728 = vmatprep.subr.bf16.mxu0 %v10666_v63 }
 0x2a9   :  { %7729 = vmatpush1.bf16.msra.mxu0 %v10664_v62 }
 0x2aa   :  { %7299 = vmatpush1.bf16.msra.mxu1 %v10661_v61  ;;  %7730 = vmatprep.subr.bf16.mxu0 %v10672_v1 }
 0x2ab   :  { %7300 = vmatprep.subr.bf16.mxu1 %v10669_v0  ;;  %v10697_v0 = vld [vmem:[#allocation8 + $0x6e0] ss:$16 sps:$4 sm:$0xff]  }
 0x2ad   :  { %7731 = vmatpush1.bf16.msra.mxu0 %v10670_v3 }
 0x2ae   :  { %7301 = vmatpush1.bf16.msra.mxu1 %v10667_v2  ;;  %7732 = vmatprep.subr.bf16.mxu0 %v10678_v19  ;;  %v10700_v19 = vld [vmem:[#allocation8 + $0x4e8] ss:$16 sps:$4 sm:$0xff]  }
 0x2af   :  { %7302 = vmatprep.subr.bf16.mxu1 %v10675_v7 }
 0x2b1   :  { %7733 = vmatpush1.bf16.msra.mxu0 %v10676_v20  ;;  %v10705_v20 = vld [vmem:[#allocation8 + $0x704] ss:$16 sps:$4 sm:$0xff]  }
 0x2b2   :  { %7303 = vmatpush1.bf16.msra.mxu1 %v10673_v4  ;;  %7734 = vmatprep.subr.bf16.mxu0 %v10684_v23 }
 0x2b3   :  { %7304 = vmatprep.subr.bf16.mxu1 %v10681_v25 }
 0x2b5   :  { %7735 = vmatpush1.bf16.msra.mxu0 %v10682_v27  ;;  %v10708_v27 = vld [vmem:[#allocation8 + $0x50c] ss:$16 sps:$4 sm:$0xff]  }
 0x2b6   :  { %7305 = vmatpush1.bf16.msra.mxu1 %v10679_v11  ;;  %7736 = vmatprep.subr.bf16.mxu0 %v10690_v30  ;;  %v10703_v11 = vld [vmem:[#allocation8 + $0x700] ss:$16 sps:$4 sm:$0xff]   ;;  %v10706_v30 = vld [vmem:[#allocation8 + $0x508] ss:$16 sps:$4 sm:$0xff]  }
 0x2b7   :  { %7306 = vmatprep.subr.bf16.mxu1 %v10687_v28  ;;  %v2760_v44 = vpop.f32.mrb[16].mxu0 }
 0x2b8   :  { %v2803_v46 = vpop.f32.mrb[16].mxu1  ;;  %v2761_v47 = vadd.f32 %v2760_v44, %v579_v32  ;;  %v2762_v48 = vpop.f32.mrb[17].mxu0  ;;  %v10723_v44 = vld [vmem:[#allocation8 + $0x764] ss:$16 sps:$4 sm:$0xff]  }
 0x2b9   :  { %v2804_v51 = vadd.f32 %v2803_v46, %v587_v33  ;;  %v2805_v50 = vpop.f32.mrb[17].mxu1  ;;  %v2763_v52 = vadd.f32 %v2762_v48, %v583_v39  ;;  %v2764_v53 = vpop.f32.mrb[18].mxu0  ;;  %7737 = vmatpush1.bf16.msra.mxu0 %v10688_v41  ;;  %v10715_v41 = vld [vmem:[#allocation8 + $0x740] ss:$16 sps:$4 sm:$0xff]   ;;  %v10726_v46 = vld [vmem:[#allocation8 + $0x56c] ss:$16 sps:$4 sm:$0xff]  }
 0x2ba   :  { %7307 = vmatpush1.bf16.msra.mxu1 %v10685_v31  ;;  %v2806_v54 = vadd.f32 %v2805_v50, %v591_v40  ;;  %v2807_v55 = vpop.f32.mrb[18].mxu1  ;;  %v2871_v29 = vmax.f32 %v2761_v47, 0.0  ;;  %v2765_v34 = vadd.f32 %v2764_v53, %v579_v32  ;;  %v2766_v22 = vpop.f32.mrb[19].mxu0  ;;  %7738 = vmatprep.subr.bf16.mxu0 %v10696_v43  ;;  %v10711_v31 = vld [vmem:[#allocation8 + $0x724] ss:$16 sps:$4 sm:$0xff]  }
 0x2bb   :  { %7308 = vmatprep.subr.bf16.mxu1 %v10693_v42  ;;  %v2873_v56 = vmax.f32 %v2804_v51, 0.0  ;;  %v2808_v57 = vadd.f32 %v2807_v55, %v587_v33  ;;  %v2809_v58 = vpop.f32.mrb[19].mxu1  ;;  %v2767_v59 = vadd.f32 %v2766_v22, %v583_v39  ;;  %v2872_v2 = vmax.f32 %v2763_v52, 0.0  ;;  %v10709_v32 = vld [vmem:[#allocation8 + $0x720] ss:$16 sps:$4 sm:$0xff]  }
 0x2bc   :  { %v2874_v61 = vmax.f32 %v2806_v54, 0.0  ;;  %v2810_v62 = vadd.f32 %v2809_v58, %v591_v40  ;;  %v2893_v63 = vmax.f32 %v2765_v34, 0.0  ;;  %v10714_v33 = vld [vmem:[#allocation8 + $0x52c] ss:$16 sps:$4 sm:$0xff]   ;;  %v10712_v39 = vld [vmem:[#allocation8 + $0x528] ss:$16 sps:$4 sm:$0xff]  }
 0x2bd   :  { %v2895_v1 = vmax.f32 %v2808_v57, 0.0  ;;  %v2894_v3 = vmax.f32 %v2767_v59, 0.0  ;;  %7739 = vmatpush1.bf16.msra.mxu0 %v10694_v49  ;;  %v10717_v40 = vld [vmem:[#allocation8 + $0x744] ss:$16 sps:$4 sm:$0xff]   ;;  %v10720_v42 = vld [vmem:[#allocation8 + $0x54c] ss:$16 sps:$4 sm:$0xff]  }
 0x2be   :  { %7309 = vmatpush1.bf16.msra.mxu1 %v10691_v45  ;;  %v2896_v7 = vmax.f32 %v2810_v62, 0.0  ;;  %v12069_v4 = vpack.c.bf16 %v2893_v63, %v2871_v29  ;;  %7740 = vmatprep.subr.bf16.mxu0 %v10702_v60  ;;  %v10718_v43 = vld [vmem:[#allocation8 + $0x548] ss:$16 sps:$4 sm:$0xff]   ;;  %v10721_v45 = vld [vmem:[#allocation8 + $0x760] ss:$16 sps:$4 sm:$0xff]  }
 0x2bf   :  { %7310 = vmatprep.subr.bf16.mxu1 %v10699_v14  ;;  %v12071_v25 = vpack.c.bf16 %v2895_v1, %v2873_v56  ;;  %v12073_v23 = vpack.c.bf16 %v2894_v3, %v2872_v2  ;;  %v10724_v47 = vld [vmem:[#allocation8 + $0x568] ss:$16 sps:$4 sm:$0xff]   ;;  %v10729_v48 = vld [vmem:[#allocation8 + $0x784] ss:$16 sps:$4 sm:$0xff]   ;;  %v10727_v49 = vld [vmem:[#allocation8 + $0x780] ss:$16 sps:$4 sm:$0xff]  }
 0x2c0   :  { %v12075_v28 = vpack.c.bf16 %v2896_v7, %v2874_v61  ;;  %v10732_v51 = vld [vmem:[#allocation8 + $0x58c] ss:$16 sps:$4 sm:$0xff]   ;;  %v10730_v50 = vld [vmem:[#allocation8 + $0x588] ss:$16 sps:$4 sm:$0xff]   ;;  %v10735_v52 = vld [vmem:[#allocation8 + $0x7a4] ss:$16 sps:$4 sm:$0xff]  }
 0x2c1   :  { %7741 = vmatpush1.bf16.msra.mxu0 %v10700_v19  ;;  %v10733_v53 = vld [vmem:[#allocation8 + $0x7a0] ss:$16 sps:$4 sm:$0xff]   ;;  %v10738_v54 = vld [vmem:[#allocation8 + $0x5ac] ss:$16 sps:$4 sm:$0xff]   ;;  %v10736_v55 = vld [vmem:[#allocation8 + $0x5a8] ss:$16 sps:$4 sm:$0xff]  }
 0x2c2   :  { %7311 = vmatpush1.bf16.msra.mxu1 %v10697_v0  ;;  %7742 = vmatprep.subr.bf16.mxu0 %v10708_v27  ;;  %v10741_v29 = vld [vmem:[#allocation8 + $0x7c4] ss:$16 sps:$4 sm:$0xff]   ;;  %v10739_v34 = vld [vmem:[#allocation8 + $0x7c0] ss:$16 sps:$4 sm:$0xff]   ;;  %v10744_v22 = vld [vmem:[#allocation8 + $0x5cc] ss:$16 sps:$4 sm:$0xff]  }
 0x2c3   :  { %7312 = vmatprep.subr.bf16.mxu1 %v10705_v20  ;;  %v10742_v14 = vld [vmem:[#allocation8 + $0x5c8] ss:$16 sps:$4 sm:$0xff]   ;;  %v10747_v56 = vld [vmem:[#allocation8 + $0x7e4] ss:$16 sps:$4 sm:$0xff]   ;;  %v10745_v57 = vld [vmem:[#allocation8 + $0x7e0] ss:$16 sps:$4 sm:$0xff]  }
 0x2c4   :  { %v10750_v58 = vld [vmem:[#allocation8 + $0x5ec] ss:$16 sps:$4 sm:$0xff]   ;;  %v10748_v59 = vld [vmem:[#allocation8 + $0x5e8] ss:$16 sps:$4 sm:$0xff]   ;;  %v10753_v60 = vld [vmem:[#allocation8 + $0x804] ss:$16 sps:$4 sm:$0xff]  }
 0x2c5   :  { %7743 = vmatpush1.bf16.msra.mxu0 %v10706_v30  ;;  %v10751_v61 = vld [vmem:[#allocation8 + $0x800] ss:$16 sps:$4 sm:$0xff]   ;;  %v10756_v62 = vld [vmem:[#allocation8 + $0x60c] ss:$16 sps:$4 sm:$0xff]   ;;  %v10754_v63 = vld [vmem:[#allocation8 + $0x608] ss:$16 sps:$4 sm:$0xff]  }
 0x2c6   :  { %7313 = vmatpush1.bf16.msra.mxu1 %v10703_v11  ;;  %7744 = vmatprep.subr.bf16.mxu0 %v10714_v33  ;;  %v10759_v0 = vld [vmem:[#allocation8 + $0x824] ss:$16 sps:$4 sm:$0xff]   ;;  %v10757_v1 = vld [vmem:[#allocation8 + $0x820] ss:$16 sps:$4 sm:$0xff]   ;;  %v10760_v2 = vld [vmem:[#allocation8 + $0x628] ss:$16 sps:$4 sm:$0xff]  }
 0x2c7   :  { %7314 = vmatprep.subr.bf16.mxu1 %v10711_v31  ;;  %v10762_v3 = vld [vmem:[#allocation8 + $0x62c] ss:$16 sps:$4 sm:$0xff]   ;;  %v10765_v7 = vld [vmem:[#allocation8 + $0x844] ss:$16 sps:$4 sm:$0xff]   ;;  %v10763_v20 = vld [vmem:[#allocation8 + $0x840] ss:$16 sps:$4 sm:$0xff]  }
 0x2c8   :  { %v10768_v19 = vld [vmem:[#allocation8 + $0x64c] ss:$16 sps:$4 sm:$0xff]   ;;  %v10766_v11 = vld [vmem:[#allocation8 + $0x648] ss:$16 sps:$4 sm:$0xff]   ;;  %v10771_v27 = vld [vmem:[#allocation8 + $0x864] ss:$16 sps:$4 sm:$0xff]  }
 0x2c9   :  { %7745 = vmatpush1.bf16.msra.mxu0 %v10712_v39  ;;  %v10769_v30 = vld [vmem:[#allocation8 + $0x860] ss:$16 sps:$4 sm:$0xff]   ;;  %v10774_v31 = vld [vmem:[#allocation8 + $0x66c] ss:$16 sps:$4 sm:$0xff]   ;;  %v10778_v39 = vld [vmem:[#allocation8 + $0x688] ss:$16 sps:$4 sm:$0xff]  }
 0x2ca   :  { %7315 = vmatpush1.bf16.msra.mxu1 %v10709_v32  ;;  %7746 = vmatprep.subr.bf16.mxu0 %v10720_v42  ;;  %v10777_v32 = vld [vmem:[#allocation8 + $0x884] ss:$16 sps:$4 sm:$0xff]   ;;  %v10775_v33 = vld [vmem:[#allocation8 + $0x880] ss:$16 sps:$4 sm:$0xff]  }
 0x2cb   :  { %7316 = vmatprep.subr.bf16.mxu1 %v10717_v40  ;;  %v10783_v40 = vld [vmem:[#allocation8 + $0x8a4] ss:$16 sps:$4 sm:$0xff]   ;;  %v10781_v42 = vld [vmem:[#allocation8 + $0x8a0] ss:$16 sps:$4 sm:$0xff]  }
 0x2cd   :  { %7747 = vmatpush1.bf16.msra.mxu0 %v10718_v43  ;;  %v595_v43 = vrot.slane %v12059_v26, %v11986_v17 }
 0x2ce   :  { %7317 = vmatpush1.bf16.msra.mxu1 %v10715_v41  ;;  %7748 = vmatprep.subr.bf16.mxu0 %v10726_v46  ;;  %v10786_v41 = vld [vmem:[#allocation8 + $0x6ac] ss:$16 sps:$4 sm:$0xff]   ;;  %v10789_v46 = vld [vmem:[#allocation8 + $0x8c4] ss:$16 sps:$4 sm:$0xff]  }
 0x2cf   :  { %7318 = vmatprep.subr.bf16.mxu1 %v10723_v44  ;;  %v599_v44 = vrot.slane %v12059_v26, %v11990_v18  ;;  %v10795_v18 = vld [vmem:[#allocation8 + $0x8e4] ss:$16 sps:$4 sm:$0xff]  }
 0x2d1   :  { %7749 = vmatpush1.bf16.msra.mxu0 %v10724_v47  ;;  %v10792_v47 = vld [vmem:[#allocation8 + $0x6cc] ss:$16 sps:$4 sm:$0xff]  }
 0x2d2   :  { %7319 = vmatpush1.bf16.msra.mxu1 %v10721_v45  ;;  %7750 = vmatprep.subr.bf16.mxu0 %v10732_v51  ;;  %v10784_v45 = vld [vmem:[#allocation8 + $0x6a8] ss:$16 sps:$4 sm:$0xff]  }
 0x2d3   :  { %7320 = vmatprep.subr.bf16.mxu1 %v10729_v48 }
 0x2d5   :  { %7751 = vmatpush1.bf16.msra.mxu0 %v10730_v50 }
 0x2d6   :  { %7321 = vmatpush1.bf16.msra.mxu1 %v10727_v49  ;;  %7752 = vmatprep.subr.bf16.mxu0 %v10738_v54  ;;  %v10787_v49 = vld [vmem:[#allocation8 + $0x8c0] ss:$16 sps:$4 sm:$0xff]  }
 0x2d7   :  { %7322 = vmatprep.subr.bf16.mxu1 %v10735_v52 }
 0x2d9   :  { %7753 = vmatpush1.bf16.msra.mxu0 %v10736_v55 }
 0x2da   :  { %7323 = vmatpush1.bf16.msra.mxu1 %v10733_v53  ;;  %7754 = vmatprep.subr.bf16.mxu0 %v10744_v22  ;;  %v10798_v22 = vld [vmem:[#allocation8 + $0x6ec] ss:$16 sps:$4 sm:$0xff]  }
 0x2db   :  { %7324 = vmatprep.subr.bf16.mxu1 %v10741_v29  ;;  %v10790_v29 = vld [vmem:[#allocation8 + $0x6c8] ss:$16 sps:$4 sm:$0xff]  }
 0x2dd   :  { %7755 = vmatpush1.bf16.msra.mxu0 %v10742_v14 }
 0x2de   :  { %7325 = vmatpush1.bf16.msra.mxu1 %v10739_v34  ;;  %7756 = vmatprep.subr.bf16.mxu0 %v10750_v58  ;;  %v10793_v34 = vld [vmem:[#allocation8 + $0x8e0] ss:$16 sps:$4 sm:$0xff]  }
 0x2df   :  { %7326 = vmatprep.subr.bf16.mxu1 %v10747_v56 }
 0x2e1   :  { %7757 = vmatpush1.bf16.msra.mxu0 %v10748_v59  ;;  %v10796_v59 = vld [vmem:[#allocation8 + $0x6e8] ss:$16 sps:$4 sm:$0xff]  }
 0x2e2   :  { %7327 = vmatpush1.bf16.msra.mxu1 %v10745_v57  ;;  %7769 = vmatprep.subr.bf16.mxu0 %v10756_v62  ;;  %v10799_v62 = vld [vmem:[#allocation8 + $0x900] ss:$16 sps:$4 sm:$0xff]  }
 0x2e3   :  { %7339 = vmatprep.subr.bf16.mxu1 %v10753_v60  ;;  %v10801_v60 = vld [vmem:[#allocation8 + $0x904] ss:$16 sps:$4 sm:$0xff]  }
 0x2e4   :  { %7759 = vmatmul.mubr.bf16.vlgmr.msra.gmra.mrb[24].mxu0 %v12003_v9  ;;  %v10772_v9 = vld [vmem:[#allocation8 + $0x668] ss:$16 sps:$4 sm:$0xff]  }
 0x2e5   :  { %7329 = vmatmul.mubr.bf16.vlgmr.msra.gmra.mrb[20].mxu1 %v12005_v10  ;;  %7770 = vmatpush1.bf16.msra.mxu0 %v10754_v63  ;;  %v10804_v63 = vld [vmem:[#allocation8 + $0x70c] ss:$16 sps:$4 sm:$0xff]  }
 0x2e6   :  { %7340 = vmatpush1.bf16.msra.mxu1 %v10751_v61  ;;  %7371 = vmatprep.mubr.bf16.mxu1 %v12029_v8 }
 0x2e7   :  { %7801 = vmatprep.mubr.bf16.mxu0 %v12009_v13  ;;  %7341 = vmatprep.subr.bf16.mxu1 %v10759_v0  ;;  %v10780_v13 = vld [vmem:[#allocation8 + $0x68c] ss:$16 sps:$4 sm:$0xff]   ;;  %v10802_v0 = vld [vmem:[#allocation8 + $0x708] ss:$16 sps:$4 sm:$0xff]  }
 0x2e8   :  { %7771 = vmatprep.subr.bf16.mxu0 %v10762_v3  ;;  %v10810_v3 = vld [vmem:[#allocation8 + $0x72c] ss:$16 sps:$4 sm:$0xff]  }
 0x2e9   :  { %7772 = vmatpush1.bf16.msra.mxu0 %v10760_v2  ;;  %v10805_v2 = vld [vmem:[#allocation8 + $0x920] ss:$16 sps:$4 sm:$0xff]  }
 0x2ea   :  { %7342 = vmatpush1.bf16.msra.mxu1 %v10757_v1  ;;  %7773 = vmatprep.subr.bf16.mxu0 %v10768_v19  ;;  %v10807_v1 = vld [vmem:[#allocation8 + $0x924] ss:$16 sps:$4 sm:$0xff]  }
 0x2eb   :  { %7343 = vmatprep.subr.bf16.mxu1 %v10765_v7  ;;  %v10808_v7 = vld [vmem:[#allocation8 + $0x728] ss:$16 sps:$4 sm:$0xff]   ;;  %v10813_v19 = vld [vmem:[#allocation8 + $0x944] ss:$16 sps:$4 sm:$0xff]  }
 0x2ed   :  { %7774 = vmatpush1.bf16.msra.mxu0 %v10766_v11  ;;  %v10816_v11 = vld [vmem:[#allocation8 + $0x74c] ss:$16 sps:$4 sm:$0xff]  }
 0x2ee   :  { %7344 = vmatpush1.bf16.msra.mxu1 %v10763_v20  ;;  %7775 = vmatprep.subr.bf16.mxu0 %v10774_v31  ;;  %v10811_v20 = vld [vmem:[#allocation8 + $0x940] ss:$16 sps:$4 sm:$0xff]  }
 0x2ef   :  { %7345 = vmatprep.subr.bf16.mxu1 %v10771_v27  ;;  %v10814_v27 = vld [vmem:[#allocation8 + $0x748] ss:$16 sps:$4 sm:$0xff]   ;;  %v10817_v31 = vld [vmem:[#allocation8 + $0x960] ss:$16 sps:$4 sm:$0xff]  }
 0x2f1   :  { %7776 = vmatpush1.bf16.msra.mxu0 %v10772_v9  ;;  %v10822_v9 = vld [vmem:[#allocation8 + $0x76c] ss:$16 sps:$4 sm:$0xff]  }
 0x2f2   :  { %7346 = vmatpush1.bf16.msra.mxu1 %v10769_v30  ;;  %7777 = vmatprep.subr.bf16.mxu0 %v10780_v13  ;;  %v10819_v30 = vld [vmem:[#allocation8 + $0x964] ss:$16 sps:$4 sm:$0xff]   ;;  %v10823_v13 = vld [vmem:[#allocation8 + $0x980] ss:$16 sps:$4 sm:$0xff]  }
 0x2f3   :  { %7347 = vmatprep.subr.bf16.mxu1 %v10777_v32  ;;  %v10820_v32 = vld [vmem:[#allocation8 + $0x768] ss:$16 sps:$4 sm:$0xff]  }
 0x2f5   :  { %7778 = vmatpush1.bf16.msra.mxu0 %v10778_v39  ;;  %v10828_v39 = vld [vmem:[#allocation8 + $0x78c] ss:$16 sps:$4 sm:$0xff]  }
 0x2f6   :  { %7348 = vmatpush1.bf16.msra.mxu1 %v10775_v33  ;;  %7779 = vmatprep.subr.bf16.mxu0 %v10786_v41  ;;  %v10825_v33 = vld [vmem:[#allocation8 + $0x984] ss:$16 sps:$4 sm:$0xff]  }
 0x2f7   :  { %7349 = vmatprep.subr.bf16.mxu1 %v10783_v40  ;;  %v2846_v48 = vpop.f32.mrb[20].mxu0  ;;  %v10826_v40 = vld [vmem:[#allocation8 + $0x788] ss:$16 sps:$4 sm:$0xff]   ;;  %v10831_v41 = vld [vmem:[#allocation8 + $0x9a4] ss:$16 sps:$4 sm:$0xff]  }
 0x2f8   :  { %v2847_v51 = vadd.f32 %v2846_v48, %v595_v43  ;;  %v2848_v50 = vpop.f32.mrb[21].mxu0  ;;  %v10838_v48 = vld [vmem:[#allocation8 + $0x7c8] ss:$16 sps:$4 sm:$0xff]  }
 0x2f9   :  { %v2849_v52 = vadd.f32 %v2848_v50, %v599_v44  ;;  %v2850_v53 = vpop.f32.mrb[22].mxu0  ;;  %7780 = vmatpush1.bf16.msra.mxu0 %v10784_v45  ;;  %v10837_v45 = vld [vmem:[#allocation8 + $0x9c4] ss:$16 sps:$4 sm:$0xff]   ;;  %v10846_v50 = vld [vmem:[#allocation8 + $0x7ec] ss:$16 sps:$4 sm:$0xff]  }
 0x2fa   :  { %7350 = vmatpush1.bf16.msra.mxu1 %v10781_v42  ;;  %v2875_v54 = vmax.f32 %v2847_v51, 0.0  ;;  %v2851_v55 = vadd.f32 %v2850_v53, %v595_v43  ;;  %v2852_v17 = vpop.f32.mrb[23].mxu0  ;;  %7781 = vmatprep.subr.bf16.mxu0 %v10792_v47  ;;  %v10829_v42 = vld [vmem:[#allocation8 + $0x9a0] ss:$16 sps:$4 sm:$0xff]   ;;  %v10834_v43 = vld [vmem:[#allocation8 + $0x7ac] ss:$16 sps:$4 sm:$0xff]  }
 0x2fb   :  { %7351 = vmatprep.subr.bf16.mxu1 %v10789_v46  ;;  %v2853_v26 = vadd.f32 %v2852_v17, %v599_v44  ;;  %v2876_v56 = vmax.f32 %v2849_v52, 0.0  ;;  %v10832_v44 = vld [vmem:[#allocation8 + $0x7a8] ss:$16 sps:$4 sm:$0xff]   ;;  %v10835_v46 = vld [vmem:[#allocation8 + $0x9c0] ss:$16 sps:$4 sm:$0xff]  }
 0x2fc   :  { %v2897_v14 = vmax.f32 %v2851_v55, 0.0  ;;  %v10840_v47 = vld [vmem:[#allocation8 + $0x7cc] ss:$16 sps:$4 sm:$0xff]   ;;  %v10841_v51 = vld [vmem:[#allocation8 + $0x9e0] ss:$16 sps:$4 sm:$0xff]  }
 0x2fd   :  { %v2898_v57 = vmax.f32 %v2853_v26, 0.0  ;;  %7782 = vmatpush1.bf16.msra.mxu0 %v10790_v29  ;;  %v10844_v52 = vld [vmem:[#allocation8 + $0x7e8] ss:$16 sps:$4 sm:$0xff]   ;;  %v10849_v53 = vld [vmem:[#allocation8 + $0xa04] ss:$16 sps:$4 sm:$0xff]  }
 0x2fe   :  { %7352 = vmatpush1.bf16.msra.mxu1 %v10787_v49  ;;  %v12085_v58 = vpack.c.bf16 %v2897_v14, %v2875_v54  ;;  %7783 = vmatprep.subr.bf16.mxu0 %v10798_v22  ;;  %v10843_v49 = vld [vmem:[#allocation8 + $0x9e4] ss:$16 sps:$4 sm:$0xff]   ;;  %v10847_v54 = vld [vmem:[#allocation8 + $0xa00] ss:$16 sps:$4 sm:$0xff]   ;;  %v10852_v55 = vld [vmem:[#allocation8 + $0x80c] ss:$16 sps:$4 sm:$0xff]  }
 0x2ff   :  { %7353 = vmatprep.subr.bf16.mxu1 %v10795_v18  ;;  %v12087_v61 = vpack.c.bf16 %v2898_v57, %v2876_v56  ;;  %v10850_v17 = vld [vmem:[#allocation8 + $0x808] ss:$16 sps:$4 sm:$0xff]   ;;  %v10855_v29 = vld [vmem:[#allocation8 + $0xa24] ss:$16 sps:$4 sm:$0xff]   ;;  %v10853_v18 = vld [vmem:[#allocation8 + $0xa20] ss:$16 sps:$4 sm:$0xff]  }
 0x300   :  { %v10856_v26 = vld [vmem:[#allocation8 + $0x828] ss:$16 sps:$4 sm:$0xff]   ;;  %v10861_v22 = vld [vmem:[#allocation8 + $0xa44] ss:$16 sps:$4 sm:$0xff]   ;;  %v10864_v14 = vld [vmem:[#allocation8 + $0x84c] ss:$16 sps:$4 sm:$0xff]  }
 0x301   :  { %7784 = vmatpush1.bf16.msra.mxu0 %v10796_v59  ;;  %v10859_v56 = vld [vmem:[#allocation8 + $0xa40] ss:$16 sps:$4 sm:$0xff]   ;;  %v10862_v57 = vld [vmem:[#allocation8 + $0x848] ss:$16 sps:$4 sm:$0xff]   ;;  %v10867_v59 = vld [vmem:[#allocation8 + $0xa64] ss:$16 sps:$4 sm:$0xff]  }
 0x302   :  { %7354 = vmatpush1.bf16.msra.mxu1 %v10793_v34  ;;  %7785 = vmatprep.subr.bf16.mxu0 %v10804_v63  ;;  %v10858_v34 = vld [vmem:[#allocation8 + $0x82c] ss:$16 sps:$4 sm:$0xff]   ;;  %v10873_v63 = vld [vmem:[#allocation8 + $0xa84] ss:$16 sps:$4 sm:$0xff]  }
 0x303   :  { %7355 = vmatprep.subr.bf16.mxu1 %v10801_v60  ;;  %v10870_v60 = vld [vmem:[#allocation8 + $0x86c] ss:$16 sps:$4 sm:$0xff]  }
 0x305   :  { %7786 = vmatpush1.bf16.msra.mxu0 %v10802_v0  ;;  %v10876_v0 = vld [vmem:[#allocation8 + $0x88c] ss:$16 sps:$4 sm:$0xff]  }
 0x306   :  { %7356 = vmatpush1.bf16.msra.mxu1 %v10799_v62  ;;  %7787 = vmatprep.subr.bf16.mxu0 %v10810_v3  ;;  %v10868_v62 = vld [vmem:[#allocation8 + $0x868] ss:$16 sps:$4 sm:$0xff]   ;;  %v10882_v3 = vld [vmem:[#allocation8 + $0x8ac] ss:$16 sps:$4 sm:$0xff]  }
 0x307   :  { %7357 = vmatprep.subr.bf16.mxu1 %v10807_v1  ;;  %v10874_v1 = vld [vmem:[#allocation8 + $0x888] ss:$16 sps:$4 sm:$0xff]  }
 0x309   :  { %7788 = vmatpush1.bf16.msra.mxu0 %v10808_v7  ;;  %v10877_v7 = vld [vmem:[#allocation8 + $0xaa0] ss:$16 sps:$4 sm:$0xff]  }
 0x30a   :  { %7358 = vmatpush1.bf16.msra.mxu1 %v10805_v2  ;;  %7789 = vmatprep.subr.bf16.mxu0 %v10816_v11  ;;  %v10879_v2 = vld [vmem:[#allocation8 + $0xaa4] ss:$16 sps:$4 sm:$0xff]   ;;  %v10888_v11 = vld [vmem:[#allocation8 + $0x8cc] ss:$16 sps:$4 sm:$0xff]  }
 0x30b   :  { %7359 = vmatprep.subr.bf16.mxu1 %v10813_v19  ;;  %v10880_v19 = vld [vmem:[#allocation8 + $0x8a8] ss:$16 sps:$4 sm:$0xff]  }
 0x30d   :  { %7790 = vmatpush1.bf16.msra.mxu0 %v10814_v27  ;;  %v10883_v27 = vld [vmem:[#allocation8 + $0xac0] ss:$16 sps:$4 sm:$0xff]  }
 0x30e   :  { %7360 = vmatpush1.bf16.msra.mxu1 %v10811_v20  ;;  %7791 = vmatprep.subr.bf16.mxu0 %v10822_v9  ;;  %v10885_v20 = vld [vmem:[#allocation8 + $0xac4] ss:$16 sps:$4 sm:$0xff]   ;;  %v10894_v9 = vld [vmem:[#allocation8 + $0x8ec] ss:$16 sps:$4 sm:$0xff]  }
 0x30f   :  { %7361 = vmatprep.subr.bf16.mxu1 %v10819_v30  ;;  %v10886_v30 = vld [vmem:[#allocation8 + $0x8c8] ss:$16 sps:$4 sm:$0xff]  }
 0x311   :  { %7792 = vmatpush1.bf16.msra.mxu0 %v10820_v32  ;;  %v10889_v32 = vld [vmem:[#allocation8 + $0xae0] ss:$16 sps:$4 sm:$0xff]  }
 0x312   :  { %7362 = vmatpush1.bf16.msra.mxu1 %v10817_v31  ;;  %7793 = vmatprep.subr.bf16.mxu0 %v10828_v39  ;;  %v10891_v31 = vld [vmem:[#allocation8 + $0xae4] ss:$16 sps:$4 sm:$0xff]   ;;  %v10900_v39 = vld [vmem:[#allocation8 + $0x90c] ss:$16 sps:$4 sm:$0xff]  }
 0x313   :  { %7363 = vmatprep.subr.bf16.mxu1 %v10825_v33  ;;  %v10892_v33 = vld [vmem:[#allocation8 + $0x8e8] ss:$16 sps:$4 sm:$0xff]  }
 0x315   :  { %7794 = vmatpush1.bf16.msra.mxu0 %v10826_v40  ;;  %v10895_v40 = vld [vmem:[#allocation8 + $0xb00] ss:$16 sps:$4 sm:$0xff]  }
 0x316   :  { %7364 = vmatpush1.bf16.msra.mxu1 %v10823_v13  ;;  %7795 = vmatprep.subr.bf16.mxu0 %v10834_v43  ;;  %v10897_v13 = vld [vmem:[#allocation8 + $0xb04] ss:$16 sps:$4 sm:$0xff]   ;;  %v10906_v43 = vld [vmem:[#allocation8 + $0x92c] ss:$16 sps:$4 sm:$0xff]  }
 0x317   :  { %7365 = vmatprep.subr.bf16.mxu1 %v10831_v41  ;;  %v10898_v41 = vld [vmem:[#allocation8 + $0x908] ss:$16 sps:$4 sm:$0xff]  }
 0x319   :  { %7796 = vmatpush1.bf16.msra.mxu0 %v10832_v44  ;;  %v10901_v44 = vld [vmem:[#allocation8 + $0xb20] ss:$16 sps:$4 sm:$0xff]  }
 0x31a   :  { %7366 = vmatpush1.bf16.msra.mxu1 %v10829_v42  ;;  %7797 = vmatprep.subr.bf16.mxu0 %v10840_v47  ;;  %v10903_v42 = vld [vmem:[#allocation8 + $0xb24] ss:$16 sps:$4 sm:$0xff]   ;;  %v10912_v47 = vld [vmem:[#allocation8 + $0x94c] ss:$16 sps:$4 sm:$0xff]  }
 0x31b   :  { %7367 = vmatprep.subr.bf16.mxu1 %v10837_v45  ;;  %v10904_v45 = vld [vmem:[#allocation8 + $0x928] ss:$16 sps:$4 sm:$0xff]  }
 0x31d   :  { %7798 = vmatpush1.bf16.msra.mxu0 %v10838_v48  ;;  %v10907_v48 = vld [vmem:[#allocation8 + $0xb40] ss:$16 sps:$4 sm:$0xff]  }
 0x31e   :  { %7368 = vmatpush1.bf16.msra.mxu1 %v10835_v46  ;;  %7799 = vmatprep.subr.bf16.mxu0 %v10846_v50  ;;  %v10909_v46 = vld [vmem:[#allocation8 + $0xb44] ss:$16 sps:$4 sm:$0xff]   ;;  %v10918_v50 = vld [vmem:[#allocation8 + $0x96c] ss:$16 sps:$4 sm:$0xff]  }
 0x31f   :  { %7369 = vmatprep.subr.bf16.mxu1 %v10843_v49  ;;  %v10910_v49 = vld [vmem:[#allocation8 + $0x948] ss:$16 sps:$4 sm:$0xff]  }
 0x321   :  { %7800 = vmatpush1.bf16.msra.mxu0 %v10844_v52  ;;  %v10913_v52 = vld [vmem:[#allocation8 + $0xb60] ss:$16 sps:$4 sm:$0xff]  }
 0x322   :  { %7370 = vmatpush1.bf16.msra.mxu1 %v10841_v51  ;;  %7812 = vmatprep.subr.bf16.mxu0 %v10852_v55  ;;  %v10915_v51 = vld [vmem:[#allocation8 + $0xb64] ss:$16 sps:$4 sm:$0xff]   ;;  %v10924_v55 = vld [vmem:[#allocation8 + $0x98c] ss:$16 sps:$4 sm:$0xff]  }
 0x323   :  { %7382 = vmatprep.subr.bf16.mxu1 %v10849_v53  ;;  %v10916_v53 = vld [vmem:[#allocation8 + $0x968] ss:$16 sps:$4 sm:$0xff]  }
 0x324   :  { %7802 = vmatmul.mubr.bf16.vlgmr.msra.gmra.mrb[24].mxu0 %v12005_v10  ;;  %v10865_v10 = vld [vmem:[#allocation8 + $0xa60] ss:$16 sps:$4 sm:$0xff]  }
 0x325   :  { %7372 = vmatmul.mubr.bf16.vlgmr.msra.gmra.mrb[20].mxu1 %v12025_v5  ;;  %7813 = vmatpush1.bf16.msra.mxu0 %v10850_v17  ;;  %v10919_v17 = vld [vmem:[#allocation8 + $0xb80] ss:$16 sps:$4 sm:$0xff]  }
 0x326   :  { %7383 = vmatpush1.bf16.msra.mxu1 %v10847_v54  ;;  %7414 = vmatprep.mubr.bf16.mxu1 %v12031_v21  ;;  %v10921_v54 = vld [vmem:[#allocation8 + $0xb84] ss:$16 sps:$4 sm:$0xff]  }
 0x327   :  { %7844 = vmatprep.mubr.bf16.mxu0 %v12029_v8  ;;  %7384 = vmatprep.subr.bf16.mxu1 %v10855_v29  ;;  %v10871_v8 = vld [vmem:[#allocation8 + $0xa80] ss:$16 sps:$4 sm:$0xff]   ;;  %v10922_v29 = vld [vmem:[#allocation8 + $0x988] ss:$16 sps:$4 sm:$0xff]  }
 0x328   :  { %7814 = vmatprep.subr.bf16.mxu0 %v10858_v34  ;;  %v10925_v34 = vld [vmem:[#allocation8 + $0xba0] ss:$16 sps:$4 sm:$0xff]  }
 0x329   :  { %7815 = vmatpush1.bf16.msra.mxu0 %v10856_v26  ;;  %v10930_v26 = vld [vmem:[#allocation8 + $0x9ac] ss:$16 sps:$4 sm:$0xff]  }
 0x32a   :  { %7385 = vmatpush1.bf16.msra.mxu1 %v10853_v18  ;;  %7816 = vmatprep.subr.bf16.mxu0 %v10864_v14  ;;  %v10927_v18 = vld [vmem:[#allocation8 + $0xba4] ss:$16 sps:$4 sm:$0xff]  }
 0x32b   :  { %7386 = vmatprep.subr.bf16.mxu1 %v10861_v22  ;;  %v10928_v22 = vld [vmem:[#allocation8 + $0x9a8] ss:$16 sps:$4 sm:$0xff]   ;;  %v10933_v14 = vld [vmem:[#allocation8 + $0xbc4] ss:$16 sps:$4 sm:$0xff]  }
 0x32d   :  { %7817 = vmatpush1.bf16.msra.mxu0 %v10862_v57  ;;  %v10931_v57 = vld [vmem:[#allocation8 + $0xbc0] ss:$16 sps:$4 sm:$0xff]  }
 0x32e   :  { %7387 = vmatpush1.bf16.msra.mxu1 %v10859_v56  ;;  %7818 = vmatprep.subr.bf16.mxu0 %v10870_v60  ;;  %v10936_v56 = vld [vmem:[#allocation8 + $0x9cc] ss:$16 sps:$4 sm:$0xff]   ;;  %v10939_v60 = vld [vmem:[#allocation8 + $0xbe4] ss:$16 sps:$4 sm:$0xff]  }
 0x32f   :  { %7388 = vmatprep.subr.bf16.mxu1 %v10867_v59  ;;  %v10934_v59 = vld [vmem:[#allocation8 + $0x9c8] ss:$16 sps:$4 sm:$0xff]  }
 0x331   :  { %7819 = vmatpush1.bf16.msra.mxu0 %v10868_v62  ;;  %v10937_v62 = vld [vmem:[#allocation8 + $0xbe0] ss:$16 sps:$4 sm:$0xff]  }
 0x332   :  { %7389 = vmatpush1.bf16.msra.mxu1 %v10865_v10  ;;  %7820 = vmatprep.subr.bf16.mxu0 %v10876_v0  ;;  %v10942_v10 = vld [vmem:[#allocation8 + $0x9ec] ss:$16 sps:$4 sm:$0xff]   ;;  %v10945_v0 = vld [vmem:[#allocation8 + $0xc04] ss:$16 sps:$4 sm:$0xff]  }
 0x333   :  { %7390 = vmatprep.subr.bf16.mxu1 %v10873_v63  ;;  %v10940_v63 = vld [vmem:[#allocation8 + $0x9e8] ss:$16 sps:$4 sm:$0xff]  }
 0x335   :  { %7821 = vmatpush1.bf16.msra.mxu0 %v10874_v1  ;;  %v10943_v1 = vld [vmem:[#allocation8 + $0xc00] ss:$16 sps:$4 sm:$0xff]  }
 0x336   :  { %7391 = vmatpush1.bf16.msra.mxu1 %v10871_v8  ;;  %7822 = vmatprep.subr.bf16.mxu0 %v10882_v3  ;;  %v10948_v8 = vld [vmem:[#allocation8 + $0xa0c] ss:$16 sps:$4 sm:$0xff]   ;;  %v10951_v3 = vld [vmem:[#allocation8 + $0xc24] ss:$16 sps:$4 sm:$0xff]  }
 0x337   :  { %7392 = vmatprep.subr.bf16.mxu1 %v10879_v2  ;;  %v10946_v2 = vld [vmem:[#allocation8 + $0xa08] ss:$16 sps:$4 sm:$0xff]  }
 0x339   :  { %7823 = vmatpush1.bf16.msra.mxu0 %v10880_v19  ;;  %v10949_v19 = vld [vmem:[#allocation8 + $0xc20] ss:$16 sps:$4 sm:$0xff]  }
 0x33a   :  { %7393 = vmatpush1.bf16.msra.mxu1 %v10877_v7  ;;  %7824 = vmatprep.subr.bf16.mxu0 %v10888_v11  ;;  %v10954_v7 = vld [vmem:[#allocation8 + $0xa2c] ss:$16 sps:$4 sm:$0xff]   ;;  %v10957_v11 = vld [vmem:[#allocation8 + $0xc44] ss:$16 sps:$4 sm:$0xff]  }
 0x33b   :  { %7394 = vmatprep.subr.bf16.mxu1 %v10885_v20  ;;  %v10952_v20 = vld [vmem:[#allocation8 + $0xa28] ss:$16 sps:$4 sm:$0xff]  }
 0x33d   :  { %7825 = vmatpush1.bf16.msra.mxu0 %v10886_v30  ;;  %v10955_v30 = vld [vmem:[#allocation8 + $0xc40] ss:$16 sps:$4 sm:$0xff]  }
 0x33e   :  { %7395 = vmatpush1.bf16.msra.mxu1 %v10883_v27  ;;  %7826 = vmatprep.subr.bf16.mxu0 %v10894_v9  ;;  %v10960_v27 = vld [vmem:[#allocation8 + $0xa4c] ss:$16 sps:$4 sm:$0xff]   ;;  %v10963_v9 = vld [vmem:[#allocation8 + $0xc64] ss:$16 sps:$4 sm:$0xff]  }
 0x33f   :  { %7396 = vmatprep.subr.bf16.mxu1 %v10891_v31  ;;  %v10958_v31 = vld [vmem:[#allocation8 + $0xa48] ss:$16 sps:$4 sm:$0xff]  }
 0x341   :  { %7827 = vmatpush1.bf16.msra.mxu0 %v10892_v33  ;;  %v10964_v33 = vld [vmem:[#allocation8 + $0xa68] ss:$16 sps:$4 sm:$0xff]  }
 0x342   :  { %7397 = vmatpush1.bf16.msra.mxu1 %v10889_v32  ;;  %7828 = vmatprep.subr.bf16.mxu0 %v10900_v39  ;;  %v10961_v32 = vld [vmem:[#allocation8 + $0xc60] ss:$16 sps:$4 sm:$0xff]   ;;  %v10972_v39 = vld [vmem:[#allocation8 + $0xa8c] ss:$16 sps:$4 sm:$0xff]  }
 0x343   :  { %7398 = vmatprep.subr.bf16.mxu1 %v10897_v13  ;;  %v10969_v13 = vld [vmem:[#allocation8 + $0xc84] ss:$16 sps:$4 sm:$0xff]  }
 0x345   :  { %7829 = vmatpush1.bf16.msra.mxu0 %v10898_v41  ;;  %v10975_v41 = vld [vmem:[#allocation8 + $0xca4] ss:$16 sps:$4 sm:$0xff]  }
 0x346   :  { %7399 = vmatpush1.bf16.msra.mxu1 %v10895_v40  ;;  %7830 = vmatprep.subr.bf16.mxu0 %v10906_v43  ;;  %v10970_v40 = vld [vmem:[#allocation8 + $0xa88] ss:$16 sps:$4 sm:$0xff]   ;;  %v10973_v43 = vld [vmem:[#allocation8 + $0xca0] ss:$16 sps:$4 sm:$0xff]  }
 0x347   :  { %7400 = vmatprep.subr.bf16.mxu1 %v10903_v42  ;;  %v10978_v42 = vld [vmem:[#allocation8 + $0xaac] ss:$16 sps:$4 sm:$0xff]  }
 0x349   :  { %7831 = vmatpush1.bf16.msra.mxu0 %v10904_v45  ;;  %v10981_v45 = vld [vmem:[#allocation8 + $0xcc4] ss:$16 sps:$4 sm:$0xff]  }
 0x34a   :  { %7401 = vmatpush1.bf16.msra.mxu1 %v10901_v44  ;;  %7832 = vmatprep.subr.bf16.mxu0 %v10912_v47  ;;  %v10976_v44 = vld [vmem:[#allocation8 + $0xaa8] ss:$16 sps:$4 sm:$0xff]   ;;  %v10979_v47 = vld [vmem:[#allocation8 + $0xcc0] ss:$16 sps:$4 sm:$0xff]  }
 0x34b   :  { %7402 = vmatprep.subr.bf16.mxu1 %v10909_v46  ;;  %v10984_v46 = vld [vmem:[#allocation8 + $0xacc] ss:$16 sps:$4 sm:$0xff]  }
 0x34d   :  { %7833 = vmatpush1.bf16.msra.mxu0 %v10910_v49  ;;  %v10987_v49 = vld [vmem:[#allocation8 + $0xce4] ss:$16 sps:$4 sm:$0xff]  }
 0x34e   :  { %7403 = vmatpush1.bf16.msra.mxu1 %v10907_v48  ;;  %7834 = vmatprep.subr.bf16.mxu0 %v10918_v50  ;;  %v10982_v48 = vld [vmem:[#allocation8 + $0xac8] ss:$16 sps:$4 sm:$0xff]   ;;  %v10985_v50 = vld [vmem:[#allocation8 + $0xce0] ss:$16 sps:$4 sm:$0xff]  }
 0x34f   :  { %7404 = vmatprep.subr.bf16.mxu1 %v10915_v51  ;;  %v10990_v51 = vld [vmem:[#allocation8 + $0xaec] ss:$16 sps:$4 sm:$0xff]  }
 0x351   :  { %7835 = vmatpush1.bf16.msra.mxu0 %v10916_v53  ;;  %v10993_v53 = vld [vmem:[#allocation8 + $0xd04] ss:$16 sps:$4 sm:$0xff]  }
 0x352   :  { %7405 = vmatpush1.bf16.msra.mxu1 %v10913_v52  ;;  %7836 = vmatprep.subr.bf16.mxu0 %v10924_v55  ;;  %v10988_v52 = vld [vmem:[#allocation8 + $0xae8] ss:$16 sps:$4 sm:$0xff]   ;;  %v10991_v55 = vld [vmem:[#allocation8 + $0xd00] ss:$16 sps:$4 sm:$0xff]  }
 0x353   :  { %7406 = vmatprep.subr.bf16.mxu1 %v10921_v54  ;;  %v10996_v54 = vld [vmem:[#allocation8 + $0xb0c] ss:$16 sps:$4 sm:$0xff]  }
 0x355   :  { %7837 = vmatpush1.bf16.msra.mxu0 %v10922_v29  ;;  %v10999_v29 = vld [vmem:[#allocation8 + $0xd24] ss:$16 sps:$4 sm:$0xff]  }
 0x356   :  { %7407 = vmatpush1.bf16.msra.mxu1 %v10919_v17  ;;  %7838 = vmatprep.subr.bf16.mxu0 %v10930_v26  ;;  %v10994_v17 = vld [vmem:[#allocation8 + $0xb08] ss:$16 sps:$4 sm:$0xff]   ;;  %v10997_v26 = vld [vmem:[#allocation8 + $0xd20] ss:$16 sps:$4 sm:$0xff]  }
 0x357   :  { %7408 = vmatprep.subr.bf16.mxu1 %v10927_v18  ;;  %v11002_v18 = vld [vmem:[#allocation8 + $0xb2c] ss:$16 sps:$4 sm:$0xff]  }
 0x359   :  { %7839 = vmatpush1.bf16.msra.mxu0 %v10928_v22  ;;  %v11005_v22 = vld [vmem:[#allocation8 + $0xd44] ss:$16 sps:$4 sm:$0xff]  }
 0x35a   :  { %7409 = vmatpush1.bf16.msra.mxu1 %v10925_v34  ;;  %7840 = vmatprep.subr.bf16.mxu0 %v10936_v56  ;;  %v11000_v34 = vld [vmem:[#allocation8 + $0xb28] ss:$16 sps:$4 sm:$0xff]   ;;  %v11003_v56 = vld [vmem:[#allocation8 + $0xd40] ss:$16 sps:$4 sm:$0xff]  }
 0x35b   :  { %7410 = vmatprep.subr.bf16.mxu1 %v10933_v14  ;;  %v11008_v14 = vld [vmem:[#allocation8 + $0xb4c] ss:$16 sps:$4 sm:$0xff]  }
 0x35d   :  { %7841 = vmatpush1.bf16.msra.mxu0 %v10934_v59  ;;  %v11011_v59 = vld [vmem:[#allocation8 + $0xd64] ss:$16 sps:$4 sm:$0xff]  }
 0x35e   :  { %7411 = vmatpush1.bf16.msra.mxu1 %v10931_v57  ;;  %7842 = vmatprep.subr.bf16.mxu0 %v10942_v10  ;;  %v11006_v57 = vld [vmem:[#allocation8 + $0xb48] ss:$16 sps:$4 sm:$0xff]   ;;  %v11009_v10 = vld [vmem:[#allocation8 + $0xd60] ss:$16 sps:$4 sm:$0xff]  }
 0x35f   :  { %7412 = vmatprep.subr.bf16.mxu1 %v10939_v60  ;;  %v11014_v60 = vld [vmem:[#allocation8 + $0xb6c] ss:$16 sps:$4 sm:$0xff]  }
 0x361   :  { %7843 = vmatpush1.bf16.msra.mxu0 %v10940_v63  ;;  %v11017_v63 = vld [vmem:[#allocation8 + $0xd84] ss:$16 sps:$4 sm:$0xff]  }
 0x362   :  { %7413 = vmatpush1.bf16.msra.mxu1 %v10937_v62  ;;  %7855 = vmatprep.subr.bf16.mxu0 %v10948_v8  ;;  %v11012_v62 = vld [vmem:[#allocation8 + $0xb68] ss:$16 sps:$4 sm:$0xff]   ;;  %v11015_v8 = vld [vmem:[#allocation8 + $0xd80] ss:$16 sps:$4 sm:$0xff]  }
 0x363   :  { %7425 = vmatprep.subr.bf16.mxu1 %v10945_v0  ;;  %v11020_v0 = vld [vmem:[#allocation8 + $0xb8c] ss:$16 sps:$4 sm:$0xff]  }
 0x364   :  { %7845 = vmatmul.mubr.bf16.vlgmr.msra.gmra.mrb[24].mxu0 %v12025_v5  ;;  %v10966_v5 = vld [vmem:[#allocation8 + $0xa6c] ss:$16 sps:$4 sm:$0xff]  }
 0x365   :  { %7415 = vmatmul.mubr.bf16.vlgmr.msra.gmra.mrb[20].mxu1 %v12027_v6  ;;  %7856 = vmatpush1.bf16.msra.mxu0 %v10946_v2  ;;  %v11023_v2 = vld [vmem:[#allocation8 + $0xda4] ss:$16 sps:$4 sm:$0xff]  }
 0x366   :  { %7426 = vmatpush1.bf16.msra.mxu1 %v10943_v1  ;;  %7457 = vmatprep.mubr.bf16.mxu1 %v12051_v16  ;;  %v11018_v1 = vld [vmem:[#allocation8 + $0xb88] ss:$16 sps:$4 sm:$0xff]  }
 0x367   :  { %7887 = vmatprep.mubr.bf16.mxu0 %v12031_v21  ;;  %7427 = vmatprep.subr.bf16.mxu1 %v10951_v3  ;;  %v10967_v21 = vld [vmem:[#allocation8 + $0xc80] ss:$16 sps:$4 sm:$0xff]   ;;  %v11026_v3 = vld [vmem:[#allocation8 + $0xbac] ss:$16 sps:$4 sm:$0xff]  }
 0x368   :  { %7857 = vmatprep.subr.bf16.mxu0 %v10954_v7  ;;  %v11021_v7 = vld [vmem:[#allocation8 + $0xda0] ss:$16 sps:$4 sm:$0xff]  }
 0x369   :  { %7858 = vmatpush1.bf16.msra.mxu0 %v10952_v20  ;;  %v11029_v20 = vld [vmem:[#allocation8 + $0xdc4] ss:$16 sps:$4 sm:$0xff]  }
 0x36a   :  { %7428 = vmatpush1.bf16.msra.mxu1 %v10949_v19  ;;  %7859 = vmatprep.subr.bf16.mxu0 %v10960_v27  ;;  %v11024_v19 = vld [vmem:[#allocation8 + $0xba8] ss:$16 sps:$4 sm:$0xff]   ;;  %v11027_v27 = vld [vmem:[#allocation8 + $0xdc0] ss:$16 sps:$4 sm:$0xff]  }
 0x36b   :  { %7429 = vmatprep.subr.bf16.mxu1 %v10957_v11  ;;  %v11032_v11 = vld [vmem:[#allocation8 + $0xbcc] ss:$16 sps:$4 sm:$0xff]  }
 0x36d   :  { %7860 = vmatpush1.bf16.msra.mxu0 %v10958_v31  ;;  %v11035_v31 = vld [vmem:[#allocation8 + $0xde4] ss:$16 sps:$4 sm:$0xff]  }
 0x36e   :  { %7430 = vmatpush1.bf16.msra.mxu1 %v10955_v30  ;;  %7861 = vmatprep.subr.bf16.mxu0 %v10966_v5  ;;  %v11030_v30 = vld [vmem:[#allocation8 + $0xbc8] ss:$16 sps:$4 sm:$0xff]   ;;  %v11033_v5 = vld [vmem:[#allocation8 + $0xde0] ss:$16 sps:$4 sm:$0xff]  }
 0x36f   :  { %7431 = vmatprep.subr.bf16.mxu1 %v10963_v9  ;;  %v11038_v9 = vld [vmem:[#allocation8 + $0xbec] ss:$16 sps:$4 sm:$0xff]  }
 0x371   :  { %7862 = vmatpush1.bf16.msra.mxu0 %v10964_v33  ;;  %v11041_v33 = vld [vmem:[#allocation8 + $0xe04] ss:$16 sps:$4 sm:$0xff]  }
 0x372   :  { %7432 = vmatpush1.bf16.msra.mxu1 %v10961_v32  ;;  %7863 = vmatprep.subr.bf16.mxu0 %v10972_v39  ;;  %v11036_v32 = vld [vmem:[#allocation8 + $0xbe8] ss:$16 sps:$4 sm:$0xff]   ;;  %v11039_v39 = vld [vmem:[#allocation8 + $0xe00] ss:$16 sps:$4 sm:$0xff]  }
 0x373   :  { %7433 = vmatprep.subr.bf16.mxu1 %v10969_v13  ;;  %v11044_v13 = vld [vmem:[#allocation8 + $0xc0c] ss:$16 sps:$4 sm:$0xff]  }
 0x375   :  { %7864 = vmatpush1.bf16.msra.mxu0 %v10970_v40  ;;  %v11047_v40 = vld [vmem:[#allocation8 + $0xe24] ss:$16 sps:$4 sm:$0xff]  }
 0x376   :  { %7434 = vmatpush1.bf16.msra.mxu1 %v10967_v21  ;;  %7865 = vmatprep.subr.bf16.mxu0 %v10978_v42  ;;  %v11042_v21 = vld [vmem:[#allocation8 + $0xc08] ss:$16 sps:$4 sm:$0xff]   ;;  %v11045_v42 = vld [vmem:[#allocation8 + $0xe20] ss:$16 sps:$4 sm:$0xff]  }
 0x377   :  { %7435 = vmatprep.subr.bf16.mxu1 %v10975_v41  ;;  %v11050_v41 = vld [vmem:[#allocation8 + $0xc2c] ss:$16 sps:$4 sm:$0xff]  }
 0x379   :  { %7866 = vmatpush1.bf16.msra.mxu0 %v10976_v44  ;;  %v11053_v44 = vld [vmem:[#allocation8 + $0xe44] ss:$16 sps:$4 sm:$0xff]  }
 0x37a   :  { %7436 = vmatpush1.bf16.msra.mxu1 %v10973_v43  ;;  %7867 = vmatprep.subr.bf16.mxu0 %v10984_v46  ;;  %v11048_v43 = vld [vmem:[#allocation8 + $0xc28] ss:$16 sps:$4 sm:$0xff]   ;;  %v11051_v46 = vld [vmem:[#allocation8 + $0xe40] ss:$16 sps:$4 sm:$0xff]  }
 0x37b   :  { %7437 = vmatprep.subr.bf16.mxu1 %v10981_v45  ;;  %v11056_v45 = vld [vmem:[#allocation8 + $0xc4c] ss:$16 sps:$4 sm:$0xff]  }
 0x37d   :  { %7868 = vmatpush1.bf16.msra.mxu0 %v10982_v48  ;;  %v11059_v48 = vld [vmem:[#allocation8 + $0xe64] ss:$16 sps:$4 sm:$0xff]  }
 0x37e   :  { %7438 = vmatpush1.bf16.msra.mxu1 %v10979_v47  ;;  %7869 = vmatprep.subr.bf16.mxu0 %v10990_v51  ;;  %v11054_v47 = vld [vmem:[#allocation8 + $0xc48] ss:$16 sps:$4 sm:$0xff]  }
 0x37f   :  { %7439 = vmatprep.subr.bf16.mxu1 %v10987_v49  ;;  %v11057_v49 = vld [vmem:[#allocation8 + $0xe60] ss:$16 sps:$4 sm:$0xff]   ;;  %v11060_v51 = vld [vmem:[#allocation8 + $0xc68] ss:$16 sps:$4 sm:$0xff]  }
 0x381   :  { %7870 = vmatpush1.bf16.msra.mxu0 %v10988_v52  ;;  %v11068_v52 = vld [vmem:[#allocation8 + $0xc8c] ss:$16 sps:$4 sm:$0xff]  }
 0x382   :  { %7440 = vmatpush1.bf16.msra.mxu1 %v10985_v50  ;;  %7871 = vmatprep.subr.bf16.mxu0 %v10996_v54  ;;  %v11065_v50 = vld [vmem:[#allocation8 + $0xe84] ss:$16 sps:$4 sm:$0xff]  }
 0x383   :  { %7441 = vmatprep.subr.bf16.mxu1 %v10993_v53  ;;  %v11066_v53 = vld [vmem:[#allocation8 + $0xc88] ss:$16 sps:$4 sm:$0xff]   ;;  %v11071_v54 = vld [vmem:[#allocation8 + $0xea4] ss:$16 sps:$4 sm:$0xff]  }
 0x385   :  { %7872 = vmatpush1.bf16.msra.mxu0 %v10994_v17  ;;  %v11069_v17 = vld [vmem:[#allocation8 + $0xea0] ss:$16 sps:$4 sm:$0xff]  }
 0x386   :  { %7442 = vmatpush1.bf16.msra.mxu1 %v10991_v55  ;;  %7873 = vmatprep.subr.bf16.mxu0 %v11002_v18  ;;  %v11074_v55 = vld [vmem:[#allocation8 + $0xcac] ss:$16 sps:$4 sm:$0xff]   ;;  %v11077_v18 = vld [vmem:[#allocation8 + $0xec4] ss:$16 sps:$4 sm:$0xff]  }
 0x387   :  { %7443 = vmatprep.subr.bf16.mxu1 %v10999_v29  ;;  %v11072_v29 = vld [vmem:[#allocation8 + $0xca8] ss:$16 sps:$4 sm:$0xff]  }
 0x389   :  { %7874 = vmatpush1.bf16.msra.mxu0 %v11000_v34  ;;  %v11075_v34 = vld [vmem:[#allocation8 + $0xec0] ss:$16 sps:$4 sm:$0xff]  }
 0x38a   :  { %7444 = vmatpush1.bf16.msra.mxu1 %v10997_v26  ;;  %7875 = vmatprep.subr.bf16.mxu0 %v11008_v14  ;;  %v11080_v26 = vld [vmem:[#allocation8 + $0xccc] ss:$16 sps:$4 sm:$0xff]   ;;  %v11083_v14 = vld [vmem:[#allocation8 + $0xee4] ss:$16 sps:$4 sm:$0xff]  }
 0x38b   :  { %7445 = vmatprep.subr.bf16.mxu1 %v11005_v22  ;;  %v11078_v22 = vld [vmem:[#allocation8 + $0xcc8] ss:$16 sps:$4 sm:$0xff]  }
 0x38d   :  { %7876 = vmatpush1.bf16.msra.mxu0 %v11006_v57  ;;  %v11081_v57 = vld [vmem:[#allocation8 + $0xee0] ss:$16 sps:$4 sm:$0xff]  }
 0x38e   :  { %7446 = vmatpush1.bf16.msra.mxu1 %v11003_v56  ;;  %7877 = vmatprep.subr.bf16.mxu0 %v11014_v60  ;;  %v11086_v56 = vld [vmem:[#allocation8 + $0xcec] ss:$16 sps:$4 sm:$0xff]   ;;  %v11089_v60 = vld [vmem:[#allocation8 + $0xf04] ss:$16 sps:$4 sm:$0xff]  }
 0x38f   :  { %7447 = vmatprep.subr.bf16.mxu1 %v11011_v59  ;;  %v11084_v59 = vld [vmem:[#allocation8 + $0xce8] ss:$16 sps:$4 sm:$0xff]  }
 0x391   :  { %7878 = vmatpush1.bf16.msra.mxu0 %v11012_v62  ;;  %v11087_v62 = vld [vmem:[#allocation8 + $0xf00] ss:$16 sps:$4 sm:$0xff]  }
 0x392   :  { %7448 = vmatpush1.bf16.msra.mxu1 %v11009_v10  ;;  %7879 = vmatprep.subr.bf16.mxu0 %v11020_v0  ;;  %v11092_v10 = vld [vmem:[#allocation8 + $0xd0c] ss:$16 sps:$4 sm:$0xff]   ;;  %v11095_v0 = vld [vmem:[#allocation8 + $0xf24] ss:$16 sps:$4 sm:$0xff]  }
 0x393   :  { %7449 = vmatprep.subr.bf16.mxu1 %v11017_v63  ;;  %v11090_v63 = vld [vmem:[#allocation8 + $0xd08] ss:$16 sps:$4 sm:$0xff]  }
 0x395   :  { %7880 = vmatpush1.bf16.msra.mxu0 %v11018_v1  ;;  %v11093_v1 = vld [vmem:[#allocation8 + $0xf20] ss:$16 sps:$4 sm:$0xff]  }
 0x396   :  { %7450 = vmatpush1.bf16.msra.mxu1 %v11015_v8  ;;  %7881 = vmatprep.subr.bf16.mxu0 %v11026_v3  ;;  %v11098_v8 = vld [vmem:[#allocation8 + $0xd2c] ss:$16 sps:$4 sm:$0xff]   ;;  %v11101_v3 = vld [vmem:[#allocation8 + $0xf44] ss:$16 sps:$4 sm:$0xff]  }
 0x397   :  { %7451 = vmatprep.subr.bf16.mxu1 %v11023_v2  ;;  %v11096_v2 = vld [vmem:[#allocation8 + $0xd28] ss:$16 sps:$4 sm:$0xff]  }
 0x399   :  { %7882 = vmatpush1.bf16.msra.mxu0 %v11024_v19  ;;  %v11099_v19 = vld [vmem:[#allocation8 + $0xf40] ss:$16 sps:$4 sm:$0xff]  }
 0x39a   :  { %7452 = vmatpush1.bf16.msra.mxu1 %v11021_v7  ;;  %7883 = vmatprep.subr.bf16.mxu0 %v11032_v11  ;;  %v11104_v7 = vld [vmem:[#allocation8 + $0xd4c] ss:$16 sps:$4 sm:$0xff]   ;;  %v11107_v11 = vld [vmem:[#allocation8 + $0xf64] ss:$16 sps:$4 sm:$0xff]  }
 0x39b   :  { %7453 = vmatprep.subr.bf16.mxu1 %v11029_v20  ;;  %v11102_v20 = vld [vmem:[#allocation8 + $0xd48] ss:$16 sps:$4 sm:$0xff]  }
 0x39d   :  { %7884 = vmatpush1.bf16.msra.mxu0 %v11030_v30  ;;  %v11105_v30 = vld [vmem:[#allocation8 + $0xf60] ss:$16 sps:$4 sm:$0xff]  }
 0x39e   :  { %7454 = vmatpush1.bf16.msra.mxu1 %v11027_v27  ;;  %7885 = vmatprep.subr.bf16.mxu0 %v11038_v9  ;;  %v11110_v27 = vld [vmem:[#allocation8 + $0xd6c] ss:$16 sps:$4 sm:$0xff]   ;;  %v11113_v9 = vld [vmem:[#allocation8 + $0xf84] ss:$16 sps:$4 sm:$0xff]  }
 0x39f   :  { %7455 = vmatprep.subr.bf16.mxu1 %v11035_v31  ;;  %v11108_v31 = vld [vmem:[#allocation8 + $0xd68] ss:$16 sps:$4 sm:$0xff]  }
 0x3a1   :  { %7886 = vmatpush1.bf16.msra.mxu0 %v11036_v32  ;;  %v11111_v32 = vld [vmem:[#allocation8 + $0xf80] ss:$16 sps:$4 sm:$0xff]  }
 0x3a2   :  { %7456 = vmatpush1.bf16.msra.mxu1 %v11033_v5  ;;  %7898 = vmatprep.subr.bf16.mxu0 %v11044_v13  ;;  %v11116_v5 = vld [vmem:[#allocation8 + $0xd8c] ss:$16 sps:$4 sm:$0xff]   ;;  %v11119_v13 = vld [vmem:[#allocation8 + $0xfa4] ss:$16 sps:$4 sm:$0xff]  }
 0x3a3   :  { %7468 = vmatprep.subr.bf16.mxu1 %v11041_v33  ;;  %v11114_v33 = vld [vmem:[#allocation8 + $0xd88] ss:$16 sps:$4 sm:$0xff]  }
 0x3a4   :  { %7888 = vmatmul.mubr.bf16.vlgmr.msra.gmra.mrb[24].mxu0 %v12027_v6  ;;  %v11062_v6 = vld [vmem:[#allocation8 + $0xc6c] ss:$16 sps:$4 sm:$0xff]  }
 0x3a5   :  { %7458 = vmatmul.mubr.bf16.vlgmr.msra.gmra.mrb[20].mxu1 %v12047_v12  ;;  %7899 = vmatpush1.bf16.msra.mxu0 %v11042_v21  ;;  %v11117_v21 = vld [vmem:[#allocation8 + $0xfa0] ss:$16 sps:$4 sm:$0xff]  }
 0x3a6   :  { %7469 = vmatpush1.bf16.msra.mxu1 %v11039_v39  ;;  %7500 = vmatprep.mubr.bf16.mxu1 %v12053_v24  ;;  %v11122_v39 = vld [vmem:[#allocation8 + $0xdac] ss:$16 sps:$4 sm:$0xff]  }
 0x3a7   :  { %7930 = vmatprep.mubr.bf16.mxu0 %v12051_v16  ;;  %7470 = vmatprep.subr.bf16.mxu1 %v11047_v40  ;;  %v11063_v16 = vld [vmem:[#allocation8 + $0xe80] ss:$16 sps:$4 sm:$0xff]   ;;  %v11120_v40 = vld [vmem:[#allocation8 + $0xda8] ss:$16 sps:$4 sm:$0xff]  }
 0x3a8   :  { %7900 = vmatprep.subr.bf16.mxu0 %v11050_v41  ;;  %v11125_v41 = vld [vmem:[#allocation8 + $0xfc4] ss:$16 sps:$4 sm:$0xff]  }
 0x3a9   :  { %7901 = vmatpush1.bf16.msra.mxu0 %v11048_v43  ;;  %v11123_v43 = vld [vmem:[#allocation8 + $0xfc0] ss:$16 sps:$4 sm:$0xff]  }
 0x3aa   :  { %7471 = vmatpush1.bf16.msra.mxu1 %v11045_v42  ;;  %7902 = vmatprep.subr.bf16.mxu0 %v11056_v45  ;;  %v11128_v42 = vld [vmem:[#allocation8 + $0xdcc] ss:$16 sps:$4 sm:$0xff]   ;;  %v11131_v45 = vld [vmem:[#allocation8 + $0xfe4] ss:$16 sps:$4 sm:$0xff]  }
 0x3ab   :  { %7472 = vmatprep.subr.bf16.mxu1 %v11053_v44  ;;  %v11126_v44 = vld [vmem:[#allocation8 + $0xdc8] ss:$16 sps:$4 sm:$0xff]  }
 0x3ad   :  { %7903 = vmatpush1.bf16.msra.mxu0 %v11054_v47  ;;  %v11129_v47 = vld [vmem:[#allocation8 + $0xfe0] ss:$16 sps:$4 sm:$0xff]  }
 0x3ae   :  { %7473 = vmatpush1.bf16.msra.mxu1 %v11051_v46  ;;  %7904 = vmatprep.subr.bf16.mxu0 %v11062_v6  ;;  %v11134_v46 = vld [vmem:[#allocation8 + $0xdec] ss:$16 sps:$4 sm:$0xff]   ;;  %v11137_v6 = vld [vmem:[#allocation8 + $0x1004] ss:$16 sps:$4 sm:$0xff]  }
 0x3af   :  { %7474 = vmatprep.subr.bf16.mxu1 %v11059_v48  ;;  %v11132_v48 = vld [vmem:[#allocation8 + $0xde8] ss:$16 sps:$4 sm:$0xff]  }
 0x3b1   :  { %7905 = vmatpush1.bf16.msra.mxu0 %v11060_v51  ;;  %v11135_v51 = vld [vmem:[#allocation8 + $0x1000] ss:$16 sps:$4 sm:$0xff]  }
 0x3b2   :  { %7475 = vmatpush1.bf16.msra.mxu1 %v11057_v49  ;;  %7906 = vmatprep.subr.bf16.mxu0 %v11068_v52  ;;  %v11140_v49 = vld [vmem:[#allocation8 + $0xe0c] ss:$16 sps:$4 sm:$0xff]   ;;  %v11143_v52 = vld [vmem:[#allocation8 + $0x1024] ss:$16 sps:$4 sm:$0xff]  }
 0x3b3   :  { %7476 = vmatprep.subr.bf16.mxu1 %v11065_v50  ;;  %v11138_v50 = vld [vmem:[#allocation8 + $0xe08] ss:$16 sps:$4 sm:$0xff]  }
 0x3b5   :  { %7907 = vmatpush1.bf16.msra.mxu0 %v11066_v53  ;;  %v11141_v53 = vld [vmem:[#allocation8 + $0x1020] ss:$16 sps:$4 sm:$0xff]  }
 0x3b6   :  { %7477 = vmatpush1.bf16.msra.mxu1 %v11063_v16  ;;  %7908 = vmatprep.subr.bf16.mxu0 %v11074_v55  ;;  %v11146_v16 = vld [vmem:[#allocation8 + $0xe2c] ss:$16 sps:$4 sm:$0xff]   ;;  %v11149_v55 = vld [vmem:[#allocation8 + $0x1044] ss:$16 sps:$4 sm:$0xff]  }
 0x3b7   :  { %7478 = vmatprep.subr.bf16.mxu1 %v11071_v54  ;;  %v11144_v54 = vld [vmem:[#allocation8 + $0xe28] ss:$16 sps:$4 sm:$0xff]  }
 0x3b9   :  { %7909 = vmatpush1.bf16.msra.mxu0 %v11072_v29  ;;  %v11147_v29 = vld [vmem:[#allocation8 + $0x1040] ss:$16 sps:$4 sm:$0xff]  }
 0x3ba   :  { %7479 = vmatpush1.bf16.msra.mxu1 %v11069_v17  ;;  %7910 = vmatprep.subr.bf16.mxu0 %v11080_v26  ;;  %v11152_v17 = vld [vmem:[#allocation8 + $0xe4c] ss:$16 sps:$4 sm:$0xff]   ;;  %v11155_v26 = vld [vmem:[#allocation8 + $0x1064] ss:$16 sps:$4 sm:$0xff]  }
 0x3bb   :  { %7480 = vmatprep.subr.bf16.mxu1 %v11077_v18  ;;  %v11150_v18 = vld [vmem:[#allocation8 + $0xe48] ss:$16 sps:$4 sm:$0xff]  }
 0x3bd   :  { %7911 = vmatpush1.bf16.msra.mxu0 %v11078_v22  ;;  %v11156_v22 = vld [vmem:[#allocation8 + $0xe68] ss:$16 sps:$4 sm:$0xff]  }
 0x3be   :  { %7481 = vmatpush1.bf16.msra.mxu1 %v11075_v34  ;;  %7912 = vmatprep.subr.bf16.mxu0 %v11086_v56  ;;  %v11153_v34 = vld [vmem:[#allocation8 + $0x1060] ss:$16 sps:$4 sm:$0xff]   ;;  %v11164_v56 = vld [vmem:[#allocation8 + $0xe8c] ss:$16 sps:$4 sm:$0xff]  }
 0x3bf   :  { %7482 = vmatprep.subr.bf16.mxu1 %v11083_v14  ;;  %v11161_v14 = vld [vmem:[#allocation8 + $0x1084] ss:$16 sps:$4 sm:$0xff]  }
 0x3c1   :  { %7913 = vmatpush1.bf16.msra.mxu0 %v11084_v59  ;;  %v11167_v59 = vld [vmem:[#allocation8 + $0x10a4] ss:$16 sps:$4 sm:$0xff]  }
 0x3c2   :  { %7483 = vmatpush1.bf16.msra.mxu1 %v11081_v57  ;;  %7914 = vmatprep.subr.bf16.mxu0 %v11092_v10  ;;  %v11162_v57 = vld [vmem:[#allocation8 + $0xe88] ss:$16 sps:$4 sm:$0xff]   ;;  %v11165_v10 = vld [vmem:[#allocation8 + $0x10a0] ss:$16 sps:$4 sm:$0xff]  }
 0x3c3   :  { %7484 = vmatprep.subr.bf16.mxu1 %v11089_v60  ;;  %v11170_v60 = vld [vmem:[#allocation8 + $0xeac] ss:$16 sps:$4 sm:$0xff]  }
 0x3c5   :  { %7915 = vmatpush1.bf16.msra.mxu0 %v11090_v63  ;;  %v11173_v63 = vld [vmem:[#allocation8 + $0x10c4] ss:$16 sps:$4 sm:$0xff]  }
 0x3c6   :  { %7485 = vmatpush1.bf16.msra.mxu1 %v11087_v62  ;;  %7916 = vmatprep.subr.bf16.mxu0 %v11098_v8  ;;  %v11168_v62 = vld [vmem:[#allocation8 + $0xea8] ss:$16 sps:$4 sm:$0xff]   ;;  %v11171_v8 = vld [vmem:[#allocation8 + $0x10c0] ss:$16 sps:$4 sm:$0xff]  }
 0x3c7   :  { %7486 = vmatprep.subr.bf16.mxu1 %v11095_v0  ;;  %v11176_v0 = vld [vmem:[#allocation8 + $0xecc] ss:$16 sps:$4 sm:$0xff]  }
 0x3c9   :  { %7917 = vmatpush1.bf16.msra.mxu0 %v11096_v2  ;;  %v11179_v2 = vld [vmem:[#allocation8 + $0x10e4] ss:$16 sps:$4 sm:$0xff]  }
 0x3ca   :  { %7487 = vmatpush1.bf16.msra.mxu1 %v11093_v1  ;;  %7918 = vmatprep.subr.bf16.mxu0 %v11104_v7  ;;  %v11174_v1 = vld [vmem:[#allocation8 + $0xec8] ss:$16 sps:$4 sm:$0xff]   ;;  %v11177_v7 = vld [vmem:[#allocation8 + $0x10e0] ss:$16 sps:$4 sm:$0xff]  }
 0x3cb   :  { %7488 = vmatprep.subr.bf16.mxu1 %v11101_v3  ;;  %v11182_v3 = vld [vmem:[#allocation8 + $0xeec] ss:$16 sps:$4 sm:$0xff]  }
 0x3cd   :  { %7919 = vmatpush1.bf16.msra.mxu0 %v11102_v20  ;;  %v11185_v20 = vld [vmem:[#allocation8 + $0x1104] ss:$16 sps:$4 sm:$0xff]  }
 0x3ce   :  { %7489 = vmatpush1.bf16.msra.mxu1 %v11099_v19  ;;  %7920 = vmatprep.subr.bf16.mxu0 %v11110_v27  ;;  %v11180_v19 = vld [vmem:[#allocation8 + $0xee8] ss:$16 sps:$4 sm:$0xff]   ;;  %v11183_v27 = vld [vmem:[#allocation8 + $0x1100] ss:$16 sps:$4 sm:$0xff]  }
 0x3cf   :  { %7490 = vmatprep.subr.bf16.mxu1 %v11107_v11  ;;  %v11188_v11 = vld [vmem:[#allocation8 + $0xf0c] ss:$16 sps:$4 sm:$0xff]  }
 0x3d1   :  { %7921 = vmatpush1.bf16.msra.mxu0 %v11108_v31  ;;  %v11191_v31 = vld [vmem:[#allocation8 + $0x1124] ss:$16 sps:$4 sm:$0xff]  }
 0x3d2   :  { %7491 = vmatpush1.bf16.msra.mxu1 %v11105_v30  ;;  %7922 = vmatprep.subr.bf16.mxu0 %v11116_v5  ;;  %v11186_v30 = vld [vmem:[#allocation8 + $0xf08] ss:$16 sps:$4 sm:$0xff]   ;;  %v11189_v5 = vld [vmem:[#allocation8 + $0x1120] ss:$16 sps:$4 sm:$0xff]  }
 0x3d3   :  { %7492 = vmatprep.subr.bf16.mxu1 %v11113_v9  ;;  %v11194_v9 = vld [vmem:[#allocation8 + $0xf2c] ss:$16 sps:$4 sm:$0xff]  }
 0x3d5   :  { %7923 = vmatpush1.bf16.msra.mxu0 %v11114_v33  ;;  %v11197_v33 = vld [vmem:[#allocation8 + $0x1144] ss:$16 sps:$4 sm:$0xff]  }
 0x3d6   :  { %7493 = vmatpush1.bf16.msra.mxu1 %v11111_v32  ;;  %7924 = vmatprep.subr.bf16.mxu0 %v11122_v39  ;;  %v11192_v32 = vld [vmem:[#allocation8 + $0xf28] ss:$16 sps:$4 sm:$0xff]   ;;  %v11195_v39 = vld [vmem:[#allocation8 + $0x1140] ss:$16 sps:$4 sm:$0xff]  }
 0x3d7   :  { %7494 = vmatprep.subr.bf16.mxu1 %v11119_v13  ;;  %v11200_v13 = vld [vmem:[#allocation8 + $0xf4c] ss:$16 sps:$4 sm:$0xff]  }
 0x3d9   :  { %7925 = vmatpush1.bf16.msra.mxu0 %v11120_v40  ;;  %v11203_v40 = vld [vmem:[#allocation8 + $0x1164] ss:$16 sps:$4 sm:$0xff]  }
 0x3da   :  { %7495 = vmatpush1.bf16.msra.mxu1 %v11117_v21  ;;  %7926 = vmatprep.subr.bf16.mxu0 %v11128_v42  ;;  %v11198_v21 = vld [vmem:[#allocation8 + $0xf48] ss:$16 sps:$4 sm:$0xff]   ;;  %v11201_v42 = vld [vmem:[#allocation8 + $0x1160] ss:$16 sps:$4 sm:$0xff]  }
 0x3db   :  { %7496 = vmatprep.subr.bf16.mxu1 %v11125_v41  ;;  %v11206_v41 = vld [vmem:[#allocation8 + $0xf6c] ss:$16 sps:$4 sm:$0xff]  }
 0x3dd   :  { %7927 = vmatpush1.bf16.msra.mxu0 %v11126_v44  ;;  %v11209_v44 = vld [vmem:[#allocation8 + $0x1184] ss:$16 sps:$4 sm:$0xff]  }
 0x3de   :  { %7497 = vmatpush1.bf16.msra.mxu1 %v11123_v43  ;;  %7928 = vmatprep.subr.bf16.mxu0 %v11134_v46  ;;  %v11204_v43 = vld [vmem:[#allocation8 + $0xf68] ss:$16 sps:$4 sm:$0xff]   ;;  %v11207_v46 = vld [vmem:[#allocation8 + $0x1180] ss:$16 sps:$4 sm:$0xff]  }
 0x3df   :  { %7498 = vmatprep.subr.bf16.mxu1 %v11131_v45  ;;  %v11212_v45 = vld [vmem:[#allocation8 + $0xf8c] ss:$16 sps:$4 sm:$0xff]  }
 0x3e1   :  { %7929 = vmatpush1.bf16.msra.mxu0 %v11132_v48  ;;  %v11215_v48 = vld [vmem:[#allocation8 + $0x11a4] ss:$16 sps:$4 sm:$0xff]  }
 0x3e2   :  { %7499 = vmatpush1.bf16.msra.mxu1 %v11129_v47  ;;  %7941 = vmatprep.subr.bf16.mxu0 %v11140_v49  ;;  %v11210_v47 = vld [vmem:[#allocation8 + $0xf88] ss:$16 sps:$4 sm:$0xff]   ;;  %v11213_v49 = vld [vmem:[#allocation8 + $0x11a0] ss:$16 sps:$4 sm:$0xff]  }
 0x3e3   :  { %7511 = vmatprep.subr.bf16.mxu1 %v11137_v6  ;;  %v11218_v6 = vld [vmem:[#allocation8 + $0xfac] ss:$16 sps:$4 sm:$0xff]  }
 0x3e4   :  { %7931 = vmatmul.mubr.bf16.vlgmr.msra.gmra.mrb[24].mxu0 %v12047_v12  ;;  %v11158_v12 = vld [vmem:[#allocation8 + $0xe6c] ss:$16 sps:$4 sm:$0xff]  }
 0x3e5   :  { %7501 = vmatmul.mubr.bf16.vlgmr.msra.gmra.mrb[20].mxu1 %v12049_v15  ;;  %7942 = vmatpush1.bf16.msra.mxu0 %v11138_v50  ;;  %v11221_v50 = vld [vmem:[#allocation8 + $0x11c4] ss:$16 sps:$4 sm:$0xff]  }
 0x3e6   :  { %7512 = vmatpush1.bf16.msra.mxu1 %v11135_v51  ;;  %7543 = vmatprep.mubr.bf16.mxu1 %v12073_v23  ;;  %v11216_v51 = vld [vmem:[#allocation8 + $0xfa8] ss:$16 sps:$4 sm:$0xff]  }
 0x3e7   :  { %7973 = vmatprep.mubr.bf16.mxu0 %v12053_v24  ;;  %7513 = vmatprep.subr.bf16.mxu1 %v11143_v52  ;;  %v11159_v24 = vld [vmem:[#allocation8 + $0x1080] ss:$16 sps:$4 sm:$0xff]   ;;  %v11224_v52 = vld [vmem:[#allocation8 + $0xfcc] ss:$16 sps:$4 sm:$0xff]  }
 0x3e8   :  { %7943 = vmatprep.subr.bf16.mxu0 %v11146_v16  ;;  %v11219_v16 = vld [vmem:[#allocation8 + $0x11c0] ss:$16 sps:$4 sm:$0xff]  }
 0x3e9   :  { %7944 = vmatpush1.bf16.msra.mxu0 %v11144_v54  ;;  %v11227_v54 = vld [vmem:[#allocation8 + $0x11e4] ss:$16 sps:$4 sm:$0xff]  }
 0x3ea   :  { %7514 = vmatpush1.bf16.msra.mxu1 %v11141_v53  ;;  %7945 = vmatprep.subr.bf16.mxu0 %v11152_v17  ;;  %v11222_v53 = vld [vmem:[#allocation8 + $0xfc8] ss:$16 sps:$4 sm:$0xff]   ;;  %v11225_v17 = vld [vmem:[#allocation8 + $0x11e0] ss:$16 sps:$4 sm:$0xff]  }
 0x3eb   :  { %7515 = vmatprep.subr.bf16.mxu1 %v11149_v55  ;;  %v11230_v55 = vld [vmem:[#allocation8 + $0xfec] ss:$16 sps:$4 sm:$0xff]  }
 0x3ed   :  { %7946 = vmatpush1.bf16.msra.mxu0 %v11150_v18  ;;  %v11233_v18 = vld [vmem:[#allocation8 + $0x1204] ss:$16 sps:$4 sm:$0xff]  }
 0x3ee   :  { %7516 = vmatpush1.bf16.msra.mxu1 %v11147_v29  ;;  %7947 = vmatprep.subr.bf16.mxu0 %v11158_v12  ;;  %v11228_v29 = vld [vmem:[#allocation8 + $0xfe8] ss:$16 sps:$4 sm:$0xff]   ;;  %v11231_v12 = vld [vmem:[#allocation8 + $0x1200] ss:$16 sps:$4 sm:$0xff]  }
 0x3ef   :  { %7517 = vmatprep.subr.bf16.mxu1 %v11155_v26  ;;  %v11236_v26 = vld [vmem:[#allocation8 + $0x100c] ss:$16 sps:$4 sm:$0xff]  }
 0x3f1   :  { %7948 = vmatpush1.bf16.msra.mxu0 %v11156_v22  ;;  %v11239_v22 = vld [vmem:[#allocation8 + $0x1224] ss:$16 sps:$4 sm:$0xff]  }
 0x3f2   :  { %7518 = vmatpush1.bf16.msra.mxu1 %v11153_v34  ;;  %7949 = vmatprep.subr.bf16.mxu0 %v11164_v56  ;;  %v11234_v34 = vld [vmem:[#allocation8 + $0x1008] ss:$16 sps:$4 sm:$0xff]   ;;  %v11237_v56 = vld [vmem:[#allocation8 + $0x1220] ss:$16 sps:$4 sm:$0xff]  }
 0x3f3   :  { %7519 = vmatprep.subr.bf16.mxu1 %v11161_v14  ;;  %v11242_v14 = vld [vmem:[#allocation8 + $0x102c] ss:$16 sps:$4 sm:$0xff]  }
 0x3f5   :  { %7950 = vmatpush1.bf16.msra.mxu0 %v11162_v57  ;;  %v11245_v57 = vld [vmem:[#allocation8 + $0x1244] ss:$16 sps:$4 sm:$0xff]  }
 0x3f6   :  { %7520 = vmatpush1.bf16.msra.mxu1 %v11159_v24  ;;  %7951 = vmatprep.subr.bf16.mxu0 %v11170_v60  ;;  %v11240_v24 = vld [vmem:[#allocation8 + $0x1028] ss:$16 sps:$4 sm:$0xff]   ;;  %v11243_v60 = vld [vmem:[#allocation8 + $0x1240] ss:$16 sps:$4 sm:$0xff]  }
 0x3f7   :  { %7521 = vmatprep.subr.bf16.mxu1 %v11167_v59  ;;  %v11248_v59 = vld [vmem:[#allocation8 + $0x104c] ss:$16 sps:$4 sm:$0xff]  }
 0x3f9   :  { %7952 = vmatpush1.bf16.msra.mxu0 %v11168_v62  ;;  %v11251_v62 = vld [vmem:[#allocation8 + $0x1264] ss:$16 sps:$4 sm:$0xff]  }
 0x3fa   :  { %7522 = vmatpush1.bf16.msra.mxu1 %v11165_v10  ;;  %7953 = vmatprep.subr.bf16.mxu0 %v11176_v0  ;;  %v11246_v10 = vld [vmem:[#allocation8 + $0x1048] ss:$16 sps:$4 sm:$0xff]  }
 0x3fb   :  { %7523 = vmatprep.subr.bf16.mxu1 %v11173_v63  ;;  %v11249_v63 = vld [vmem:[#allocation8 + $0x1260] ss:$16 sps:$4 sm:$0xff]   ;;  %v11252_v0 = vld [vmem:[#allocation8 + $0x1068] ss:$16 sps:$4 sm:$0xff]  }
 0x3fd   :  { %7954 = vmatpush1.bf16.msra.mxu0 %v11174_v1  ;;  %v11260_v1 = vld [vmem:[#allocation8 + $0x108c] ss:$16 sps:$4 sm:$0xff]  }
 0x3fe   :  { %7524 = vmatpush1.bf16.msra.mxu1 %v11171_v8  ;;  %7955 = vmatprep.subr.bf16.mxu0 %v11182_v3  ;;  %v11257_v8 = vld [vmem:[#allocation8 + $0x1284] ss:$16 sps:$4 sm:$0xff]  }
 0x3ff   :  { %7525 = vmatprep.subr.bf16.mxu1 %v11179_v2  ;;  %v11258_v2 = vld [vmem:[#allocation8 + $0x1088] ss:$16 sps:$4 sm:$0xff]   ;;  %v11263_v3 = vld [vmem:[#allocation8 + $0x12a4] ss:$16 sps:$4 sm:$0xff]  }
 0x401   :  { %7956 = vmatpush1.bf16.msra.mxu0 %v11180_v19  ;;  %v11261_v19 = vld [vmem:[#allocation8 + $0x12a0] ss:$16 sps:$4 sm:$0xff]  }
 0x402   :  { %7526 = vmatpush1.bf16.msra.mxu1 %v11177_v7  ;;  %7957 = vmatprep.subr.bf16.mxu0 %v11188_v11  ;;  %v11266_v7 = vld [vmem:[#allocation8 + $0x10ac] ss:$16 sps:$4 sm:$0xff]   ;;  %v11269_v11 = vld [vmem:[#allocation8 + $0x12c4] ss:$16 sps:$4 sm:$0xff]  }
 0x403   :  { %7527 = vmatprep.subr.bf16.mxu1 %v11185_v20  ;;  %v11264_v20 = vld [vmem:[#allocation8 + $0x10a8] ss:$16 sps:$4 sm:$0xff]  }
 0x405   :  { %7958 = vmatpush1.bf16.msra.mxu0 %v11186_v30  ;;  %v11267_v30 = vld [vmem:[#allocation8 + $0x12c0] ss:$16 sps:$4 sm:$0xff]  }
 0x406   :  { %7528 = vmatpush1.bf16.msra.mxu1 %v11183_v27  ;;  %7959 = vmatprep.subr.bf16.mxu0 %v11194_v9  ;;  %v11272_v27 = vld [vmem:[#allocation8 + $0x10cc] ss:$16 sps:$4 sm:$0xff]   ;;  %v11275_v9 = vld [vmem:[#allocation8 + $0x12e4] ss:$16 sps:$4 sm:$0xff]  }
 0x407   :  { %7529 = vmatprep.subr.bf16.mxu1 %v11191_v31  ;;  %v11270_v31 = vld [vmem:[#allocation8 + $0x10c8] ss:$16 sps:$4 sm:$0xff]  }
 0x409   :  { %7960 = vmatpush1.bf16.msra.mxu0 %v11192_v32  ;;  %v11273_v32 = vld [vmem:[#allocation8 + $0x12e0] ss:$16 sps:$4 sm:$0xff]  }
 0x40a   :  { %7530 = vmatpush1.bf16.msra.mxu1 %v11189_v5  ;;  %7961 = vmatprep.subr.bf16.mxu0 %v11200_v13  ;;  %v11278_v5 = vld [vmem:[#allocation8 + $0x10ec] ss:$16 sps:$4 sm:$0xff]   ;;  %v11281_v13 = vld [vmem:[#allocation8 + $0x1304] ss:$16 sps:$4 sm:$0xff]  }
 0x40b   :  { %7531 = vmatprep.subr.bf16.mxu1 %v11197_v33  ;;  %v11276_v33 = vld [vmem:[#allocation8 + $0x10e8] ss:$16 sps:$4 sm:$0xff]  }
 0x40d   :  { %7962 = vmatpush1.bf16.msra.mxu0 %v11198_v21  ;;  %v11279_v21 = vld [vmem:[#allocation8 + $0x1300] ss:$16 sps:$4 sm:$0xff]  }
 0x40e   :  { %7532 = vmatpush1.bf16.msra.mxu1 %v11195_v39  ;;  %7963 = vmatprep.subr.bf16.mxu0 %v11206_v41  ;;  %v11284_v39 = vld [vmem:[#allocation8 + $0x110c] ss:$16 sps:$4 sm:$0xff]   ;;  %v11287_v41 = vld [vmem:[#allocation8 + $0x1324] ss:$16 sps:$4 sm:$0xff]  }
 0x40f   :  { %7533 = vmatprep.subr.bf16.mxu1 %v11203_v40  ;;  %v11282_v40 = vld [vmem:[#allocation8 + $0x1108] ss:$16 sps:$4 sm:$0xff]  }
 0x411   :  { %7964 = vmatpush1.bf16.msra.mxu0 %v11204_v43  ;;  %v11285_v43 = vld [vmem:[#allocation8 + $0x1320] ss:$16 sps:$4 sm:$0xff]  }
 0x412   :  { %7534 = vmatpush1.bf16.msra.mxu1 %v11201_v42  ;;  %7965 = vmatprep.subr.bf16.mxu0 %v11212_v45  ;;  %v11290_v42 = vld [vmem:[#allocation8 + $0x112c] ss:$16 sps:$4 sm:$0xff]   ;;  %v11293_v45 = vld [vmem:[#allocation8 + $0x1344] ss:$16 sps:$4 sm:$0xff]  }
 0x413   :  { %7535 = vmatprep.subr.bf16.mxu1 %v11209_v44  ;;  %v11288_v44 = vld [vmem:[#allocation8 + $0x1128] ss:$16 sps:$4 sm:$0xff]  }
 0x415   :  { %7966 = vmatpush1.bf16.msra.mxu0 %v11210_v47  ;;  %v11291_v47 = vld [vmem:[#allocation8 + $0x1340] ss:$16 sps:$4 sm:$0xff]  }
 0x416   :  { %7536 = vmatpush1.bf16.msra.mxu1 %v11207_v46  ;;  %7967 = vmatprep.subr.bf16.mxu0 %v11218_v6  ;;  %v11296_v46 = vld [vmem:[#allocation8 + $0x114c] ss:$16 sps:$4 sm:$0xff]   ;;  %v11299_v6 = vld [vmem:[#allocation8 + $0x1364] ss:$16 sps:$4 sm:$0xff]  }
 0x417   :  { %7537 = vmatprep.subr.bf16.mxu1 %v11215_v48  ;;  %v11294_v48 = vld [vmem:[#allocation8 + $0x1148] ss:$16 sps:$4 sm:$0xff]  }
 0x419   :  { %7968 = vmatpush1.bf16.msra.mxu0 %v11216_v51  ;;  %v11297_v51 = vld [vmem:[#allocation8 + $0x1360] ss:$16 sps:$4 sm:$0xff]  }
 0x41a   :  { %7538 = vmatpush1.bf16.msra.mxu1 %v11213_v49  ;;  %7969 = vmatprep.subr.bf16.mxu0 %v11224_v52  ;;  %v11302_v49 = vld [vmem:[#allocation8 + $0x116c] ss:$16 sps:$4 sm:$0xff]   ;;  %v11305_v52 = vld [vmem:[#allocation8 + $0x1384] ss:$16 sps:$4 sm:$0xff]  }
 0x41b   :  { %7539 = vmatprep.subr.bf16.mxu1 %v11221_v50  ;;  %v11300_v50 = vld [vmem:[#allocation8 + $0x1168] ss:$16 sps:$4 sm:$0xff]  }
 0x41d   :  { %7970 = vmatpush1.bf16.msra.mxu0 %v11222_v53  ;;  %v11303_v53 = vld [vmem:[#allocation8 + $0x1380] ss:$16 sps:$4 sm:$0xff]  }
 0x41e   :  { %7540 = vmatpush1.bf16.msra.mxu1 %v11219_v16  ;;  %7971 = vmatprep.subr.bf16.mxu0 %v11230_v55  ;;  %v11308_v16 = vld [vmem:[#allocation8 + $0x118c] ss:$16 sps:$4 sm:$0xff]   ;;  %v11311_v55 = vld [vmem:[#allocation8 + $0x13a4] ss:$16 sps:$4 sm:$0xff]  }
 0x41f   :  { %7541 = vmatprep.subr.bf16.mxu1 %v11227_v54  ;;  %v11306_v54 = vld [vmem:[#allocation8 + $0x1188] ss:$16 sps:$4 sm:$0xff]  }
 0x421   :  { %7972 = vmatpush1.bf16.msra.mxu0 %v11228_v29  ;;  %v11309_v29 = vld [vmem:[#allocation8 + $0x13a0] ss:$16 sps:$4 sm:$0xff]  }
 0x422   :  { %7542 = vmatpush1.bf16.msra.mxu1 %v11225_v17  ;;  %7984 = vmatprep.subr.bf16.mxu0 %v11236_v26  ;;  %v11314_v17 = vld [vmem:[#allocation8 + $0x11ac] ss:$16 sps:$4 sm:$0xff]   ;;  %v11317_v26 = vld [vmem:[#allocation8 + $0x13c4] ss:$16 sps:$4 sm:$0xff]  }
 0x423   :  { %7554 = vmatprep.subr.bf16.mxu1 %v11233_v18  ;;  %v11312_v18 = vld [vmem:[#allocation8 + $0x11a8] ss:$16 sps:$4 sm:$0xff]  }
 0x424   :  { %7974 = vmatmul.mubr.bf16.vlgmr.msra.gmra.mrb[24].mxu0 %v12049_v15  ;;  %v11254_v15 = vld [vmem:[#allocation8 + $0x106c] ss:$16 sps:$4 sm:$0xff]  }
 0x425   :  { %7544 = vmatmul.mubr.bf16.vlgmr.msra.gmra.mrb[20].mxu1 %v12069_v4  ;;  %7985 = vmatpush1.bf16.msra.mxu0 %v11234_v34  ;;  %v11315_v34 = vld [vmem:[#allocation8 + $0x13c0] ss:$16 sps:$4 sm:$0xff]  }
 0x426   :  { %7555 = vmatpush1.bf16.msra.mxu1 %v11231_v12  ;;  %7586 = vmatprep.mubr.bf16.mxu1 %v12075_v28  ;;  %v11320_v12 = vld [vmem:[#allocation8 + $0x11cc] ss:$16 sps:$4 sm:$0xff]  }
 0x427   :  { %8016 = vmatprep.mubr.bf16.mxu0 %v12073_v23  ;;  %7556 = vmatprep.subr.bf16.mxu1 %v11239_v22  ;;  %v11255_v23 = vld [vmem:[#allocation8 + $0x1280] ss:$16 sps:$4 sm:$0xff]   ;;  %v11318_v22 = vld [vmem:[#allocation8 + $0x11c8] ss:$16 sps:$4 sm:$0xff]  }
 0x428   :  { %7986 = vmatprep.subr.bf16.mxu0 %v11242_v14  ;;  %v11323_v14 = vld [vmem:[#allocation8 + $0x13e4] ss:$16 sps:$4 sm:$0xff]  }
 0x429   :  { %7987 = vmatpush1.bf16.msra.mxu0 %v11240_v24  ;;  %v11321_v24 = vld [vmem:[#allocation8 + $0x13e0] ss:$16 sps:$4 sm:$0xff]  }
 0x42a   :  { %7557 = vmatpush1.bf16.msra.mxu1 %v11237_v56  ;;  %7988 = vmatprep.subr.bf16.mxu0 %v11248_v59  ;;  %v11326_v56 = vld [vmem:[#allocation8 + $0x11ec] ss:$16 sps:$4 sm:$0xff]   ;;  %v11329_v59 = vld [vmem:[#allocation8 + $0x1404] ss:$16 sps:$4 sm:$0xff]  }
 0x42b   :  { %7558 = vmatprep.subr.bf16.mxu1 %v11245_v57  ;;  %v11324_v57 = vld [vmem:[#allocation8 + $0x11e8] ss:$16 sps:$4 sm:$0xff]  }
 0x42d   :  { %7989 = vmatpush1.bf16.msra.mxu0 %v11246_v10  ;;  %v11327_v10 = vld [vmem:[#allocation8 + $0x1400] ss:$16 sps:$4 sm:$0xff]  }
 0x42e   :  { %7559 = vmatpush1.bf16.msra.mxu1 %v11243_v60  ;;  %7990 = vmatprep.subr.bf16.mxu0 %v11254_v15  ;;  %v11332_v60 = vld [vmem:[#allocation8 + $0x120c] ss:$16 sps:$4 sm:$0xff]   ;;  %v11335_v15 = vld [vmem:[#allocation8 + $0x1424] ss:$16 sps:$4 sm:$0xff]  }
 0x42f   :  { %7560 = vmatprep.subr.bf16.mxu1 %v11251_v62  ;;  %v11330_v62 = vld [vmem:[#allocation8 + $0x1208] ss:$16 sps:$4 sm:$0xff]  }
 0x431   :  { %7991 = vmatpush1.bf16.msra.mxu0 %v11252_v0  ;;  %v11333_v0 = vld [vmem:[#allocation8 + $0x1420] ss:$16 sps:$4 sm:$0xff]  }
 0x432   :  { %7561 = vmatpush1.bf16.msra.mxu1 %v11249_v63  ;;  %7992 = vmatprep.subr.bf16.mxu0 %v11260_v1  ;;  %v11338_v63 = vld [vmem:[#allocation8 + $0x122c] ss:$16 sps:$4 sm:$0xff]   ;;  %v11341_v1 = vld [vmem:[#allocation8 + $0x1444] ss:$16 sps:$4 sm:$0xff]  }
 0x433   :  { %7562 = vmatprep.subr.bf16.mxu1 %v11257_v8  ;;  %v11336_v8 = vld [vmem:[#allocation8 + $0x1228] ss:$16 sps:$4 sm:$0xff]  }
 0x435   :  { %7993 = vmatpush1.bf16.msra.mxu0 %v11258_v2  ;;  %v11339_v2 = vld [vmem:[#allocation8 + $0x1440] ss:$16 sps:$4 sm:$0xff]  }
 0x436   :  { %7563 = vmatpush1.bf16.msra.mxu1 %v11255_v23  ;;  %7994 = vmatprep.subr.bf16.mxu0 %v11266_v7  ;;  %v11344_v23 = vld [vmem:[#allocation8 + $0x124c] ss:$16 sps:$4 sm:$0xff]   ;;  %v11347_v7 = vld [vmem:[#allocation8 + $0x1464] ss:$16 sps:$4 sm:$0xff]  }
 0x437   :  { %7564 = vmatprep.subr.bf16.mxu1 %v11263_v3  ;;  %v11342_v3 = vld [vmem:[#allocation8 + $0x1248] ss:$16 sps:$4 sm:$0xff]  }
 0x439   :  { %7995 = vmatpush1.bf16.msra.mxu0 %v11264_v20  ;;  %v11348_v20 = vld [vmem:[#allocation8 + $0x1268] ss:$16 sps:$4 sm:$0xff]  }
 0x43a   :  { %7565 = vmatpush1.bf16.msra.mxu1 %v11261_v19  ;;  %7996 = vmatprep.subr.bf16.mxu0 %v11272_v27  ;;  %v11345_v19 = vld [vmem:[#allocation8 + $0x1460] ss:$16 sps:$4 sm:$0xff]   ;;  %v11356_v27 = vld [vmem:[#allocation8 + $0x128c] ss:$16 sps:$4 sm:$0xff]  }
 0x43b   :  { %7566 = vmatprep.subr.bf16.mxu1 %v11269_v11  ;;  %v11353_v11 = vld [vmem:[#allocation8 + $0x1484] ss:$16 sps:$4 sm:$0xff]  }
 0x43d   :  { %7997 = vmatpush1.bf16.msra.mxu0 %v11270_v31  ;;  %v11359_v31 = vld [vmem:[#allocation8 + $0x14a4] ss:$16 sps:$4 sm:$0xff]  }
 0x43e   :  { %7567 = vmatpush1.bf16.msra.mxu1 %v11267_v30  ;;  %7998 = vmatprep.subr.bf16.mxu0 %v11278_v5  ;;  %v11354_v30 = vld [vmem:[#allocation8 + $0x1288] ss:$16 sps:$4 sm:$0xff]   ;;  %v11357_v5 = vld [vmem:[#allocation8 + $0x14a0] ss:$16 sps:$4 sm:$0xff]  }
 0x43f   :  { %7568 = vmatprep.subr.bf16.mxu1 %v11275_v9  ;;  %v11362_v9 = vld [vmem:[#allocation8 + $0x12ac] ss:$16 sps:$4 sm:$0xff]  }
 0x441   :  { %7999 = vmatpush1.bf16.msra.mxu0 %v11276_v33  ;;  %v11365_v33 = vld [vmem:[#allocation8 + $0x14c4] ss:$16 sps:$4 sm:$0xff]  }
 0x442   :  { %7569 = vmatpush1.bf16.msra.mxu1 %v11273_v32  ;;  %8000 = vmatprep.subr.bf16.mxu0 %v11284_v39  ;;  %v11360_v32 = vld [vmem:[#allocation8 + $0x12a8] ss:$16 sps:$4 sm:$0xff]   ;;  %v11363_v39 = vld [vmem:[#allocation8 + $0x14c0] ss:$16 sps:$4 sm:$0xff]  }
 0x443   :  { %7570 = vmatprep.subr.bf16.mxu1 %v11281_v13  ;;  %v11368_v13 = vld [vmem:[#allocation8 + $0x12cc] ss:$16 sps:$4 sm:$0xff]  }
 0x445   :  { %8001 = vmatpush1.bf16.msra.mxu0 %v11282_v40  ;;  %v11371_v40 = vld [vmem:[#allocation8 + $0x14e4] ss:$16 sps:$4 sm:$0xff]  }
 0x446   :  { %7571 = vmatpush1.bf16.msra.mxu1 %v11279_v21  ;;  %8002 = vmatprep.subr.bf16.mxu0 %v11290_v42  ;;  %v11366_v21 = vld [vmem:[#allocation8 + $0x12c8] ss:$16 sps:$4 sm:$0xff]   ;;  %v11369_v42 = vld [vmem:[#allocation8 + $0x14e0] ss:$16 sps:$4 sm:$0xff]  }
 0x447   :  { %7572 = vmatprep.subr.bf16.mxu1 %v11287_v41  ;;  %v11374_v41 = vld [vmem:[#allocation8 + $0x12ec] ss:$16 sps:$4 sm:$0xff]  }
 0x449   :  { %8003 = vmatpush1.bf16.msra.mxu0 %v11288_v44  ;;  %v11377_v44 = vld [vmem:[#allocation8 + $0x1504] ss:$16 sps:$4 sm:$0xff]  }
 0x44a   :  { %7573 = vmatpush1.bf16.msra.mxu1 %v11285_v43  ;;  %8004 = vmatprep.subr.bf16.mxu0 %v11296_v46  ;;  %v11372_v43 = vld [vmem:[#allocation8 + $0x12e8] ss:$16 sps:$4 sm:$0xff]   ;;  %v11375_v46 = vld [vmem:[#allocation8 + $0x1500] ss:$16 sps:$4 sm:$0xff]  }
 0x44b   :  { %7574 = vmatprep.subr.bf16.mxu1 %v11293_v45  ;;  %v11380_v45 = vld [vmem:[#allocation8 + $0x130c] ss:$16 sps:$4 sm:$0xff]  }
 0x44d   :  { %8005 = vmatpush1.bf16.msra.mxu0 %v11294_v48  ;;  %v11383_v48 = vld [vmem:[#allocation8 + $0x1524] ss:$16 sps:$4 sm:$0xff]  }
 0x44e   :  { %7575 = vmatpush1.bf16.msra.mxu1 %v11291_v47  ;;  %8006 = vmatprep.subr.bf16.mxu0 %v11302_v49  ;;  %v11378_v47 = vld [vmem:[#allocation8 + $0x1308] ss:$16 sps:$4 sm:$0xff]   ;;  %v11381_v49 = vld [vmem:[#allocation8 + $0x1520] ss:$16 sps:$4 sm:$0xff]  }
 0x44f   :  { %7576 = vmatprep.subr.bf16.mxu1 %v11299_v6  ;;  %v11386_v6 = vld [vmem:[#allocation8 + $0x132c] ss:$16 sps:$4 sm:$0xff]  }
 0x451   :  { %8007 = vmatpush1.bf16.msra.mxu0 %v11300_v50  ;;  %v11389_v50 = vld [vmem:[#allocation8 + $0x1544] ss:$16 sps:$4 sm:$0xff]  }
 0x452   :  { %7577 = vmatpush1.bf16.msra.mxu1 %v11297_v51  ;;  %8008 = vmatprep.subr.bf16.mxu0 %v11308_v16  ;;  %v11384_v51 = vld [vmem:[#allocation8 + $0x1328] ss:$16 sps:$4 sm:$0xff]   ;;  %v11387_v16 = vld [vmem:[#allocation8 + $0x1540] ss:$16 sps:$4 sm:$0xff]  }
 0x453   :  { %7578 = vmatprep.subr.bf16.mxu1 %v11305_v52  ;;  %v11392_v52 = vld [vmem:[#allocation8 + $0x134c] ss:$16 sps:$4 sm:$0xff]  }
 0x455   :  { %8009 = vmatpush1.bf16.msra.mxu0 %v11306_v54  ;;  %v11395_v54 = vld [vmem:[#allocation8 + $0x1564] ss:$16 sps:$4 sm:$0xff]  }
 0x456   :  { %7579 = vmatpush1.bf16.msra.mxu1 %v11303_v53  ;;  %8010 = vmatprep.subr.bf16.mxu0 %v11314_v17  ;;  %v11390_v53 = vld [vmem:[#allocation8 + $0x1348] ss:$16 sps:$4 sm:$0xff]   ;;  %v11393_v17 = vld [vmem:[#allocation8 + $0x1560] ss:$16 sps:$4 sm:$0xff]  }
 0x457   :  { %7580 = vmatprep.subr.bf16.mxu1 %v11311_v55  ;;  %v11398_v55 = vld [vmem:[#allocation8 + $0x136c] ss:$16 sps:$4 sm:$0xff]  }
 0x459   :  { %8011 = vmatpush1.bf16.msra.mxu0 %v11312_v18  ;;  %v11401_v18 = vld [vmem:[#allocation8 + $0x1584] ss:$16 sps:$4 sm:$0xff]  }
 0x45a   :  { %7581 = vmatpush1.bf16.msra.mxu1 %v11309_v29  ;;  %8012 = vmatprep.subr.bf16.mxu0 %v11320_v12  ;;  %v11396_v29 = vld [vmem:[#allocation8 + $0x1368] ss:$16 sps:$4 sm:$0xff]   ;;  %v11399_v12 = vld [vmem:[#allocation8 + $0x1580] ss:$16 sps:$4 sm:$0xff]  }
 0x45b   :  { %7582 = vmatprep.subr.bf16.mxu1 %v11317_v26  ;;  %v11404_v26 = vld [vmem:[#allocation8 + $0x138c] ss:$16 sps:$4 sm:$0xff]  }
 0x45d   :  { %8013 = vmatpush1.bf16.msra.mxu0 %v11318_v22  ;;  %v11407_v22 = vld [vmem:[#allocation8 + $0x15a4] ss:$16 sps:$4 sm:$0xff]  }
 0x45e   :  { %7583 = vmatpush1.bf16.msra.mxu1 %v11315_v34  ;;  %8014 = vmatprep.subr.bf16.mxu0 %v11326_v56  ;;  %v11402_v34 = vld [vmem:[#allocation8 + $0x1388] ss:$16 sps:$4 sm:$0xff]   ;;  %v11405_v56 = vld [vmem:[#allocation8 + $0x15a0] ss:$16 sps:$4 sm:$0xff]  }
 0x45f   :  { %7584 = vmatprep.subr.bf16.mxu1 %v11323_v14  ;;  %v11410_v14 = vld [vmem:[#allocation8 + $0x13ac] ss:$16 sps:$4 sm:$0xff]  }
 0x461   :  { %8015 = vmatpush1.bf16.msra.mxu0 %v11324_v57  ;;  %v11413_v57 = vld [vmem:[#allocation8 + $0x15c4] ss:$16 sps:$4 sm:$0xff]  }
 0x462   :  { %7585 = vmatpush1.bf16.msra.mxu1 %v11321_v24  ;;  %8027 = vmatprep.subr.bf16.mxu0 %v11332_v60  ;;  %v11408_v24 = vld [vmem:[#allocation8 + $0x13a8] ss:$16 sps:$4 sm:$0xff]   ;;  %v11411_v60 = vld [vmem:[#allocation8 + $0x15c0] ss:$16 sps:$4 sm:$0xff]  }
 0x463   :  { %7597 = vmatprep.subr.bf16.mxu1 %v11329_v59  ;;  %v11416_v59 = vld [vmem:[#allocation8 + $0x13cc] ss:$16 sps:$4 sm:$0xff]  }
 0x464   :  { %8017 = vmatmul.mubr.bf16.vlgmr.msra.gmra.mrb[24].mxu0 %v12069_v4  ;;  %v11350_v4 = vld [vmem:[#allocation8 + $0x126c] ss:$16 sps:$4 sm:$0xff]  }
 0x465   :  { %7587 = vmatmul.mubr.bf16.vlgmr.msra.gmra.mrb[20].mxu1 %v12071_v25  ;;  %8028 = vmatpush1.bf16.msra.mxu0 %v11330_v62  ;;  %v11419_v62 = vld [vmem:[#allocation8 + $0x15e4] ss:$16 sps:$4 sm:$0xff]  }
 0x466   :  { %7598 = vmatpush1.bf16.msra.mxu1 %v11327_v10  ;;  %7629 = vmatprep.mubr.bf16.mxu1 %v12087_v61  ;;  %v11414_v10 = vld [vmem:[#allocation8 + $0x13c8] ss:$16 sps:$4 sm:$0xff]  }
 0x467   :  { %8059 = vmatprep.mubr.bf16.mxu0 %v12075_v28  ;;  %7599 = vmatprep.subr.bf16.mxu1 %v11335_v15  ;;  %v11351_v28 = vld [vmem:[#allocation8 + $0x1480] ss:$16 sps:$4 sm:$0xff]   ;;  %v11422_v15 = vld [vmem:[#allocation8 + $0x13ec] ss:$16 sps:$4 sm:$0xff]  }
 0x468   :  { %8029 = vmatprep.subr.bf16.mxu0 %v11338_v63  ;;  %v11417_v63 = vld [vmem:[#allocation8 + $0x15e0] ss:$16 sps:$4 sm:$0xff]  }
 0x469   :  { %8030 = vmatpush1.bf16.msra.mxu0 %v11336_v8  ;;  %v11471_v8 = vld [vmem:[#allocation11 + $0x40] sm:$0xff]  }
 0x46a   :  { %7600 = vmatpush1.bf16.msra.mxu1 %v11333_v0  ;;  %8031 = vmatprep.subr.bf16.mxu0 %v11344_v23  ;;  %v11420_v0 = vld [vmem:[#allocation8 + $0x13e8] ss:$16 sps:$4 sm:$0xff]  }
 0x46b   :  { %7601 = vmatprep.subr.bf16.mxu1 %v11341_v1  ;;  %v11425_v1 = vld [vmem:[#allocation8 + $0x140c] ss:$16 sps:$4 sm:$0xff]   ;;  %v11472_v23 = vld [vmem:[#allocation11] sm:$0xff]  }
 0x46d   :  { %8032 = vmatpush1.bf16.msra.mxu0 %v11342_v3  ;;  %v11428_v3 = vld [vmem:[#allocation8 + $0x142c] ss:$16 sps:$4 sm:$0xff]  }
 0x46e   :  { %7602 = vmatpush1.bf16.msra.mxu1 %v11339_v2  ;;  %8033 = vmatprep.subr.bf16.mxu0 %v11350_v4  ;;  %v11423_v2 = vld [vmem:[#allocation8 + $0x1408] ss:$16 sps:$4 sm:$0xff]   ;;  %v11474_v4 = vld [vmem:[#allocation11 + $0x8] sm:$0xff]  }
 0x46f   :  { %7603 = vmatprep.subr.bf16.mxu1 %v11347_v7  ;;  %v11473_v7 = vld [vmem:[#allocation11 + $0x48] sm:$0xff]  }
 0x471   :  { %8034 = vmatpush1.bf16.msra.mxu0 %v11348_v20  ;;  %v11475_v20 = vld [vmem:[#allocation11 + $0x50] sm:$0xff]  }
 0x472   :  { %7604 = vmatpush1.bf16.msra.mxu1 %v11345_v19  ;;  %8035 = vmatprep.subr.bf16.mxu0 %v11356_v27  ;;  %v11426_v19 = vld [vmem:[#allocation8 + $0x1428] ss:$16 sps:$4 sm:$0xff]  }
 0x473   :  { %7605 = vmatprep.subr.bf16.mxu1 %v11353_v11  ;;  %v11431_v11 = vld [vmem:[#allocation8 + $0x144c] ss:$16 sps:$4 sm:$0xff]   ;;  %v11476_v27 = vld [vmem:[#allocation11 + $0x10] sm:$0xff]  }
 0x475   :  { %8036 = vmatpush1.bf16.msra.mxu0 %v11354_v30  ;;  %v11477_v30 = vld [vmem:[#allocation11 + $0x58] sm:$0xff]  }
 0x476   :  { %7606 = vmatpush1.bf16.msra.mxu1 %v11351_v28  ;;  %8037 = vmatprep.subr.bf16.mxu0 %v11362_v9  ;;  %v11429_v28 = vld [vmem:[#allocation8 + $0x1448] ss:$16 sps:$4 sm:$0xff]  }
 0x477   :  { %7607 = vmatprep.subr.bf16.mxu1 %v11359_v31  ;;  %v11434_v31 = vld [vmem:[#allocation8 + $0x146c] ss:$16 sps:$4 sm:$0xff]   ;;  %v11432_v9 = vld [vmem:[#allocation8 + $0x1468] ss:$16 sps:$4 sm:$0xff]  }
 0x479   :  { %8038 = vmatpush1.bf16.msra.mxu0 %v11360_v32  ;;  %v11480_v32 = vld [vmem:[#allocation11 + $0x20] sm:$0xff]  }
 0x47a   :  { %7608 = vmatpush1.bf16.msra.mxu1 %v11357_v5  ;;  %8039 = vmatprep.subr.bf16.mxu0 %v11368_v13  ;;  %v11479_v5 = vld [vmem:[#allocation11 + $0x60] sm:$0xff]   ;;  %v11481_v13 = vld [vmem:[#allocation11 + $0x68] sm:$0xff]  }
 0x47b   :  { %7609 = vmatprep.subr.bf16.mxu1 %v11365_v33  ;;  %v11435_v33 = vld [vmem:[#allocation8 + $0x1488] ss:$16 sps:$4 sm:$0xff]  }
 0x47d   :  { %8040 = vmatpush1.bf16.msra.mxu0 %v11366_v21  ;;  %v11438_v21 = vld [vmem:[#allocation8 + $0x14a8] ss:$16 sps:$4 sm:$0xff]  }
 0x47e   :  { %7610 = vmatpush1.bf16.msra.mxu1 %v11363_v39  ;;  %8041 = vmatprep.subr.bf16.mxu0 %v11374_v41  ;;  %v11440_v39 = vld [vmem:[#allocation8 + $0x14ac] ss:$16 sps:$4 sm:$0xff]   ;;  %v11441_v41 = vld [vmem:[#allocation8 + $0x14c8] ss:$16 sps:$4 sm:$0xff]  }
 0x47f   :  { %7611 = vmatprep.subr.bf16.mxu1 %v11371_v40  ;;  %v11443_v40 = vld [vmem:[#allocation8 + $0x14cc] ss:$16 sps:$4 sm:$0xff]  }
 0x481   :  { %8042 = vmatpush1.bf16.msra.mxu0 %v11372_v43  ;;  %v11444_v43 = vld [vmem:[#allocation8 + $0x14e8] ss:$16 sps:$4 sm:$0xff]  }
 0x482   :  { %7612 = vmatpush1.bf16.msra.mxu1 %v11369_v42  ;;  %8043 = vmatprep.subr.bf16.mxu0 %v11380_v45  ;;  %v11446_v42 = vld [vmem:[#allocation8 + $0x14ec] ss:$16 sps:$4 sm:$0xff]   ;;  %v11447_v45 = vld [vmem:[#allocation8 + $0x1508] ss:$16 sps:$4 sm:$0xff]  }
 0x483   :  { %7613 = vmatprep.subr.bf16.mxu1 %v11377_v44  ;;  %v11449_v44 = vld [vmem:[#allocation8 + $0x150c] ss:$16 sps:$4 sm:$0xff]  }
 0x485   :  { %8044 = vmatpush1.bf16.msra.mxu0 %v11378_v47  ;;  %v11450_v47 = vld [vmem:[#allocation8 + $0x1528] ss:$16 sps:$4 sm:$0xff]  }
 0x486   :  { %7614 = vmatpush1.bf16.msra.mxu1 %v11375_v46  ;;  %8045 = vmatprep.subr.bf16.mxu0 %v11386_v6  ;;  %v11452_v46 = vld [vmem:[#allocation8 + $0x152c] ss:$16 sps:$4 sm:$0xff]   ;;  %v11453_v6 = vld [vmem:[#allocation8 + $0x1548] ss:$16 sps:$4 sm:$0xff]  }
 0x487   :  { %7615 = vmatprep.subr.bf16.mxu1 %v11383_v48  ;;  %v11455_v48 = vld [vmem:[#allocation8 + $0x154c] ss:$16 sps:$4 sm:$0xff]  }
 0x489   :  { %8046 = vmatpush1.bf16.msra.mxu0 %v11384_v51  ;;  %v11456_v51 = vld [vmem:[#allocation8 + $0x1568] ss:$16 sps:$4 sm:$0xff]  }
 0x48a   :  { %7616 = vmatpush1.bf16.msra.mxu1 %v11381_v49  ;;  %8047 = vmatprep.subr.bf16.mxu0 %v11392_v52  ;;  %v11458_v49 = vld [vmem:[#allocation8 + $0x156c] ss:$16 sps:$4 sm:$0xff]   ;;  %v11459_v52 = vld [vmem:[#allocation8 + $0x1588] ss:$16 sps:$4 sm:$0xff]  }
 0x48b   :  { %7617 = vmatprep.subr.bf16.mxu1 %v11389_v50  ;;  %v11461_v50 = vld [vmem:[#allocation8 + $0x158c] ss:$16 sps:$4 sm:$0xff]  }
 0x48d   :  { %8048 = vmatpush1.bf16.msra.mxu0 %v11390_v53  ;;  %v11462_v53 = vld [vmem:[#allocation8 + $0x15a8] ss:$16 sps:$4 sm:$0xff]  }
 0x48e   :  { %7618 = vmatpush1.bf16.msra.mxu1 %v11387_v16  ;;  %8049 = vmatprep.subr.bf16.mxu0 %v11398_v55  ;;  %v11464_v16 = vld [vmem:[#allocation8 + $0x15ac] ss:$16 sps:$4 sm:$0xff]   ;;  %v11465_v55 = vld [vmem:[#allocation8 + $0x15c8] ss:$16 sps:$4 sm:$0xff]  }
 0x48f   :  { %7619 = vmatprep.subr.bf16.mxu1 %v11395_v54  ;;  %v11467_v54 = vld [vmem:[#allocation8 + $0x15cc] ss:$16 sps:$4 sm:$0xff]  }
 0x491   :  { %8050 = vmatpush1.bf16.msra.mxu0 %v11396_v29  ;;  %v11468_v29 = vld [vmem:[#allocation8 + $0x15e8] ss:$16 sps:$4 sm:$0xff]  }
 0x492   :  { %7620 = vmatpush1.bf16.msra.mxu1 %v11393_v17  ;;  %8051 = vmatprep.subr.bf16.mxu0 %v11404_v26  ;;  %v11470_v17 = vld [vmem:[#allocation8 + $0x15ec] ss:$16 sps:$4 sm:$0xff]   ;;  %v11483_v26 = vld [vmem:[#allocation11 + $0x70] sm:$0xff]  }
 0x493   :  { %7621 = vmatprep.subr.bf16.mxu1 %v11401_v18  ;;  %v11482_v18 = vld [vmem:[#allocation11 + $0x28] sm:$0xff]  }
 0x495   :  { %8052 = vmatpush1.bf16.msra.mxu0 %v11402_v34  ;;  %v11485_v34 = vld [vmem:[#allocation11 + $0x78] sm:$0xff]  }
 0x496   :  { %7622 = vmatpush1.bf16.msra.mxu1 %v11399_v12  ;;  %8053 = vmatprep.subr.bf16.mxu0 %v11410_v14  ;;  %v11484_v12 = vld [vmem:[#allocation11 + $0x30] sm:$0xff]   ;;  %v11487_v14 = vld [vmem:[#allocation11 + $0xc0] sm:$0xff]  }
 0x497   :  { %7623 = vmatprep.subr.bf16.mxu1 %v11407_v22  ;;  %v11486_v22 = vld [vmem:[#allocation11 + $0x38] sm:$0xff]  }
 0x499   :  { %8054 = vmatpush1.bf16.msra.mxu0 %v11408_v24 }
 0x49a   :  { %7624 = vmatpush1.bf16.msra.mxu1 %v11405_v56  ;;  %8055 = vmatprep.subr.bf16.mxu0 %v11416_v59  ;;  %v3625_v56 = vld [vmem:[#allocation10] sm:$0xf] }
 0x49b   :  { %7625 = vmatprep.subr.bf16.mxu1 %v11413_v57  ;;  %v3630_v24 = vrot.slane %v3625_v56, %v11954_v35  ;;  %v3634_v57 = vrot.slane %v3625_v56, %v11960_v37  ;;  %v11490_v35 = vld [vmem:[#allocation11 + $0x88] sm:$0xff]   ;;  %v11491_v37 = vld [vmem:[#allocation11 + $0xd0] sm:$0xff]  }
 0x49d   :  { %8056 = vmatpush1.bf16.msra.mxu0 %v11414_v10 }
 0x49e   :  { %7626 = vmatpush1.bf16.msra.mxu1 %v11411_v60  ;;  %8057 = vmatprep.subr.bf16.mxu0 %v11422_v15 }
 0x49f   :  { %7627 = vmatprep.subr.bf16.mxu1 %v11419_v62 }
 0x4a1   :  { %8058 = vmatpush1.bf16.msra.mxu0 %v11420_v0 }
 0x4a2   :  { %7628 = vmatpush1.bf16.msra.mxu1 %v11417_v63  ;;  %8070 = vmatprep.subr.bf16.mxu0 %v11425_v1 }
 0x4a3   :  { %9706 = vmatprep.subr.bf16.mxu1 %v11471_v8 }
 0x4a4   :  { %8060 = vmatmul.mubr.bf16.vlgmr.msra.gmra.mrb[24].mxu0 %v12071_v25  ;;  %v11478_v25 = vld [vmem:[#allocation11 + $0x18] sm:$0xff]  }
 0x4a5   :  { %7630 = vmatmul.mubr.bf16.vlgmr.msra.gmra.mrb[20].mxu1 %v12085_v58  ;;  %8071 = vmatpush1.bf16.msra.mxu0 %v11423_v2 }
 0x4a6   :  { %9707 = vmatpush3.bf16.msra.mxu1 %v11472_v23  ;;  %8102 = vmatprep.mubr.bf16.mxu0 %v12087_v61  ;;  %v11437_v61 = vld [vmem:[#allocation8 + $0x148c] ss:$16 sps:$4 sm:$0xff]  }
 0x4a7   :  { %8072 = vmatprep.subr.bf16.mxu0 %v11428_v3  ;;  %9708 = vmatprep.subr.bf16.mxu1 %v11473_v7 }
 0x4a9   :  { %8073 = vmatpush1.bf16.msra.mxu0 %v11426_v19  ;;  %v11489_v19 = vld [vmem:[#allocation11 + $0xc8] sm:$0xff]  }
 0x4aa   :  { %9709 = vmatpush3.bf16.msra.mxu1 %v11474_v4  ;;  %8074 = vmatprep.subr.bf16.mxu0 %v11431_v11  ;;  %v11488_v4 = vld [vmem:[#allocation11 + $0x80] sm:$0xff]   ;;  %v11493_v11 = vld [vmem:[#allocation11 + $0xd8] sm:$0xff]  }
 0x4ab   :  { %9710 = vmatprep.subr.bf16.mxu1 %v11475_v20  ;;  %v11492_v20 = vld [vmem:[#allocation11 + $0x90] sm:$0xff]  }
 0x4ad   :  { %8075 = vmatpush1.bf16.msra.mxu0 %v11429_v28  ;;  %v11495_v28 = vld [vmem:[#allocation11 + $0xe0] sm:$0xff]  }
 0x4ae   :  { %9711 = vmatpush3.bf16.msra.mxu1 %v11476_v27  ;;  %8076 = vmatprep.subr.bf16.mxu0 %v11434_v31  ;;  %v11494_v27 = vld [vmem:[#allocation11 + $0x98] sm:$0xff]   ;;  %v11497_v31 = vld [vmem:[#allocation11 + $0xe8] sm:$0xff]  }
 0x4af   :  { %9712 = vmatprep.subr.bf16.mxu1 %v11477_v30  ;;  %v11496_v30 = vld [vmem:[#allocation11 + $0xa0] sm:$0xff]  }
 0x4b1   :  { %8077 = vmatpush1.bf16.msra.mxu0 %v11432_v9  ;;  %v11499_v9 = vld [vmem:[#allocation11 + $0xf0] sm:$0xff]  }
 0x4b2   :  { %9713 = vmatpush3.bf16.msra.mxu1 %v11478_v25  ;;  %8078 = vmatprep.subr.bf16.mxu0 %v11437_v61  ;;  %v11498_v25 = vld [vmem:[#allocation11 + $0xa8] sm:$0xff]   ;;  %v11501_v61 = vld [vmem:[#allocation11 + $0xf8] sm:$0xff]  }
 0x4b3   :  { %9714 = vmatprep.subr.bf16.mxu1 %v11479_v5  ;;  %v11500_v5 = vld [vmem:[#allocation11 + $0xb0] sm:$0xff]  }
 0x4b5   :  { %8079 = vmatpush1.bf16.msra.mxu0 %v11435_v33  ;;  %v3638_v33 = vrot.slane %v3625_v56, %v11957_v36  ;;  %v11758_v36 = vmov 0.0  }
 0x4b6   :  { %9715 = vmatpush3.bf16.msra.mxu1 %v11480_v32  ;;  %8080 = vmatprep.subr.bf16.mxu0 %v11440_v39  ;;  %v11502_v32 = vld [vmem:[#allocation11 + $0xb8] sm:$0xff]  }
 0x4b7   :  { %9716 = vmatprep.subr.bf16.mxu1 %v11481_v13  ;;  %v3642_v13 = vrot.slane %v3625_v56, %v11963_v38  ;;  %v11504_v38 = vld [vmem:[#allocation14 + $0x8] sm:$0xff]  }
 0x4b9   :  { %8081 = vmatpush1.bf16.msra.mxu0 %v11438_v21 }
 0x4ba   :  { %8082 = vmatprep.subr.bf16.mxu0 %v11443_v40  ;;  %9717 = vmatpush3.bf16.msra.mxu1 %v11482_v18 }
 0x4bb   :  { %9718 = vmatprep.subr.bf16.mxu1 %v11483_v26 }
 0x4bd   :  { %8083 = vmatpush1.bf16.msra.mxu0 %v11441_v41 }
 0x4be   :  { %8084 = vmatprep.subr.bf16.mxu0 %v11446_v42  ;;  %9719 = vmatpush3.bf16.msra.mxu1 %v11484_v12 }
 0x4bf   :  { %9720 = vmatprep.subr.bf16.mxu1 %v11485_v34 }
 0x4c1   :  { %8085 = vmatpush1.bf16.msra.mxu0 %v11444_v43 }
 0x4c2   :  { %8086 = vmatprep.subr.bf16.mxu0 %v11449_v44  ;;  %9721 = vmatpush3.bf16.msra.mxu1 %v11486_v22 }
 0x4c3   :  { %9728 = vmatprep.subr.bf16.mxu1 %v11487_v14  ;;  %v9664_v14 = vld [vmem:[#allocation13] ss:$0 sm:$0xff] }
 0x4c5   :  { %8087 = vmatpush1.bf16.msra.mxu0 %v11447_v45 }
 0x4c6   :  { %8088 = vmatprep.subr.bf16.mxu0 %v11452_v46 }
 0x4c9   :  { %8089 = vmatpush1.bf16.msra.mxu0 %v11450_v47 }
 0x4ca   :  { %8090 = vmatprep.subr.bf16.mxu0 %v11455_v48 }
 0x4cd   :  { %8091 = vmatpush1.bf16.msra.mxu0 %v11453_v6 }
 0x4ce   :  { %8092 = vmatprep.subr.bf16.mxu0 %v11458_v49 }
 0x4d1   :  { %8093 = vmatpush1.bf16.msra.mxu0 %v11456_v51 }
 0x4d2   :  { %8094 = vmatprep.subr.bf16.mxu0 %v11461_v50  ;;  %v11503_v50 = vld [vmem:[#allocation14] sm:$0xff]  }
 0x4d5   :  { %8095 = vmatpush1.bf16.msra.mxu0 %v11459_v52  ;;  %v11505_v52 = vld [vmem:[#allocation14 + $0x10] sm:$0xff]  }
 0x4d6   :  { %8096 = vmatprep.subr.bf16.mxu0 %v11464_v16  ;;  %v11506_v16 = vld [vmem:[#allocation14 + $0x18] sm:$0xff]  }
 0x4d9   :  { %8097 = vmatpush1.bf16.msra.mxu0 %v11462_v53  ;;  %v11507_v53 = vld [vmem:[#allocation14 + $0x20] sm:$0xff]  }
 0x4da   :  { %8098 = vmatprep.subr.bf16.mxu0 %v11467_v54  ;;  %v11508_v54 = vld [vmem:[#allocation14 + $0x28] sm:$0xff]  }
 0x4dd   :  { %8099 = vmatpush1.bf16.msra.mxu0 %v11465_v55  ;;  %v11509_v55 = vld [vmem:[#allocation14 + $0x30] sm:$0xff]  }
 0x4de   :  { %8100 = vmatprep.subr.bf16.mxu0 %v11470_v17  ;;  %v11510_v17 = vld [vmem:[#allocation14 + $0x38] sm:$0xff]  }
 0x4e1   :  { %8101 = vmatpush1.bf16.msra.mxu0 %v11468_v29 }
 0x4e2   :  { %9759 = vmatprep.subr.bf16.mxu0 %v11758_v36 }
 0x4e4   :  { %8103 = vmatmul.mubr.bf16.vlgmr.msra.gmra.mrb[24].mxu0 %v12085_v58 }
 0x4e5   :  { %9760 = vmatpush3.bf16.msra.mxu0 %v11503_v50  ;;  %9775 = vmatprep.mubr.msk.bf16.mxu0 %vm11759_vm0, %v11758_v36 }
 0x4e6   :  { %9761 = vmatprep.subr.bf16.mxu0 %v11758_v36 }
 0x4e9   :  { %9762 = vmatpush3.bf16.msra.mxu0 %v11504_v38 }
 0x4ea   :  { %9763 = vmatprep.subr.bf16.mxu0 %v11758_v36 }
 0x4ed   :  { %9764 = vmatpush3.bf16.msra.mxu0 %v11505_v52 }
 0x4ee   :  { %9765 = vmatprep.subr.bf16.mxu0 %v11758_v36 }
 0x4f1   :  { %9766 = vmatpush3.bf16.msra.mxu0 %v11506_v16 }
 0x4f2   :  { %9767 = vmatprep.subr.bf16.mxu0 %v11758_v36 }
 0x4f5   :  { %9768 = vmatpush3.bf16.msra.mxu0 %v11507_v53 }
 0x4f6   :  { %9769 = vmatprep.subr.bf16.mxu0 %v11758_v36 }
 0x4f9   :  { %9770 = vmatpush3.bf16.msra.mxu0 %v11508_v54 }
 0x4fa   :  { %9771 = vmatprep.subr.bf16.mxu0 %v11758_v36 }
 0x4fd   :  { %9772 = vmatpush3.bf16.msra.mxu0 %v11509_v55 }
 0x4fe   :  { %9773 = vmatprep.subr.bf16.mxu0 %v11758_v36 }
 0x501   :  { %9774 = vmatpush3.bf16.msra.mxu0 %v11510_v17 }
 0x578   :  { %v7631_v59 = vpop.f32.mrb[20].mxu1 }
 0x579   :  { %v9779_v60 = vadd.f32 %v7631_v59, %v3630_v24  ;;  %v7633_v58 = vpop.f32.mrb[21].mxu1 }
 0x57a   :  { %v9780_v10 = vadd.f32 %v7633_v58, %v3634_v57  ;;  %v7635_v62 = vpop.f32.mrb[22].mxu1 }
 0x57b   :  { %v9781_v15 = vadd.f32 %v7635_v62, %v3630_v24  ;;  %v7637_v63 = vpop.f32.mrb[23].mxu1  ;;  %v8113_v8 = vmax.f32 %v9779_v60, 0.0 }
 0x57c   :  { %v9782_v0 = vadd.f32 %v7637_v63, %v3634_v57  ;;  %v8114_v23 = vmax.f32 %v9780_v10, 0.0 }
 0x57d   :  { %v8117_v1 = vmax.f32 %v9781_v15, 0.0 }
 0x57e   :  { %v8118_v2 = vmax.f32 %v9782_v0, 0.0 }
 0x57f   :  { %v8121_v3 = vpack.c.bf16 %v8117_v1, %v8113_v8 }
 0x580   :  { %v8122_v7 = vpack.c.bf16 %v8118_v2, %v8114_v23  ;;  %v9697_v23 = vld [vmem:[#allocation16] ss:$0 sm:$0xff] }
 0x582   :  { %8420 = vmatprep.mubr.bf16.mxu1 %v8122_v7 }
 0x583   :  { %8421 = vmatmul.mubr.bf16.vlgmr.msra.gmra.mrb[24].mxu1 %v8121_v3 }
 0x584   :  { %9729 = vmatpush3.bf16.msra.mxu1 %v11488_v4 }
 0x585   :  { %9730 = vmatprep.subr.bf16.mxu1 %v11489_v19 }
 0x588   :  { %9731 = vmatpush3.bf16.msra.mxu1 %v11490_v35 }
 0x589   :  { %9732 = vmatprep.subr.bf16.mxu1 %v11491_v37 }
 0x58c   :  { %9733 = vmatpush3.bf16.msra.mxu1 %v11492_v20 }
 0x58d   :  { %9734 = vmatprep.subr.bf16.mxu1 %v11493_v11 }
 0x590   :  { %9735 = vmatpush3.bf16.msra.mxu1 %v11494_v27 }
 0x591   :  { %9736 = vmatprep.subr.bf16.mxu1 %v11495_v28 }
 0x594   :  { %9737 = vmatpush3.bf16.msra.mxu1 %v11496_v30 }
 0x595   :  { %9738 = vmatprep.subr.bf16.mxu1 %v11497_v31 }
 0x598   :  { %9739 = vmatpush3.bf16.msra.mxu1 %v11498_v25 }
 0x599   :  { %9740 = vmatprep.subr.bf16.mxu1 %v11499_v9 }
 0x59c   :  { %9741 = vmatpush3.bf16.msra.mxu1 %v11500_v5 }
 0x59d   :  { %9742 = vmatprep.subr.bf16.mxu1 %v11501_v61 }
 0x5a0   :  { %9743 = vmatpush3.bf16.msra.mxu1 %v11502_v32 }
 0x5b7   :  { %v8104_v39 = vpop.f32.mrb[24].mxu0 }
 0x5b8   :  { %v9783_v21 = vadd.f32 %v8104_v39, %v3638_v33  ;;  %v8106_v40 = vpop.f32.mrb[25].mxu0 }
 0x5b9   :  { %v9784_v41 = vadd.f32 %v8106_v40, %v3642_v13  ;;  %v8108_v42 = vpop.f32.mrb[26].mxu0 }
 0x5ba   :  { %v9785_v43 = vadd.f32 %v8108_v42, %v3638_v33  ;;  %v8110_v44 = vpop.f32.mrb[27].mxu0  ;;  %v8115_v46 = vmax.f32 %v9783_v21, 0.0 }
 0x5bb   :  { %v9786_v45 = vadd.f32 %v8110_v44, %v3642_v13  ;;  %v8116_v48 = vmax.f32 %v9784_v41, 0.0 }
 0x5bc   :  { %v8119_v47 = vmax.f32 %v9785_v43, 0.0 }
 0x5bd   :  { %v8120_v6 = vmax.f32 %v9786_v45, 0.0 }
 0x5be   :  { %v8123_v49 = vpack.c.bf16 %v8119_v47, %v8115_v46 }
 0x5bf   :  { %v8124_v51 = vpack.c.bf16 %v8120_v6, %v8116_v48 }
 0x5c1   :  { %8461 = vmatprep.mubr.bf16.mxu1 %v8124_v51 }
 0x5c2   :  { %8462 = vmatmul.mubr.bf16.vlgmr.msra.gmra.mrb[28].mxu1 %v8123_v49 }
 0x656   :  { %v9722_v29 = vpop.f32.mrb[24].mxu1 }
 0x657   :  { %v9723_v18 = vpop.f32.mrb[25].mxu1 }
 0x658   :  { %v9724_v26 = vadd.f32 %v9723_v18, %v9722_v29  ;;  %v9725_v12 = vpop.f32.mrb[26].mxu1 }
 0x659   :  { %v9726_v34 = vpop.f32.mrb[27].mxu1 }
 0x65a   :  { %v9727_v22 = vadd.f32 %v9726_v34, %v9725_v12  ;;  %v8423_v57 = vadd.f32 %v9724_v26, %v9664_v14 }
 0x65c   :  { %v8426_v10 = vadd.f32 %v9727_v22, %v9664_v14 }
 0x695   :  { %v9744_v56 = vpop.f32.mrb[28].mxu1 }
 0x696   :  { %v9745_v24 = vpop.f32.mrb[29].mxu1 }
 0x697   :  { %v9746_v59 = vadd.f32 %v9745_v24, %v9744_v56  ;;  %v9747_v60 = vpop.f32.mrb[30].mxu1 }
 0x698   :  { %v9748_v58 = vpop.f32.mrb[31].mxu1 }
 0x699   :  { %v8464_v62 = vadd.f32 %v9746_v59, %v8423_v57  ;;  %v9749_v15 = vadd.f32 %v9748_v58, %v9747_v60 }
 0x69b   :  { %v8467_v63 = vadd.f32 %v9749_v15, %v8426_v10  ;;  %v8470_v0 = vmax.f32 %v8464_v62, 0.0 }
 0x69d   :  { %v8471_v8 = vmax.f32 %v8467_v63, 0.0 }
 0x69f   :  { %v8472_v1 = vpack.c.bf16 %v8471_v8, %v8470_v0 }
 0x6a1   :  { %9776 = vmatmul.mubr.bf16.vlgmr.msra.gmra.mrb[28].mxu0 %v8472_v1 }
 0x774   :  { %v8578_v2 = vpop.f32.mrb[28].mxu0 }
 0x775   :  { %v8579_v3 = vadd.f32 %v9697_v23, %v8578_v2  ;;  %v9777_v7 = vpop.f32.mrb[29].mxu0 }
 0x776   :  { %v8581_v4 = vpop.f32.mrb[30].mxu0 }
 0x777   :  { %8585 = vst [vmem:[#allocation17] sm:$0xff] %v8579_v3  ;;  %v8582_v19 = vadd.f32 %v9697_v23, %v8581_v4  ;;  %v9778_v35 = vpop.f32.mrb[31].mxu0 }
 0x779   :  { %8586 = vst [vmem:[#allocation17 + $0x8] sm:$0xff] %v8582_v19 }
 0x77a   :  { %11720 = shalt.err (!%p11717_p6)
}
 0x77b   :  { %s11721_s7 = scalar_lea.hbm %s12142_s9, 256 }
 0x77c   :  { %p11722_p7 = scmp.ne.s32.totalorder %s12142_s9, %s11721_s7  ;;  %p11725_p8 = scmp.lt.u32.totalorder %s11721_s7, %s12142_s9 }
 0x77e   :  { %p11727_p9 = pnand %p11725_p8, %p11722_p7 }
 0x780   :  { %11730 = shalt.err (!%p11727_p9)
}
 0x781   :  { %s11761_s15 = smov 128   ;;  %s11762_s16 = smov 8  }
 0x782   :  { %8598 = dma.vmem_to_hbm [thread:$0]  %s8593_s28, 256, %s12142_s9, [#allocation4], %s11761_s15, %s11761_s15, %s11762_s16  }
 0x783   :  { %11741 = dma.done.wait [#allocation4], 256  }
 0x784   :  { %11742 = vsyncadd [#allocation4], 4294967040 }
 0x785   :  { %8602 = vsyncpa [#allocation3], 1 }
 0x786   :  { %8603 = vsyncpa [#allocation6], 1 }
 0x787   :  { %8604 = vsyncpa [#allocation9], 1 }
 0x788   :  { %8605 = vsyncpa [#allocation12], 1 }
 0x789   :  { %8606 = vsyncpa [#allocation15], 1 }
 0x78a   :  { %8607 = vsyncpa [#allocation4], 1 }

</bundles_post_ra>
